<compile_context>
chip_gen: v7x
topology: tpu7x:2x2x1
jax: 0.10.0
libtpu: 0.0.40
codegen_flags: <defaults>
</compile_context>

<pallas_src>
import math
import numpy as np

import jax
import jax.numpy as jnp
from jax.experimental import pallas as pl
from jax.experimental.pallas import tpu as pltpu

# ----------------------------- configuration -----------------------------
BATCH = 2
IMAGE_SIZE = 16
IN_CH = 3
OUT_CH = 3
CHANNELS = 4
ENC_BLOCKS = [1, 1]
DEC_BLOCKS = [1]
assert len(ENC_BLOCKS) == len(DEC_BLOCKS) + 1
DEC_CH = CHANNELS * 2 ** len(ENC_BLOCKS)            # 16
EMBED_DIM = 8
N_E = 16
TRANS_LAYERS = 1
HIDDEN_DIM = 32
NUM_HEADS = 2
BETA = 0.25
LAT = IMAGE_SIZE // 2 ** len(ENC_BLOCKS)            # 4
LAT_HW = LAT * LAT                                   # 16


# ----------------------- host-side constant builders -----------------------
def _make_S(H, Ho, stride):
    """Row-selection matrices (3, Ho, H): S[dy, ho, hi]=1 iff hi == ho*s+dy-1."""
    S = np.zeros((3, Ho, H), np.float32)
    for dy in range(3):
        for ho in range(Ho):
            hi = ho * stride + dy - 1
            if 0 <= hi < H:
                S[dy, ho, hi] = 1.0
    return S


def _make_T(w, W, stride):
    """Column block-Toeplitz (3, W*Cin, Wo*Cout) from conv weight (Cout,Cin,3,3)."""
    Cout, Cin, _, _ = w.shape
    Wo = (W - 1) // stride + 1
    T = np.zeros((3, W * Cin, Wo * Cout), np.float32)
    for dy in range(3):
        for wo in range(Wo):
            for dx in range(3):
                wi = wo * stride + dx - 1
                if 0 <= wi < W:
                    T[dy, wi * Cin:(wi + 1) * Cin, wo * Cout:(wo + 1) * Cout] = \
                        w[:, :, dy, dx].T
    return T


def _make_up_row(H):
    U = np.zeros((2 * H, H), np.float32)
    for h in range(2 * H):
        U[h, h // 2] = 1.0
    return U


def _make_up_col(W, C):
    U = np.zeros((W * C, 2 * W * C), np.float32)
    for wu in range(2 * W):
        for c in range(C):
            U[(wu // 2) * C + c, wu * C + c] = 1.0
    return U


def _make_Sup(Hin):
    """Nearest-x2 row upsample fused with the following conv's row selection."""
    S = _make_S(2 * Hin, 2 * Hin, 1)                 # (3, 2Hin, 2Hin)
    Ur = _make_up_row(Hin)                           # (2Hin, Hin)
    return np.einsum('dij,jk->dik', S, Ur)           # (3, 2Hin, Hin)


def _bias_row(b, Wo):
    return np.tile(np.asarray(b, np.float32), Wo).reshape(1, -1)


def _conv_const(pc, W, stride):
    w = np.asarray(pc["w"], np.float32)
    b = np.asarray(pc["b"], np.float32)
    Wo = (W - 1) // stride + 1
    return {"T": jnp.asarray(_make_T(w, W, stride)),
            "b": jnp.asarray(_bias_row(b, Wo))}


def _upconv_const(pc, Win):
    """Nearest-x2 upsample (cols) folded into the conv's T matrix."""
    w = np.asarray(pc["w"], np.float32)
    b = np.asarray(pc["b"], np.float32)
    _, Cin, _, _ = w.shape
    T = _make_T(w, 2 * Win, 1)                       # (3, 2Win*Cin, 2Win*Cout)
    Uc = _make_up_col(Win, Cin)                      # (Win*Cin, 2Win*Cin)
    Tup = np.einsum('ij,djk->dik', Uc, T)            # (3, Win*Cin, 2Win*Cout)
    return {"T": jnp.asarray(Tup), "b": jnp.asarray(_bias_row(b, 2 * Win))}


def _concat_conv_const(pc, Ch, W):
    """conv over concat([h, skip]) split into two T sets (no in-kernel concat)."""
    w = np.asarray(pc["w"], np.float32)
    b = np.asarray(pc["b"], np.float32)
    return {"Th": jnp.asarray(_make_T(w[:, :Ch], W, 1)),
            "Ts": jnp.asarray(_make_T(w[:, Ch:], W, 1)),
            "b": jnp.asarray(_bias_row(b, W))}


def _make_RQ(H, W, C):
    """Selection matrices converting (H, W*C) <-> (H*W, C) token layout."""
    Rw = np.zeros((W, H * W, H), np.float32)
    Q = np.zeros((W, W * C, C), np.float32)
    for wi in range(W):
        for h in range(H):
            Rw[wi, h * W + wi, h] = 1.0
        for c in range(C):
            Q[wi, wi * C + c, c] = 1.0
    return Rw, Q, np.transpose(Rw, (0, 2, 1)), np.transpose(Q, (0, 2, 1))


def _make_pe_tokens(H, W, C):
    """PositionalEncodingPermute2D table in token layout (H*W, C) — host constant."""
    ch = int(np.ceil(C / 4) * 2)
    inv_freq = 1.0 / (10000.0 ** (np.arange(0, ch, 2, dtype=np.float64) / ch))
    pos_h = np.arange(H, dtype=np.float64)[:, None] * inv_freq[None, :]
    pos_w = np.arange(W, dtype=np.float64)[:, None] * inv_freq[None, :]
    emb_h = np.stack([np.sin(pos_h), np.cos(pos_h)], -1).reshape(H, ch)
    emb_w = np.stack([np.sin(pos_w), np.cos(pos_w)], -1).reshape(W, ch)
    emb = np.zeros((H, W, 2 * ch), np.float64)
    emb[:, :, :ch] = emb_h[:, None, :]
    emb[:, :, ch:2 * ch] = emb_w[None, :, :]
    return jnp.asarray(emb[:, :, :C].reshape(H * W, C).astype(np.float32))


def _tblock_const(blk):
    Dh = DEC_CH // NUM_HEADS

    def row(v):
        return jnp.asarray(np.asarray(v, np.float32).reshape(1, -1))

    def heads_in(d):
        w = np.asarray(d["w"], np.float32)
        b = np.asarray(d["b"], np.float32)
        wh = np.stack([w[:, i * Dh:(i + 1) * Dh] for i in range(NUM_HEADS)], 0)
        bh = np.stack([b[i * Dh:(i + 1) * Dh].reshape(1, Dh)
                       for i in range(NUM_HEADS)], 0)
        return jnp.asarray(wh), jnp.asarray(bh)

    Wq, bq = heads_in(blk["wq"])
    Wk, bk = heads_in(blk["wk"])
    Wv, bv = heads_in(blk["wv"])
    wo = np.asarray(blk["wo"]["w"], np.float32)
    Wo = jnp.asarray(np.stack([wo[i * Dh:(i + 1) * Dh, :]
                               for i in range(NUM_HEADS)], 0))
    return {
        "ln1_g": row(blk["ln1_g"]), "ln1_b": row(blk["ln1_b"]),
        "Wq": Wq, "bq": bq, "Wk": Wk, "bk": bk, "Wv": Wv, "bv": bv,
        "Wo": Wo, "bo": row(blk["wo"]["b"]),
        "ln2_g": row(blk["ln2_g"]), "ln2_b": row(blk["ln2_b"]),
        "W1": jnp.asarray(np.asarray(blk["mlp1"]["w"], np.float32)),
        "b1": row(blk["mlp1"]["b"]),
        "W2": jnp.asarray(np.asarray(blk["mlp2"]["w"], np.float32)),
        "b2": row(blk["mlp2"]["b"]),
    }


# ----------------------------- parameters ---------------------------------
def init_params(key):
    ks = iter(jax.random.split(key, 64))

    def conv_p(cin, cout):
        w = (1.0 / math.sqrt(9 * cin)) * jax.random.normal(
            next(ks), (cout, cin, 3, 3), jnp.float32)
        b = 0.01 * jax.random.normal(next(ks), (cout,), jnp.float32)
        return {"w": w, "b": b}

    def dense_p(cin, cout):
        w = (1.0 / math.sqrt(cin)) * jax.random.normal(
            next(ks), (cin, cout), jnp.float32)
        b = 0.01 * jax.random.normal(next(ks), (cout,), jnp.float32)
        return {"w": w, "b": b}

    C = CHANNELS
    p = {}
    p["enc_in"] = conv_p(IN_CH, C)
    p["enc_b0"] = conv_p(C, C)
    p["enc_d0"] = conv_p(C, 2 * C)
    p["enc_b1"] = conv_p(2 * C, 2 * C)
    p["enc_d1"] = conv_p(2 * C, 4 * C)
    p["pre_q"] = dense_p(DEC_CH, EMBED_DIM)
    p["post_q"] = dense_p(EMBED_DIM, DEC_CH)
    p["codebook"] = jax.random.uniform(next(ks), (N_E, EMBED_DIM),
                                       minval=-1.0 / N_E, maxval=1.0 / N_E,
                                       dtype=jnp.float32)
    p["tblocks"] = []
    for _ in range(TRANS_LAYERS):
        p["tblocks"].append({
            "ln1_g": jnp.ones((DEC_CH,), jnp.float32),
            "ln1_b": jnp.zeros((DEC_CH,), jnp.float32),
            "wq": dense_p(DEC_CH, DEC_CH), "wk": dense_p(DEC_CH, DEC_CH),
            "wv": dense_p(DEC_CH, DEC_CH), "wo": dense_p(DEC_CH, DEC_CH),
            "ln2_g": jnp.ones((DEC_CH,), jnp.float32),
            "ln2_b": jnp.zeros((DEC_CH,), jnp.float32),
            "mlp1": dense_p(DEC_CH, HIDDEN_DIM),
            "mlp2": dense_p(HIDDEN_DIM, DEC_CH),
        })
    p["dec_up1"] = conv_p(DEC_CH, 2 * C)
    p["dec_b1"] = conv_p(2 * C + 2 * C, 2 * C)
    p["dec_up0"] = conv_p(2 * C, C)
    p["dec_b0"] = conv_p(C + C, C)
    p["dec_out"] = conv_p(C, OUT_CH)
    return p


def build_constants(p):
    """Precompute every matrix the fused kernel needs (one-time host setup)."""
    c = {}
    c["S16"] = jnp.asarray(_make_S(16, 16, 1))
    c["S16d"] = jnp.asarray(_make_S(16, 8, 2))
    c["S8"] = jnp.asarray(_make_S(8, 8, 1))
    c["S8d"] = jnp.asarray(_make_S(8, 4, 2))
    c["Sup1"] = jnp.asarray(_make_Sup(LAT))          # (3, 8, 4)
    c["Sup0"] = jnp.asarray(_make_Sup(8))            # (3, 16, 8)

    c["enc_in"] = _conv_const(p["enc_in"], 16, 1)
    c["enc_b0"] = _conv_const(p["enc_b0"], 16, 1)
    c["enc_d0"] = _conv_const(p["enc_d0"], 16, 2)
    c["enc_b1"] = _conv_const(p["enc_b1"], 8, 1)
    c["enc_d1"] = _conv_const(p["enc_d1"], 8, 2)

    Rw, Q16, RwT, Q16T = _make_RQ(LAT, LAT, DEC_CH)
    c["Rw"], c["Q16"] = jnp.asarray(Rw), jnp.asarray(Q16)
    c["RwT"], c["Q16T"] = jnp.asarray(RwT), jnp.asarray(Q16T)

    c["pre_q"] = {"W": jnp.asarray(np.asarray(p["pre_q"]["w"], np.float32)),
                  "b": jnp.asarray(np.asarray(p["pre_q"]["b"],
                                              np.float32).reshape(1, -1))}
    c["post_q"] = {"W": jnp.asarray(np.asarray(p["post_q"]["w"], np.float32)),
                   "b": jnp.asarray(np.asarray(p["post_q"]["b"],
                                               np.float32).reshape(1, -1))}
    c["pe"] = _make_pe_tokens(LAT, LAT, EMBED_DIM)

    cb = np.asarray(p["codebook"], np.float32)
    c["cb"] = jnp.asarray(cb)
    c["esq"] = jnp.asarray(np.sum(cb * cb, axis=1).reshape(1, -1))

    c["tblocks"] = [_tblock_const(blk) for blk in p["tblocks"]]

    c["dec_up1"] = _upconv_const(p["dec_up1"], LAT)
    c["dec_b1"] = _concat_conv_const(p["dec_b1"], 2 * CHANNELS, 8)
    c["dec_up0"] = _upconv_const(p["dec_up0"], 8)
    c["dec_b0"] = _concat_conv_const(p["dec_b0"], CHANNELS, 16)
    c["dec_out"] = _conv_const(p["dec_out"], 16, 1)
    return c


# ----------------------------- fused kernel body ---------------------------
def _forward_body(x_ref, c, out_ref, vq_ref, loss_ref, info_ref):
    f32 = jnp.float32

    def mm(a, b):
        return jnp.dot(a, b, preferred_element_type=f32)

    def conv(x, s_ref, t_ref, b_ref, act=True):
        y = None
        for dy in range(3):
            part = mm(mm(s_ref[dy], x), t_ref[dy])
            y = part if y is None else y + part
        y = y + b_ref[...]
        return jnp.maximum(y, 0.0) if act else y

    def conv_cat(xa, ta_ref, xb, tb_ref, s_ref, b_ref, act=True):
        y = None
        for dy in range(3):
            part = mm(mm(s_ref[dy], xa), ta_ref[dy]) + \
                   mm(mm(s_ref[dy], xb), tb_ref[dy])
            y = part if y is None else y + part
        y = y + b_ref[...]
        return jnp.maximum(y, 0.0) if act else y

    def layernorm(v, g_ref, b_ref):
        mu = jnp.mean(v, axis=-1, keepdims=True)
        var = jnp.mean((v - mu) ** 2, axis=-1, keepdims=True)
        return (v - mu) * jax.lax.rsqrt(var + 1e-5) * g_ref[...] + b_ref[...]

    def transformer_block(xx, blk):
        hn = layernorm(xx, blk["ln1_g"], blk["ln1_b"])
        scale = 1.0 / math.sqrt(DEC_CH // NUM_HEADS)
        attn = None
        for hh in range(NUM_HEADS):
            qh = mm(hn, blk["Wq"][hh]) + blk["bq"][hh]
            kh = mm(hn, blk["Wk"][hh]) + blk["bk"][hh]
            vh = mm(hn, blk["Wv"][hh]) + blk["bv"][hh]
            s = jax.lax.dot_general(qh, kh, (((1,), (1,)), ((), ())),
                                    preferred_element_type=f32) * scale
            s = s - jnp.max(s, axis=-1, keepdims=True)
            p = jnp.exp(s)
            p = p * pl.reciprocal(jnp.sum(p, axis=-1, keepdims=True), approx=True)
            oh = mm(p, vh)                                   # (S, Dh)
            part = mm(oh, blk["Wo"][hh])                     # (S, C)
            attn = part if attn is None else attn + part
        xx = xx + attn + blk["bo"][...]
        hn2 = layernorm(xx, blk["ln2_g"], blk["ln2_b"])
        # TODO(synk): PyTorch nn.GELU defaults to exact erf GELU; tanh approx used.
        m = jax.nn.gelu(mm(hn2, blk["W1"][...]) + blk["b1"][...], approximate=True)
        m = mm(m, blk["W2"][...]) + blk["b2"][...]
        return xx + m

    # ------------------------------- encoder -------------------------------
    x = x_ref[0]                                             # (16, 48)
    e0 = conv(x, c["S16"], c["enc_in"]["T"], c["enc_in"]["b"])    # (16, 64) skip0
    h = conv(e0, c["S16"], c["enc_b0"]["T"], c["enc_b0"]["b"])
    e1 = conv(h, c["S16d"], c["enc_d0"]["T"], c["enc_d0"]["b"])   # (8, 64) skip1
    h = conv(e1, c["S8"], c["enc_b1"]["T"], c["enc_b1"]["b"])
    e2 = conv(h, c["S8d"], c["enc_d1"]["T"], c["enc_d1"]["b"])    # (4, 64)

    # ------------- bottleneck: tokens, pre-quant, pos-enc, VQ --------------
    tok = None
    for w in range(LAT):                                     # (H,W*C)->(HW,C)
        part = mm(mm(c["Rw"][w], e2), c["Q16"][w])
        tok = part if tok is None else tok + part            # (16, 16)

    z = mm(tok, c["pre_q"]["W"][...]) + c["pre_q"]["b"][...] + c["pe"][...]  # (16,8)

    cb = c["cb"][...]                                        # (16, 8)
    cross = jax.lax.dot_general(z, cb, (((1,), (1,)), ((), ())),
                                preferred_element_type=f32)  # (16, 16)
    d = jnp.sum(z * z, axis=1, keepdims=True) - 2.0 * cross + c["esq"][...]
    lane = jax.lax.broadcasted_iota(jnp.int32, d.shape, 1)
    dmin = jnp.min(d, axis=1, keepdims=True)
    idx = jnp.min(jnp.where(d == dmin, lane, N_E), axis=1, keepdims=True)
    onehot = (lane == idx).astype(f32)
    z_q = mm(onehot, cb)                                     # (16, 8)
    diff = z_q - z
    sse = jnp.sum(jnp.sum(diff * diff, axis=1, keepdims=True),
                  axis=0, keepdims=True)                     # (1, 1)

    vq_ref[0] = z_q
    info_ref[0] = idx
    loss_ref[0] = sse

    # ---------------- post-quant + transformer (token layout) --------------
    t = mm(z_q, c["post_q"]["W"][...]) + c["post_q"]["b"][...]   # (16, 16)
    # NOTE: reference rearranges `vq_post` back (shape-incompatible einops); we
    # implement the evident intent and feed the transformer output to the decoder.
    for blk in c["tblocks"]:
        t = transformer_block(t, blk)

    sp = None
    for w in range(LAT):                                     # (HW,C)->(H,W*C)
        part = mm(mm(c["RwT"][w], t), c["Q16T"][w])
        sp = part if sp is None else sp + part               # (4, 64)

    # ------------------------------- decoder -------------------------------
    h = conv(sp, c["Sup1"], c["dec_up1"]["T"], c["dec_up1"]["b"])        # (8, 64)
    h = conv_cat(h, c["dec_b1"]["Th"], e1, c["dec_b1"]["Ts"],
                 c["S8"], c["dec_b1"]["b"])
    h = conv(h, c["Sup0"], c["dec_up0"]["T"], c["dec_up0"]["b"])         # (16, 64)
    h = conv_cat(h, c["dec_b0"]["Th"], e0, c["dec_b0"]["Ts"],
                 c["S16"], c["dec_b0"]["b"])
    y = conv(h, c["S16"], c["dec_out"]["T"], c["dec_out"]["b"], act=False)  # (16,48)

    out_ref[0] = y


# ----------------------------- full forward --------------------------------
def vqtransunet_forward(consts, x_nchw):
    B = x_nchw.shape[0]
    x_l = jnp.transpose(x_nchw.astype(jnp.float32), (0, 2, 3, 1)).reshape(
        B, IMAGE_SIZE, IMAGE_SIZE * IN_CH)                   # (B, H, W*Cin)

    flat, treedef = jax.tree_util.tree_flatten(consts)
    n_const = len(flat)

    def kernel(*refs):
        x_ref = refs[0]
        c = jax.tree_util.tree_unflatten(treedef, refs[1:1 + n_const])
        out_ref, vq_ref, loss_ref, info_ref = refs[1 + n_const:]
        _forward_body(x_ref, c, out_ref, vq_ref, loss_ref, info_ref)

    def _const_spec(a):
        nd = a.ndim
        return pl.BlockSpec(a.shape, lambda b, _nd=nd: (0,) * _nd)

    in_specs = [pl.BlockSpec((1, IMAGE_SIZE, IMAGE_SIZE * IN_CH),
                             lambda b: (b, 0, 0))]
    in_specs += [_const_spec(a) for a in flat]

    out_shape = (
        jax.ShapeDtypeStruct((B, IMAGE_SIZE, IMAGE_SIZE * OUT_CH), jnp.float32),
        jax.ShapeDtypeStruct((B, LAT_HW, EMBED_DIM), jnp.float32),
        jax.ShapeDtypeStruct((B, 1, 1), jnp.float32),
        jax.ShapeDtypeStruct((B, LAT_HW, 1), jnp.int32),
    )
    out_specs = (
        pl.BlockSpec((1, IMAGE_SIZE, IMAGE_SIZE * OUT_CH), lambda b: (b, 0, 0)),
        pl.BlockSpec((1, LAT_HW, EMBED_DIM), lambda b: (b, 0, 0)),
        pl.BlockSpec((1, 1, 1), lambda b: (b, 0, 0)),
        pl.BlockSpec((1, LAT_HW, 1), lambda b: (b, 0, 0)),
    )

    out_l, vq_tok, sse, idx = pl.pallas_call(
        kernel,
        grid=(B,),
        in_specs=in_specs,
        out_specs=out_specs,
        out_shape=out_shape,
        compiler_params=pltpu.CompilerParams(
            dimension_semantics=("parallel",)),
    )(x_l, *flat)

    out = jnp.transpose(out_l.reshape(B, IMAGE_SIZE, IMAGE_SIZE, OUT_CH),
                        (0, 3, 1, 2))                        # NCHW
    vq = jnp.transpose(vq_tok.reshape(B, LAT, LAT, EMBED_DIM), (0, 3, 1, 2))
    q_loss = (1.0 + BETA) * jnp.sum(sse) / (B * LAT_HW * EMBED_DIM)
    info = idx[..., 0]
    return out, vq, q_loss, info


# ----------------------------- main ----------------------------------------
if __name__ == "__main__":
    key = jax.random.PRNGKey(0)
    pkey, xkey = jax.random.split(key)
    params = init_params(pkey)
    consts = build_constants(params)                         # one-time host setup
    x = jax.random.normal(xkey, (BATCH, IN_CH, IMAGE_SIZE, IMAGE_SIZE),
                          dtype=jnp.float32)

    fwd = jax.jit(vqtransunet_forward)
    out, vq, q_loss, info = fwd(consts, x)
    jax.block_until_ready((out, vq, q_loss, info))

    assert out.shape == (BATCH, OUT_CH, IMAGE_SIZE, IMAGE_SIZE)
    assert vq.shape == (BATCH, EMBED_DIM, LAT, LAT)
    assert info.shape == (BATCH, LAT_HW)
    assert q_loss.shape == ()
    print("KERNEL_OK")
</pallas_src>

<mosaic_0001>
module attributes {stable_mosaic.version = 11 : i64} {
  func.func @kernel(%arg0: i32, %arg1: memref<1x16x48xf32, #tpu.memory_space<vmem>>, %arg2: memref<4x64x16xf32, #tpu.memory_space<vmem>>, %arg3: memref<4x16x64xf32, #tpu.memory_space<vmem>>, %arg4: memref<4x16x4xf32, #tpu.memory_space<vmem>>, %arg5: memref<4x4x16xf32, #tpu.memory_space<vmem>>, %arg6: memref<3x16x16xf32, #tpu.memory_space<vmem>>, %arg7: memref<3x8x16xf32, #tpu.memory_space<vmem>>, %arg8: memref<3x8x8xf32, #tpu.memory_space<vmem>>, %arg9: memref<3x4x8xf32, #tpu.memory_space<vmem>>, %arg10: memref<3x16x8xf32, #tpu.memory_space<vmem>>, %arg11: memref<3x8x4xf32, #tpu.memory_space<vmem>>, %arg12: memref<16x8xf32, #tpu.memory_space<vmem>>, %arg13: memref<3x64x64xf32, #tpu.memory_space<vmem>>, %arg14: memref<3x64x64xf32, #tpu.memory_space<vmem>>, %arg15: memref<1x64xf32, #tpu.memory_space<vmem>>, %arg16: memref<3x64x64xf32, #tpu.memory_space<vmem>>, %arg17: memref<3x64x64xf32, #tpu.memory_space<vmem>>, %arg18: memref<1x64xf32, #tpu.memory_space<vmem>>, %arg19: memref<3x64x48xf32, #tpu.memory_space<vmem>>, %arg20: memref<1x48xf32, #tpu.memory_space<vmem>>, %arg21: memref<3x64x64xf32, #tpu.memory_space<vmem>>, %arg22: memref<1x64xf32, #tpu.memory_space<vmem>>, %arg23: memref<3x64x64xf32, #tpu.memory_space<vmem>>, %arg24: memref<1x64xf32, #tpu.memory_space<vmem>>, %arg25: memref<3x64x64xf32, #tpu.memory_space<vmem>>, %arg26: memref<1x64xf32, #tpu.memory_space<vmem>>, %arg27: memref<3x64x64xf32, #tpu.memory_space<vmem>>, %arg28: memref<1x64xf32, #tpu.memory_space<vmem>>, %arg29: memref<3x64x64xf32, #tpu.memory_space<vmem>>, %arg30: memref<1x64xf32, #tpu.memory_space<vmem>>, %arg31: memref<3x64x64xf32, #tpu.memory_space<vmem>>, %arg32: memref<1x64xf32, #tpu.memory_space<vmem>>, %arg33: memref<3x48x64xf32, #tpu.memory_space<vmem>>, %arg34: memref<1x64xf32, #tpu.memory_space<vmem>>, %arg35: memref<1x16xf32, #tpu.memory_space<vmem>>, %arg36: memref<16x8xf32, #tpu.memory_space<vmem>>, %arg37: memref<8x16xf32, #tpu.memory_space<vmem>>, %arg38: memref<1x16xf32, #tpu.memory_space<vmem>>, %arg39: memref<16x8xf32, #tpu.memory_space<vmem>>, %arg40: memref<1x8xf32, #tpu.memory_space<vmem>>, %arg41: memref<16x32xf32, #tpu.memory_space<vmem>>, %arg42: memref<32x16xf32, #tpu.memory_space<vmem>>, %arg43: memref<2x16x8xf32, #tpu.memory_space<vmem>>, %arg44: memref<2x8x16xf32, #tpu.memory_space<vmem>>, %arg45: memref<2x16x8xf32, #tpu.memory_space<vmem>>, %arg46: memref<2x16x8xf32, #tpu.memory_space<vmem>>, %arg47: memref<1x32xf32, #tpu.memory_space<vmem>>, %arg48: memref<1x16xf32, #tpu.memory_space<vmem>>, %arg49: memref<2x1x8xf32, #tpu.memory_space<vmem>>, %arg50: memref<1x16xf32, #tpu.memory_space<vmem>>, %arg51: memref<2x1x8xf32, #tpu.memory_space<vmem>>, %arg52: memref<2x1x8xf32, #tpu.memory_space<vmem>>, %arg53: memref<1x16xf32, #tpu.memory_space<vmem>>, %arg54: memref<1x16xf32, #tpu.memory_space<vmem>>, %arg55: memref<1x16xf32, #tpu.memory_space<vmem>>, %arg56: memref<1x16xf32, #tpu.memory_space<vmem>>, %arg57: memref<1x16x48xf32, #tpu.memory_space<vmem>>, %arg58: memref<1x16x8xf32, #tpu.memory_space<vmem>>, %arg59: memref<1x1x1xf32, #tpu.memory_space<vmem>>, %arg60: memref<1x16x1xi32, #tpu.memory_space<vmem>>) attributes {dimension_semantics = [#tpu.dimension_semantics<parallel>], iteration_bounds = array<i64: 2>, scalar_prefetch = 0 : i64, scratch_operands = 0 : i64, tpu.core_type = #tpu.core_type<tc>, window_params = [{transform_indices = @transform_0, window_bounds = array<i64: 1, 16, 48>}, {pipeline_mode = #tpu.pipeline_mode<synchronous>, transform_indices = @transform_1, window_bounds = array<i64: 4, 64, 16>}, {pipeline_mode = #tpu.pipeline_mode<synchronous>, transform_indices = @transform_2, window_bounds = array<i64: 4, 16, 64>}, {pipeline_mode = #tpu.pipeline_mode<synchronous>, transform_indices = @transform_3, window_bounds = array<i64: 4, 16, 4>}, {pipeline_mode = #tpu.pipeline_mode<synchronous>, transform_indices = @transform_4, window_bounds = array<i64: 4, 4, 16>}, {pipeline_mode = #tpu.pipeline_mode<synchronous>, transform_indices = @transform_5, window_bounds = array<i64: 3, 16, 16>}, {pipeline_mode = #tpu.pipeline_mode<synchronous>, transform_indices = @transform_6, window_bounds = array<i64: 3, 8, 16>}, {pipeline_mode = #tpu.pipeline_mode<synchronous>, transform_indices = @transform_7, window_bounds = array<i64: 3, 8, 8>}, {pipeline_mode = #tpu.pipeline_mode<synchronous>, transform_indices = @transform_8, window_bounds = array<i64: 3, 4, 8>}, {pipeline_mode = #tpu.pipeline_mode<synchronous>, transform_indices = @transform_9, window_bounds = array<i64: 3, 16, 8>}, {pipeline_mode = #tpu.pipeline_mode<synchronous>, transform_indices = @transform_10, window_bounds = array<i64: 3, 8, 4>}, {pipeline_mode = #tpu.pipeline_mode<synchronous>, transform_indices = @transform_11, window_bounds = array<i64: 16, 8>}, {pipeline_mode = #tpu.pipeline_mode<synchronous>, transform_indices = @transform_12, window_bounds = array<i64: 3, 64, 64>}, {pipeline_mode = #tpu.pipeline_mode<synchronous>, transform_indices = @transform_13, window_bounds = array<i64: 3, 64, 64>}, {pipeline_mode = #tpu.pipeline_mode<synchronous>, transform_indices = @transform_14, window_bounds = array<i64: 1, 64>}, {pipeline_mode = #tpu.pipeline_mode<synchronous>, transform_indices = @transform_15, window_bounds = array<i64: 3, 64, 64>}, {pipeline_mode = #tpu.pipeline_mode<synchronous>, transform_indices = @transform_16, window_bounds = array<i64: 3, 64, 64>}, {pipeline_mode = #tpu.pipeline_mode<synchronous>, transform_indices = @transform_17, window_bounds = array<i64: 1, 64>}, {pipeline_mode = #tpu.pipeline_mode<synchronous>, transform_indices = @transform_18, window_bounds = array<i64: 3, 64, 48>}, {pipeline_mode = #tpu.pipeline_mode<synchronous>, transform_indices = @transform_19, window_bounds = array<i64: 1, 48>}, {pipeline_mode = #tpu.pipeline_mode<synchronous>, transform_indices = @transform_20, window_bounds = array<i64: 3, 64, 64>}, {pipeline_mode = #tpu.pipeline_mode<synchronous>, transform_indices = @transform_21, window_bounds = array<i64: 1, 64>}, {pipeline_mode = #tpu.pipeline_mode<synchronous>, transform_indices = @transform_22, window_bounds = array<i64: 3, 64, 64>}, {pipeline_mode = #tpu.pipeline_mode<synchronous>, transform_indices = @transform_23, window_bounds = array<i64: 1, 64>}, {pipeline_mode = #tpu.pipeline_mode<synchronous>, transform_indices = @transform_24, window_bounds = array<i64: 3, 64, 64>}, {pipeline_mode = #tpu.pipeline_mode<synchronous>, transform_indices = @transform_25, window_bounds = array<i64: 1, 64>}, {pipeline_mode = #tpu.pipeline_mode<synchronous>, transform_indices = @transform_26, window_bounds = array<i64: 3, 64, 64>}, {pipeline_mode = #tpu.pipeline_mode<synchronous>, transform_indices = @transform_27, window_bounds = array<i64: 1, 64>}, {pipeline_mode = #tpu.pipeline_mode<synchronous>, transform_indices = @transform_28, window_bounds = array<i64: 3, 64, 64>}, {pipeline_mode = #tpu.pipeline_mode<synchronous>, transform_indices = @transform_29, window_bounds = array<i64: 1, 64>}, {pipeline_mode = #tpu.pipeline_mode<synchronous>, transform_indices = @transform_30, window_bounds = array<i64: 3, 64, 64>}, {pipeline_mode = #tpu.pipeline_mode<synchronous>, transform_indices = @transform_31, window_bounds = array<i64: 1, 64>}, {pipeline_mode = #tpu.pipeline_mode<synchronous>, transform_indices = @transform_32, window_bounds = array<i64: 3, 48, 64>}, {pipeline_mode = #tpu.pipeline_mode<synchronous>, transform_indices = @transform_33, window_bounds = array<i64: 1, 64>}, {pipeline_mode = #tpu.pipeline_mode<synchronous>, transform_indices = @transform_34, window_bounds = array<i64: 1, 16>}, {pipeline_mode = #tpu.pipeline_mode<synchronous>, transform_indices = @transform_35, window_bounds = array<i64: 16, 8>}, {pipeline_mode = #tpu.pipeline_mode<synchronous>, transform_indices = @transform_36, window_bounds = array<i64: 8, 16>}, {pipeline_mode = #tpu.pipeline_mode<synchronous>, transform_indices = @transform_37, window_bounds = array<i64: 1, 16>}, {pipeline_mode = #tpu.pipeline_mode<synchronous>, transform_indices = @transform_38, window_bounds = array<i64: 16, 8>}, {pipeline_mode = #tpu.pipeline_mode<synchronous>, transform_indices = @transform_39, window_bounds = array<i64: 1, 8>}, {pipeline_mode = #tpu.pipeline_mode<synchronous>, transform_indices = @transform_40, window_bounds = array<i64: 16, 32>}, {pipeline_mode = #tpu.pipeline_mode<synchronous>, transform_indices = @transform_41, window_bounds = array<i64: 32, 16>}, {pipeline_mode = #tpu.pipeline_mode<synchronous>, transform_indices = @transform_42, window_bounds = array<i64: 2, 16, 8>}, {pipeline_mode = #tpu.pipeline_mode<synchronous>, transform_indices = @transform_43, window_bounds = array<i64: 2, 8, 16>}, {pipeline_mode = #tpu.pipeline_mode<synchronous>, transform_indices = @transform_44, window_bounds = array<i64: 2, 16, 8>}, {pipeline_mode = #tpu.pipeline_mode<synchronous>, transform_indices = @transform_45, window_bounds = array<i64: 2, 16, 8>}, {pipeline_mode = #tpu.pipeline_mode<synchronous>, transform_indices = @transform_46, window_bounds = array<i64: 1, 32>}, {pipeline_mode = #tpu.pipeline_mode<synchronous>, transform_indices = @transform_47, window_bounds = array<i64: 1, 16>}, {pipeline_mode = #tpu.pipeline_mode<synchronous>, transform_indices = @transform_48, window_bounds = array<i64: 2, 1, 8>}, {pipeline_mode = #tpu.pipeline_mode<synchronous>, transform_indices = @transform_49, window_bounds = array<i64: 1, 16>}, {pipeline_mode = #tpu.pipeline_mode<synchronous>, transform_indices = @transform_50, window_bounds = array<i64: 2, 1, 8>}, {pipeline_mode = #tpu.pipeline_mode<synchronous>, transform_indices = @transform_51, window_bounds = array<i64: 2, 1, 8>}, {pipeline_mode = #tpu.pipeline_mode<synchronous>, transform_indices = @transform_52, window_bounds = array<i64: 1, 16>}, {pipeline_mode = #tpu.pipeline_mode<synchronous>, transform_indices = @transform_53, window_bounds = array<i64: 1, 16>}, {pipeline_mode = #tpu.pipeline_mode<synchronous>, transform_indices = @transform_54, window_bounds = array<i64: 1, 16>}, {pipeline_mode = #tpu.pipeline_mode<synchronous>, transform_indices = @transform_55, window_bounds = array<i64: 1, 16>}, {transform_indices = @transform_56, window_bounds = array<i64: 1, 16, 48>}, {transform_indices = @transform_57, window_bounds = array<i64: 1, 16, 8>}, {transform_indices = @transform_58, window_bounds = array<i64: 1, 1, 1>}, {transform_indices = @transform_59, window_bounds = array<i64: 1, 16, 1>}]} {
    %c0 = arith.constant 0 : index
    %c0_0 = arith.constant 0 : index
    %c0_1 = arith.constant 0 : index
    %0 = vector.load %arg1[%c0, %c0_0, %c0_1] : memref<1x16x48xf32, #tpu.memory_space<vmem>>, vector<1x16x48xf32>
    %1 = vector.shape_cast %0 : vector<1x16x48xf32> to vector<16x48xf32>
    %c0_2 = arith.constant 0 : index
    %c0_3 = arith.constant 0 : index
    %c0_4 = arith.constant 0 : index
    %2 = vector.load %arg6[%c0_2, %c0_3, %c0_4] : memref<3x16x16xf32, #tpu.memory_space<vmem>>, vector<1x16x16xf32>
    %3 = vector.shape_cast %2 : vector<1x16x16xf32> to vector<16x16xf32>
    %cst = arith.constant dense<0.000000e+00> : vector<16x48xf32>
    %4 = tpu.matmul %3, %1, %cst {dimension_numbers = #tpu.dot_dimension_numbers<[1], [0], [0], [1], [0, 0, 1, 1], [], []>} : vector<16x16xf32>, vector<16x48xf32>, vector<16x48xf32> -> vector<16x48xf32>
    %c0_5 = arith.constant 0 : index
    %c0_6 = arith.constant 0 : index
    %c0_7 = arith.constant 0 : index
    %5 = vector.load %arg33[%c0_5, %c0_6, %c0_7] : memref<3x48x64xf32, #tpu.memory_space<vmem>>, vector<1x48x64xf32>
    %6 = vector.shape_cast %5 : vector<1x48x64xf32> to vector<48x64xf32>
    %cst_8 = arith.constant dense<0.000000e+00> : vector<16x64xf32>
    %7 = tpu.matmul %4, %6, %cst_8 {dimension_numbers = #tpu.dot_dimension_numbers<[1], [0], [0], [1], [0, 0, 1, 1], [], []>} : vector<16x48xf32>, vector<48x64xf32>, vector<16x64xf32> -> vector<16x64xf32>
    %c1 = arith.constant 1 : index
    %c0_9 = arith.constant 0 : index
    %c0_10 = arith.constant 0 : index
    %8 = vector.load %arg6[%c1, %c0_9, %c0_10] : memref<3x16x16xf32, #tpu.memory_space<vmem>>, vector<1x16x16xf32>
    %9 = vector.shape_cast %8 : vector<1x16x16xf32> to vector<16x16xf32>
    %cst_11 = arith.constant dense<0.000000e+00> : vector<16x48xf32>
    %10 = tpu.matmul %9, %1, %cst_11 {dimension_numbers = #tpu.dot_dimension_numbers<[1], [0], [0], [1], [0, 0, 1, 1], [], []>} : vector<16x16xf32>, vector<16x48xf32>, vector<16x48xf32> -> vector<16x48xf32>
    %c1_12 = arith.constant 1 : index
    %c0_13 = arith.constant 0 : index
    %c0_14 = arith.constant 0 : index
    %11 = vector.load %arg33[%c1_12, %c0_13, %c0_14] : memref<3x48x64xf32, #tpu.memory_space<vmem>>, vector<1x48x64xf32>
    %12 = vector.shape_cast %11 : vector<1x48x64xf32> to vector<48x64xf32>
    %cst_15 = arith.constant dense<0.000000e+00> : vector<16x64xf32>
    %13 = tpu.matmul %10, %12, %cst_15 {dimension_numbers = #tpu.dot_dimension_numbers<[1], [0], [0], [1], [0, 0, 1, 1], [], []>} : vector<16x48xf32>, vector<48x64xf32>, vector<16x64xf32> -> vector<16x64xf32>
    %14 = arith.addf %7, %13 : vector<16x64xf32>
    %c2 = arith.constant 2 : index
    %c0_16 = arith.constant 0 : index
    %c0_17 = arith.constant 0 : index
    %15 = vector.load %arg6[%c2, %c0_16, %c0_17] : memref<3x16x16xf32, #tpu.memory_space<vmem>>, vector<1x16x16xf32>
    %16 = vector.shape_cast %15 : vector<1x16x16xf32> to vector<16x16xf32>
    %cst_18 = arith.constant dense<0.000000e+00> : vector<16x48xf32>
    %17 = tpu.matmul %16, %1, %cst_18 {dimension_numbers = #tpu.dot_dimension_numbers<[1], [0], [0], [1], [0, 0, 1, 1], [], []>} : vector<16x16xf32>, vector<16x48xf32>, vector<16x48xf32> -> vector<16x48xf32>
    %c2_19 = arith.constant 2 : index
    %c0_20 = arith.constant 0 : index
    %c0_21 = arith.constant 0 : index
    %18 = vector.load %arg33[%c2_19, %c0_20, %c0_21] : memref<3x48x64xf32, #tpu.memory_space<vmem>>, vector<1x48x64xf32>
    %19 = vector.shape_cast %18 : vector<1x48x64xf32> to vector<48x64xf32>
    %cst_22 = arith.constant dense<0.000000e+00> : vector<16x64xf32>
    %20 = tpu.matmul %17, %19, %cst_22 {dimension_numbers = #tpu.dot_dimension_numbers<[1], [0], [0], [1], [0, 0, 1, 1], [], []>} : vector<16x48xf32>, vector<48x64xf32>, vector<16x64xf32> -> vector<16x64xf32>
    %21 = arith.addf %14, %20 : vector<16x64xf32>
    %c0_23 = arith.constant 0 : index
    %c0_24 = arith.constant 0 : index
    %22 = vector.load %arg34[%c0_23, %c0_24] : memref<1x64xf32, #tpu.memory_space<vmem>>, vector<1x64xf32>
    %23 = vector.broadcast %22 : vector<1x64xf32> to vector<16x64xf32>
    %24 = arith.addf %21, %23 : vector<16x64xf32>
    %cst_25 = arith.constant 0.000000e+00 : f32
    %25 = vector.broadcast %cst_25 : f32 to vector<16x64xf32>
    %26 = arith.maximumf %24, %25 : vector<16x64xf32>
    %c0_26 = arith.constant 0 : index
    %c0_27 = arith.constant 0 : index
    %c0_28 = arith.constant 0 : index
    %27 = vector.load %arg6[%c0_26, %c0_27, %c0_28] : memref<3x16x16xf32, #tpu.memory_space<vmem>>, vector<1x16x16xf32>
    %28 = vector.shape_cast %27 : vector<1x16x16xf32> to vector<16x16xf32>
    %cst_29 = arith.constant dense<0.000000e+00> : vector<16x64xf32>
    %29 = tpu.matmul %28, %26, %cst_29 {dimension_numbers = #tpu.dot_dimension_numbers<[1], [0], [0], [1], [0, 0, 1, 1], [], []>} : vector<16x16xf32>, vector<16x64xf32>, vector<16x64xf32> -> vector<16x64xf32>
    %c0_30 = arith.constant 0 : index
    %c0_31 = arith.constant 0 : index
    %c0_32 = arith.constant 0 : index
    %30 = vector.load %arg25[%c0_30, %c0_31, %c0_32] : memref<3x64x64xf32, #tpu.memory_space<vmem>>, vector<1x64x64xf32>
    %31 = vector.shape_cast %30 : vector<1x64x64xf32> to vector<64x64xf32>
    %cst_33 = arith.constant dense<0.000000e+00> : vector<16x64xf32>
    %32 = tpu.matmul %29, %31, %cst_33 {dimension_numbers = #tpu.dot_dimension_numbers<[1], [0], [0], [1], [0, 0, 1, 1], [], []>} : vector<16x64xf32>, vector<64x64xf32>, vector<16x64xf32> -> vector<16x64xf32>
    %c1_34 = arith.constant 1 : index
    %c0_35 = arith.constant 0 : index
    %c0_36 = arith.constant 0 : index
    %33 = vector.load %arg6[%c1_34, %c0_35, %c0_36] : memref<3x16x16xf32, #tpu.memory_space<vmem>>, vector<1x16x16xf32>
    %34 = vector.shape_cast %33 : vector<1x16x16xf32> to vector<16x16xf32>
    %cst_37 = arith.constant dense<0.000000e+00> : vector<16x64xf32>
    %35 = tpu.matmul %34, %26, %cst_37 {dimension_numbers = #tpu.dot_dimension_numbers<[1], [0], [0], [1], [0, 0, 1, 1], [], []>} : vector<16x16xf32>, vector<16x64xf32>, vector<16x64xf32> -> vector<16x64xf32>
    %c1_38 = arith.constant 1 : index
    %c0_39 = arith.constant 0 : index
    %c0_40 = arith.constant 0 : index
    %36 = vector.load %arg25[%c1_38, %c0_39, %c0_40] : memref<3x64x64xf32, #tpu.memory_space<vmem>>, vector<1x64x64xf32>
    %37 = vector.shape_cast %36 : vector<1x64x64xf32> to vector<64x64xf32>
    %cst_41 = arith.constant dense<0.000000e+00> : vector<16x64xf32>
    %38 = tpu.matmul %35, %37, %cst_41 {dimension_numbers = #tpu.dot_dimension_numbers<[1], [0], [0], [1], [0, 0, 1, 1], [], []>} : vector<16x64xf32>, vector<64x64xf32>, vector<16x64xf32> -> vector<16x64xf32>
    %39 = arith.addf %32, %38 : vector<16x64xf32>
    %c2_42 = arith.constant 2 : index
    %c0_43 = arith.constant 0 : index
    %c0_44 = arith.constant 0 : index
    %40 = vector.load %arg6[%c2_42, %c0_43, %c0_44] : memref<3x16x16xf32, #tpu.memory_space<vmem>>, vector<1x16x16xf32>
    %41 = vector.shape_cast %40 : vector<1x16x16xf32> to vector<16x16xf32>
    %cst_45 = arith.constant dense<0.000000e+00> : vector<16x64xf32>
    %42 = tpu.matmul %41, %26, %cst_45 {dimension_numbers = #tpu.dot_dimension_numbers<[1], [0], [0], [1], [0, 0, 1, 1], [], []>} : vector<16x16xf32>, vector<16x64xf32>, vector<16x64xf32> -> vector<16x64xf32>
    %c2_46 = arith.constant 2 : index
    %c0_47 = arith.constant 0 : index
    %c0_48 = arith.constant 0 : index
    %43 = vector.load %arg25[%c2_46, %c0_47, %c0_48] : memref<3x64x64xf32, #tpu.memory_space<vmem>>, vector<1x64x64xf32>
    %44 = vector.shape_cast %43 : vector<1x64x64xf32> to vector<64x64xf32>
    %cst_49 = arith.constant dense<0.000000e+00> : vector<16x64xf32>
    %45 = tpu.matmul %42, %44, %cst_49 {dimension_numbers = #tpu.dot_dimension_numbers<[1], [0], [0], [1], [0, 0, 1, 1], [], []>} : vector<16x64xf32>, vector<64x64xf32>, vector<16x64xf32> -> vector<16x64xf32>
    %46 = arith.addf %39, %45 : vector<16x64xf32>
    %c0_50 = arith.constant 0 : index
    %c0_51 = arith.constant 0 : index
    %47 = vector.load %arg26[%c0_50, %c0_51] : memref<1x64xf32, #tpu.memory_space<vmem>>, vector<1x64xf32>
    %48 = vector.broadcast %47 : vector<1x64xf32> to vector<16x64xf32>
    %49 = arith.addf %46, %48 : vector<16x64xf32>
    %cst_52 = arith.constant 0.000000e+00 : f32
    %50 = vector.broadcast %cst_52 : f32 to vector<16x64xf32>
    %51 = arith.maximumf %49, %50 : vector<16x64xf32>
    %c0_53 = arith.constant 0 : index
    %c0_54 = arith.constant 0 : index
    %c0_55 = arith.constant 0 : index
    %52 = vector.load %arg7[%c0_53, %c0_54, %c0_55] : memref<3x8x16xf32, #tpu.memory_space<vmem>>, vector<1x8x16xf32>
    %53 = vector.shape_cast %52 : vector<1x8x16xf32> to vector<8x16xf32>
    %cst_56 = arith.constant dense<0.000000e+00> : vector<8x64xf32>
    %54 = tpu.matmul %53, %51, %cst_56 {dimension_numbers = #tpu.dot_dimension_numbers<[1], [0], [0], [1], [0, 0, 1, 1], [], []>} : vector<8x16xf32>, vector<16x64xf32>, vector<8x64xf32> -> vector<8x64xf32>
    %c0_57 = arith.constant 0 : index
    %c0_58 = arith.constant 0 : index
    %c0_59 = arith.constant 0 : index
    %55 = vector.load %arg29[%c0_57, %c0_58, %c0_59] : memref<3x64x64xf32, #tpu.memory_space<vmem>>, vector<1x64x64xf32>
    %56 = vector.shape_cast %55 : vector<1x64x64xf32> to vector<64x64xf32>
    %cst_60 = arith.constant dense<0.000000e+00> : vector<8x64xf32>
    %57 = tpu.matmul %54, %56, %cst_60 {dimension_numbers = #tpu.dot_dimension_numbers<[1], [0], [0], [1], [0, 0, 1, 1], [], []>} : vector<8x64xf32>, vector<64x64xf32>, vector<8x64xf32> -> vector<8x64xf32>
    %c1_61 = arith.constant 1 : index
    %c0_62 = arith.constant 0 : index
    %c0_63 = arith.constant 0 : index
    %58 = vector.load %arg7[%c1_61, %c0_62, %c0_63] : memref<3x8x16xf32, #tpu.memory_space<vmem>>, vector<1x8x16xf32>
    %59 = vector.shape_cast %58 : vector<1x8x16xf32> to vector<8x16xf32>
    %cst_64 = arith.constant dense<0.000000e+00> : vector<8x64xf32>
    %60 = tpu.matmul %59, %51, %cst_64 {dimension_numbers = #tpu.dot_dimension_numbers<[1], [0], [0], [1], [0, 0, 1, 1], [], []>} : vector<8x16xf32>, vector<16x64xf32>, vector<8x64xf32> -> vector<8x64xf32>
    %c1_65 = arith.constant 1 : index
    %c0_66 = arith.constant 0 : index
    %c0_67 = arith.constant 0 : index
    %61 = vector.load %arg29[%c1_65, %c0_66, %c0_67] : memref<3x64x64xf32, #tpu.memory_space<vmem>>, vector<1x64x64xf32>
    %62 = vector.shape_cast %61 : vector<1x64x64xf32> to vector<64x64xf32>
    %cst_68 = arith.constant dense<0.000000e+00> : vector<8x64xf32>
    %63 = tpu.matmul %60, %62, %cst_68 {dimension_numbers = #tpu.dot_dimension_numbers<[1], [0], [0], [1], [0, 0, 1, 1], [], []>} : vector<8x64xf32>, vector<64x64xf32>, vector<8x64xf32> -> vector<8x64xf32>
    %64 = arith.addf %57, %63 : vector<8x64xf32>
    %c2_69 = arith.constant 2 : index
    %c0_70 = arith.constant 0 : index
    %c0_71 = arith.constant 0 : index
    %65 = vector.load %arg7[%c2_69, %c0_70, %c0_71] : memref<3x8x16xf32, #tpu.memory_space<vmem>>, vector<1x8x16xf32>
    %66 = vector.shape_cast %65 : vector<1x8x16xf32> to vector<8x16xf32>
    %cst_72 = arith.constant dense<0.000000e+00> : vector<8x64xf32>
    %67 = tpu.matmul %66, %51, %cst_72 {dimension_numbers = #tpu.dot_dimension_numbers<[1], [0], [0], [1], [0, 0, 1, 1], [], []>} : vector<8x16xf32>, vector<16x64xf32>, vector<8x64xf32> -> vector<8x64xf32>
    %c2_73 = arith.constant 2 : index
    %c0_74 = arith.constant 0 : index
    %c0_75 = arith.constant 0 : index
    %68 = vector.load %arg29[%c2_73, %c0_74, %c0_75] : memref<3x64x64xf32, #tpu.memory_space<vmem>>, vector<1x64x64xf32>
    %69 = vector.shape_cast %68 : vector<1x64x64xf32> to vector<64x64xf32>
    %cst_76 = arith.constant dense<0.000000e+00> : vector<8x64xf32>
    %70 = tpu.matmul %67, %69, %cst_76 {dimension_numbers = #tpu.dot_dimension_numbers<[1], [0], [0], [1], [0, 0, 1, 1], [], []>} : vector<8x64xf32>, vector<64x64xf32>, vector<8x64xf32> -> vector<8x64xf32>
    %71 = arith.addf %64, %70 : vector<8x64xf32>
    %c0_77 = arith.constant 0 : index
    %c0_78 = arith.constant 0 : index
    %72 = vector.load %arg30[%c0_77, %c0_78] : memref<1x64xf32, #tpu.memory_space<vmem>>, vector<1x64xf32>
    %73 = vector.broadcast %72 : vector<1x64xf32> to vector<8x64xf32>
    %74 = arith.addf %71, %73 : vector<8x64xf32>
    %cst_79 = arith.constant 0.000000e+00 : f32
    %75 = vector.broadcast %cst_79 : f32 to vector<8x64xf32>
    %76 = arith.maximumf %74, %75 : vector<8x64xf32>
    %c0_80 = arith.constant 0 : index
    %c0_81 = arith.constant 0 : index
    %c0_82 = arith.constant 0 : index
    %77 = vector.load %arg8[%c0_80, %c0_81, %c0_82] : memref<3x8x8xf32, #tpu.memory_space<vmem>>, vector<1x8x8xf32>
    %78 = vector.shape_cast %77 : vector<1x8x8xf32> to vector<8x8xf32>
    %cst_83 = arith.constant dense<0.000000e+00> : vector<8x64xf32>
    %79 = tpu.matmul %78, %76, %cst_83 {dimension_numbers = #tpu.dot_dimension_numbers<[1], [0], [0], [1], [0, 0, 1, 1], [], []>} : vector<8x8xf32>, vector<8x64xf32>, vector<8x64xf32> -> vector<8x64xf32>
    %c0_84 = arith.constant 0 : index
    %c0_85 = arith.constant 0 : index
    %c0_86 = arith.constant 0 : index
    %80 = vector.load %arg27[%c0_84, %c0_85, %c0_86] : memref<3x64x64xf32, #tpu.memory_space<vmem>>, vector<1x64x64xf32>
    %81 = vector.shape_cast %80 : vector<1x64x64xf32> to vector<64x64xf32>
    %cst_87 = arith.constant dense<0.000000e+00> : vector<8x64xf32>
    %82 = tpu.matmul %79, %81, %cst_87 {dimension_numbers = #tpu.dot_dimension_numbers<[1], [0], [0], [1], [0, 0, 1, 1], [], []>} : vector<8x64xf32>, vector<64x64xf32>, vector<8x64xf32> -> vector<8x64xf32>
    %c1_88 = arith.constant 1 : index
    %c0_89 = arith.constant 0 : index
    %c0_90 = arith.constant 0 : index
    %83 = vector.load %arg8[%c1_88, %c0_89, %c0_90] : memref<3x8x8xf32, #tpu.memory_space<vmem>>, vector<1x8x8xf32>
    %84 = vector.shape_cast %83 : vector<1x8x8xf32> to vector<8x8xf32>
    %cst_91 = arith.constant dense<0.000000e+00> : vector<8x64xf32>
    %85 = tpu.matmul %84, %76, %cst_91 {dimension_numbers = #tpu.dot_dimension_numbers<[1], [0], [0], [1], [0, 0, 1, 1], [], []>} : vector<8x8xf32>, vector<8x64xf32>, vector<8x64xf32> -> vector<8x64xf32>
    %c1_92 = arith.constant 1 : index
    %c0_93 = arith.constant 0 : index
    %c0_94 = arith.constant 0 : index
    %86 = vector.load %arg27[%c1_92, %c0_93, %c0_94] : memref<3x64x64xf32, #tpu.memory_space<vmem>>, vector<1x64x64xf32>
    %87 = vector.shape_cast %86 : vector<1x64x64xf32> to vector<64x64xf32>
    %cst_95 = arith.constant dense<0.000000e+00> : vector<8x64xf32>
    %88 = tpu.matmul %85, %87, %cst_95 {dimension_numbers = #tpu.dot_dimension_numbers<[1], [0], [0], [1], [0, 0, 1, 1], [], []>} : vector<8x64xf32>, vector<64x64xf32>, vector<8x64xf32> -> vector<8x64xf32>
    %89 = arith.addf %82, %88 : vector<8x64xf32>
    %c2_96 = arith.constant 2 : index
    %c0_97 = arith.constant 0 : index
    %c0_98 = arith.constant 0 : index
    %90 = vector.load %arg8[%c2_96, %c0_97, %c0_98] : memref<3x8x8xf32, #tpu.memory_space<vmem>>, vector<1x8x8xf32>
    %91 = vector.shape_cast %90 : vector<1x8x8xf32> to vector<8x8xf32>
    %cst_99 = arith.constant dense<0.000000e+00> : vector<8x64xf32>
    %92 = tpu.matmul %91, %76, %cst_99 {dimension_numbers = #tpu.dot_dimension_numbers<[1], [0], [0], [1], [0, 0, 1, 1], [], []>} : vector<8x8xf32>, vector<8x64xf32>, vector<8x64xf32> -> vector<8x64xf32>
    %c2_100 = arith.constant 2 : index
    %c0_101 = arith.constant 0 : index
    %c0_102 = arith.constant 0 : index
    %93 = vector.load %arg27[%c2_100, %c0_101, %c0_102] : memref<3x64x64xf32, #tpu.memory_space<vmem>>, vector<1x64x64xf32>
    %94 = vector.shape_cast %93 : vector<1x64x64xf32> to vector<64x64xf32>
    %cst_103 = arith.constant dense<0.000000e+00> : vector<8x64xf32>
    %95 = tpu.matmul %92, %94, %cst_103 {dimension_numbers = #tpu.dot_dimension_numbers<[1], [0], [0], [1], [0, 0, 1, 1], [], []>} : vector<8x64xf32>, vector<64x64xf32>, vector<8x64xf32> -> vector<8x64xf32>
    %96 = arith.addf %89, %95 : vector<8x64xf32>
    %c0_104 = arith.constant 0 : index
    %c0_105 = arith.constant 0 : index
    %97 = vector.load %arg28[%c0_104, %c0_105] : memref<1x64xf32, #tpu.memory_space<vmem>>, vector<1x64xf32>
    %98 = vector.broadcast %97 : vector<1x64xf32> to vector<8x64xf32>
    %99 = arith.addf %96, %98 : vector<8x64xf32>
    %cst_106 = arith.constant 0.000000e+00 : f32
    %100 = vector.broadcast %cst_106 : f32 to vector<8x64xf32>
    %101 = arith.maximumf %99, %100 : vector<8x64xf32>
    %c0_107 = arith.constant 0 : index
    %c0_108 = arith.constant 0 : index
    %c0_109 = arith.constant 0 : index
    %102 = vector.load %arg9[%c0_107, %c0_108, %c0_109] : memref<3x4x8xf32, #tpu.memory_space<vmem>>, vector<1x4x8xf32>
    %103 = vector.shape_cast %102 : vector<1x4x8xf32> to vector<4x8xf32>
    %cst_110 = arith.constant dense<0.000000e+00> : vector<4x64xf32>
    %104 = tpu.matmul %103, %101, %cst_110 {dimension_numbers = #tpu.dot_dimension_numbers<[1], [0], [0], [1], [0, 0, 1, 1], [], []>} : vector<4x8xf32>, vector<8x64xf32>, vector<4x64xf32> -> vector<4x64xf32>
    %c0_111 = arith.constant 0 : index
    %c0_112 = arith.constant 0 : index
    %c0_113 = arith.constant 0 : index
    %105 = vector.load %arg31[%c0_111, %c0_112, %c0_113] : memref<3x64x64xf32, #tpu.memory_space<vmem>>, vector<1x64x64xf32>
    %106 = vector.shape_cast %105 : vector<1x64x64xf32> to vector<64x64xf32>
    %cst_114 = arith.constant dense<0.000000e+00> : vector<4x64xf32>
    %107 = tpu.matmul %104, %106, %cst_114 {dimension_numbers = #tpu.dot_dimension_numbers<[1], [0], [0], [1], [0, 0, 1, 1], [], []>} : vector<4x64xf32>, vector<64x64xf32>, vector<4x64xf32> -> vector<4x64xf32>
    %c1_115 = arith.constant 1 : index
    %c0_116 = arith.constant 0 : index
    %c0_117 = arith.constant 0 : index
    %108 = vector.load %arg9[%c1_115, %c0_116, %c0_117] : memref<3x4x8xf32, #tpu.memory_space<vmem>>, vector<1x4x8xf32>
    %109 = vector.shape_cast %108 : vector<1x4x8xf32> to vector<4x8xf32>
    %cst_118 = arith.constant dense<0.000000e+00> : vector<4x64xf32>
    %110 = tpu.matmul %109, %101, %cst_118 {dimension_numbers = #tpu.dot_dimension_numbers<[1], [0], [0], [1], [0, 0, 1, 1], [], []>} : vector<4x8xf32>, vector<8x64xf32>, vector<4x64xf32> -> vector<4x64xf32>
    %c1_119 = arith.constant 1 : index
    %c0_120 = arith.constant 0 : index
    %c0_121 = arith.constant 0 : index
    %111 = vector.load %arg31[%c1_119, %c0_120, %c0_121] : memref<3x64x64xf32, #tpu.memory_space<vmem>>, vector<1x64x64xf32>
    %112 = vector.shape_cast %111 : vector<1x64x64xf32> to vector<64x64xf32>
    %cst_122 = arith.constant dense<0.000000e+00> : vector<4x64xf32>
    %113 = tpu.matmul %110, %112, %cst_122 {dimension_numbers = #tpu.dot_dimension_numbers<[1], [0], [0], [1], [0, 0, 1, 1], [], []>} : vector<4x64xf32>, vector<64x64xf32>, vector<4x64xf32> -> vector<4x64xf32>
    %114 = arith.addf %107, %113 : vector<4x64xf32>
    %c2_123 = arith.constant 2 : index
    %c0_124 = arith.constant 0 : index
    %c0_125 = arith.constant 0 : index
    %115 = vector.load %arg9[%c2_123, %c0_124, %c0_125] : memref<3x4x8xf32, #tpu.memory_space<vmem>>, vector<1x4x8xf32>
    %116 = vector.shape_cast %115 : vector<1x4x8xf32> to vector<4x8xf32>
    %cst_126 = arith.constant dense<0.000000e+00> : vector<4x64xf32>
    %117 = tpu.matmul %116, %101, %cst_126 {dimension_numbers = #tpu.dot_dimension_numbers<[1], [0], [0], [1], [0, 0, 1, 1], [], []>} : vector<4x8xf32>, vector<8x64xf32>, vector<4x64xf32> -> vector<4x64xf32>
    %c2_127 = arith.constant 2 : index
    %c0_128 = arith.constant 0 : index
    %c0_129 = arith.constant 0 : index
    %118 = vector.load %arg31[%c2_127, %c0_128, %c0_129] : memref<3x64x64xf32, #tpu.memory_space<vmem>>, vector<1x64x64xf32>
    %119 = vector.shape_cast %118 : vector<1x64x64xf32> to vector<64x64xf32>
    %cst_130 = arith.constant dense<0.000000e+00> : vector<4x64xf32>
    %120 = tpu.matmul %117, %119, %cst_130 {dimension_numbers = #tpu.dot_dimension_numbers<[1], [0], [0], [1], [0, 0, 1, 1], [], []>} : vector<4x64xf32>, vector<64x64xf32>, vector<4x64xf32> -> vector<4x64xf32>
    %121 = arith.addf %114, %120 : vector<4x64xf32>
    %c0_131 = arith.constant 0 : index
    %c0_132 = arith.constant 0 : index
    %122 = vector.load %arg32[%c0_131, %c0_132] : memref<1x64xf32, #tpu.memory_space<vmem>>, vector<1x64xf32>
    %123 = vector.broadcast %122 : vector<1x64xf32> to vector<4x64xf32>
    %124 = arith.addf %121, %123 : vector<4x64xf32>
    %cst_133 = arith.constant 0.000000e+00 : f32
    %125 = vector.broadcast %cst_133 : f32 to vector<4x64xf32>
    %126 = arith.maximumf %124, %125 : vector<4x64xf32>
    %c0_134 = arith.constant 0 : index
    %c0_135 = arith.constant 0 : index
    %c0_136 = arith.constant 0 : index
    %127 = vector.load %arg4[%c0_134, %c0_135, %c0_136] : memref<4x16x4xf32, #tpu.memory_space<vmem>>, vector<1x16x4xf32>
    %128 = vector.shape_cast %127 : vector<1x16x4xf32> to vector<16x4xf32>
    %cst_137 = arith.constant dense<0.000000e+00> : vector<16x64xf32>
    %129 = tpu.matmul %128, %126, %cst_137 {dimension_numbers = #tpu.dot_dimension_numbers<[1], [0], [0], [1], [0, 0, 1, 1], [], []>} : vector<16x4xf32>, vector<4x64xf32>, vector<16x64xf32> -> vector<16x64xf32>
    %c0_138 = arith.constant 0 : index
    %c0_139 = arith.constant 0 : index
    %c0_140 = arith.constant 0 : index
    %130 = vector.load %arg2[%c0_138, %c0_139, %c0_140] : memref<4x64x16xf32, #tpu.memory_space<vmem>>, vector<1x64x16xf32>
    %131 = vector.shape_cast %130 : vector<1x64x16xf32> to vector<64x16xf32>
    %cst_141 = arith.constant dense<0.000000e+00> : vector<16x16xf32>
    %132 = tpu.matmul %129, %131, %cst_141 {dimension_numbers = #tpu.dot_dimension_numbers<[1], [0], [0], [1], [0, 0, 1, 1], [], []>} : vector<16x64xf32>, vector<64x16xf32>, vector<16x16xf32> -> vector<16x16xf32>
    %c1_142 = arith.constant 1 : index
    %c0_143 = arith.constant 0 : index
    %c0_144 = arith.constant 0 : index
    %133 = vector.load %arg4[%c1_142, %c0_143, %c0_144] : memref<4x16x4xf32, #tpu.memory_space<vmem>>, vector<1x16x4xf32>
    %134 = vector.shape_cast %133 : vector<1x16x4xf32> to vector<16x4xf32>
    %cst_145 = arith.constant dense<0.000000e+00> : vector<16x64xf32>
    %135 = tpu.matmul %134, %126, %cst_145 {dimension_numbers = #tpu.dot_dimension_numbers<[1], [0], [0], [1], [0, 0, 1, 1], [], []>} : vector<16x4xf32>, vector<4x64xf32>, vector<16x64xf32> -> vector<16x64xf32>
    %c1_146 = arith.constant 1 : index
    %c0_147 = arith.constant 0 : index
    %c0_148 = arith.constant 0 : index
    %136 = vector.load %arg2[%c1_146, %c0_147, %c0_148] : memref<4x64x16xf32, #tpu.memory_space<vmem>>, vector<1x64x16xf32>
    %137 = vector.shape_cast %136 : vector<1x64x16xf32> to vector<64x16xf32>
    %cst_149 = arith.constant dense<0.000000e+00> : vector<16x16xf32>
    %138 = tpu.matmul %135, %137, %cst_149 {dimension_numbers = #tpu.dot_dimension_numbers<[1], [0], [0], [1], [0, 0, 1, 1], [], []>} : vector<16x64xf32>, vector<64x16xf32>, vector<16x16xf32> -> vector<16x16xf32>
    %139 = arith.addf %132, %138 : vector<16x16xf32>
    %c2_150 = arith.constant 2 : index
    %c0_151 = arith.constant 0 : index
    %c0_152 = arith.constant 0 : index
    %140 = vector.load %arg4[%c2_150, %c0_151, %c0_152] : memref<4x16x4xf32, #tpu.memory_space<vmem>>, vector<1x16x4xf32>
    %141 = vector.shape_cast %140 : vector<1x16x4xf32> to vector<16x4xf32>
    %cst_153 = arith.constant dense<0.000000e+00> : vector<16x64xf32>
    %142 = tpu.matmul %141, %126, %cst_153 {dimension_numbers = #tpu.dot_dimension_numbers<[1], [0], [0], [1], [0, 0, 1, 1], [], []>} : vector<16x4xf32>, vector<4x64xf32>, vector<16x64xf32> -> vector<16x64xf32>
    %c2_154 = arith.constant 2 : index
    %c0_155 = arith.constant 0 : index
    %c0_156 = arith.constant 0 : index
    %143 = vector.load %arg2[%c2_154, %c0_155, %c0_156] : memref<4x64x16xf32, #tpu.memory_space<vmem>>, vector<1x64x16xf32>
    %144 = vector.shape_cast %143 : vector<1x64x16xf32> to vector<64x16xf32>
    %cst_157 = arith.constant dense<0.000000e+00> : vector<16x16xf32>
    %145 = tpu.matmul %142, %144, %cst_157 {dimension_numbers = #tpu.dot_dimension_numbers<[1], [0], [0], [1], [0, 0, 1, 1], [], []>} : vector<16x64xf32>, vector<64x16xf32>, vector<16x16xf32> -> vector<16x16xf32>
    %146 = arith.addf %139, %145 : vector<16x16xf32>
    %c3 = arith.constant 3 : index
    %c0_158 = arith.constant 0 : index
    %c0_159 = arith.constant 0 : index
    %147 = vector.load %arg4[%c3, %c0_158, %c0_159] : memref<4x16x4xf32, #tpu.memory_space<vmem>>, vector<1x16x4xf32>
    %148 = vector.shape_cast %147 : vector<1x16x4xf32> to vector<16x4xf32>
    %cst_160 = arith.constant dense<0.000000e+00> : vector<16x64xf32>
    %149 = tpu.matmul %148, %126, %cst_160 {dimension_numbers = #tpu.dot_dimension_numbers<[1], [0], [0], [1], [0, 0, 1, 1], [], []>} : vector<16x4xf32>, vector<4x64xf32>, vector<16x64xf32> -> vector<16x64xf32>
    %c3_161 = arith.constant 3 : index
    %c0_162 = arith.constant 0 : index
    %c0_163 = arith.constant 0 : index
    %150 = vector.load %arg2[%c3_161, %c0_162, %c0_163] : memref<4x64x16xf32, #tpu.memory_space<vmem>>, vector<1x64x16xf32>
    %151 = vector.shape_cast %150 : vector<1x64x16xf32> to vector<64x16xf32>
    %cst_164 = arith.constant dense<0.000000e+00> : vector<16x16xf32>
    %152 = tpu.matmul %149, %151, %cst_164 {dimension_numbers = #tpu.dot_dimension_numbers<[1], [0], [0], [1], [0, 0, 1, 1], [], []>} : vector<16x64xf32>, vector<64x16xf32>, vector<16x16xf32> -> vector<16x16xf32>
    %153 = arith.addf %146, %152 : vector<16x16xf32>
    %c0_165 = arith.constant 0 : index
    %c0_166 = arith.constant 0 : index
    %154 = vector.load %arg39[%c0_165, %c0_166] : memref<16x8xf32, #tpu.memory_space<vmem>>, vector<16x8xf32>
    %cst_167 = arith.constant dense<0.000000e+00> : vector<16x8xf32>
    %155 = tpu.matmul %153, %154, %cst_167 {dimension_numbers = #tpu.dot_dimension_numbers<[1], [0], [0], [1], [0, 0, 1, 1], [], []>} : vector<16x16xf32>, vector<16x8xf32>, vector<16x8xf32> -> vector<16x8xf32>
    %c0_168 = arith.constant 0 : index
    %c0_169 = arith.constant 0 : index
    %156 = vector.load %arg40[%c0_168, %c0_169] : memref<1x8xf32, #tpu.memory_space<vmem>>, vector<1x8xf32>
    %157 = vector.broadcast %156 : vector<1x8xf32> to vector<16x8xf32>
    %158 = arith.addf %155, %157 : vector<16x8xf32>
    %c0_170 = arith.constant 0 : index
    %c0_171 = arith.constant 0 : index
    %159 = vector.load %arg36[%c0_170, %c0_171] : memref<16x8xf32, #tpu.memory_space<vmem>>, vector<16x8xf32>
    %160 = arith.addf %158, %159 : vector<16x8xf32>
    %c0_172 = arith.constant 0 : index
    %c0_173 = arith.constant 0 : index
    %161 = vector.load %arg12[%c0_172, %c0_173] : memref<16x8xf32, #tpu.memory_space<vmem>>, vector<16x8xf32>
    %cst_174 = arith.constant dense<0.000000e+00> : vector<16x16xf32>
    %162 = tpu.matmul %160, %161, %cst_174 {dimension_numbers = #tpu.dot_dimension_numbers<[1], [1], [0], [0], [0, 0, 1, 0], [], []>} : vector<16x8xf32>, vector<16x8xf32>, vector<16x16xf32> -> vector<16x16xf32>
    %163 = arith.mulf %160, %160 : vector<16x8xf32>
    %cst_175 = arith.constant dense<0.000000e+00> : vector<16xf32>
    %164 = vector.multi_reduction <add>, %163, %cst_175 [1] : vector<16x8xf32> to vector<16xf32>
    %165 = vector.shape_cast %164 : vector<16xf32> to vector<16x1xf32>
    %cst_176 = arith.constant 2.000000e+00 : f32
    %166 = vector.broadcast %cst_176 : f32 to vector<16x16xf32>
    %167 = arith.mulf %166, %162 : vector<16x16xf32>
    %168 = vector.broadcast %165 : vector<16x1xf32> to vector<16x16xf32>
    %169 = arith.subf %168, %167 : vector<16x16xf32>
    %c0_177 = arith.constant 0 : index
    %c0_178 = arith.constant 0 : index
    %170 = vector.load %arg35[%c0_177, %c0_178] : memref<1x16xf32, #tpu.memory_space<vmem>>, vector<1x16xf32>
    %171 = vector.broadcast %170 : vector<1x16xf32> to vector<16x16xf32>
    %172 = arith.addf %169, %171 : vector<16x16xf32>
    %173 = tpu.iota {dimensions = array<i32: 1>} : vector<16x16xi32>
    %cst_179 = arith.constant dense<0x7F800000> : vector<16xf32>
    %174 = vector.multi_reduction <minimumf>, %172, %cst_179 [1] : vector<16x16xf32> to vector<16xf32>
    %175 = vector.shape_cast %174 : vector<16xf32> to vector<16x1xf32>
    %176 = vector.broadcast %175 : vector<16x1xf32> to vector<16x16xf32>
    %177 = arith.cmpf oeq, %172, %176 : vector<16x16xf32>
    %c16_i32 = arith.constant 16 : i32
    %178 = vector.broadcast %c16_i32 : i32 to vector<16x16xi32>
    %179 = arith.select %177, %173, %178 : vector<16x16xi1>, vector<16x16xi32>
    %cst_180 = arith.constant dense<2147483647> : vector<16xi32>
    %180 = vector.multi_reduction <minsi>, %179, %cst_180 [1] : vector<16x16xi32> to vector<16xi32>
    %181 = vector.shape_cast %180 : vector<16xi32> to vector<16x1xi32>
    %182 = vector.broadcast %181 : vector<16x1xi32> to vector<16x16xi32>
    %183 = arith.cmpi eq, %173, %182 : vector<16x16xi32>
    %184 = arith.extui %183 : vector<16x16xi1> to vector<16x16xi32>
    %185 = arith.sitofp %184 : vector<16x16xi32> to vector<16x16xf32>
    %cst_181 = arith.constant dense<0.000000e+00> : vector<16x8xf32>
    %186 = tpu.matmul %185, %161, %cst_181 {dimension_numbers = #tpu.dot_dimension_numbers<[1], [0], [0], [1], [0, 0, 1, 1], [], []>} : vector<16x16xf32>, vector<16x8xf32>, vector<16x8xf32> -> vector<16x8xf32>
    %187 = arith.subf %186, %160 : vector<16x8xf32>
    %188 = arith.mulf %187, %187 : vector<16x8xf32>
    %cst_182 = arith.constant dense<0.000000e+00> : vector<16xf32>
    %189 = vector.multi_reduction <add>, %188, %cst_182 [1] : vector<16x8xf32> to vector<16xf32>
    %190 = vector.shape_cast %189 : vector<16xf32> to vector<16x1xf32>
    %cst_183 = arith.constant dense<0.000000e+00> : vector<1xf32>
    %191 = vector.multi_reduction <add>, %190, %cst_183 [0] : vector<16x1xf32> to vector<1xf32>
    %192 = vector.shape_cast %191 : vector<1xf32> to vector<1x1xf32>
    %c0_184 = arith.constant 0 : index
    %c0_185 = arith.constant 0 : index
    %c0_186 = arith.constant 0 : index
    %193 = vector.load %arg58[%c0_184, %c0_185, %c0_186] : memref<1x16x8xf32, #tpu.memory_space<vmem>>, vector<1x16x8xf32>
    %194 = vector.shape_cast %193 : vector<1x16x8xf32> to vector<16x8xf32>
    %195 = vector.shape_cast %186 : vector<16x8xf32> to vector<1x16x8xf32>
    tpu.vector_store %arg58[%c0_184, %c0_185, %c0_186], %195 {strides = array<i32>} : memref<1x16x8xf32, #tpu.memory_space<vmem>>, vector<1x16x8xf32>,
    %c0_187 = arith.constant 0 : index
    %c0_188 = arith.constant 0 : index
    %c0_189 = arith.constant 0 : index
    %196 = vector.load %arg60[%c0_187, %c0_188, %c0_189] : memref<1x16x1xi32, #tpu.memory_space<vmem>>, vector<1x16x1xi32>
    %197 = vector.shape_cast %196 : vector<1x16x1xi32> to vector<16x1xi32>
    %198 = vector.shape_cast %181 : vector<16x1xi32> to vector<1x16x1xi32>
    tpu.vector_store %arg60[%c0_187, %c0_188, %c0_189], %198 {strides = array<i32>} : memref<1x16x1xi32, #tpu.memory_space<vmem>>, vector<1x16x1xi32>,
    %c0_190 = arith.constant 0 : index
    %c0_191 = arith.constant 0 : index
    %c0_192 = arith.constant 0 : index
    %199 = vector.load %arg59[%c0_190, %c0_191, %c0_192] : memref<1x1x1xf32, #tpu.memory_space<vmem>>, vector<1x1x1xf32>
    %200 = vector.shape_cast %199 : vector<1x1x1xf32> to vector<1x1xf32>
    %201 = vector.shape_cast %192 : vector<1x1xf32> to vector<1x1x1xf32>
    tpu.vector_store %arg59[%c0_190, %c0_191, %c0_192], %201 {strides = array<i32>} : memref<1x1x1xf32, #tpu.memory_space<vmem>>, vector<1x1x1xf32>,
    %c0_193 = arith.constant 0 : index
    %c0_194 = arith.constant 0 : index
    %202 = vector.load %arg37[%c0_193, %c0_194] : memref<8x16xf32, #tpu.memory_space<vmem>>, vector<8x16xf32>
    %cst_195 = arith.constant dense<0.000000e+00> : vector<16x16xf32>
    %203 = tpu.matmul %186, %202, %cst_195 {dimension_numbers = #tpu.dot_dimension_numbers<[1], [0], [0], [1], [0, 0, 1, 1], [], []>} : vector<16x8xf32>, vector<8x16xf32>, vector<16x16xf32> -> vector<16x16xf32>
    %c0_196 = arith.constant 0 : index
    %c0_197 = arith.constant 0 : index
    %204 = vector.load %arg38[%c0_196, %c0_197] : memref<1x16xf32, #tpu.memory_space<vmem>>, vector<1x16xf32>
    %205 = vector.broadcast %204 : vector<1x16xf32> to vector<16x16xf32>
    %206 = arith.addf %203, %205 : vector<16x16xf32>
    %cst_198 = arith.constant dense<0.000000e+00> : vector<16xf32>
    %207 = vector.multi_reduction <add>, %206, %cst_198 [1] : vector<16x16xf32> to vector<16xf32>
    %208 = vector.shape_cast %207 : vector<16xf32> to vector<16x1xf32>
    %cst_199 = arith.constant 1.600000e+01 : f32
    %209 = vector.broadcast %cst_199 : f32 to vector<16x1xf32>
    %210 = arith.divf %208, %209 : vector<16x1xf32>
    %211 = vector.broadcast %210 : vector<16x1xf32> to vector<16x16xf32>
    %212 = arith.subf %206, %211 : vector<16x16xf32>
    %213 = arith.mulf %212, %212 : vector<16x16xf32>
    %cst_200 = arith.constant dense<0.000000e+00> : vector<16xf32>
    %214 = vector.multi_reduction <add>, %213, %cst_200 [1] : vector<16x16xf32> to vector<16xf32>
    %215 = vector.shape_cast %214 : vector<16xf32> to vector<16x1xf32>
    %cst_201 = arith.constant 1.600000e+01 : f32
    %216 = vector.broadcast %cst_201 : f32 to vector<16x1xf32>
    %217 = arith.divf %215, %216 : vector<16x1xf32>
    %218 = vector.broadcast %210 : vector<16x1xf32> to vector<16x16xf32>
    %219 = arith.subf %206, %218 : vector<16x16xf32>
    %cst_202 = arith.constant 9.99999974E-6 : f32
    %220 = vector.broadcast %cst_202 : f32 to vector<16x1xf32>
    %221 = arith.addf %217, %220 : vector<16x1xf32>
    %222 = math.rsqrt %221 : vector<16x1xf32>
    %223 = vector.broadcast %222 : vector<16x1xf32> to vector<16x16xf32>
    %224 = arith.mulf %219, %223 : vector<16x16xf32>
    %c0_203 = arith.constant 0 : index
    %c0_204 = arith.constant 0 : index
    %225 = vector.load %arg54[%c0_203, %c0_204] : memref<1x16xf32, #tpu.memory_space<vmem>>, vector<1x16xf32>
    %226 = vector.broadcast %225 : vector<1x16xf32> to vector<16x16xf32>
    %227 = arith.mulf %224, %226 : vector<16x16xf32>
    %c0_205 = arith.constant 0 : index
    %c0_206 = arith.constant 0 : index
    %228 = vector.load %arg53[%c0_205, %c0_206] : memref<1x16xf32, #tpu.memory_space<vmem>>, vector<1x16xf32>
    %229 = vector.broadcast %228 : vector<1x16xf32> to vector<16x16xf32>
    %230 = arith.addf %227, %229 : vector<16x16xf32>
    %c0_207 = arith.constant 0 : index
    %c0_208 = arith.constant 0 : index
    %c0_209 = arith.constant 0 : index
    %231 = vector.load %arg45[%c0_207, %c0_208, %c0_209] : memref<2x16x8xf32, #tpu.memory_space<vmem>>, vector<1x16x8xf32>
    %232 = vector.shape_cast %231 : vector<1x16x8xf32> to vector<16x8xf32>
    %cst_210 = arith.constant dense<0.000000e+00> : vector<16x8xf32>
    %233 = tpu.matmul %230, %232, %cst_210 {dimension_numbers = #tpu.dot_dimension_numbers<[1], [0], [0], [1], [0, 0, 1, 1], [], []>} : vector<16x16xf32>, vector<16x8xf32>, vector<16x8xf32> -> vector<16x8xf32>
    %c0_211 = arith.constant 0 : index
    %c0_212 = arith.constant 0 : index
    %c0_213 = arith.constant 0 : index
    %234 = vector.load %arg51[%c0_211, %c0_212, %c0_213] : memref<2x1x8xf32, #tpu.memory_space<vmem>>, vector<1x1x8xf32>
    %235 = vector.shape_cast %234 : vector<1x1x8xf32> to vector<1x8xf32>
    %236 = vector.broadcast %235 : vector<1x8xf32> to vector<16x8xf32>
    %237 = arith.addf %233, %236 : vector<16x8xf32>
    %c0_214 = arith.constant 0 : index
    %c0_215 = arith.constant 0 : index
    %c0_216 = arith.constant 0 : index
    %238 = vector.load %arg43[%c0_214, %c0_215, %c0_216] : memref<2x16x8xf32, #tpu.memory_space<vmem>>, vector<1x16x8xf32>
    %239 = vector.shape_cast %238 : vector<1x16x8xf32> to vector<16x8xf32>
    %cst_217 = arith.constant dense<0.000000e+00> : vector<16x8xf32>
    %240 = tpu.matmul %230, %239, %cst_217 {dimension_numbers = #tpu.dot_dimension_numbers<[1], [0], [0], [1], [0, 0, 1, 1], [], []>} : vector<16x16xf32>, vector<16x8xf32>, vector<16x8xf32> -> vector<16x8xf32>
    %c0_218 = arith.constant 0 : index
    %c0_219 = arith.constant 0 : index
    %c0_220 = arith.constant 0 : index
    %241 = vector.load %arg49[%c0_218, %c0_219, %c0_220] : memref<2x1x8xf32, #tpu.memory_space<vmem>>, vector<1x1x8xf32>
    %242 = vector.shape_cast %241 : vector<1x1x8xf32> to vector<1x8xf32>
    %243 = vector.broadcast %242 : vector<1x8xf32> to vector<16x8xf32>
    %244 = arith.addf %240, %243 : vector<16x8xf32>
    %c0_221 = arith.constant 0 : index
    %c0_222 = arith.constant 0 : index
    %c0_223 = arith.constant 0 : index
    %245 = vector.load %arg46[%c0_221, %c0_222, %c0_223] : memref<2x16x8xf32, #tpu.memory_space<vmem>>, vector<1x16x8xf32>
    %246 = vector.shape_cast %245 : vector<1x16x8xf32> to vector<16x8xf32>
    %cst_224 = arith.constant dense<0.000000e+00> : vector<16x8xf32>
    %247 = tpu.matmul %230, %246, %cst_224 {dimension_numbers = #tpu.dot_dimension_numbers<[1], [0], [0], [1], [0, 0, 1, 1], [], []>} : vector<16x16xf32>, vector<16x8xf32>, vector<16x8xf32> -> vector<16x8xf32>
    %c0_225 = arith.constant 0 : index
    %c0_226 = arith.constant 0 : index
    %c0_227 = arith.constant 0 : index
    %248 = vector.load %arg52[%c0_225, %c0_226, %c0_227] : memref<2x1x8xf32, #tpu.memory_space<vmem>>, vector<1x1x8xf32>
    %249 = vector.shape_cast %248 : vector<1x1x8xf32> to vector<1x8xf32>
    %250 = vector.broadcast %249 : vector<1x8xf32> to vector<16x8xf32>
    %251 = arith.addf %247, %250 : vector<16x8xf32>
    %cst_228 = arith.constant dense<0.000000e+00> : vector<16x16xf32>
    %252 = tpu.matmul %237, %244, %cst_228 {dimension_numbers = #tpu.dot_dimension_numbers<[1], [1], [0], [0], [0, 0, 1, 0], [], []>} : vector<16x8xf32>, vector<16x8xf32>, vector<16x16xf32> -> vector<16x16xf32>
    %cst_229 = arith.constant 0.353553385 : f32
    %253 = vector.broadcast %cst_229 : f32 to vector<16x16xf32>
    %254 = arith.mulf %252, %253 : vector<16x16xf32>
    %cst_230 = arith.constant dense<0xFF800000> : vector<16xf32>
    %255 = vector.multi_reduction <maximumf>, %254, %cst_230 [1] : vector<16x16xf32> to vector<16xf32>
    %256 = vector.shape_cast %255 : vector<16xf32> to vector<16x1xf32>
    %257 = vector.broadcast %256 : vector<16x1xf32> to vector<16x16xf32>
    %258 = arith.subf %254, %257 : vector<16x16xf32>
    %259 = math.exp %258 : vector<16x16xf32>
    %cst_231 = arith.constant dense<0.000000e+00> : vector<16xf32>
    %260 = vector.multi_reduction <add>, %259, %cst_231 [1] : vector<16x16xf32> to vector<16xf32>
    %261 = vector.shape_cast %260 : vector<16xf32> to vector<16x1xf32>
    %262 = tpu.reciprocal %261 {approx = true} : vector<16x1xf32> -> vector<16x1xf32>
    %263 = vector.broadcast %262 : vector<16x1xf32> to vector<16x16xf32>
    %264 = arith.mulf %259, %263 : vector<16x16xf32>
    %cst_232 = arith.constant dense<0.000000e+00> : vector<16x8xf32>
    %265 = tpu.matmul %264, %251, %cst_232 {dimension_numbers = #tpu.dot_dimension_numbers<[1], [0], [0], [1], [0, 0, 1, 1], [], []>} : vector<16x16xf32>, vector<16x8xf32>, vector<16x8xf32> -> vector<16x8xf32>
    %c0_233 = arith.constant 0 : index
    %c0_234 = arith.constant 0 : index
    %c0_235 = arith.constant 0 : index
    %266 = vector.load %arg44[%c0_233, %c0_234, %c0_235] : memref<2x8x16xf32, #tpu.memory_space<vmem>>, vector<1x8x16xf32>
    %267 = vector.shape_cast %266 : vector<1x8x16xf32> to vector<8x16xf32>
    %cst_236 = arith.constant dense<0.000000e+00> : vector<16x16xf32>
    %268 = tpu.matmul %265, %267, %cst_236 {dimension_numbers = #tpu.dot_dimension_numbers<[1], [0], [0], [1], [0, 0, 1, 1], [], []>} : vector<16x8xf32>, vector<8x16xf32>, vector<16x16xf32> -> vector<16x16xf32>
    %c1_237 = arith.constant 1 : index
    %c0_238 = arith.constant 0 : index
    %c0_239 = arith.constant 0 : index
    %269 = vector.load %arg45[%c1_237, %c0_238, %c0_239] : memref<2x16x8xf32, #tpu.memory_space<vmem>>, vector<1x16x8xf32>
    %270 = vector.shape_cast %269 : vector<1x16x8xf32> to vector<16x8xf32>
    %cst_240 = arith.constant dense<0.000000e+00> : vector<16x8xf32>
    %271 = tpu.matmul %230, %270, %cst_240 {dimension_numbers = #tpu.dot_dimension_numbers<[1], [0], [0], [1], [0, 0, 1, 1], [], []>} : vector<16x16xf32>, vector<16x8xf32>, vector<16x8xf32> -> vector<16x8xf32>
    %c1_241 = arith.constant 1 : index
    %c0_242 = arith.constant 0 : index
    %c0_243 = arith.constant 0 : index
    %272 = vector.load %arg51[%c1_241, %c0_242, %c0_243] : memref<2x1x8xf32, #tpu.memory_space<vmem>>, vector<1x1x8xf32>
    %273 = vector.shape_cast %272 : vector<1x1x8xf32> to vector<1x8xf32>
    %274 = vector.broadcast %273 : vector<1x8xf32> to vector<16x8xf32>
    %275 = arith.addf %271, %274 : vector<16x8xf32>
    %c1_244 = arith.constant 1 : index
    %c0_245 = arith.constant 0 : index
    %c0_246 = arith.constant 0 : index
    %276 = vector.load %arg43[%c1_244, %c0_245, %c0_246] : memref<2x16x8xf32, #tpu.memory_space<vmem>>, vector<1x16x8xf32>
    %277 = vector.shape_cast %276 : vector<1x16x8xf32> to vector<16x8xf32>
    %cst_247 = arith.constant dense<0.000000e+00> : vector<16x8xf32>
    %278 = tpu.matmul %230, %277, %cst_247 {dimension_numbers = #tpu.dot_dimension_numbers<[1], [0], [0], [1], [0, 0, 1, 1], [], []>} : vector<16x16xf32>, vector<16x8xf32>, vector<16x8xf32> -> vector<16x8xf32>
    %c1_248 = arith.constant 1 : index
    %c0_249 = arith.constant 0 : index
    %c0_250 = arith.constant 0 : index
    %279 = vector.load %arg49[%c1_248, %c0_249, %c0_250] : memref<2x1x8xf32, #tpu.memory_space<vmem>>, vector<1x1x8xf32>
    %280 = vector.shape_cast %279 : vector<1x1x8xf32> to vector<1x8xf32>
    %281 = vector.broadcast %280 : vector<1x8xf32> to vector<16x8xf32>
    %282 = arith.addf %278, %281 : vector<16x8xf32>
    %c1_251 = arith.constant 1 : index
    %c0_252 = arith.constant 0 : index
    %c0_253 = arith.constant 0 : index
    %283 = vector.load %arg46[%c1_251, %c0_252, %c0_253] : memref<2x16x8xf32, #tpu.memory_space<vmem>>, vector<1x16x8xf32>
    %284 = vector.shape_cast %283 : vector<1x16x8xf32> to vector<16x8xf32>
    %cst_254 = arith.constant dense<0.000000e+00> : vector<16x8xf32>
    %285 = tpu.matmul %230, %284, %cst_254 {dimension_numbers = #tpu.dot_dimension_numbers<[1], [0], [0], [1], [0, 0, 1, 1], [], []>} : vector<16x16xf32>, vector<16x8xf32>, vector<16x8xf32> -> vector<16x8xf32>
    %c1_255 = arith.constant 1 : index
    %c0_256 = arith.constant 0 : index
    %c0_257 = arith.constant 0 : index
    %286 = vector.load %arg52[%c1_255, %c0_256, %c0_257] : memref<2x1x8xf32, #tpu.memory_space<vmem>>, vector<1x1x8xf32>
    %287 = vector.shape_cast %286 : vector<1x1x8xf32> to vector<1x8xf32>
    %288 = vector.broadcast %287 : vector<1x8xf32> to vector<16x8xf32>
    %289 = arith.addf %285, %288 : vector<16x8xf32>
    %cst_258 = arith.constant dense<0.000000e+00> : vector<16x16xf32>
    %290 = tpu.matmul %275, %282, %cst_258 {dimension_numbers = #tpu.dot_dimension_numbers<[1], [1], [0], [0], [0, 0, 1, 0], [], []>} : vector<16x8xf32>, vector<16x8xf32>, vector<16x16xf32> -> vector<16x16xf32>
    %cst_259 = arith.constant 0.353553385 : f32
    %291 = vector.broadcast %cst_259 : f32 to vector<16x16xf32>
    %292 = arith.mulf %290, %291 : vector<16x16xf32>
    %cst_260 = arith.constant dense<0xFF800000> : vector<16xf32>
    %293 = vector.multi_reduction <maximumf>, %292, %cst_260 [1] : vector<16x16xf32> to vector<16xf32>
    %294 = vector.shape_cast %293 : vector<16xf32> to vector<16x1xf32>
    %295 = vector.broadcast %294 : vector<16x1xf32> to vector<16x16xf32>
    %296 = arith.subf %292, %295 : vector<16x16xf32>
    %297 = math.exp %296 : vector<16x16xf32>
    %cst_261 = arith.constant dense<0.000000e+00> : vector<16xf32>
    %298 = vector.multi_reduction <add>, %297, %cst_261 [1] : vector<16x16xf32> to vector<16xf32>
    %299 = vector.shape_cast %298 : vector<16xf32> to vector<16x1xf32>
    %300 = tpu.reciprocal %299 {approx = true} : vector<16x1xf32> -> vector<16x1xf32>
    %301 = vector.broadcast %300 : vector<16x1xf32> to vector<16x16xf32>
    %302 = arith.mulf %297, %301 : vector<16x16xf32>
    %cst_262 = arith.constant dense<0.000000e+00> : vector<16x8xf32>
    %303 = tpu.matmul %302, %289, %cst_262 {dimension_numbers = #tpu.dot_dimension_numbers<[1], [0], [0], [1], [0, 0, 1, 1], [], []>} : vector<16x16xf32>, vector<16x8xf32>, vector<16x8xf32> -> vector<16x8xf32>
    %c1_263 = arith.constant 1 : index
    %c0_264 = arith.constant 0 : index
    %c0_265 = arith.constant 0 : index
    %304 = vector.load %arg44[%c1_263, %c0_264, %c0_265] : memref<2x8x16xf32, #tpu.memory_space<vmem>>, vector<1x8x16xf32>
    %305 = vector.shape_cast %304 : vector<1x8x16xf32> to vector<8x16xf32>
    %cst_266 = arith.constant dense<0.000000e+00> : vector<16x16xf32>
    %306 = tpu.matmul %303, %305, %cst_266 {dimension_numbers = #tpu.dot_dimension_numbers<[1], [0], [0], [1], [0, 0, 1, 1], [], []>} : vector<16x8xf32>, vector<8x16xf32>, vector<16x16xf32> -> vector<16x16xf32>
    %307 = arith.addf %268, %306 : vector<16x16xf32>
    %308 = arith.addf %206, %307 : vector<16x16xf32>
    %c0_267 = arith.constant 0 : index
    %c0_268 = arith.constant 0 : index
    %309 = vector.load %arg50[%c0_267, %c0_268] : memref<1x16xf32, #tpu.memory_space<vmem>>, vector<1x16xf32>
    %310 = vector.broadcast %309 : vector<1x16xf32> to vector<16x16xf32>
    %311 = arith.addf %308, %310 : vector<16x16xf32>
    %cst_269 = arith.constant dense<0.000000e+00> : vector<16xf32>
    %312 = vector.multi_reduction <add>, %311, %cst_269 [1] : vector<16x16xf32> to vector<16xf32>
    %313 = vector.shape_cast %312 : vector<16xf32> to vector<16x1xf32>
    %cst_270 = arith.constant 1.600000e+01 : f32
    %314 = vector.broadcast %cst_270 : f32 to vector<16x1xf32>
    %315 = arith.divf %313, %314 : vector<16x1xf32>
    %316 = vector.broadcast %315 : vector<16x1xf32> to vector<16x16xf32>
    %317 = arith.subf %311, %316 : vector<16x16xf32>
    %318 = arith.mulf %317, %317 : vector<16x16xf32>
    %cst_271 = arith.constant dense<0.000000e+00> : vector<16xf32>
    %319 = vector.multi_reduction <add>, %318, %cst_271 [1] : vector<16x16xf32> to vector<16xf32>
    %320 = vector.shape_cast %319 : vector<16xf32> to vector<16x1xf32>
    %cst_272 = arith.constant 1.600000e+01 : f32
    %321 = vector.broadcast %cst_272 : f32 to vector<16x1xf32>
    %322 = arith.divf %320, %321 : vector<16x1xf32>
    %323 = vector.broadcast %315 : vector<16x1xf32> to vector<16x16xf32>
    %324 = arith.subf %311, %323 : vector<16x16xf32>
    %cst_273 = arith.constant 9.99999974E-6 : f32
    %325 = vector.broadcast %cst_273 : f32 to vector<16x1xf32>
    %326 = arith.addf %322, %325 : vector<16x1xf32>
    %327 = math.rsqrt %326 : vector<16x1xf32>
    %328 = vector.broadcast %327 : vector<16x1xf32> to vector<16x16xf32>
    %329 = arith.mulf %324, %328 : vector<16x16xf32>
    %c0_274 = arith.constant 0 : index
    %c0_275 = arith.constant 0 : index
    %330 = vector.load %arg56[%c0_274, %c0_275] : memref<1x16xf32, #tpu.memory_space<vmem>>, vector<1x16xf32>
    %331 = vector.broadcast %330 : vector<1x16xf32> to vector<16x16xf32>
    %332 = arith.mulf %329, %331 : vector<16x16xf32>
    %c0_276 = arith.constant 0 : index
    %c0_277 = arith.constant 0 : index
    %333 = vector.load %arg55[%c0_276, %c0_277] : memref<1x16xf32, #tpu.memory_space<vmem>>, vector<1x16xf32>
    %334 = vector.broadcast %333 : vector<1x16xf32> to vector<16x16xf32>
    %335 = arith.addf %332, %334 : vector<16x16xf32>
    %c0_278 = arith.constant 0 : index
    %c0_279 = arith.constant 0 : index
    %336 = vector.load %arg41[%c0_278, %c0_279] : memref<16x32xf32, #tpu.memory_space<vmem>>, vector<16x32xf32>
    %cst_280 = arith.constant dense<0.000000e+00> : vector<16x32xf32>
    %337 = tpu.matmul %335, %336, %cst_280 {dimension_numbers = #tpu.dot_dimension_numbers<[1], [0], [0], [1], [0, 0, 1, 1], [], []>} : vector<16x16xf32>, vector<16x32xf32>, vector<16x32xf32> -> vector<16x32xf32>
    %c0_281 = arith.constant 0 : index
    %c0_282 = arith.constant 0 : index
    %338 = vector.load %arg47[%c0_281, %c0_282] : memref<1x32xf32, #tpu.memory_space<vmem>>, vector<1x32xf32>
    %339 = vector.broadcast %338 : vector<1x32xf32> to vector<16x32xf32>
    %340 = arith.addf %337, %339 : vector<16x32xf32>
    %341 = arith.mulf %340, %340 : vector<16x32xf32>
    %342 = arith.mulf %340, %341 : vector<16x32xf32>
    %cst_283 = arith.constant 4.471500e-02 : f32
    %343 = vector.broadcast %cst_283 : f32 to vector<16x32xf32>
    %344 = arith.mulf %343, %342 : vector<16x32xf32>
    %345 = arith.addf %340, %344 : vector<16x32xf32>
    %cst_284 = arith.constant 0.797884583 : f32
    %346 = vector.broadcast %cst_284 : f32 to vector<16x32xf32>
    %347 = arith.mulf %346, %345 : vector<16x32xf32>
    %348 = math.tanh %347 : vector<16x32xf32>
    %cst_285 = arith.constant 1.000000e+00 : f32
    %349 = vector.broadcast %cst_285 : f32 to vector<16x32xf32>
    %350 = arith.addf %349, %348 : vector<16x32xf32>
    %cst_286 = arith.constant 5.000000e-01 : f32
    %351 = vector.broadcast %cst_286 : f32 to vector<16x32xf32>
    %352 = arith.mulf %351, %350 : vector<16x32xf32>
    %353 = arith.mulf %340, %352 : vector<16x32xf32>
    %c0_287 = arith.constant 0 : index
    %c0_288 = arith.constant 0 : index
    %354 = vector.load %arg42[%c0_287, %c0_288] : memref<32x16xf32, #tpu.memory_space<vmem>>, vector<32x16xf32>
    %cst_289 = arith.constant dense<0.000000e+00> : vector<16x16xf32>
    %355 = tpu.matmul %353, %354, %cst_289 {dimension_numbers = #tpu.dot_dimension_numbers<[1], [0], [0], [1], [0, 0, 1, 1], [], []>} : vector<16x32xf32>, vector<32x16xf32>, vector<16x16xf32> -> vector<16x16xf32>
    %c0_290 = arith.constant 0 : index
    %c0_291 = arith.constant 0 : index
    %356 = vector.load %arg48[%c0_290, %c0_291] : memref<1x16xf32, #tpu.memory_space<vmem>>, vector<1x16xf32>
    %357 = vector.broadcast %356 : vector<1x16xf32> to vector<16x16xf32>
    %358 = arith.addf %355, %357 : vector<16x16xf32>
    %359 = arith.addf %311, %358 : vector<16x16xf32>
    %c0_292 = arith.constant 0 : index
    %c0_293 = arith.constant 0 : index
    %c0_294 = arith.constant 0 : index
    %360 = vector.load %arg5[%c0_292, %c0_293, %c0_294] : memref<4x4x16xf32, #tpu.memory_space<vmem>>, vector<1x4x16xf32>
    %361 = vector.shape_cast %360 : vector<1x4x16xf32> to vector<4x16xf32>
    %cst_295 = arith.constant dense<0.000000e+00> : vector<4x16xf32>
    %362 = tpu.matmul %361, %359, %cst_295 {dimension_numbers = #tpu.dot_dimension_numbers<[1], [0], [0], [1], [0, 0, 1, 1], [], []>} : vector<4x16xf32>, vector<16x16xf32>, vector<4x16xf32> -> vector<4x16xf32>
    %c0_296 = arith.constant 0 : index
    %c0_297 = arith.constant 0 : index
    %c0_298 = arith.constant 0 : index
    %363 = vector.load %arg3[%c0_296, %c0_297, %c0_298] : memref<4x16x64xf32, #tpu.memory_space<vmem>>, vector<1x16x64xf32>
    %364 = vector.shape_cast %363 : vector<1x16x64xf32> to vector<16x64xf32>
    %cst_299 = arith.constant dense<0.000000e+00> : vector<4x64xf32>
    %365 = tpu.matmul %362, %364, %cst_299 {dimension_numbers = #tpu.dot_dimension_numbers<[1], [0], [0], [1], [0, 0, 1, 1], [], []>} : vector<4x16xf32>, vector<16x64xf32>, vector<4x64xf32> -> vector<4x64xf32>
    %c1_300 = arith.constant 1 : index
    %c0_301 = arith.constant 0 : index
    %c0_302 = arith.constant 0 : index
    %366 = vector.load %arg5[%c1_300, %c0_301, %c0_302] : memref<4x4x16xf32, #tpu.memory_space<vmem>>, vector<1x4x16xf32>
    %367 = vector.shape_cast %366 : vector<1x4x16xf32> to vector<4x16xf32>
    %cst_303 = arith.constant dense<0.000000e+00> : vector<4x16xf32>
    %368 = tpu.matmul %367, %359, %cst_303 {dimension_numbers = #tpu.dot_dimension_numbers<[1], [0], [0], [1], [0, 0, 1, 1], [], []>} : vector<4x16xf32>, vector<16x16xf32>, vector<4x16xf32> -> vector<4x16xf32>
    %c1_304 = arith.constant 1 : index
    %c0_305 = arith.constant 0 : index
    %c0_306 = arith.constant 0 : index
    %369 = vector.load %arg3[%c1_304, %c0_305, %c0_306] : memref<4x16x64xf32, #tpu.memory_space<vmem>>, vector<1x16x64xf32>
    %370 = vector.shape_cast %369 : vector<1x16x64xf32> to vector<16x64xf32>
    %cst_307 = arith.constant dense<0.000000e+00> : vector<4x64xf32>
    %371 = tpu.matmul %368, %370, %cst_307 {dimension_numbers = #tpu.dot_dimension_numbers<[1], [0], [0], [1], [0, 0, 1, 1], [], []>} : vector<4x16xf32>, vector<16x64xf32>, vector<4x64xf32> -> vector<4x64xf32>
    %372 = arith.addf %365, %371 : vector<4x64xf32>
    %c2_308 = arith.constant 2 : index
    %c0_309 = arith.constant 0 : index
    %c0_310 = arith.constant 0 : index
    %373 = vector.load %arg5[%c2_308, %c0_309, %c0_310] : memref<4x4x16xf32, #tpu.memory_space<vmem>>, vector<1x4x16xf32>
    %374 = vector.shape_cast %373 : vector<1x4x16xf32> to vector<4x16xf32>
    %cst_311 = arith.constant dense<0.000000e+00> : vector<4x16xf32>
    %375 = tpu.matmul %374, %359, %cst_311 {dimension_numbers = #tpu.dot_dimension_numbers<[1], [0], [0], [1], [0, 0, 1, 1], [], []>} : vector<4x16xf32>, vector<16x16xf32>, vector<4x16xf32> -> vector<4x16xf32>
    %c2_312 = arith.constant 2 : index
    %c0_313 = arith.constant 0 : index
    %c0_314 = arith.constant 0 : index
    %376 = vector.load %arg3[%c2_312, %c0_313, %c0_314] : memref<4x16x64xf32, #tpu.memory_space<vmem>>, vector<1x16x64xf32>
    %377 = vector.shape_cast %376 : vector<1x16x64xf32> to vector<16x64xf32>
    %cst_315 = arith.constant dense<0.000000e+00> : vector<4x64xf32>
    %378 = tpu.matmul %375, %377, %cst_315 {dimension_numbers = #tpu.dot_dimension_numbers<[1], [0], [0], [1], [0, 0, 1, 1], [], []>} : vector<4x16xf32>, vector<16x64xf32>, vector<4x64xf32> -> vector<4x64xf32>
    %379 = arith.addf %372, %378 : vector<4x64xf32>
    %c3_316 = arith.constant 3 : index
    %c0_317 = arith.constant 0 : index
    %c0_318 = arith.constant 0 : index
    %380 = vector.load %arg5[%c3_316, %c0_317, %c0_318] : memref<4x4x16xf32, #tpu.memory_space<vmem>>, vector<1x4x16xf32>
    %381 = vector.shape_cast %380 : vector<1x4x16xf32> to vector<4x16xf32>
    %cst_319 = arith.constant dense<0.000000e+00> : vector<4x16xf32>
    %382 = tpu.matmul %381, %359, %cst_319 {dimension_numbers = #tpu.dot_dimension_numbers<[1], [0], [0], [1], [0, 0, 1, 1], [], []>} : vector<4x16xf32>, vector<16x16xf32>, vector<4x16xf32> -> vector<4x16xf32>
    %c3_320 = arith.constant 3 : index
    %c0_321 = arith.constant 0 : index
    %c0_322 = arith.constant 0 : index
    %383 = vector.load %arg3[%c3_320, %c0_321, %c0_322] : memref<4x16x64xf32, #tpu.memory_space<vmem>>, vector<1x16x64xf32>
    %384 = vector.shape_cast %383 : vector<1x16x64xf32> to vector<16x64xf32>
    %cst_323 = arith.constant dense<0.000000e+00> : vector<4x64xf32>
    %385 = tpu.matmul %382, %384, %cst_323 {dimension_numbers = #tpu.dot_dimension_numbers<[1], [0], [0], [1], [0, 0, 1, 1], [], []>} : vector<4x16xf32>, vector<16x64xf32>, vector<4x64xf32> -> vector<4x64xf32>
    %386 = arith.addf %379, %385 : vector<4x64xf32>
    %c0_324 = arith.constant 0 : index
    %c0_325 = arith.constant 0 : index
    %c0_326 = arith.constant 0 : index
    %387 = vector.load %arg11[%c0_324, %c0_325, %c0_326] : memref<3x8x4xf32, #tpu.memory_space<vmem>>, vector<1x8x4xf32>
    %388 = vector.shape_cast %387 : vector<1x8x4xf32> to vector<8x4xf32>
    %cst_327 = arith.constant dense<0.000000e+00> : vector<8x64xf32>
    %389 = tpu.matmul %388, %386, %cst_327 {dimension_numbers = #tpu.dot_dimension_numbers<[1], [0], [0], [1], [0, 0, 1, 1], [], []>} : vector<8x4xf32>, vector<4x64xf32>, vector<8x64xf32> -> vector<8x64xf32>
    %c0_328 = arith.constant 0 : index
    %c0_329 = arith.constant 0 : index
    %c0_330 = arith.constant 0 : index
    %390 = vector.load %arg23[%c0_328, %c0_329, %c0_330] : memref<3x64x64xf32, #tpu.memory_space<vmem>>, vector<1x64x64xf32>
    %391 = vector.shape_cast %390 : vector<1x64x64xf32> to vector<64x64xf32>
    %cst_331 = arith.constant dense<0.000000e+00> : vector<8x64xf32>
    %392 = tpu.matmul %389, %391, %cst_331 {dimension_numbers = #tpu.dot_dimension_numbers<[1], [0], [0], [1], [0, 0, 1, 1], [], []>} : vector<8x64xf32>, vector<64x64xf32>, vector<8x64xf32> -> vector<8x64xf32>
    %c1_332 = arith.constant 1 : index
    %c0_333 = arith.constant 0 : index
    %c0_334 = arith.constant 0 : index
    %393 = vector.load %arg11[%c1_332, %c0_333, %c0_334] : memref<3x8x4xf32, #tpu.memory_space<vmem>>, vector<1x8x4xf32>
    %394 = vector.shape_cast %393 : vector<1x8x4xf32> to vector<8x4xf32>
    %cst_335 = arith.constant dense<0.000000e+00> : vector<8x64xf32>
    %395 = tpu.matmul %394, %386, %cst_335 {dimension_numbers = #tpu.dot_dimension_numbers<[1], [0], [0], [1], [0, 0, 1, 1], [], []>} : vector<8x4xf32>, vector<4x64xf32>, vector<8x64xf32> -> vector<8x64xf32>
    %c1_336 = arith.constant 1 : index
    %c0_337 = arith.constant 0 : index
    %c0_338 = arith.constant 0 : index
    %396 = vector.load %arg23[%c1_336, %c0_337, %c0_338] : memref<3x64x64xf32, #tpu.memory_space<vmem>>, vector<1x64x64xf32>
    %397 = vector.shape_cast %396 : vector<1x64x64xf32> to vector<64x64xf32>
    %cst_339 = arith.constant dense<0.000000e+00> : vector<8x64xf32>
    %398 = tpu.matmul %395, %397, %cst_339 {dimension_numbers = #tpu.dot_dimension_numbers<[1], [0], [0], [1], [0, 0, 1, 1], [], []>} : vector<8x64xf32>, vector<64x64xf32>, vector<8x64xf32> -> vector<8x64xf32>
    %399 = arith.addf %392, %398 : vector<8x64xf32>
    %c2_340 = arith.constant 2 : index
    %c0_341 = arith.constant 0 : index
    %c0_342 = arith.constant 0 : index
    %400 = vector.load %arg11[%c2_340, %c0_341, %c0_342] : memref<3x8x4xf32, #tpu.memory_space<vmem>>, vector<1x8x4xf32>
    %401 = vector.shape_cast %400 : vector<1x8x4xf32> to vector<8x4xf32>
    %cst_343 = arith.constant dense<0.000000e+00> : vector<8x64xf32>
    %402 = tpu.matmul %401, %386, %cst_343 {dimension_numbers = #tpu.dot_dimension_numbers<[1], [0], [0], [1], [0, 0, 1, 1], [], []>} : vector<8x4xf32>, vector<4x64xf32>, vector<8x64xf32> -> vector<8x64xf32>
    %c2_344 = arith.constant 2 : index
    %c0_345 = arith.constant 0 : index
    %c0_346 = arith.constant 0 : index
    %403 = vector.load %arg23[%c2_344, %c0_345, %c0_346] : memref<3x64x64xf32, #tpu.memory_space<vmem>>, vector<1x64x64xf32>
    %404 = vector.shape_cast %403 : vector<1x64x64xf32> to vector<64x64xf32>
    %cst_347 = arith.constant dense<0.000000e+00> : vector<8x64xf32>
    %405 = tpu.matmul %402, %404, %cst_347 {dimension_numbers = #tpu.dot_dimension_numbers<[1], [0], [0], [1], [0, 0, 1, 1], [], []>} : vector<8x64xf32>, vector<64x64xf32>, vector<8x64xf32> -> vector<8x64xf32>
    %406 = arith.addf %399, %405 : vector<8x64xf32>
    %c0_348 = arith.constant 0 : index
    %c0_349 = arith.constant 0 : index
    %407 = vector.load %arg24[%c0_348, %c0_349] : memref<1x64xf32, #tpu.memory_space<vmem>>, vector<1x64xf32>
    %408 = vector.broadcast %407 : vector<1x64xf32> to vector<8x64xf32>
    %409 = arith.addf %406, %408 : vector<8x64xf32>
    %cst_350 = arith.constant 0.000000e+00 : f32
    %410 = vector.broadcast %cst_350 : f32 to vector<8x64xf32>
    %411 = arith.maximumf %409, %410 : vector<8x64xf32>
    %c0_351 = arith.constant 0 : index
    %c0_352 = arith.constant 0 : index
    %c0_353 = arith.constant 0 : index
    %412 = vector.load %arg8[%c0_351, %c0_352, %c0_353] : memref<3x8x8xf32, #tpu.memory_space<vmem>>, vector<1x8x8xf32>
    %413 = vector.shape_cast %412 : vector<1x8x8xf32> to vector<8x8xf32>
    %cst_354 = arith.constant dense<0.000000e+00> : vector<8x64xf32>
    %414 = tpu.matmul %413, %411, %cst_354 {dimension_numbers = #tpu.dot_dimension_numbers<[1], [0], [0], [1], [0, 0, 1, 1], [], []>} : vector<8x8xf32>, vector<8x64xf32>, vector<8x64xf32> -> vector<8x64xf32>
    %c0_355 = arith.constant 0 : index
    %c0_356 = arith.constant 0 : index
    %c0_357 = arith.constant 0 : index
    %415 = vector.load %arg16[%c0_355, %c0_356, %c0_357] : memref<3x64x64xf32, #tpu.memory_space<vmem>>, vector<1x64x64xf32>
    %416 = vector.shape_cast %415 : vector<1x64x64xf32> to vector<64x64xf32>
    %cst_358 = arith.constant dense<0.000000e+00> : vector<8x64xf32>
    %417 = tpu.matmul %414, %416, %cst_358 {dimension_numbers = #tpu.dot_dimension_numbers<[1], [0], [0], [1], [0, 0, 1, 1], [], []>} : vector<8x64xf32>, vector<64x64xf32>, vector<8x64xf32> -> vector<8x64xf32>
    %c0_359 = arith.constant 0 : index
    %c0_360 = arith.constant 0 : index
    %c0_361 = arith.constant 0 : index
    %418 = vector.load %arg8[%c0_359, %c0_360, %c0_361] : memref<3x8x8xf32, #tpu.memory_space<vmem>>, vector<1x8x8xf32>
    %419 = vector.shape_cast %418 : vector<1x8x8xf32> to vector<8x8xf32>
    %cst_362 = arith.constant dense<0.000000e+00> : vector<8x64xf32>
    %420 = tpu.matmul %419, %76, %cst_362 {dimension_numbers = #tpu.dot_dimension_numbers<[1], [0], [0], [1], [0, 0, 1, 1], [], []>} : vector<8x8xf32>, vector<8x64xf32>, vector<8x64xf32> -> vector<8x64xf32>
    %c0_363 = arith.constant 0 : index
    %c0_364 = arith.constant 0 : index
    %c0_365 = arith.constant 0 : index
    %421 = vector.load %arg17[%c0_363, %c0_364, %c0_365] : memref<3x64x64xf32, #tpu.memory_space<vmem>>, vector<1x64x64xf32>
    %422 = vector.shape_cast %421 : vector<1x64x64xf32> to vector<64x64xf32>
    %cst_366 = arith.constant dense<0.000000e+00> : vector<8x64xf32>
    %423 = tpu.matmul %420, %422, %cst_366 {dimension_numbers = #tpu.dot_dimension_numbers<[1], [0], [0], [1], [0, 0, 1, 1], [], []>} : vector<8x64xf32>, vector<64x64xf32>, vector<8x64xf32> -> vector<8x64xf32>
    %424 = arith.addf %417, %423 : vector<8x64xf32>
    %c1_367 = arith.constant 1 : index
    %c0_368 = arith.constant 0 : index
    %c0_369 = arith.constant 0 : index
    %425 = vector.load %arg8[%c1_367, %c0_368, %c0_369] : memref<3x8x8xf32, #tpu.memory_space<vmem>>, vector<1x8x8xf32>
    %426 = vector.shape_cast %425 : vector<1x8x8xf32> to vector<8x8xf32>
    %cst_370 = arith.constant dense<0.000000e+00> : vector<8x64xf32>
    %427 = tpu.matmul %426, %411, %cst_370 {dimension_numbers = #tpu.dot_dimension_numbers<[1], [0], [0], [1], [0, 0, 1, 1], [], []>} : vector<8x8xf32>, vector<8x64xf32>, vector<8x64xf32> -> vector<8x64xf32>
    %c1_371 = arith.constant 1 : index
    %c0_372 = arith.constant 0 : index
    %c0_373 = arith.constant 0 : index
    %428 = vector.load %arg16[%c1_371, %c0_372, %c0_373] : memref<3x64x64xf32, #tpu.memory_space<vmem>>, vector<1x64x64xf32>
    %429 = vector.shape_cast %428 : vector<1x64x64xf32> to vector<64x64xf32>
    %cst_374 = arith.constant dense<0.000000e+00> : vector<8x64xf32>
    %430 = tpu.matmul %427, %429, %cst_374 {dimension_numbers = #tpu.dot_dimension_numbers<[1], [0], [0], [1], [0, 0, 1, 1], [], []>} : vector<8x64xf32>, vector<64x64xf32>, vector<8x64xf32> -> vector<8x64xf32>
    %c1_375 = arith.constant 1 : index
    %c0_376 = arith.constant 0 : index
    %c0_377 = arith.constant 0 : index
    %431 = vector.load %arg8[%c1_375, %c0_376, %c0_377] : memref<3x8x8xf32, #tpu.memory_space<vmem>>, vector<1x8x8xf32>
    %432 = vector.shape_cast %431 : vector<1x8x8xf32> to vector<8x8xf32>
    %cst_378 = arith.constant dense<0.000000e+00> : vector<8x64xf32>
    %433 = tpu.matmul %432, %76, %cst_378 {dimension_numbers = #tpu.dot_dimension_numbers<[1], [0], [0], [1], [0, 0, 1, 1], [], []>} : vector<8x8xf32>, vector<8x64xf32>, vector<8x64xf32> -> vector<8x64xf32>
    %c1_379 = arith.constant 1 : index
    %c0_380 = arith.constant 0 : index
    %c0_381 = arith.constant 0 : index
    %434 = vector.load %arg17[%c1_379, %c0_380, %c0_381] : memref<3x64x64xf32, #tpu.memory_space<vmem>>, vector<1x64x64xf32>
    %435 = vector.shape_cast %434 : vector<1x64x64xf32> to vector<64x64xf32>
    %cst_382 = arith.constant dense<0.000000e+00> : vector<8x64xf32>
    %436 = tpu.matmul %433, %435, %cst_382 {dimension_numbers = #tpu.dot_dimension_numbers<[1], [0], [0], [1], [0, 0, 1, 1], [], []>} : vector<8x64xf32>, vector<64x64xf32>, vector<8x64xf32> -> vector<8x64xf32>
    %437 = arith.addf %430, %436 : vector<8x64xf32>
    %438 = arith.addf %424, %437 : vector<8x64xf32>
    %c2_383 = arith.constant 2 : index
    %c0_384 = arith.constant 0 : index
    %c0_385 = arith.constant 0 : index
    %439 = vector.load %arg8[%c2_383, %c0_384, %c0_385] : memref<3x8x8xf32, #tpu.memory_space<vmem>>, vector<1x8x8xf32>
    %440 = vector.shape_cast %439 : vector<1x8x8xf32> to vector<8x8xf32>
    %cst_386 = arith.constant dense<0.000000e+00> : vector<8x64xf32>
    %441 = tpu.matmul %440, %411, %cst_386 {dimension_numbers = #tpu.dot_dimension_numbers<[1], [0], [0], [1], [0, 0, 1, 1], [], []>} : vector<8x8xf32>, vector<8x64xf32>, vector<8x64xf32> -> vector<8x64xf32>
    %c2_387 = arith.constant 2 : index
    %c0_388 = arith.constant 0 : index
    %c0_389 = arith.constant 0 : index
    %442 = vector.load %arg16[%c2_387, %c0_388, %c0_389] : memref<3x64x64xf32, #tpu.memory_space<vmem>>, vector<1x64x64xf32>
    %443 = vector.shape_cast %442 : vector<1x64x64xf32> to vector<64x64xf32>
    %cst_390 = arith.constant dense<0.000000e+00> : vector<8x64xf32>
    %444 = tpu.matmul %441, %443, %cst_390 {dimension_numbers = #tpu.dot_dimension_numbers<[1], [0], [0], [1], [0, 0, 1, 1], [], []>} : vector<8x64xf32>, vector<64x64xf32>, vector<8x64xf32> -> vector<8x64xf32>
    %c2_391 = arith.constant 2 : index
    %c0_392 = arith.constant 0 : index
    %c0_393 = arith.constant 0 : index
    %445 = vector.load %arg8[%c2_391, %c0_392, %c0_393] : memref<3x8x8xf32, #tpu.memory_space<vmem>>, vector<1x8x8xf32>
    %446 = vector.shape_cast %445 : vector<1x8x8xf32> to vector<8x8xf32>
    %cst_394 = arith.constant dense<0.000000e+00> : vector<8x64xf32>
    %447 = tpu.matmul %446, %76, %cst_394 {dimension_numbers = #tpu.dot_dimension_numbers<[1], [0], [0], [1], [0, 0, 1, 1], [], []>} : vector<8x8xf32>, vector<8x64xf32>, vector<8x64xf32> -> vector<8x64xf32>
    %c2_395 = arith.constant 2 : index
    %c0_396 = arith.constant 0 : index
    %c0_397 = arith.constant 0 : index
    %448 = vector.load %arg17[%c2_395, %c0_396, %c0_397] : memref<3x64x64xf32, #tpu.memory_space<vmem>>, vector<1x64x64xf32>
    %449 = vector.shape_cast %448 : vector<1x64x64xf32> to vector<64x64xf32>
    %cst_398 = arith.constant dense<0.000000e+00> : vector<8x64xf32>
    %450 = tpu.matmul %447, %449, %cst_398 {dimension_numbers = #tpu.dot_dimension_numbers<[1], [0], [0], [1], [0, 0, 1, 1], [], []>} : vector<8x64xf32>, vector<64x64xf32>, vector<8x64xf32> -> vector<8x64xf32>
    %451 = arith.addf %444, %450 : vector<8x64xf32>
    %452 = arith.addf %438, %451 : vector<8x64xf32>
    %c0_399 = arith.constant 0 : index
    %c0_400 = arith.constant 0 : index
    %453 = vector.load %arg18[%c0_399, %c0_400] : memref<1x64xf32, #tpu.memory_space<vmem>>, vector<1x64xf32>
    %454 = vector.broadcast %453 : vector<1x64xf32> to vector<8x64xf32>
    %455 = arith.addf %452, %454 : vector<8x64xf32>
    %cst_401 = arith.constant 0.000000e+00 : f32
    %456 = vector.broadcast %cst_401 : f32 to vector<8x64xf32>
    %457 = arith.maximumf %455, %456 : vector<8x64xf32>
    %c0_402 = arith.constant 0 : index
    %c0_403 = arith.constant 0 : index
    %c0_404 = arith.constant 0 : index
    %458 = vector.load %arg10[%c0_402, %c0_403, %c0_404] : memref<3x16x8xf32, #tpu.memory_space<vmem>>, vector<1x16x8xf32>
    %459 = vector.shape_cast %458 : vector<1x16x8xf32> to vector<16x8xf32>
    %cst_405 = arith.constant dense<0.000000e+00> : vector<16x64xf32>
    %460 = tpu.matmul %459, %457, %cst_405 {dimension_numbers = #tpu.dot_dimension_numbers<[1], [0], [0], [1], [0, 0, 1, 1], [], []>} : vector<16x8xf32>, vector<8x64xf32>, vector<16x64xf32> -> vector<16x64xf32>
    %c0_406 = arith.constant 0 : index
    %c0_407 = arith.constant 0 : index
    %c0_408 = arith.constant 0 : index
    %461 = vector.load %arg21[%c0_406, %c0_407, %c0_408] : memref<3x64x64xf32, #tpu.memory_space<vmem>>, vector<1x64x64xf32>
    %462 = vector.shape_cast %461 : vector<1x64x64xf32> to vector<64x64xf32>
    %cst_409 = arith.constant dense<0.000000e+00> : vector<16x64xf32>
    %463 = tpu.matmul %460, %462, %cst_409 {dimension_numbers = #tpu.dot_dimension_numbers<[1], [0], [0], [1], [0, 0, 1, 1], [], []>} : vector<16x64xf32>, vector<64x64xf32>, vector<16x64xf32> -> vector<16x64xf32>
    %c1_410 = arith.constant 1 : index
    %c0_411 = arith.constant 0 : index
    %c0_412 = arith.constant 0 : index
    %464 = vector.load %arg10[%c1_410, %c0_411, %c0_412] : memref<3x16x8xf32, #tpu.memory_space<vmem>>, vector<1x16x8xf32>
    %465 = vector.shape_cast %464 : vector<1x16x8xf32> to vector<16x8xf32>
    %cst_413 = arith.constant dense<0.000000e+00> : vector<16x64xf32>
    %466 = tpu.matmul %465, %457, %cst_413 {dimension_numbers = #tpu.dot_dimension_numbers<[1], [0], [0], [1], [0, 0, 1, 1], [], []>} : vector<16x8xf32>, vector<8x64xf32>, vector<16x64xf32> -> vector<16x64xf32>
    %c1_414 = arith.constant 1 : index
    %c0_415 = arith.constant 0 : index
    %c0_416 = arith.constant 0 : index
    %467 = vector.load %arg21[%c1_414, %c0_415, %c0_416] : memref<3x64x64xf32, #tpu.memory_space<vmem>>, vector<1x64x64xf32>
    %468 = vector.shape_cast %467 : vector<1x64x64xf32> to vector<64x64xf32>
    %cst_417 = arith.constant dense<0.000000e+00> : vector<16x64xf32>
    %469 = tpu.matmul %466, %468, %cst_417 {dimension_numbers = #tpu.dot_dimension_numbers<[1], [0], [0], [1], [0, 0, 1, 1], [], []>} : vector<16x64xf32>, vector<64x64xf32>, vector<16x64xf32> -> vector<16x64xf32>
    %470 = arith.addf %463, %469 : vector<16x64xf32>
    %c2_418 = arith.constant 2 : index
    %c0_419 = arith.constant 0 : index
    %c0_420 = arith.constant 0 : index
    %471 = vector.load %arg10[%c2_418, %c0_419, %c0_420] : memref<3x16x8xf32, #tpu.memory_space<vmem>>, vector<1x16x8xf32>
    %472 = vector.shape_cast %471 : vector<1x16x8xf32> to vector<16x8xf32>
    %cst_421 = arith.constant dense<0.000000e+00> : vector<16x64xf32>
    %473 = tpu.matmul %472, %457, %cst_421 {dimension_numbers = #tpu.dot_dimension_numbers<[1], [0], [0], [1], [0, 0, 1, 1], [], []>} : vector<16x8xf32>, vector<8x64xf32>, vector<16x64xf32> -> vector<16x64xf32>
    %c2_422 = arith.constant 2 : index
    %c0_423 = arith.constant 0 : index
    %c0_424 = arith.constant 0 : index
    %474 = vector.load %arg21[%c2_422, %c0_423, %c0_424] : memref<3x64x64xf32, #tpu.memory_space<vmem>>, vector<1x64x64xf32>
    %475 = vector.shape_cast %474 : vector<1x64x64xf32> to vector<64x64xf32>
    %cst_425 = arith.constant dense<0.000000e+00> : vector<16x64xf32>
    %476 = tpu.matmul %473, %475, %cst_425 {dimension_numbers = #tpu.dot_dimension_numbers<[1], [0], [0], [1], [0, 0, 1, 1], [], []>} : vector<16x64xf32>, vector<64x64xf32>, vector<16x64xf32> -> vector<16x64xf32>
    %477 = arith.addf %470, %476 : vector<16x64xf32>
    %c0_426 = arith.constant 0 : index
    %c0_427 = arith.constant 0 : index
    %478 = vector.load %arg22[%c0_426, %c0_427] : memref<1x64xf32, #tpu.memory_space<vmem>>, vector<1x64xf32>
    %479 = vector.broadcast %478 : vector<1x64xf32> to vector<16x64xf32>
    %480 = arith.addf %477, %479 : vector<16x64xf32>
    %cst_428 = arith.constant 0.000000e+00 : f32
    %481 = vector.broadcast %cst_428 : f32 to vector<16x64xf32>
    %482 = arith.maximumf %480, %481 : vector<16x64xf32>
    %c0_429 = arith.constant 0 : index
    %c0_430 = arith.constant 0 : index
    %c0_431 = arith.constant 0 : index
    %483 = vector.load %arg6[%c0_429, %c0_430, %c0_431] : memref<3x16x16xf32, #tpu.memory_space<vmem>>, vector<1x16x16xf32>
    %484 = vector.shape_cast %483 : vector<1x16x16xf32> to vector<16x16xf32>
    %cst_432 = arith.constant dense<0.000000e+00> : vector<16x64xf32>
    %485 = tpu.matmul %484, %482, %cst_432 {dimension_numbers = #tpu.dot_dimension_numbers<[1], [0], [0], [1], [0, 0, 1, 1], [], []>} : vector<16x16xf32>, vector<16x64xf32>, vector<16x64xf32> -> vector<16x64xf32>
    %c0_433 = arith.constant 0 : index
    %c0_434 = arith.constant 0 : index
    %c0_435 = arith.constant 0 : index
    %486 = vector.load %arg13[%c0_433, %c0_434, %c0_435] : memref<3x64x64xf32, #tpu.memory_space<vmem>>, vector<1x64x64xf32>
    %487 = vector.shape_cast %486 : vector<1x64x64xf32> to vector<64x64xf32>
    %cst_436 = arith.constant dense<0.000000e+00> : vector<16x64xf32>
    %488 = tpu.matmul %485, %487, %cst_436 {dimension_numbers = #tpu.dot_dimension_numbers<[1], [0], [0], [1], [0, 0, 1, 1], [], []>} : vector<16x64xf32>, vector<64x64xf32>, vector<16x64xf32> -> vector<16x64xf32>
    %c0_437 = arith.constant 0 : index
    %c0_438 = arith.constant 0 : index
    %c0_439 = arith.constant 0 : index
    %489 = vector.load %arg6[%c0_437, %c0_438, %c0_439] : memref<3x16x16xf32, #tpu.memory_space<vmem>>, vector<1x16x16xf32>
    %490 = vector.shape_cast %489 : vector<1x16x16xf32> to vector<16x16xf32>
    %cst_440 = arith.constant dense<0.000000e+00> : vector<16x64xf32>
    %491 = tpu.matmul %490, %26, %cst_440 {dimension_numbers = #tpu.dot_dimension_numbers<[1], [0], [0], [1], [0, 0, 1, 1], [], []>} : vector<16x16xf32>, vector<16x64xf32>, vector<16x64xf32> -> vector<16x64xf32>
    %c0_441 = arith.constant 0 : index
    %c0_442 = arith.constant 0 : index
    %c0_443 = arith.constant 0 : index
    %492 = vector.load %arg14[%c0_441, %c0_442, %c0_443] : memref<3x64x64xf32, #tpu.memory_space<vmem>>, vector<1x64x64xf32>
    %493 = vector.shape_cast %492 : vector<1x64x64xf32> to vector<64x64xf32>
    %cst_444 = arith.constant dense<0.000000e+00> : vector<16x64xf32>
    %494 = tpu.matmul %491, %493, %cst_444 {dimension_numbers = #tpu.dot_dimension_numbers<[1], [0], [0], [1], [0, 0, 1, 1], [], []>} : vector<16x64xf32>, vector<64x64xf32>, vector<16x64xf32> -> vector<16x64xf32>
    %495 = arith.addf %488, %494 : vector<16x64xf32>
    %c1_445 = arith.constant 1 : index
    %c0_446 = arith.constant 0 : index
    %c0_447 = arith.constant 0 : index
    %496 = vector.load %arg6[%c1_445, %c0_446, %c0_447] : memref<3x16x16xf32, #tpu.memory_space<vmem>>, vector<1x16x16xf32>
    %497 = vector.shape_cast %496 : vector<1x16x16xf32> to vector<16x16xf32>
    %cst_448 = arith.constant dense<0.000000e+00> : vector<16x64xf32>
    %498 = tpu.matmul %497, %482, %cst_448 {dimension_numbers = #tpu.dot_dimension_numbers<[1], [0], [0], [1], [0, 0, 1, 1], [], []>} : vector<16x16xf32>, vector<16x64xf32>, vector<16x64xf32> -> vector<16x64xf32>
    %c1_449 = arith.constant 1 : index
    %c0_450 = arith.constant 0 : index
    %c0_451 = arith.constant 0 : index
    %499 = vector.load %arg13[%c1_449, %c0_450, %c0_451] : memref<3x64x64xf32, #tpu.memory_space<vmem>>, vector<1x64x64xf32>
    %500 = vector.shape_cast %499 : vector<1x64x64xf32> to vector<64x64xf32>
    %cst_452 = arith.constant dense<0.000000e+00> : vector<16x64xf32>
    %501 = tpu.matmul %498, %500, %cst_452 {dimension_numbers = #tpu.dot_dimension_numbers<[1], [0], [0], [1], [0, 0, 1, 1], [], []>} : vector<16x64xf32>, vector<64x64xf32>, vector<16x64xf32> -> vector<16x64xf32>
    %c1_453 = arith.constant 1 : index
    %c0_454 = arith.constant 0 : index
    %c0_455 = arith.constant 0 : index
    %502 = vector.load %arg6[%c1_453, %c0_454, %c0_455] : memref<3x16x16xf32, #tpu.memory_space<vmem>>, vector<1x16x16xf32>
    %503 = vector.shape_cast %502 : vector<1x16x16xf32> to vector<16x16xf32>
    %cst_456 = arith.constant dense<0.000000e+00> : vector<16x64xf32>
    %504 = tpu.matmul %503, %26, %cst_456 {dimension_numbers = #tpu.dot_dimension_numbers<[1], [0], [0], [1], [0, 0, 1, 1], [], []>} : vector<16x16xf32>, vector<16x64xf32>, vector<16x64xf32> -> vector<16x64xf32>
    %c1_457 = arith.constant 1 : index
    %c0_458 = arith.constant 0 : index
    %c0_459 = arith.constant 0 : index
    %505 = vector.load %arg14[%c1_457, %c0_458, %c0_459] : memref<3x64x64xf32, #tpu.memory_space<vmem>>, vector<1x64x64xf32>
    %506 = vector.shape_cast %505 : vector<1x64x64xf32> to vector<64x64xf32>
    %cst_460 = arith.constant dense<0.000000e+00> : vector<16x64xf32>
    %507 = tpu.matmul %504, %506, %cst_460 {dimension_numbers = #tpu.dot_dimension_numbers<[1], [0], [0], [1], [0, 0, 1, 1], [], []>} : vector<16x64xf32>, vector<64x64xf32>, vector<16x64xf32> -> vector<16x64xf32>
    %508 = arith.addf %501, %507 : vector<16x64xf32>
    %509 = arith.addf %495, %508 : vector<16x64xf32>
    %c2_461 = arith.constant 2 : index
    %c0_462 = arith.constant 0 : index
    %c0_463 = arith.constant 0 : index
    %510 = vector.load %arg6[%c2_461, %c0_462, %c0_463] : memref<3x16x16xf32, #tpu.memory_space<vmem>>, vector<1x16x16xf32>
    %511 = vector.shape_cast %510 : vector<1x16x16xf32> to vector<16x16xf32>
    %cst_464 = arith.constant dense<0.000000e+00> : vector<16x64xf32>
    %512 = tpu.matmul %511, %482, %cst_464 {dimension_numbers = #tpu.dot_dimension_numbers<[1], [0], [0], [1], [0, 0, 1, 1], [], []>} : vector<16x16xf32>, vector<16x64xf32>, vector<16x64xf32> -> vector<16x64xf32>
    %c2_465 = arith.constant 2 : index
    %c0_466 = arith.constant 0 : index
    %c0_467 = arith.constant 0 : index
    %513 = vector.load %arg13[%c2_465, %c0_466, %c0_467] : memref<3x64x64xf32, #tpu.memory_space<vmem>>, vector<1x64x64xf32>
    %514 = vector.shape_cast %513 : vector<1x64x64xf32> to vector<64x64xf32>
    %cst_468 = arith.constant dense<0.000000e+00> : vector<16x64xf32>
    %515 = tpu.matmul %512, %514, %cst_468 {dimension_numbers = #tpu.dot_dimension_numbers<[1], [0], [0], [1], [0, 0, 1, 1], [], []>} : vector<16x64xf32>, vector<64x64xf32>, vector<16x64xf32> -> vector<16x64xf32>
    %c2_469 = arith.constant 2 : index
    %c0_470 = arith.constant 0 : index
    %c0_471 = arith.constant 0 : index
    %516 = vector.load %arg6[%c2_469, %c0_470, %c0_471] : memref<3x16x16xf32, #tpu.memory_space<vmem>>, vector<1x16x16xf32>
    %517 = vector.shape_cast %516 : vector<1x16x16xf32> to vector<16x16xf32>
    %cst_472 = arith.constant dense<0.000000e+00> : vector<16x64xf32>
    %518 = tpu.matmul %517, %26, %cst_472 {dimension_numbers = #tpu.dot_dimension_numbers<[1], [0], [0], [1], [0, 0, 1, 1], [], []>} : vector<16x16xf32>, vector<16x64xf32>, vector<16x64xf32> -> vector<16x64xf32>
    %c2_473 = arith.constant 2 : index
    %c0_474 = arith.constant 0 : index
    %c0_475 = arith.constant 0 : index
    %519 = vector.load %arg14[%c2_473, %c0_474, %c0_475] : memref<3x64x64xf32, #tpu.memory_space<vmem>>, vector<1x64x64xf32>
    %520 = vector.shape_cast %519 : vector<1x64x64xf32> to vector<64x64xf32>
    %cst_476 = arith.constant dense<0.000000e+00> : vector<16x64xf32>
    %521 = tpu.matmul %518, %520, %cst_476 {dimension_numbers = #tpu.dot_dimension_numbers<[1], [0], [0], [1], [0, 0, 1, 1], [], []>} : vector<16x64xf32>, vector<64x64xf32>, vector<16x64xf32> -> vector<16x64xf32>
    %522 = arith.addf %515, %521 : vector<16x64xf32>
    %523 = arith.addf %509, %522 : vector<16x64xf32>
    %c0_477 = arith.constant 0 : index
    %c0_478 = arith.constant 0 : index
    %524 = vector.load %arg15[%c0_477, %c0_478] : memref<1x64xf32, #tpu.memory_space<vmem>>, vector<1x64xf32>
    %525 = vector.broadcast %524 : vector<1x64xf32> to vector<16x64xf32>
    %526 = arith.addf %523, %525 : vector<16x64xf32>
    %cst_479 = arith.constant 0.000000e+00 : f32
    %527 = vector.broadcast %cst_479 : f32 to vector<16x64xf32>
    %528 = arith.maximumf %526, %527 : vector<16x64xf32>
    %c0_480 = arith.constant 0 : index
    %c0_481 = arith.constant 0 : index
    %c0_482 = arith.constant 0 : index
    %529 = vector.load %arg6[%c0_480, %c0_481, %c0_482] : memref<3x16x16xf32, #tpu.memory_space<vmem>>, vector<1x16x16xf32>
    %530 = vector.shape_cast %529 : vector<1x16x16xf32> to vector<16x16xf32>
    %cst_483 = arith.constant dense<0.000000e+00> : vector<16x64xf32>
    %531 = tpu.matmul %530, %528, %cst_483 {dimension_numbers = #tpu.dot_dimension_numbers<[1], [0], [0], [1], [0, 0, 1, 1], [], []>} : vector<16x16xf32>, vector<16x64xf32>, vector<16x64xf32> -> vector<16x64xf32>
    %c0_484 = arith.constant 0 : index
    %c0_485 = arith.constant 0 : index
    %c0_486 = arith.constant 0 : index
    %532 = vector.load %arg19[%c0_484, %c0_485, %c0_486] : memref<3x64x48xf32, #tpu.memory_space<vmem>>, vector<1x64x48xf32>
    %533 = vector.shape_cast %532 : vector<1x64x48xf32> to vector<64x48xf32>
    %cst_487 = arith.constant dense<0.000000e+00> : vector<16x48xf32>
    %534 = tpu.matmul %531, %533, %cst_487 {dimension_numbers = #tpu.dot_dimension_numbers<[1], [0], [0], [1], [0, 0, 1, 1], [], []>} : vector<16x64xf32>, vector<64x48xf32>, vector<16x48xf32> -> vector<16x48xf32>
    %c1_488 = arith.constant 1 : index
    %c0_489 = arith.constant 0 : index
    %c0_490 = arith.constant 0 : index
    %535 = vector.load %arg6[%c1_488, %c0_489, %c0_490] : memref<3x16x16xf32, #tpu.memory_space<vmem>>, vector<1x16x16xf32>
    %536 = vector.shape_cast %535 : vector<1x16x16xf32> to vector<16x16xf32>
    %cst_491 = arith.constant dense<0.000000e+00> : vector<16x64xf32>
    %537 = tpu.matmul %536, %528, %cst_491 {dimension_numbers = #tpu.dot_dimension_numbers<[1], [0], [0], [1], [0, 0, 1, 1], [], []>} : vector<16x16xf32>, vector<16x64xf32>, vector<16x64xf32> -> vector<16x64xf32>
    %c1_492 = arith.constant 1 : index
    %c0_493 = arith.constant 0 : index
    %c0_494 = arith.constant 0 : index
    %538 = vector.load %arg19[%c1_492, %c0_493, %c0_494] : memref<3x64x48xf32, #tpu.memory_space<vmem>>, vector<1x64x48xf32>
    %539 = vector.shape_cast %538 : vector<1x64x48xf32> to vector<64x48xf32>
    %cst_495 = arith.constant dense<0.000000e+00> : vector<16x48xf32>
    %540 = tpu.matmul %537, %539, %cst_495 {dimension_numbers = #tpu.dot_dimension_numbers<[1], [0], [0], [1], [0, 0, 1, 1], [], []>} : vector<16x64xf32>, vector<64x48xf32>, vector<16x48xf32> -> vector<16x48xf32>
    %541 = arith.addf %534, %540 : vector<16x48xf32>
    %c2_496 = arith.constant 2 : index
    %c0_497 = arith.constant 0 : index
    %c0_498 = arith.constant 0 : index
    %542 = vector.load %arg6[%c2_496, %c0_497, %c0_498] : memref<3x16x16xf32, #tpu.memory_space<vmem>>, vector<1x16x16xf32>
    %543 = vector.shape_cast %542 : vector<1x16x16xf32> to vector<16x16xf32>
    %cst_499 = arith.constant dense<0.000000e+00> : vector<16x64xf32>
    %544 = tpu.matmul %543, %528, %cst_499 {dimension_numbers = #tpu.dot_dimension_numbers<[1], [0], [0], [1], [0, 0, 1, 1], [], []>} : vector<16x16xf32>, vector<16x64xf32>, vector<16x64xf32> -> vector<16x64xf32>
    %c2_500 = arith.constant 2 : index
    %c0_501 = arith.constant 0 : index
    %c0_502 = arith.constant 0 : index
    %545 = vector.load %arg19[%c2_500, %c0_501, %c0_502] : memref<3x64x48xf32, #tpu.memory_space<vmem>>, vector<1x64x48xf32>
    %546 = vector.shape_cast %545 : vector<1x64x48xf32> to vector<64x48xf32>
    %cst_503 = arith.constant dense<0.000000e+00> : vector<16x48xf32>
    %547 = tpu.matmul %544, %546, %cst_503 {dimension_numbers = #tpu.dot_dimension_numbers<[1], [0], [0], [1], [0, 0, 1, 1], [], []>} : vector<16x64xf32>, vector<64x48xf32>, vector<16x48xf32> -> vector<16x48xf32>
    %548 = arith.addf %541, %547 : vector<16x48xf32>
    %c0_504 = arith.constant 0 : index
    %c0_505 = arith.constant 0 : index
    %549 = vector.load %arg20[%c0_504, %c0_505] : memref<1x48xf32, #tpu.memory_space<vmem>>, vector<1x48xf32>
    %550 = vector.broadcast %549 : vector<1x48xf32> to vector<16x48xf32>
    %551 = arith.addf %548, %550 : vector<16x48xf32>
    %c0_506 = arith.constant 0 : index
    %c0_507 = arith.constant 0 : index
    %c0_508 = arith.constant 0 : index
    %552 = vector.load %arg57[%c0_506, %c0_507, %c0_508] : memref<1x16x48xf32, #tpu.memory_space<vmem>>, vector<1x16x48xf32>
    %553 = vector.shape_cast %552 : vector<1x16x48xf32> to vector<16x48xf32>
    %554 = vector.shape_cast %551 : vector<16x48xf32> to vector<1x16x48xf32>
    tpu.vector_store %arg57[%c0_506, %c0_507, %c0_508], %554 {strides = array<i32>} : memref<1x16x48xf32, #tpu.memory_space<vmem>>, vector<1x16x48xf32>,
    return
  }
  func.func @transform_0(%arg0: i32) -> (i32, i32, i32) {
    %c0_i32 = arith.constant 0 : i32
    %c0_i32_0 = arith.constant 0 : i32
    %c0_i32_1 = arith.constant 0 : i32
    return %arg0, %c0_i32, %c0_i32_0 : i32, i32, i32
  }
  func.func @transform_1(%arg0: i32) -> (i32, i32, i32) {
    %c0_i32 = arith.constant 0 : i32
    %c0_i32_0 = arith.constant 0 : i32
    %c0_i32_1 = arith.constant 0 : i32
    %c0_i32_2 = arith.constant 0 : i32
    return %c0_i32, %c0_i32_0, %c0_i32_1 : i32, i32, i32
  }
  func.func @transform_2(%arg0: i32) -> (i32, i32, i32) {
    %c0_i32 = arith.constant 0 : i32
    %c0_i32_0 = arith.constant 0 : i32
    %c0_i32_1 = arith.constant 0 : i32
    %c0_i32_2 = arith.constant 0 : i32
    return %c0_i32, %c0_i32_0, %c0_i32_1 : i32, i32, i32
  }
  func.func @transform_3(%arg0: i32) -> (i32, i32, i32) {
    %c0_i32 = arith.constant 0 : i32
    %c0_i32_0 = arith.constant 0 : i32
    %c0_i32_1 = arith.constant 0 : i32
    %c0_i32_2 = arith.constant 0 : i32
    return %c0_i32, %c0_i32_0, %c0_i32_1 : i32, i32, i32
  }
  func.func @transform_4(%arg0: i32) -> (i32, i32, i32) {
    %c0_i32 = arith.constant 0 : i32
    %c0_i32_0 = arith.constant 0 : i32
    %c0_i32_1 = arith.constant 0 : i32
    %c0_i32_2 = arith.constant 0 : i32
    return %c0_i32, %c0_i32_0, %c0_i32_1 : i32, i32, i32
  }
  func.func @transform_5(%arg0: i32) -> (i32, i32, i32) {
    %c0_i32 = arith.constant 0 : i32
    %c0_i32_0 = arith.constant 0 : i32
    %c0_i32_1 = arith.constant 0 : i32
    %c0_i32_2 = arith.constant 0 : i32
    return %c0_i32, %c0_i32_0, %c0_i32_1 : i32, i32, i32
  }
  func.func @transform_6(%arg0: i32) -> (i32, i32, i32) {
    %c0_i32 = arith.constant 0 : i32
    %c0_i32_0 = arith.constant 0 : i32
    %c0_i32_1 = arith.constant 0 : i32
    %c0_i32_2 = arith.constant 0 : i32
    return %c0_i32, %c0_i32_0, %c0_i32_1 : i32, i32, i32
  }
  func.func @transform_7(%arg0: i32) -> (i32, i32, i32) {
    %c0_i32 = arith.constant 0 : i32
    %c0_i32_0 = arith.constant 0 : i32
    %c0_i32_1 = arith.constant 0 : i32
    %c0_i32_2 = arith.constant 0 : i32
    return %c0_i32, %c0_i32_0, %c0_i32_1 : i32, i32, i32
  }
  func.func @transform_8(%arg0: i32) -> (i32, i32, i32) {
    %c0_i32 = arith.constant 0 : i32
    %c0_i32_0 = arith.constant 0 : i32
    %c0_i32_1 = arith.constant 0 : i32
    %c0_i32_2 = arith.constant 0 : i32
    return %c0_i32, %c0_i32_0, %c0_i32_1 : i32, i32, i32
  }
  func.func @transform_9(%arg0: i32) -> (i32, i32, i32) {
    %c0_i32 = arith.constant 0 : i32
    %c0_i32_0 = arith.constant 0 : i32
    %c0_i32_1 = arith.constant 0 : i32
    %c0_i32_2 = arith.constant 0 : i32
    return %c0_i32, %c0_i32_0, %c0_i32_1 : i32, i32, i32
  }
  func.func @transform_10(%arg0: i32) -> (i32, i32, i32) {
    %c0_i32 = arith.constant 0 : i32
    %c0_i32_0 = arith.constant 0 : i32
    %c0_i32_1 = arith.constant 0 : i32
    %c0_i32_2 = arith.constant 0 : i32
    return %c0_i32, %c0_i32_0, %c0_i32_1 : i32, i32, i32
  }
  func.func @transform_11(%arg0: i32) -> (i32, i32) {
    %c0_i32 = arith.constant 0 : i32
    %c0_i32_0 = arith.constant 0 : i32
    %c0_i32_1 = arith.constant 0 : i32
    return %c0_i32, %c0_i32_0 : i32, i32
  }
  func.func @transform_12(%arg0: i32) -> (i32, i32, i32) {
    %c0_i32 = arith.constant 0 : i32
    %c0_i32_0 = arith.constant 0 : i32
    %c0_i32_1 = arith.constant 0 : i32
    %c0_i32_2 = arith.constant 0 : i32
    return %c0_i32, %c0_i32_0, %c0_i32_1 : i32, i32, i32
  }
  func.func @transform_13(%arg0: i32) -> (i32, i32, i32) {
    %c0_i32 = arith.constant 0 : i32
    %c0_i32_0 = arith.constant 0 : i32
    %c0_i32_1 = arith.constant 0 : i32
    %c0_i32_2 = arith.constant 0 : i32
    return %c0_i32, %c0_i32_0, %c0_i32_1 : i32, i32, i32
  }
  func.func @transform_14(%arg0: i32) -> (i32, i32) {
    %c0_i32 = arith.constant 0 : i32
    %c0_i32_0 = arith.constant 0 : i32
    %c0_i32_1 = arith.constant 0 : i32
    return %c0_i32, %c0_i32_0 : i32, i32
  }
  func.func @transform_15(%arg0: i32) -> (i32, i32, i32) {
    %c0_i32 = arith.constant 0 : i32
    %c0_i32_0 = arith.constant 0 : i32
    %c0_i32_1 = arith.constant 0 : i32
    %c0_i32_2 = arith.constant 0 : i32
    return %c0_i32, %c0_i32_0, %c0_i32_1 : i32, i32, i32
  }
  func.func @transform_16(%arg0: i32) -> (i32, i32, i32) {
    %c0_i32 = arith.constant 0 : i32
    %c0_i32_0 = arith.constant 0 : i32
    %c0_i32_1 = arith.constant 0 : i32
    %c0_i32_2 = arith.constant 0 : i32
    return %c0_i32, %c0_i32_0, %c0_i32_1 : i32, i32, i32
  }
  func.func @transform_17(%arg0: i32) -> (i32, i32) {
    %c0_i32 = arith.constant 0 : i32
    %c0_i32_0 = arith.constant 0 : i32
    %c0_i32_1 = arith.constant 0 : i32
    return %c0_i32, %c0_i32_0 : i32, i32
  }
  func.func @transform_18(%arg0: i32) -> (i32, i32, i32) {
    %c0_i32 = arith.constant 0 : i32
    %c0_i32_0 = arith.constant 0 : i32
    %c0_i32_1 = arith.constant 0 : i32
    %c0_i32_2 = arith.constant 0 : i32
    return %c0_i32, %c0_i32_0, %c0_i32_1 : i32, i32, i32
  }
  func.func @transform_19(%arg0: i32) -> (i32, i32) {
    %c0_i32 = arith.constant 0 : i32
    %c0_i32_0 = arith.constant 0 : i32
    %c0_i32_1 = arith.constant 0 : i32
    return %c0_i32, %c0_i32_0 : i32, i32
  }
  func.func @transform_20(%arg0: i32) -> (i32, i32, i32) {
    %c0_i32 = arith.constant 0 : i32
    %c0_i32_0 = arith.constant 0 : i32
    %c0_i32_1 = arith.constant 0 : i32
    %c0_i32_2 = arith.constant 0 : i32
    return %c0_i32, %c0_i32_0, %c0_i32_1 : i32, i32, i32
  }
  func.func @transform_21(%arg0: i32) -> (i32, i32) {
    %c0_i32 = arith.constant 0 : i32
    %c0_i32_0 = arith.constant 0 : i32
    %c0_i32_1 = arith.constant 0 : i32
    return %c0_i32, %c0_i32_0 : i32, i32
  }
  func.func @transform_22(%arg0: i32) -> (i32, i32, i32) {
    %c0_i32 = arith.constant 0 : i32
    %c0_i32_0 = arith.constant 0 : i32
    %c0_i32_1 = arith.constant 0 : i32
    %c0_i32_2 = arith.constant 0 : i32
    return %c0_i32, %c0_i32_0, %c0_i32_1 : i32, i32, i32
  }
  func.func @transform_23(%arg0: i32) -> (i32, i32) {
    %c0_i32 = arith.constant 0 : i32
    %c0_i32_0 = arith.constant 0 : i32
    %c0_i32_1 = arith.constant 0 : i32
    return %c0_i32, %c0_i32_0 : i32, i32
  }
  func.func @transform_24(%arg0: i32) -> (i32, i32, i32) {
    %c0_i32 = arith.constant 0 : i32
    %c0_i32_0 = arith.constant 0 : i32
    %c0_i32_1 = arith.constant 0 : i32
    %c0_i32_2 = arith.constant 0 : i32
    return %c0_i32, %c0_i32_0, %c0_i32_1 : i32, i32, i32
  }
  func.func @transform_25(%arg0: i32) -> (i32, i32) {
    %c0_i32 = arith.constant 0 : i32
    %c0_i32_0 = arith.constant 0 : i32
    %c0_i32_1 = arith.constant 0 : i32
    return %c0_i32, %c0_i32_0 : i32, i32
  }
  func.func @transform_26(%arg0: i32) -> (i32, i32, i32) {
    %c0_i32 = arith.constant 0 : i32
    %c0_i32_0 = arith.constant 0 : i32
    %c0_i32_1 = arith.constant 0 : i32
    %c0_i32_2 = arith.constant 0 : i32
    return %c0_i32, %c0_i32_0, %c0_i32_1 : i32, i32, i32
  }
  func.func @transform_27(%arg0: i32) -> (i32, i32) {
    %c0_i32 = arith.constant 0 : i32
    %c0_i32_0 = arith.constant 0 : i32
    %c0_i32_1 = arith.constant 0 : i32
    return %c0_i32, %c0_i32_0 : i32, i32
  }
  func.func @transform_28(%arg0: i32) -> (i32, i32, i32) {
    %c0_i32 = arith.constant 0 : i32
    %c0_i32_0 = arith.constant 0 : i32
    %c0_i32_1 = arith.constant 0 : i32
    %c0_i32_2 = arith.constant 0 : i32
    return %c0_i32, %c0_i32_0, %c0_i32_1 : i32, i32, i32
  }
  func.func @transform_29(%arg0: i32) -> (i32, i32) {
    %c0_i32 = arith.constant 0 : i32
    %c0_i32_0 = arith.constant 0 : i32
    %c0_i32_1 = arith.constant 0 : i32
    return %c0_i32, %c0_i32_0 : i32, i32
  }
  func.func @transform_30(%arg0: i32) -> (i32, i32, i32) {
    %c0_i32 = arith.constant 0 : i32
    %c0_i32_0 = arith.constant 0 : i32
    %c0_i32_1 = arith.constant 0 : i32
    %c0_i32_2 = arith.constant 0 : i32
    return %c0_i32, %c0_i32_0, %c0_i32_1 : i32, i32, i32
  }
  func.func @transform_31(%arg0: i32) -> (i32, i32) {
    %c0_i32 = arith.constant 0 : i32
    %c0_i32_0 = arith.constant 0 : i32
    %c0_i32_1 = arith.constant 0 : i32
    return %c0_i32, %c0_i32_0 : i32, i32
  }
  func.func @transform_32(%arg0: i32) -> (i32, i32, i32) {
    %c0_i32 = arith.constant 0 : i32
    %c0_i32_0 = arith.constant 0 : i32
    %c0_i32_1 = arith.constant 0 : i32
    %c0_i32_2 = arith.constant 0 : i32
    return %c0_i32, %c0_i32_0, %c0_i32_1 : i32, i32, i32
  }
  func.func @transform_33(%arg0: i32) -> (i32, i32) {
    %c0_i32 = arith.constant 0 : i32
    %c0_i32_0 = arith.constant 0 : i32
    %c0_i32_1 = arith.constant 0 : i32
    return %c0_i32, %c0_i32_0 : i32, i32
  }
  func.func @transform_34(%arg0: i32) -> (i32, i32) {
    %c0_i32 = arith.constant 0 : i32
    %c0_i32_0 = arith.constant 0 : i32
    %c0_i32_1 = arith.constant 0 : i32
    return %c0_i32, %c0_i32_0 : i32, i32
  }
  func.func @transform_35(%arg0: i32) -> (i32, i32) {
    %c0_i32 = arith.constant 0 : i32
    %c0_i32_0 = arith.constant 0 : i32
    %c0_i32_1 = arith.constant 0 : i32
    return %c0_i32, %c0_i32_0 : i32, i32
  }
  func.func @transform_36(%arg0: i32) -> (i32, i32) {
    %c0_i32 = arith.constant 0 : i32
    %c0_i32_0 = arith.constant 0 : i32
    %c0_i32_1 = arith.constant 0 : i32
    return %c0_i32, %c0_i32_0 : i32, i32
  }
  func.func @transform_37(%arg0: i32) -> (i32, i32) {
    %c0_i32 = arith.constant 0 : i32
    %c0_i32_0 = arith.constant 0 : i32
    %c0_i32_1 = arith.constant 0 : i32
    return %c0_i32, %c0_i32_0 : i32, i32
  }
  func.func @transform_38(%arg0: i32) -> (i32, i32) {
    %c0_i32 = arith.constant 0 : i32
    %c0_i32_0 = arith.constant 0 : i32
    %c0_i32_1 = arith.constant 0 : i32
    return %c0_i32, %c0_i32_0 : i32, i32
  }
  func.func @transform_39(%arg0: i32) -> (i32, i32) {
    %c0_i32 = arith.constant 0 : i32
    %c0_i32_0 = arith.constant 0 : i32
    %c0_i32_1 = arith.constant 0 : i32
    return %c0_i32, %c0_i32_0 : i32, i32
  }
  func.func @transform_40(%arg0: i32) -> (i32, i32) {
    %c0_i32 = arith.constant 0 : i32
    %c0_i32_0 = arith.constant 0 : i32
    %c0_i32_1 = arith.constant 0 : i32
    return %c0_i32, %c0_i32_0 : i32, i32
  }
  func.func @transform_41(%arg0: i32) -> (i32, i32) {
    %c0_i32 = arith.constant 0 : i32
    %c0_i32_0 = arith.constant 0 : i32
    %c0_i32_1 = arith.constant 0 : i32
    return %c0_i32, %c0_i32_0 : i32, i32
  }
  func.func @transform_42(%arg0: i32) -> (i32, i32, i32) {
    %c0_i32 = arith.constant 0 : i32
    %c0_i32_0 = arith.constant 0 : i32
    %c0_i32_1 = arith.constant 0 : i32
    %c0_i32_2 = arith.constant 0 : i32
    return %c0_i32, %c0_i32_0, %c0_i32_1 : i32, i32, i32
  }
  func.func @transform_43(%arg0: i32) -> (i32, i32, i32) {
    %c0_i32 = arith.constant 0 : i32
    %c0_i32_0 = arith.constant 0 : i32
    %c0_i32_1 = arith.constant 0 : i32
    %c0_i32_2 = arith.constant 0 : i32
    return %c0_i32, %c0_i32_0, %c0_i32_1 : i32, i32, i32
  }
  func.func @transform_44(%arg0: i32) -> (i32, i32, i32) {
    %c0_i32 = arith.constant 0 : i32
    %c0_i32_0 = arith.constant 0 : i32
    %c0_i32_1 = arith.constant 0 : i32
    %c0_i32_2 = arith.constant 0 : i32
    return %c0_i32, %c0_i32_0, %c0_i32_1 : i32, i32, i32
  }
  func.func @transform_45(%arg0: i32) -> (i32, i32, i32) {
    %c0_i32 = arith.constant 0 : i32
    %c0_i32_0 = arith.constant 0 : i32
    %c0_i32_1 = arith.constant 0 : i32
    %c0_i32_2 = arith.constant 0 : i32
    return %c0_i32, %c0_i32_0, %c0_i32_1 : i32, i32, i32
  }
  func.func @transform_46(%arg0: i32) -> (i32, i32) {
    %c0_i32 = arith.constant 0 : i32
    %c0_i32_0 = arith.constant 0 : i32
    %c0_i32_1 = arith.constant 0 : i32
    return %c0_i32, %c0_i32_0 : i32, i32
  }
  func.func @transform_47(%arg0: i32) -> (i32, i32) {
    %c0_i32 = arith.constant 0 : i32
    %c0_i32_0 = arith.constant 0 : i32
    %c0_i32_1 = arith.constant 0 : i32
    return %c0_i32, %c0_i32_0 : i32, i32
  }
  func.func @transform_48(%arg0: i32) -> (i32, i32, i32) {
    %c0_i32 = arith.constant 0 : i32
    %c0_i32_0 = arith.constant 0 : i32
    %c0_i32_1 = arith.constant 0 : i32
    %c0_i32_2 = arith.constant 0 : i32
    return %c0_i32, %c0_i32_0, %c0_i32_1 : i32, i32, i32
  }
  func.func @transform_49(%arg0: i32) -> (i32, i32) {
    %c0_i32 = arith.constant 0 : i32
    %c0_i32_0 = arith.constant 0 : i32
    %c0_i32_1 = arith.constant 0 : i32
    return %c0_i32, %c0_i32_0 : i32, i32
  }
  func.func @transform_50(%arg0: i32) -> (i32, i32, i32) {
    %c0_i32 = arith.constant 0 : i32
    %c0_i32_0 = arith.constant 0 : i32
    %c0_i32_1 = arith.constant 0 : i32
    %c0_i32_2 = arith.constant 0 : i32
    return %c0_i32, %c0_i32_0, %c0_i32_1 : i32, i32, i32
  }
  func.func @transform_51(%arg0: i32) -> (i32, i32, i32) {
    %c0_i32 = arith.constant 0 : i32
    %c0_i32_0 = arith.constant 0 : i32
    %c0_i32_1 = arith.constant 0 : i32
    %c0_i32_2 = arith.constant 0 : i32
    return %c0_i32, %c0_i32_0, %c0_i32_1 : i32, i32, i32
  }
  func.func @transform_52(%arg0: i32) -> (i32, i32) {
    %c0_i32 = arith.constant 0 : i32
    %c0_i32_0 = arith.constant 0 : i32
    %c0_i32_1 = arith.constant 0 : i32
    return %c0_i32, %c0_i32_0 : i32, i32
  }
  func.func @transform_53(%arg0: i32) -> (i32, i32) {
    %c0_i32 = arith.constant 0 : i32
    %c0_i32_0 = arith.constant 0 : i32
    %c0_i32_1 = arith.constant 0 : i32
    return %c0_i32, %c0_i32_0 : i32, i32
  }
  func.func @transform_54(%arg0: i32) -> (i32, i32) {
    %c0_i32 = arith.constant 0 : i32
    %c0_i32_0 = arith.constant 0 : i32
    %c0_i32_1 = arith.constant 0 : i32
    return %c0_i32, %c0_i32_0 : i32, i32
  }
  func.func @transform_55(%arg0: i32) -> (i32, i32) {
    %c0_i32 = arith.constant 0 : i32
    %c0_i32_0 = arith.constant 0 : i32
    %c0_i32_1 = arith.constant 0 : i32
    return %c0_i32, %c0_i32_0 : i32, i32
  }
  func.func @transform_56(%arg0: i32) -> (i32, i32, i32) {
    %c0_i32 = arith.constant 0 : i32
    %c0_i32_0 = arith.constant 0 : i32
    %c0_i32_1 = arith.constant 0 : i32
    return %arg0, %c0_i32, %c0_i32_0 : i32, i32, i32
  }
  func.func @transform_57(%arg0: i32) -> (i32, i32, i32) {
    %c0_i32 = arith.constant 0 : i32
    %c0_i32_0 = arith.constant 0 : i32
    %c0_i32_1 = arith.constant 0 : i32
    return %arg0, %c0_i32, %c0_i32_0 : i32, i32, i32
  }
  func.func @transform_58(%arg0: i32) -> (i32, i32, i32) {
    %c0_i32 = arith.constant 0 : i32
    %c0_i32_0 = arith.constant 0 : i32
    %c0_i32_1 = arith.constant 0 : i32
    return %arg0, %c0_i32, %c0_i32_0 : i32, i32, i32
  }
  func.func @transform_59(%arg0: i32) -> (i32, i32, i32) {
    %c0_i32 = arith.constant 0 : i32
    %c0_i32_0 = arith.constant 0 : i32
    %c0_i32_1 = arith.constant 0 : i32
    return %arg0, %c0_i32, %c0_i32_0 : i32, i32, i32
  }
}

</mosaic_0001>

<bundles_post_ra>
// kernel: vqtransunet_forward.1
= control target key start
LH: loop header
LB: loop body
LE: loop exit
PB: predicated region body
PF: predicated region fallthrough
CT: control target
= control target key end

     0   :  { %s16132_s6 = smov 1   ;;  %s16133_s10 = smov 2   ;;  %s17989_s0 = inlined_call_operand.smem [shape: u32[60], index: -1, kind: input, shape index: {}] }
   0x1   :  { %s16243_s5 = sld [smem:[%s17989_s0]]   ;;  %s16134_s14 = smov 3  }
   0x2   :  { %s16248_s9 = sld [smem:[%s17989_s0 + %s16132_s6]]   ;;  %s16135_s18 = smov 4  }
   0x3   :  { %s16253_s13 = sld [smem:[%s17989_s0 + %s16133_s10]]   ;;  %s16136_s22 = smov 5  }
   0x4   :  { %s16258_s17 = sld [smem:[%s17989_s0 + %s16134_s14]]   ;;  %s16137_s26 = smov 6  }
   0x5   :  { %s16263_s21 = sld [smem:[%s17989_s0 + %s16135_s18]]   ;;  %s16138_s30 = smov 7  }
   0x6   :  { %s16268_s25 = sld [smem:[%s17989_s0 + %s16136_s22]]   ;;  %s16139_s4 = smov 8  }
   0x7   :  { %18081 = sst [smem:[#allocation71_spill]] %s16243_s5  ;;  %s16140_s10 = smov 9  }
   0x8   :  { %18082 = sst [smem:[#allocation72_spill]] %s16248_s9  ;;  %s16141_s15 = smov 10  }
   0x9   :  { %18083 = sst [smem:[#allocation73_spill]] %s16253_s13  ;;  %s16142_s20 = smov 11  }
   0xa   :  { %18084 = sst [smem:[#allocation74_spill]] %s16258_s17  ;;  %s16144_s1 = smov 13  }
   0xb   :  { %s16273_s29 = sld [smem:[%s17989_s0 + %s16137_s26]]   ;;  %s16143_s26 = smov 12  }
   0xc   :  { %18085 = sst [smem:[#allocation75_spill]] %s16268_s25  ;;  %s16145_s7 = smov 14  }
   0xd   :  { %s16278_s3 = sld [smem:[%s17989_s0 + %s16138_s30]]   ;;  %s16147_s22 = smov 16  }
   0xe   :  { %s16283_s8 = sld [smem:[%s17989_s0 + %s16139_s4]]   ;;  %s16148_s28 = smov 17  }
   0xf   :  { %s16288_s14 = sld [smem:[%s17989_s0 + %s16140_s10]]  }
  0x10   :  { %s16293_s19 = sld [smem:[%s17989_s0 + %s16141_s15]]   ;;  %s16146_s15 = smov 15  }
  0x11   :  { %s16298_s24 = sld [smem:[%s17989_s0 + %s16142_s20]]  }
  0x12   :  { %s16303_s30 = sld [smem:[%s17989_s0 + %s16143_s26]]  }
  0x13   :  { %18086 = sst [smem:[#allocation76_spill]] %s16278_s3 }
  0x14   :  { %18087 = sst [smem:[#allocation77_spill]] %s16283_s8 }
  0x15   :  { %18088 = sst [smem:[#allocation78_spill]] %s16288_s14 }
  0x16   :  { %18089 = sst [smem:[#allocation79_spill]] %s16293_s19 }
  0x17   :  { %18090 = sst [smem:[#allocation80_spill]] %s16298_s24 }
  0x18   :  { %18091 = sst [smem:[#allocation81_spill]] %s16303_s30 }
  0x19   :  { %s16308_s6 = sld [smem:[%s17989_s0 + %s16144_s1]]  }
  0x1a   :  { %s16313_s12 = sld [smem:[%s17989_s0 + %s16145_s7]]   ;;  %s16149_s7 = smov 18  }
  0x1b   :  { %s16318_s20 = sld [smem:[%s17989_s0 + %s16146_s15]]   ;;  %s16150_s15 = smov 19  }
  0x1c   :  { %s16323_s27 = sld [smem:[%s17989_s0 + %s16147_s22]]   ;;  %s16151_s22 = smov 20  }
  0x1d   :  { %s16328_s4 = sld [smem:[%s17989_s0 + %s16148_s28]]   ;;  %s16152_s28 = smov 21  }
  0x1e   :  { %s16333_s30 = sld [smem:[%s17989_s0 + %s16149_s7]]   ;;  %s16153_s7 = smov 22  }
  0x1f   :  { %18092 = sst [smem:[#allocation82_spill]] %s16308_s6 }
  0x20   :  { %18093 = sst [smem:[#allocation83_spill]] %s16313_s12 }
  0x21   :  { %18094 = sst [smem:[#allocation84_spill]] %s16318_s20 }
  0x22   :  { %18095 = sst [smem:[#allocation85_spill]] %s16323_s27 }
  0x23   :  { %18096 = sst [smem:[#allocation86_spill]] %s16328_s4 }
  0x24   :  { %18097 = sst [smem:[#allocation87_spill]] %s16333_s30 }
  0x25   :  { %s16338_s6 = sld [smem:[%s17989_s0 + %s16150_s15]]   ;;  %s16154_s15 = smov 23  }
  0x26   :  { %s16343_s14 = sld [smem:[%s17989_s0 + %s16151_s22]]   ;;  %s16155_s22 = smov 24  }
  0x27   :  { %s16348_s27 = sld [smem:[%s17989_s0 + %s16152_s28]]   ;;  %s16156_s28 = smov 25  }
  0x28   :  { %s16353_s30 = sld [smem:[%s17989_s0 + %s16153_s7]]   ;;  %s16157_s7 = smov 26  }
  0x29   :  { %s16358_s20 = sld [smem:[%s17989_s0 + %s16154_s15]]   ;;  %s16158_s15 = smov 27  }
  0x2a   :  { %s16368_s19 = sld [smem:[%s17989_s0 + %s16156_s28]]   ;;  %s16160_s28 = smov 29  }
  0x2b   :  { %18098 = sst [smem:[#allocation88_spill]] %s16338_s6 }
  0x2c   :  { %18099 = sst [smem:[#allocation89_spill]] %s16343_s14 }
  0x2d   :  { %s16363_s14 = sld [smem:[%s17989_s0 + %s16155_s22]]   ;;  %s16159_s22 = smov 28  }
  0x2e   :  { %18100 = sst [smem:[#allocation90_spill]] %s16353_s30 }
  0x2f   :  { %18101 = sst [smem:[#allocation91_spill]] %s16358_s20 }
  0x30   :  { %s16373_s30 = sld [smem:[%s17989_s0 + %s16157_s7]]   ;;  %s16161_s7 = smov 30  }
  0x31   :  { %s16378_s24 = sld [smem:[%s17989_s0 + %s16158_s15]]   ;;  %s16162_s15 = smov 31  }
  0x32   :  { %s16383_s9 = sld [smem:[%s17989_s0 + %s16159_s22]]   ;;  %s16163_s22 = smov 32  }
  0x33   :  { %18102 = sst [smem:[#allocation92_spill]] %s16363_s14 }
  0x34   :  { %s16388_s17 = sld [smem:[%s17989_s0 + %s16160_s28]]   ;;  %s16164_s28 = smov 33  }
  0x35   :  { %s16393_s14 = sld [smem:[%s17989_s0 + %s16161_s7]]   ;;  %s16165_s7 = smov 34  }
  0x36   :  { %18103 = sst [smem:[#allocation93_spill]] %s16373_s30 }
  0x37   :  { %s16398_s5 = sld [smem:[%s17989_s0 + %s16162_s15]]   ;;  %s16166_s15 = smov 35  }
  0x38   :  { %18104 = sst [smem:[#allocation94_spill]] %s16383_s9 }
  0x39   :  { %s16403_s9 = sld [smem:[%s17989_s0 + %s16163_s22]]   ;;  %s16167_s22 = smov 36  }
  0x3a   :  { %s16408_s30 = sld [smem:[%s17989_s0 + %s16164_s28]]   ;;  %s16168_s28 = smov 37  }
  0x3b   :  { %18105 = sst [smem:[#allocation95_spill]] %s16393_s14 }
  0x3c   :  { %s16413_s14 = sld [smem:[%s17989_s0 + %s16165_s7]]   ;;  %s16169_s7 = smov 38  }
  0x3d   :  { %18106 = sst [smem:[#allocation96_spill]] %s16398_s5 }
  0x3e   :  { %s16418_s5 = sld [smem:[%s17989_s0 + %s16166_s15]]   ;;  %s16170_s15 = smov 39  }
  0x3f   :  { %18107 = sst [smem:[#allocation97_spill]] %s16403_s9 }
  0x40   :  { %18108 = sst [smem:[#allocation98_spill]] %s16408_s30 }
  0x41   :  { %s16423_s20 = sld [smem:[%s17989_s0 + %s16167_s22]]   ;;  %s16171_s22 = smov 40  }
  0x42   :  { %s16428_s30 = sld [smem:[%s17989_s0 + %s16168_s28]]   ;;  %s16172_s28 = smov 41  }
  0x43   :  { %s16433_s6 = sld [smem:[%s17989_s0 + %s16169_s7]]   ;;  %s16173_s7 = smov 42  }
  0x44   :  { %18109 = sst [smem:[#allocation99_spill]] %s16418_s5 }
  0x45   :  { %s16438_s5 = sld [smem:[%s17989_s0 + %s16170_s15]]   ;;  %s16174_s15 = smov 43  }
  0x46   :  { %s16448_s12 = sld [smem:[%s17989_s0 + %s16172_s28]]   ;;  %s16176_s28 = smov 45  }
  0x47   :  { %18110 = sst [smem:[#allocation100_spill]] %s16423_s20 }
  0x48   :  { %s16443_s20 = sld [smem:[%s17989_s0 + %s16171_s22]]   ;;  %s16175_s22 = smov 44  }
  0x49   :  { %18111 = sst [smem:[#allocation101_spill]] %s16433_s6 }
  0x4a   :  { %s16453_s6 = sld [smem:[%s17989_s0 + %s16173_s7]]   ;;  %s16177_s7 = smov 46  }
  0x4b   :  { %18112 = sst [smem:[#allocation102_spill]] %s16438_s5 }
  0x4c   :  { %18113 = sst [smem:[#allocation103_spill]] %s16448_s12 }
  0x4d   :  { %s16458_s5 = sld [smem:[%s17989_s0 + %s16174_s15]]   ;;  %s16178_s15 = smov 47  }
  0x4e   :  { %s16463_s3 = sld [smem:[%s17989_s0 + %s16175_s22]]   ;;  %s16179_s22 = smov 48  }
  0x4f   :  { %s16468_s12 = sld [smem:[%s17989_s0 + %s16176_s28]]   ;;  %s16180_s28 = smov 49  }
  0x50   :  { %18114 = sst [smem:[#allocation104_spill]] %s16453_s6 }
  0x51   :  { %s16473_s6 = sld [smem:[%s17989_s0 + %s16177_s7]]   ;;  %s16181_s7 = smov 50  }
  0x52   :  { %s16493_s25 = sld [smem:[%s17989_s0 + %s16181_s7]]   ;;  %s16185_s7 = smov 54  }
  0x53   :  { %18115 = sst [smem:[#allocation105_spill]] %s16458_s5 }
  0x54   :  { %18116 = sst [smem:[#allocation106_spill]] %s16463_s3 }
  0x55   :  { %18117 = sst [smem:[#allocation107_spill]] %s16468_s12 }
  0x56   :  { %s16478_s5 = sld [smem:[%s17989_s0 + %s16178_s15]]   ;;  %s16182_s15 = smov 51  }
  0x57   :  { %18118 = sst [smem:[#allocation108_spill]] %s16473_s6 }
  0x58   :  { %s16483_s3 = sld [smem:[%s17989_s0 + %s16179_s22]]   ;;  %s16183_s22 = smov 52  }
  0x59   :  { %s16488_s12 = sld [smem:[%s17989_s0 + %s16180_s28]]   ;;  %s16184_s28 = smov 53  }
  0x5a   :  { %18121 = sst [smem:[#allocation111_spill]] %s16493_s25 }
  0x5b   :  { %s16508_s13 = sld [smem:[%s17989_s0 + %s16184_s28]]   ;;  %s16188_s28 = smov 57  }
  0x5c   :  { %18119 = sst [smem:[#allocation109_spill]] %s16478_s5 }
  0x5d   :  { %s16498_s5 = sld [smem:[%s17989_s0 + %s16182_s15]]   ;;  %s16186_s15 = smov 55  }
  0x5e   :  { %18120 = sst [smem:[#allocation110_spill]] %s16483_s3 }
  0x5f   :  { %s16503_s3 = sld [smem:[%s17989_s0 + %s16183_s22]]   ;;  %s16187_s22 = smov 56  }
  0x60   :  { %s16513_s25 = sld [smem:[%s17989_s0 + %s16185_s7]]   ;;  %s16189_s7 = smov 58  }
  0x61   :  { %18124 = sst [smem:[#allocation114_spill]] %s16508_s13 }
  0x62   :  { %s16528_s13 = sld [smem:[%s17989_s0 + %s16188_s28]]  }
  0x63   :  { %18122 = sst [smem:[#allocation112_spill]] %s16498_s5 }
  0x64   :  { %s16518_s5 = sld [smem:[%s17989_s0 + %s16186_s15]]   ;;  %s16190_s15 = smov 59  }
  0x65   :  { %18123 = sst [smem:[#allocation113_spill]] %s16503_s3 }
  0x66   :  { %18125 = sst [smem:[#allocation115_spill]] %s16513_s25 }
  0x67   :  { %s16523_s3 = sld [smem:[%s17989_s0 + %s16187_s22]]  }
  0x68   :  { %s16533_s25 = sld [smem:[%s17989_s0 + %s16189_s7]]  }
  0x6a   :  { %18126 = sst [smem:[#allocation116_spill]] %s16518_s5 }
  0x6b   :  { %s16538_s5 = sld [smem:[%s17989_s0 + %s16190_s15]]  }
  0x71   :  { %18127 = sst [smem:[#allocation117_spill]] %s16538_s5 }
  0x72   :  { %125 = vsyncpa [#allocation3], 0 }
  0x73   :  { %126 = vsyncpa [#allocation6], 0 }
  0x74   :  { %127 = vsyncpa [#allocation9], 0 }
  0x75   :  { %128 = vsyncpa [#allocation12], 0 }
  0x76   :  { %129 = vsyncpa [#allocation15], 0 }
  0x77   :  { %130 = vsyncpa [#allocation18], 0 }
  0x78   :  { %131 = vsyncpa [#allocation21], 0 }
  0x79   :  { %132 = vsyncpa [#allocation24], 0 }
  0x7a   :  { %133 = vsyncpa [#allocation27], 0 }
  0x7b   :  { %134 = vsyncpa [#allocation30], 0 }
  0x7c   :  { %135 = vsyncpa [#allocation33], 0 }
  0x7d   :  { %136 = vsyncpa [#allocation36], 0 }
  0x7e   :  { %137 = vsyncpa [#allocation39], 0 }
  0x7f   :  { %138 = vsyncpa [#allocation42], 0 }
  0x80   :  { %139 = vsyncpa [#allocation45], 0 }
  0x81   :  { %140 = vsyncpa [#allocation48], 0 }
  0x82   :  { %141 = vsyncpa [#allocation51], 0 }
  0x83   :  { %142 = vsyncpa [#allocation4], 0 }
  0x84   :  { %144 = vsyncpa [#allocation4 + $0x1], 0  ;;  %s16540_s0 = smov 0   ;;  %s16542_s22 = smov 0  }
  0x85   :  { %s16544_s23 = smov 0   ;;  %s16546_s26 = smov 0  }
  0x86   :  { %18128 = sst [smem:[#allocation118_spill]] %s16544_s23 }
  0x87 LB: > { %s18130_s9 = sld [smem:[#allocation97_spill]]  ;;  %s18131_s8 = sld [smem:[#allocation77_spill]]  ;;  %s16130_s26 = sphi %s16546_s26, %s18220_s26   ;;  %s16122_s22 = sphi %s16542_s22, %s18224_s22   ;;  %s16118_s0 = sphi %s16540_s0, %s18223_s0  }
  0x88   : > { %s18132_s6 = sld [smem:[#allocation108_spill]]  ;;  %s18133_s4 = sld [smem:[#allocation86_spill]] }
  0x89   : > { %s18134_s23 = sld [smem:[#allocation118_spill]]  ;;  %18137 = sst [smem:[#allocation120_spill]] %s16130_s26 }
  0x8a   : > { %18135 = sst [smem:[#allocation118_spill]] %s16118_s0  ;;  %s16561_s28 = sadd.s32 4294967295, %s16130_s26  }
  0x8b   : > { %s11812_s1 = sadd.s32 4294967294, %s16130_s26   ;;  %s16565_s2 = sadd.s32 1, %s16130_s26  }
  0x8c   : > { %18138 = sst [smem:[#allocation121_spill]] %s16565_s2  ;;  %s1361_s10 = ssub.s32 %s16130_s26, %s16565_s2 }
  0x8d   : > { %p1362_p1 = scmp.eq.s32.totalorder %s1361_s10, 0  ;;  %p1375_p2 = scmp.eq.s32.totalorder %s16561_s28, 1 }
  0x8e   : > { %p1380_p3 = scmp.ne.s32.totalorder %s16122_s22, %s16118_s0  ;;  %p1381_p4 = scmp.eq.s32.totalorder %s11812_s1, 1 }
  0x8f   : > { %18136 = sst [smem:[#allocation119_spill]] %s18134_s23  ;;  %s1364_s7 = sadd.s32 1, %s18134_s23 }
  0x90   : > { %p1374_p0 = scmp.ne.s32.totalorder %s18134_s23, %s16122_s22  ;;  %p16582_p6 = por %p1381_p4, %p1380_p3 }
  0x91   : > { %s16576_s11 = scalar_select %p1362_p1, %s18134_s23, %s1364_s7  }
  0x92   : > { %p16578_p5 = por %p1375_p2, %p1374_p0  ;;  %p11813_p7 = scmp.ge.s32.totalorder %s16130_s26, 1 }
  0x93   : > { %18139 = sst [smem:[#allocation122_spill]] %s16576_s11  ;;  %p1440_p8 = scmp.lt.s32.totalorder %s16130_s26, 3 }
  0x94   : > { %s18140_s15 = scalar_select %p16578_p5, 1, 0 }
  0x95   : > { %s18141_s16 = scalar_select %p16582_p6, 1, 0 }
  0x96   : > { %p16588_p9 = pnand %p11813_p7, %p1440_p8 }
  0x97   : > { %18142 = sst [smem:[#allocation123_spill]] %s18141_s16  ;;  %p14941_p10 = scmp.eq.s32.totalorder (!%p16588_p9), %s16561_s28, 0 }
  0x98   : > { %1444 = sbr.rel (%p16588_p9) target bundleno = 932 (0x3a4), region = 12  ;;  %s16191_s1 = smov (!%p16588_p9), [#allocation5]  }
  0x99   : > { %s1471_s7 = sshll.u32 (!%p16588_p9), %s16191_s1, 4  ;;  %s15168_s10 = scalar_lea.hbm (!%p16588_p9), %s16263_s21, 256  ;;  %s1472_s7 = int_to_ptr.vmem [resolvable:$true] %s1471_s7 }
  0x9a   : > { %p15169_p11 = scmp.ne.s32.totalorder (!%p16588_p9), %s16263_s21, %s15168_s10  ;;  %p15174_p0 = scmp.lt.u32.totalorder (!%p16588_p9), %s15168_s10, %s16263_s21 }
  0x9c   : > { %p15170_p12 = pnand (!%p16588_p9), %p15169_p11, %p14941_p10 }
  0x9e   : > { %p15171_p13 = pneg (!%p16588_p9), %p15170_p12 }
  0xa0   : > { %p15176_p1 = pnand %p15174_p0, %p15171_p13 }
  0xa2   : > { %15179 = shalt.err (!%p15176_p1)
}
  0xa3   : > { %s15180_s11 = scalar_lea.vmem %s1472_s7, 256  ;;  %p15187_p7 = scmp.lt.s32.totalorder %s1472_s7, %s1472_s7 }
  0xa4   : > { %p15181_p2 = scmp.ne.s32.totalorder %s1472_s7, %s15180_s11  ;;  %p15188_p8 = scmp.lt.s32.totalorder %s15180_s11, %s15180_s11 }
  0xa6   : > { %p15182_p3 = pnand %p15181_p2, %p14941_p10  ;;  %p15189_p6 = por %p15188_p8, %p15187_p7 }
  0xa8   : > { %p15183_p4 = pneg %p15182_p3 }
  0xaa   : > { %p15190_p5 = pnand %p15189_p6, %p15183_p4 }
  0xac   : > { %15193 = shalt.err (!%p15190_p5)
}
  0xad   : > { %s16192_s1 = smov 64   ;;  %s16193_s10 = smov 4  }
  0xae   : > { %14810 = dma.hbm_to_vmem [thread:$0]  (%p14941_p10), %s16263_s21, 256, %s1472_s7, [#allocation6], %s16192_s1, %s16192_s1, %s16193_s10  }
  0xaf   : > { %s16194_s23 = smov [#allocation8]   ;;  %s16195_s16 = smov [#allocation11]  }
  0xb0   : > { %s1497_s2 = sshll.u32 %s16194_s23, 4  ;;  %s1523_s11 = sshll.u32 %s16195_s16, 4  ;;  %s1498_s2 = int_to_ptr.vmem [resolvable:$true] %s1497_s2  ;;  %s16608_s11 = int_to_ptr.vmem [resolvable:$true] %s1523_s11 }
  0xb1   : > { %s15194_s0 = scalar_lea.hbm %s16273_s29, 384 }
  0xb2   : > { %p15195_p5 = scmp.ne.s32.totalorder %s16273_s29, %s15194_s0  ;;  %p15200_p12 = scmp.lt.u32.totalorder %s15194_s0, %s16273_s29 }
  0xb4   : > { %p15196_p6 = pnand %p15195_p5, %p14941_p10 }
  0xb6   : > { %p15197_p11 = pneg %p15196_p6 }
  0xb8   : > { %p15202_p13 = pnand %p15200_p12, %p15197_p11 }
  0xba   : > { %15205 = shalt.err (!%p15202_p13)
}
  0xbb   : > { %s15206_s26 = scalar_lea.vmem %s1498_s2, 384  ;;  %p15213_p3 = scmp.lt.s32.totalorder %s1498_s2, %s1498_s2 }
  0xbc   : > { %p15207_p0 = scmp.ne.s32.totalorder %s1498_s2, %s15206_s26  ;;  %p15214_p4 = scmp.lt.s32.totalorder %s15206_s26, %s15206_s26 }
  0xbe   : > { %p15208_p1 = pnand %p15207_p0, %p14941_p10  ;;  %p15215_p7 = por %p15214_p4, %p15213_p3 }
  0xc0   : > { %p15209_p2 = pneg %p15208_p1 }
  0xc2   : > { %p15216_p8 = pnand %p15215_p7, %p15209_p2 }
  0xc4   : > { %15219 = shalt.err (!%p15216_p8)
}
  0xc5   : > { %s18037_s23 = smov 128   ;;  %s18039_s0 = smov 8  }
  0xc6   : > { %14814 = dma.hbm_to_vmem [thread:$0]  (%p14941_p10), %s16273_s29, 384, %s1498_s2, [#allocation9], %s18037_s23, %s18037_s23, %s18039_s0  }
  0xc7   : > { %s15220_s16 = scalar_lea.hbm %s18131_s8, 192 }
  0xc8   : > { %p15221_p5 = scmp.ne.s32.totalorder %s18131_s8, %s15220_s16  ;;  %p15226_p12 = scmp.lt.u32.totalorder %s15220_s16, %s18131_s8 }
  0xca   : > { %p15222_p6 = pnand %p15221_p5, %p14941_p10 }
  0xcc   : > { %p15223_p11 = pneg %p15222_p6 }
  0xce   : > { %p15228_p13 = pnand %p15226_p12, %p15223_p11 }
  0xd0   : > { %15231 = shalt.err (!%p15228_p13)
}
  0xd1   : > { %s15232_s26 = scalar_lea.vmem %s16608_s11, 192  ;;  %p15239_p3 = scmp.lt.s32.totalorder %s16608_s11, %s16608_s11 }
  0xd2   : > { %p15233_p0 = scmp.ne.s32.totalorder %s16608_s11, %s15232_s26  ;;  %p15240_p4 = scmp.lt.s32.totalorder %s15232_s26, %s15232_s26 }
  0xd4   : > { %p15234_p1 = pnand %p15233_p0, %p14941_p10  ;;  %p15241_p7 = por %p15240_p4, %p15239_p3 }
  0xd6   : > { %p15235_p2 = pneg %p15234_p1 }
  0xd8   : > { %p15242_p8 = pnand %p15241_p7, %p15235_p2 }
  0xda   : > { %15245 = shalt.err (!%p15242_p8)
}
  0xdb   : > { %14818 = dma.hbm_to_vmem [thread:$0]  (%p14941_p10), %s18131_s8, 192, %s16608_s11, [#allocation12], %s16192_s1, %s16192_s1, %s16193_s10  }
  0xdc   : > { %s16198_s2 = smov [#allocation14]   ;;  %s16199_s16 = smov [#allocation17]  }
  0xdd   : > { %s1569_s7 = sshll.u32 %s16198_s2, 4  ;;  %s1597_s23 = sshll.u32 %s16199_s16, 4  ;;  %s1570_s7 = int_to_ptr.vmem [resolvable:$true] %s1569_s7  ;;  %s16641_s23 = int_to_ptr.vmem [resolvable:$true] %s1597_s23 }
  0xde   : > { %s15246_s26 = scalar_lea.hbm %s18133_s4, 16 }
  0xdf   : > { %p15247_p5 = scmp.ne.s32.totalorder %s18133_s4, %s15246_s26  ;;  %p15252_p12 = scmp.lt.u32.totalorder %s15246_s26, %s18133_s4 }
  0xe1   : > { %p15248_p6 = pnand %p15247_p5, %p14941_p10 }
  0xe3   : > { %p15249_p11 = pneg %p15248_p6 }
  0xe5   : > { %p15254_p13 = pnand %p15252_p12, %p15249_p11 }
  0xe7   : > { %15257 = shalt.err (!%p15254_p13)
}
  0xe8   : > { %s15258_s0 = scalar_lea.vmem %s1570_s7, 16  ;;  %s15264_s1 = scalar_lea.vmem %s1570_s7, 32 }
  0xe9   : > { %p15259_p0 = scmp.ne.s32.totalorder %s1570_s7, %s15258_s0  ;;  %p15265_p3 = scmp.lt.s32.totalorder %s1570_s7, %s1570_s7 }
  0xea   : > { %p15266_p4 = scmp.lt.s32.totalorder %s15264_s1, %s15258_s0 }
  0xeb   : > { %p15260_p1 = pnand %p15259_p0, %p14941_p10 }
  0xec   : > { %p15267_p7 = por %p15266_p4, %p15265_p3 }
  0xed   : > { %p15261_p2 = pneg %p15260_p1 }
  0xef   : > { %p15268_p8 = pnand %p15267_p7, %p15261_p2 }
  0xf1   : > { %15271 = shalt.err (!%p15268_p8)
}
  0xf2   : > { %14822 = dma.hbm_to_vmem [thread:$0]  (%p14941_p10), %s18133_s4, 16, %s1570_s7, [#allocation15]  }
  0xf3   : > { %s15272_s10 = scalar_lea.hbm %s16348_s27, 16 }
  0xf4   : > { %p15273_p5 = scmp.ne.s32.totalorder %s16348_s27, %s15272_s10  ;;  %p15278_p12 = scmp.lt.u32.totalorder %s15272_s10, %s16348_s27 }
  0xf6   : > { %p15274_p6 = pnand %p15273_p5, %p14941_p10 }
  0xf8   : > { %p15275_p11 = pneg %p15274_p6 }
  0xfa   : > { %p15280_p13 = pnand %p15278_p12, %p15275_p11 }
  0xfc   : > { %15283 = shalt.err (!%p15280_p13)
}
  0xfd   : > { %s15284_s11 = scalar_lea.vmem %s16641_s23, 16  ;;  %s15290_s0 = scalar_lea.vmem %s16641_s23, 32 }
  0xfe   : > { %p15285_p0 = scmp.ne.s32.totalorder %s16641_s23, %s15284_s11  ;;  %p15291_p3 = scmp.lt.s32.totalorder %s16641_s23, %s16641_s23 }
  0xff   : > { %p15292_p4 = scmp.lt.s32.totalorder %s15290_s0, %s15284_s11 }
 0x100   : > { %p15286_p1 = pnand %p15285_p0, %p14941_p10 }
 0x101   : > { %p15293_p7 = por %p15292_p4, %p15291_p3 }
 0x102   : > { %p15287_p2 = pneg %p15286_p1 }
 0x104   : > { %p15294_p8 = pnand %p15293_p7, %p15287_p2 }
 0x106   : > { %15297 = shalt.err (!%p15294_p8)
}
 0x107   : > { %14826 = dma.hbm_to_vmem [thread:$0]  (%p14941_p10), %s16348_s27, 16, %s16641_s23, [#allocation18]  }
 0x108   : > { %s16200_s2 = smov [#allocation20]   ;;  %s16201_s16 = smov [#allocation23]  }
 0x109   : > { %s1625_s7 = sshll.u32 %s16200_s2, 4  ;;  %s1649_s26 = sshll.u32 %s16201_s16, 4  ;;  %s1626_s7 = int_to_ptr.vmem [resolvable:$true] %s1625_s7  ;;  %s16669_s26 = int_to_ptr.vmem [resolvable:$true] %s1649_s26 }
 0x10a   : > { %s15298_s1 = scalar_lea.hbm %s16368_s19, 16 }
 0x10b   : > { %p15299_p5 = scmp.ne.s32.totalorder %s16368_s19, %s15298_s1  ;;  %p15304_p12 = scmp.lt.u32.totalorder %s15298_s1, %s16368_s19 }
 0x10d   : > { %p15300_p6 = pnand %p15299_p5, %p14941_p10 }
 0x10f   : > { %p15301_p11 = pneg %p15300_p6 }
 0x111   : > { %p15306_p13 = pnand %p15304_p12, %p15301_p11 }
 0x113   : > { %15309 = shalt.err (!%p15306_p13)
}
 0x114   : > { %s15310_s10 = scalar_lea.vmem %s1626_s7, 16  ;;  %s15316_s23 = scalar_lea.vmem %s1626_s7, 32 }
 0x115   : > { %p15311_p0 = scmp.ne.s32.totalorder %s1626_s7, %s15310_s10  ;;  %p15317_p3 = scmp.lt.s32.totalorder %s1626_s7, %s1626_s7 }
 0x116   : > { %p15318_p4 = scmp.lt.s32.totalorder %s15316_s23, %s15310_s10 }
 0x117   : > { %p15312_p1 = pnand %p15311_p0, %p14941_p10 }
 0x118   : > { %p15319_p7 = por %p15318_p4, %p15317_p3 }
 0x119   : > { %p15313_p2 = pneg %p15312_p1 }
 0x11b   : > { %p15320_p8 = pnand %p15319_p7, %p15313_p2 }
 0x11d   : > { %15323 = shalt.err (!%p15320_p8)
}
 0x11e   : > { %14830 = dma.hbm_to_vmem [thread:$0]  (%p14941_p10), %s16368_s19, 16, %s1626_s7, [#allocation21]  }
 0x11f   : > { %s15324_s11 = scalar_lea.hbm %s16378_s24, 16 }
 0x120   : > { %p15325_p5 = scmp.ne.s32.totalorder %s16378_s24, %s15324_s11  ;;  %p15330_p12 = scmp.lt.u32.totalorder %s15324_s11, %s16378_s24 }
 0x122   : > { %p15326_p6 = pnand %p15325_p5, %p14941_p10 }
 0x124   : > { %p15327_p11 = pneg %p15326_p6 }
 0x126   : > { %p15332_p13 = pnand %p15330_p12, %p15327_p11 }
 0x128   : > { %15335 = shalt.err (!%p15332_p13)
}
 0x129   : > { %s15336_s0 = scalar_lea.vmem %s16669_s26, 16  ;;  %s15342_s2 = scalar_lea.vmem %s16669_s26, 32 }
 0x12a   : > { %p15337_p0 = scmp.ne.s32.totalorder %s16669_s26, %s15336_s0  ;;  %p15343_p3 = scmp.lt.s32.totalorder %s16669_s26, %s16669_s26 }
 0x12b   : > { %p15344_p4 = scmp.lt.s32.totalorder %s15342_s2, %s15336_s0 }
 0x12c   : > { %p15338_p1 = pnand %p15337_p0, %p14941_p10 }
 0x12d   : > { %p15345_p7 = por %p15344_p4, %p15343_p3 }
 0x12e   : > { %p15339_p2 = pneg %p15338_p1 }
 0x130   : > { %p15346_p8 = pnand %p15345_p7, %p15339_p2 }
 0x132   : > { %15349 = shalt.err (!%p15346_p8)
}
 0x133   : > { %14834 = dma.hbm_to_vmem [thread:$0]  (%p14941_p10), %s16378_s24, 16, %s16669_s26, [#allocation24]  }
 0x134   : > { %s16202_s7 = smov [#allocation26]   ;;  %s16203_s1 = smov [#allocation29]  }
 0x135   : > { %s1673_s16 = sshll.u32 %s16202_s7, 4  ;;  %s1697_s10 = sshll.u32 %s16203_s1, 4  ;;  %s1674_s16 = int_to_ptr.vmem [resolvable:$true] %s1673_s16  ;;  %s16697_s10 = int_to_ptr.vmem [resolvable:$true] %s1697_s10 }
 0x136   : > { %s15350_s23 = scalar_lea.hbm %s16388_s17, 16 }
 0x137   : > { %p15351_p5 = scmp.ne.s32.totalorder %s16388_s17, %s15350_s23  ;;  %p15356_p12 = scmp.lt.u32.totalorder %s15350_s23, %s16388_s17 }
 0x139   : > { %p15352_p6 = pnand %p15351_p5, %p14941_p10 }
 0x13b   : > { %p15353_p11 = pneg %p15352_p6 }
 0x13d   : > { %p15358_p13 = pnand %p15356_p12, %p15353_p11 }
 0x13f   : > { %15361 = shalt.err (!%p15358_p13)
}
 0x140   : > { %s15362_s11 = scalar_lea.vmem %s1674_s16, 16  ;;  %s15368_s26 = scalar_lea.vmem %s1674_s16, 32 }
 0x141   : > { %p15363_p0 = scmp.ne.s32.totalorder %s1674_s16, %s15362_s11  ;;  %p15369_p3 = scmp.lt.s32.totalorder %s1674_s16, %s1674_s16 }
 0x142   : > { %p15370_p4 = scmp.lt.s32.totalorder %s15368_s26, %s15362_s11 }
 0x143   : > { %p15364_p1 = pnand %p15363_p0, %p14941_p10 }
 0x144   : > { %p15371_p7 = por %p15370_p4, %p15369_p3 }
 0x145   : > { %p15365_p2 = pneg %p15364_p1 }
 0x147   : > { %p15372_p8 = pnand %p15371_p7, %p15365_p2 }
 0x149   : > { %15375 = shalt.err (!%p15372_p8)
}
 0x14a   : > { %14838 = dma.hbm_to_vmem [thread:$0]  (%p14941_p10), %s16388_s17, 16, %s1674_s16, [#allocation27]  }
 0x14b   : > { %s15376_s0 = scalar_lea.hbm %s18130_s9, 2304 }
 0x14c   : > { %p15377_p5 = scmp.ne.s32.totalorder %s18130_s9, %s15376_s0  ;;  %p15382_p12 = scmp.lt.u32.totalorder %s15376_s0, %s18130_s9 }
 0x14e   : > { %p15378_p6 = pnand %p15377_p5, %p14941_p10 }
 0x150   : > { %p15379_p11 = pneg %p15378_p6 }
 0x152   : > { %p15384_p13 = pnand %p15382_p12, %p15379_p11 }
 0x154   : > { %15387 = shalt.err (!%p15384_p13)
}
 0x155   : > { %s15388_s2 = scalar_lea.vmem %s16697_s10, 2304  ;;  %p15395_p3 = scmp.lt.s32.totalorder %s16697_s10, %s16697_s10 }
 0x156   : > { %p15389_p0 = scmp.ne.s32.totalorder %s16697_s10, %s15388_s2  ;;  %p15396_p4 = scmp.lt.s32.totalorder %s15388_s2, %s15388_s2 }
 0x158   : > { %p15390_p1 = pnand %p15389_p0, %p14941_p10  ;;  %p15397_p7 = por %p15396_p4, %p15395_p3 }
 0x15a   : > { %p15391_p2 = pneg %p15390_p1 }
 0x15c   : > { %p15398_p8 = pnand %p15397_p7, %p15391_p2 }
 0x15e   : > { %15401 = shalt.err (!%p15398_p8)
}
 0x15f   : > { %s18144_s7 = smov 8   ;;  %s18145_s16 = smov 128  }
 0x160   : > { %14842 = dma.hbm_to_vmem [thread:$0]  (%p14941_p10), %s18130_s9, 2304, %s16697_s10, [#allocation30], %s18145_s16, %s18145_s16, %s18144_s7  }
 0x161   : > { %s16204_s1 = smov [#allocation32]   ;;  %s16205_s11 = smov [#allocation35]  }
 0x162   : > { %s1722_s23 = sshll.u32 %s16204_s1, 4  ;;  %s1747_s26 = sshll.u32 %s16205_s11, 4  ;;  %s1723_s23 = int_to_ptr.vmem [resolvable:$true] %s1722_s23  ;;  %s16727_s26 = int_to_ptr.vmem [resolvable:$true] %s1747_s26 }
 0x163   : > { %s15402_s0 = scalar_lea.hbm %s16413_s14, 16 }
 0x164   : > { %p15403_p5 = scmp.ne.s32.totalorder %s16413_s14, %s15402_s0  ;;  %p15408_p12 = scmp.lt.u32.totalorder %s15402_s0, %s16413_s14 }
 0x166   : > { %p15404_p6 = pnand %p15403_p5, %p14941_p10 }
 0x168   : > { %p15405_p11 = pneg %p15404_p6 }
 0x16a   : > { %p15410_p13 = pnand %p15408_p12, %p15405_p11 }
 0x16c   : > { %15413 = shalt.err (!%p15410_p13)
}
 0x16d   : > { %s15414_s2 = scalar_lea.vmem %s1723_s23, 16  ;;  %s15420_s10 = scalar_lea.vmem %s1723_s23, 32 }
 0x16e   : > { %p15415_p0 = scmp.ne.s32.totalorder %s1723_s23, %s15414_s2  ;;  %p15421_p3 = scmp.lt.s32.totalorder %s1723_s23, %s1723_s23 }
 0x16f   : > { %p15422_p4 = scmp.lt.s32.totalorder %s15420_s10, %s15414_s2 }
 0x170   : > { %p15416_p1 = pnand %p15415_p0, %p14941_p10 }
 0x171   : > { %p15423_p7 = por %p15422_p4, %p15421_p3 }
 0x172   : > { %p15417_p2 = pneg %p15416_p1 }
 0x174   : > { %p15424_p8 = pnand %p15423_p7, %p15417_p2 }
 0x176   : > { %15427 = shalt.err (!%p15424_p8)
}
 0x177   : > { %14846 = dma.hbm_to_vmem [thread:$0]  (%p14941_p10), %s16413_s14, 16, %s1723_s23, [#allocation33]  }
 0x178   : > { %s15428_s1 = scalar_lea.hbm %s16428_s30, 16 }
 0x179   : > { %p15429_p5 = scmp.ne.s32.totalorder %s16428_s30, %s15428_s1  ;;  %p15434_p12 = scmp.lt.u32.totalorder %s15428_s1, %s16428_s30 }
 0x17b   : > { %p15430_p6 = pnand %p15429_p5, %p14941_p10 }
 0x17d   : > { %p15431_p11 = pneg %p15430_p6 }
 0x17f   : > { %p15436_p13 = pnand %p15434_p12, %p15431_p11 }
 0x181   : > { %15439 = shalt.err (!%p15436_p13)
}
 0x182   : > { %s15440_s11 = scalar_lea.vmem %s16727_s26, 16  ;;  %s15446_s0 = scalar_lea.vmem %s16727_s26, 32 }
 0x183   : > { %p15441_p0 = scmp.ne.s32.totalorder %s16727_s26, %s15440_s11  ;;  %p15447_p3 = scmp.lt.s32.totalorder %s16727_s26, %s16727_s26 }
 0x184   : > { %p15448_p4 = scmp.lt.s32.totalorder %s15446_s0, %s15440_s11 }
 0x185   : > { %p15442_p1 = pnand %p15441_p0, %p14941_p10 }
 0x186   : > { %p15449_p7 = por %p15448_p4, %p15447_p3 }
 0x187   : > { %p15443_p2 = pneg %p15442_p1 }
 0x189   : > { %p15450_p8 = pnand %p15449_p7, %p15443_p2 }
 0x18b   : > { %15453 = shalt.err (!%p15450_p8)
}
 0x18c   : > { %14850 = dma.hbm_to_vmem [thread:$0]  (%p14941_p10), %s16428_s30, 16, %s16727_s26, [#allocation36]  }
 0x18d   : > { %s16206_s23 = smov [#allocation38]   ;;  %s16207_s10 = smov [#allocation41]  }
 0x18e   : > { %s1771_s2 = sshll.u32 %s16206_s23, 4  ;;  %s1810_s1 = sshll.u32 %s16207_s10, 4  ;;  %s1772_s2 = int_to_ptr.vmem [resolvable:$true] %s1771_s2  ;;  %s16755_s1 = int_to_ptr.vmem [resolvable:$true] %s1810_s1 }
 0x18f   : > { %s15454_s11 = scalar_lea.hbm %s16443_s20, 256 }
 0x190   : > { %p15455_p5 = scmp.ne.s32.totalorder %s16443_s20, %s15454_s11  ;;  %p15460_p12 = scmp.lt.u32.totalorder %s15454_s11, %s16443_s20 }
 0x192   : > { %p15456_p6 = pnand %p15455_p5, %p14941_p10 }
 0x194   : > { %p15457_p11 = pneg %p15456_p6 }
 0x196   : > { %p15462_p13 = pnand %p15460_p12, %p15457_p11 }
 0x198   : > { %15465 = shalt.err (!%p15462_p13)
}
 0x199   : > { %s15466_s0 = scalar_lea.vmem %s1772_s2, 256  ;;  %p15473_p3 = scmp.lt.s32.totalorder %s1772_s2, %s1772_s2 }
 0x19a   : > { %p15467_p0 = scmp.ne.s32.totalorder %s1772_s2, %s15466_s0  ;;  %p15474_p4 = scmp.lt.s32.totalorder %s15466_s0, %s15466_s0 }
 0x19c   : > { %p15468_p1 = pnand %p15467_p0, %p14941_p10  ;;  %p15475_p7 = por %p15474_p4, %p15473_p3 }
 0x19e   : > { %p15469_p2 = pneg %p15468_p1 }
 0x1a0   : > { %p15476_p8 = pnand %p15475_p7, %p15469_p2 }
 0x1a2   : > { %15479 = shalt.err (!%p15476_p8)
}
 0x1a3   : > { %14854 = dma.hbm_to_vmem [thread:$0]  (%p14941_p10), %s16443_s20, 256, %s1772_s2, [#allocation39], %s18145_s16, %s18145_s16, %s18144_s7  }
 0x1a4   : > { %s15480_s26 = scalar_lea.hbm %s18132_s6, 16 }
 0x1a5   : > { %p15481_p5 = scmp.ne.s32.totalorder %s18132_s6, %s15480_s26  ;;  %p15486_p12 = scmp.lt.u32.totalorder %s15480_s26, %s18132_s6 }
 0x1a7   : > { %p15482_p6 = pnand %p15481_p5, %p14941_p10 }
 0x1a9   : > { %p15483_p11 = pneg %p15482_p6 }
 0x1ab   : > { %p15488_p13 = pnand %p15486_p12, %p15483_p11 }
 0x1ad   : > { %15491 = shalt.err (!%p15488_p13)
}
 0x1ae   : > { %s15492_s23 = scalar_lea.vmem %s16755_s1, 16  ;;  %s15498_s10 = scalar_lea.vmem %s16755_s1, 32 }
 0x1af   : > { %p15493_p0 = scmp.ne.s32.totalorder %s16755_s1, %s15492_s23  ;;  %p15499_p3 = scmp.lt.s32.totalorder %s16755_s1, %s16755_s1 }
 0x1b0   : > { %p15500_p4 = scmp.lt.s32.totalorder %s15498_s10, %s15492_s23 }
 0x1b1   : > { %p15494_p1 = pnand %p15493_p0, %p14941_p10 }
 0x1b2   : > { %p15501_p7 = por %p15500_p4, %p15499_p3 }
 0x1b3   : > { %p15495_p2 = pneg %p15494_p1 }
 0x1b5   : > { %p15502_p8 = pnand %p15501_p7, %p15495_p2 }
 0x1b7   : > { %15505 = shalt.err (!%p15502_p8)
}
 0x1b8   : > { %14858 = dma.hbm_to_vmem [thread:$0]  (%p14941_p10), %s18132_s6, 16, %s16755_s1, [#allocation42]  }
 0x1b9   : > { %s16208_s2 = smov [#allocation44]   ;;  %s16209_s0 = smov [#allocation47]  }
 0x1ba   : > { %s1835_s11 = sshll.u32 %s16208_s2, 4  ;;  %s1862_s26 = sshll.u32 %s16209_s0, 4  ;;  %s1836_s11 = int_to_ptr.vmem [resolvable:$true] %s1835_s11  ;;  %s16786_s26 = int_to_ptr.vmem [resolvable:$true] %s1862_s26 }
 0x1bb   : > { %s15506_s23 = scalar_lea.hbm %s16488_s12, 16 }
 0x1bc   : > { %p15507_p5 = scmp.ne.s32.totalorder %s16488_s12, %s15506_s23  ;;  %p15512_p12 = scmp.lt.u32.totalorder %s15506_s23, %s16488_s12 }
 0x1be   : > { %p15508_p6 = pnand %p15507_p5, %p14941_p10 }
 0x1c0   : > { %p15509_p11 = pneg %p15508_p6 }
 0x1c2   : > { %p15514_p13 = pnand %p15512_p12, %p15509_p11 }
 0x1c4   : > { %15517 = shalt.err (!%p15514_p13)
}
 0x1c5   : > { %s15518_s10 = scalar_lea.vmem %s1836_s11, 16  ;;  %s15524_s1 = scalar_lea.vmem %s1836_s11, 32 }
 0x1c6   : > { %p15519_p0 = scmp.ne.s32.totalorder %s1836_s11, %s15518_s10  ;;  %p15525_p3 = scmp.lt.s32.totalorder %s1836_s11, %s1836_s11 }
 0x1c7   : > { %p15526_p4 = scmp.lt.s32.totalorder %s15524_s1, %s15518_s10 }
 0x1c8   : > { %p15520_p1 = pnand %p15519_p0, %p14941_p10 }
 0x1c9   : > { %p15527_p7 = por %p15526_p4, %p15525_p3 }
 0x1ca   : > { %p15521_p2 = pneg %p15520_p1 }
 0x1cc   : > { %p15528_p8 = pnand %p15527_p7, %p15521_p2 }
 0x1ce   : > { %15531 = shalt.err (!%p15528_p8)
}
 0x1cf   : > { %s18146_s2 = sld [smem:[#allocation113_spill]] }
 0x1d0   : > { %14862 = dma.hbm_to_vmem [thread:$0]  (%p14941_p10), %s16488_s12, 16, %s1836_s11, [#allocation45]  }
 0x1d5   : > { %s15532_s0 = scalar_lea.hbm %s18146_s2, 16 }
 0x1d6   : > { %p15533_p5 = scmp.ne.s32.totalorder %s18146_s2, %s15532_s0  ;;  %p15538_p12 = scmp.lt.u32.totalorder %s15532_s0, %s18146_s2 }
 0x1d8   : > { %p15534_p6 = pnand %p15533_p5, %p14941_p10 }
 0x1da   : > { %p15535_p11 = pneg %p15534_p6 }
 0x1dc   : > { %p15540_p13 = pnand %p15538_p12, %p15535_p11 }
 0x1de   : > { %15543 = shalt.err (!%p15540_p13)
}
 0x1df   : > { %s15544_s23 = scalar_lea.vmem %s16786_s26, 16  ;;  %s15550_s10 = scalar_lea.vmem %s16786_s26, 32 }
 0x1e0   : > { %p15545_p0 = scmp.ne.s32.totalorder %s16786_s26, %s15544_s23  ;;  %p15551_p3 = scmp.lt.s32.totalorder %s16786_s26, %s16786_s26 }
 0x1e1   : > { %p15552_p4 = scmp.lt.s32.totalorder %s15550_s10, %s15544_s23 }
 0x1e2   : > { %p15546_p1 = pnand %p15545_p0, %p14941_p10 }
 0x1e3   : > { %p15553_p7 = por %p15552_p4, %p15551_p3 }
 0x1e4   : > { %p15547_p2 = pneg %p15546_p1 }
 0x1e6   : > { %p15554_p8 = pnand %p15553_p7, %p15547_p2 }
 0x1e8   : > { %15557 = shalt.err (!%p15554_p8)
}
 0x1e9   : > { %s18147_s11 = sld [smem:[#allocation73_spill]]  ;;  %s16210_s1 = smov [#allocation2]  }
 0x1ea   : > { %14866 = dma.hbm_to_vmem [thread:$0]  (%p14941_p10), %s18146_s2, 16, %s16786_s26, [#allocation48]  }
 0x1eb   : > { %s1455_s0 = sshll.u32 %s16210_s1, 4  ;;  %s16211_s4 = smov [#allocation7]   ;;  %s1456_s0 = int_to_ptr.vmem [resolvable:$true] %s1455_s0 }
 0x1ec   : > { %s1484_s6 = sshll.u32 %s16211_s4, 4  ;;  %s1485_s6 = int_to_ptr.vmem [resolvable:$true] %s1484_s6 }
 0x1ef   : > { %s15558_s8 = scalar_lea.hbm %s18147_s11, 1024 }
 0x1f0   : > { %p15559_p5 = scmp.ne.s32.totalorder %s18147_s11, %s15558_s8  ;;  %p15564_p12 = scmp.lt.u32.totalorder %s15558_s8, %s18147_s11 }
 0x1f2   : > { %p15560_p6 = pnand %p15559_p5, %p14941_p10 }
 0x1f4   : > { %p15561_p11 = pneg %p15560_p6 }
 0x1f6   : > { %p15566_p13 = pnand %p15564_p12, %p15561_p11 }
 0x1f8   : > { %15569 = shalt.err (!%p15566_p13)
}
 0x1f9   : > { %s15570_s23 = scalar_lea.vmem %s1456_s0, 1024  ;;  %p15577_p3 = scmp.lt.s32.totalorder %s1456_s0, %s1456_s0 }
 0x1fa   : > { %p15571_p0 = scmp.ne.s32.totalorder %s1456_s0, %s15570_s23  ;;  %p15578_p4 = scmp.lt.s32.totalorder %s15570_s23, %s15570_s23 }
 0x1fc   : > { %p15572_p1 = pnand %p15571_p0, %p14941_p10  ;;  %p15579_p7 = por %p15578_p4, %p15577_p3 }
 0x1fe   : > { %p15573_p2 = pneg %p15572_p1 }
 0x200   : > { %p15580_p8 = pnand %p15579_p7, %p15573_p2 }
 0x202   : > { %15583 = shalt.err (!%p15580_p8)
}
 0x203   : > { %s18148_s8 = sld [smem:[#allocation75_spill]] }
 0x204   : > { %14808 = dma.hbm_to_vmem [thread:$0]  (%p14941_p10), %s18147_s11, 1024, %s1456_s0, [#allocation3], %s18145_s16, %s18145_s16, %s18144_s7  }
 0x209   : > { %s15584_s4 = scalar_lea.hbm %s18148_s8, 768 }
 0x20a   : > { %p15585_p5 = scmp.ne.s32.totalorder %s18148_s8, %s15584_s4  ;;  %p15590_p12 = scmp.lt.u32.totalorder %s15584_s4, %s18148_s8 }
 0x20c   : > { %p15586_p6 = pnand %p15585_p5, %p14941_p10 }
 0x20e   : > { %p15587_p11 = pneg %p15586_p6 }
 0x210   : > { %p15592_p13 = pnand %p15590_p12, %p15587_p11 }
 0x212   : > { %15595 = shalt.err (!%p15592_p13)
}
 0x213   : > { %s15596_s26 = scalar_lea.vmem %s1485_s6, 768  ;;  %p15603_p3 = scmp.lt.s32.totalorder %s1485_s6, %s1485_s6 }
 0x214   : > { %p15597_p0 = scmp.ne.s32.totalorder %s1485_s6, %s15596_s26  ;;  %p15604_p4 = scmp.lt.s32.totalorder %s15596_s26, %s15596_s26 }
 0x216   : > { %p15598_p1 = pnand %p15597_p0, %p14941_p10  ;;  %p15605_p7 = por %p15604_p4, %p15603_p3 }
 0x218   : > { %p15599_p2 = pneg %p15598_p1 }
 0x21a   : > { %p15606_p8 = pnand %p15605_p7, %p15599_p2 }
 0x21c   : > { %15609 = shalt.err (!%p15606_p8)
}
 0x21d   : > { %s18149_s10 = sld [smem:[#allocation76_spill]]  ;;  %s16212_s1 = smov [#allocation10]  }
 0x21e   : > { %14812 = dma.hbm_to_vmem [thread:$0]  (%p14941_p10), %s18148_s8, 768, %s1485_s6, [#allocation6], %s18145_s16, %s18145_s16, %s18144_s7  }
 0x21f   : > { %s1510_s0 = sshll.u32 %s16212_s1, 4  ;;  %s16213_s23 = smov [#allocation13]   ;;  %s1511_s0 = int_to_ptr.vmem [resolvable:$true] %s1510_s0 }
 0x220   : > { %s1552_s4 = sshll.u32 %s16213_s23, 4  ;;  %s1553_s4 = int_to_ptr.vmem [resolvable:$true] %s1552_s4 }
 0x223   : > { %s15610_s26 = scalar_lea.hbm %s18149_s10, 384 }
 0x224   : > { %p15611_p5 = scmp.ne.s32.totalorder %s18149_s10, %s15610_s26  ;;  %p15616_p12 = scmp.lt.u32.totalorder %s15610_s26, %s18149_s10 }
 0x226   : > { %p15612_p6 = pnand %p15611_p5, %p14941_p10 }
 0x228   : > { %p15613_p11 = pneg %p15612_p6 }
 0x22a   : > { %p15618_p13 = pnand %p15616_p12, %p15613_p11 }
 0x22c   : > { %15621 = shalt.err (!%p15618_p13)
}
 0x22d   : > { %s15622_s2 = scalar_lea.vmem %s1511_s0, 384  ;;  %p15629_p3 = scmp.lt.s32.totalorder %s1511_s0, %s1511_s0 }
 0x22e   : > { %p15623_p0 = scmp.ne.s32.totalorder %s1511_s0, %s15622_s2  ;;  %p15630_p4 = scmp.lt.s32.totalorder %s15622_s2, %s15622_s2 }
 0x230   : > { %p15624_p1 = pnand %p15623_p0, %p14941_p10  ;;  %p15631_p7 = por %p15630_p4, %p15629_p3 }
 0x232   : > { %p15625_p2 = pneg %p15624_p1 }
 0x234   : > { %p15632_p8 = pnand %p15631_p7, %p15625_p2 }
 0x236   : > { %15635 = shalt.err (!%p15632_p8)
}
 0x237   : > { %s18150_s6 = sld [smem:[#allocation83_spill]] }
 0x238   : > { %14816 = dma.hbm_to_vmem [thread:$0]  (%p14941_p10), %s18149_s10, 384, %s1511_s0, [#allocation9], %s18145_s16, %s18145_s16, %s18144_s7  }
 0x23d   : > { %s15636_s1 = scalar_lea.hbm %s18150_s6, 16 }
 0x23e   : > { %p15637_p5 = scmp.ne.s32.totalorder %s18150_s6, %s15636_s1  ;;  %p15642_p12 = scmp.lt.u32.totalorder %s15636_s1, %s18150_s6 }
 0x240   : > { %p15638_p6 = pnand %p15637_p5, %p14941_p10 }
 0x242   : > { %p15639_p11 = pneg %p15638_p6 }
 0x244   : > { %p15644_p13 = pnand %p15642_p12, %p15639_p11 }
 0x246   : > { %15647 = shalt.err (!%p15644_p13)
}
 0x247   : > { %s15648_s2 = scalar_lea.vmem %s1553_s4, 16  ;;  %s15654_s23 = scalar_lea.vmem %s1553_s4, 32 }
 0x248   : > { %p15649_p0 = scmp.ne.s32.totalorder %s1553_s4, %s15648_s2  ;;  %p15655_p3 = scmp.lt.s32.totalorder %s1553_s4, %s1553_s4 }
 0x249   : > { %p15656_p4 = scmp.lt.s32.totalorder %s15654_s23, %s15648_s2 }
 0x24a   : > { %p15650_p1 = pnand %p15649_p0, %p14941_p10 }
 0x24b   : > { %p15657_p7 = por %p15656_p4, %p15655_p3 }
 0x24c   : > { %p15651_p2 = pneg %p15650_p1 }
 0x24e   : > { %p15658_p8 = pnand %p15657_p7, %p15651_p2 }
 0x250   : > { %15661 = shalt.err (!%p15658_p8)
}
 0x251   : > { %s18151_s0 = sld [smem:[#allocation88_spill]]  ;;  %s16214_s26 = smov [#allocation16]  }
 0x252   : > { %14820 = dma.hbm_to_vmem [thread:$0]  (%p14941_p10), %s18150_s6, 16, %s1553_s4, [#allocation12]  }
 0x253   : > { %s1583_s1 = sshll.u32 %s16214_s26, 4  ;;  %s16215_s9 = smov [#allocation19]   ;;  %s1584_s1 = int_to_ptr.vmem [resolvable:$true] %s1583_s1 }
 0x254   : > { %s1611_s10 = sshll.u32 %s16215_s9, 4  ;;  %s1612_s10 = int_to_ptr.vmem [resolvable:$true] %s1611_s10 }
 0x257   : > { %s18152_s8 = smov %s18151_s0  ;;  %s15662_s11 = scalar_lea.hbm %s18151_s0, 16 }
 0x258   : > { %p15663_p5 = scmp.ne.s32.totalorder %s18152_s8, %s15662_s11  ;;  %p15668_p12 = scmp.lt.u32.totalorder %s15662_s11, %s18152_s8 }
 0x25a   : > { %p15664_p6 = pnand %p15663_p5, %p14941_p10 }
 0x25c   : > { %p15665_p11 = pneg %p15664_p6 }
 0x25e   : > { %p15670_p13 = pnand %p15668_p12, %p15665_p11 }
 0x260   : > { %15673 = shalt.err (!%p15670_p13)
}
 0x261   : > { %s15674_s2 = scalar_lea.vmem %s1584_s1, 16  ;;  %s15680_s4 = scalar_lea.vmem %s1584_s1, 32 }
 0x262   : > { %p15675_p0 = scmp.ne.s32.totalorder %s1584_s1, %s15674_s2  ;;  %p15681_p3 = scmp.lt.s32.totalorder %s1584_s1, %s1584_s1 }
 0x263   : > { %p15682_p4 = scmp.lt.s32.totalorder %s15680_s4, %s15674_s2 }
 0x264   : > { %p15676_p1 = pnand %p15675_p0, %p14941_p10 }
 0x265   : > { %p15683_p7 = por %p15682_p4, %p15681_p3 }
 0x266   : > { %p15677_p2 = pneg %p15676_p1 }
 0x268   : > { %p15684_p8 = pnand %p15683_p7, %p15677_p2 }
 0x26a   : > { %15687 = shalt.err (!%p15684_p8)
}
 0x26b   : > { %s18153_s9 = sld [smem:[#allocation91_spill]] }
 0x26c   : > { %14824 = dma.hbm_to_vmem [thread:$0]  (%p14941_p10), %s18152_s8, 16, %s1584_s1, [#allocation15]  }
 0x271   : > { %s15688_s11 = scalar_lea.hbm %s18153_s9, 16 }
 0x272   : > { %p15689_p5 = scmp.ne.s32.totalorder %s18153_s9, %s15688_s11  ;;  %p15694_p12 = scmp.lt.u32.totalorder %s15688_s11, %s18153_s9 }
 0x274   : > { %p15690_p6 = pnand %p15689_p5, %p14941_p10 }
 0x276   : > { %p15691_p11 = pneg %p15690_p6 }
 0x278   : > { %p15696_p13 = pnand %p15694_p12, %p15691_p11 }
 0x27a   : > { %15699 = shalt.err (!%p15696_p13)
}
 0x27b   : > { %s15700_s23 = scalar_lea.vmem %s1612_s10, 16  ;;  %s15706_s0 = scalar_lea.vmem %s1612_s10, 32 }
 0x27c   : > { %p15701_p0 = scmp.ne.s32.totalorder %s1612_s10, %s15700_s23  ;;  %p15707_p3 = scmp.lt.s32.totalorder %s1612_s10, %s1612_s10 }
 0x27d   : > { %p15708_p4 = scmp.lt.s32.totalorder %s15706_s0, %s15700_s23 }
 0x27e   : > { %p15702_p1 = pnand %p15701_p0, %p14941_p10 }
 0x27f   : > { %p15709_p7 = por %p15708_p4, %p15707_p3 }
 0x280   : > { %p15703_p2 = pneg %p15702_p1 }
 0x282   : > { %p15710_p8 = pnand %p15709_p7, %p15703_p2 }
 0x284   : > { %15713 = shalt.err (!%p15710_p8)
}
 0x285   : > { %s18154_s26 = sld [smem:[#allocation93_spill]]  ;;  %s16216_s2 = smov [#allocation22]  }
 0x286   : > { %14828 = dma.hbm_to_vmem [thread:$0]  (%p14941_p10), %s18153_s9, 16, %s1612_s10, [#allocation18]  }
 0x287   : > { %s1635_s4 = sshll.u32 %s16216_s2, 4  ;;  %s16217_s11 = smov [#allocation25]   ;;  %s1636_s4 = int_to_ptr.vmem [resolvable:$true] %s1635_s4 }
 0x288   : > { %s1659_s6 = sshll.u32 %s16217_s11, 4  ;;  %s1660_s6 = int_to_ptr.vmem [resolvable:$true] %s1659_s6 }
 0x28b   : > { %s18155_s1 = smov %s18154_s26  ;;  %s15714_s8 = scalar_lea.hbm %s18154_s26, 3072 }
 0x28c   : > { %p15715_p5 = scmp.ne.s32.totalorder %s18155_s1, %s15714_s8  ;;  %p15720_p12 = scmp.lt.u32.totalorder %s15714_s8, %s18155_s1 }
 0x28e   : > { %p15716_p6 = pnand %p15715_p5, %p14941_p10 }
 0x290   : > { %p15717_p11 = pneg %p15716_p6 }
 0x292   : > { %p15722_p13 = pnand %p15720_p12, %p15717_p11 }
 0x294   : > { %15725 = shalt.err (!%p15722_p13)
}
 0x295   : > { %s15726_s23 = scalar_lea.vmem %s1636_s4, 3072  ;;  %p15733_p3 = scmp.lt.s32.totalorder %s1636_s4, %s1636_s4 }
 0x296   : > { %p15727_p0 = scmp.ne.s32.totalorder %s1636_s4, %s15726_s23  ;;  %p15734_p4 = scmp.lt.s32.totalorder %s15726_s23, %s15726_s23 }
 0x298   : > { %p15728_p1 = pnand %p15727_p0, %p14941_p10  ;;  %p15735_p7 = por %p15734_p4, %p15733_p3 }
 0x29a   : > { %p15729_p2 = pneg %p15728_p1 }
 0x29c   : > { %p15736_p8 = pnand %p15735_p7, %p15729_p2 }
 0x29e   : > { %15739 = shalt.err (!%p15736_p8)
}
 0x29f   : > { %s18156_s8 = sld [smem:[#allocation94_spill]] }
 0x2a0   : > { %14832 = dma.hbm_to_vmem [thread:$0]  (%p14941_p10), %s18155_s1, 3072, %s1636_s4, [#allocation21], %s18145_s16, %s18145_s16, %s18144_s7  }
 0x2a5   : > { %s15740_s10 = scalar_lea.hbm %s18156_s8, 3072 }
 0x2a6   : > { %p15741_p5 = scmp.ne.s32.totalorder %s18156_s8, %s15740_s10  ;;  %p15746_p12 = scmp.lt.u32.totalorder %s15740_s10, %s18156_s8 }
 0x2a8   : > { %p15742_p6 = pnand %p15741_p5, %p14941_p10 }
 0x2aa   : > { %p15743_p11 = pneg %p15742_p6 }
 0x2ac   : > { %p15748_p13 = pnand %p15746_p12, %p15743_p11 }
 0x2ae   : > { %15751 = shalt.err (!%p15748_p13)
}
 0x2af   : > { %s15752_s0 = scalar_lea.vmem %s1660_s6, 3072  ;;  %p15759_p3 = scmp.lt.s32.totalorder %s1660_s6, %s1660_s6 }
 0x2b0   : > { %p15753_p0 = scmp.ne.s32.totalorder %s1660_s6, %s15752_s0  ;;  %p15760_p4 = scmp.lt.s32.totalorder %s15752_s0, %s15752_s0 }
 0x2b2   : > { %p15754_p1 = pnand %p15753_p0, %p14941_p10  ;;  %p15761_p7 = por %p15760_p4, %p15759_p3 }
 0x2b4   : > { %p15755_p2 = pneg %p15754_p1 }
 0x2b6   : > { %p15762_p8 = pnand %p15761_p7, %p15755_p2 }
 0x2b8   : > { %15765 = shalt.err (!%p15762_p8)
}
 0x2b9   : > { %s18157_s26 = sld [smem:[#allocation96_spill]]  ;;  %s16218_s4 = smov [#allocation28]  }
 0x2ba   : > { %14836 = dma.hbm_to_vmem [thread:$0]  (%p14941_p10), %s18156_s8, 3072, %s1660_s6, [#allocation24], %s18145_s16, %s18145_s16, %s18144_s7  }
 0x2bb   : > { %s1687_s11 = sshll.u32 %s16218_s4, 4  ;;  %s16219_s23 = smov [#allocation31]   ;;  %s1688_s11 = int_to_ptr.vmem [resolvable:$true] %s1687_s11 }
 0x2bc   : > { %s1711_s10 = sshll.u32 %s16219_s23, 4  ;;  %s1712_s10 = int_to_ptr.vmem [resolvable:$true] %s1711_s10 }
 0x2bf   : > { %s18158_s2 = smov %s18157_s26  ;;  %s15766_s0 = scalar_lea.hbm %s18157_s26, 16 }
 0x2c0   : > { %p15767_p5 = scmp.ne.s32.totalorder %s18158_s2, %s15766_s0  ;;  %p15772_p12 = scmp.lt.u32.totalorder %s15766_s0, %s18158_s2 }
 0x2c2   : > { %p15768_p6 = pnand %p15767_p5, %p14941_p10 }
 0x2c4   : > { %p15769_p11 = pneg %p15768_p6 }
 0x2c6   : > { %p15774_p13 = pnand %p15772_p12, %p15769_p11 }
 0x2c8   : > { %15777 = shalt.err (!%p15774_p13)
}
 0x2c9   : > { %s15778_s1 = scalar_lea.vmem %s1688_s11, 16  ;;  %s15784_s6 = scalar_lea.vmem %s1688_s11, 32 }
 0x2ca   : > { %p15779_p0 = scmp.ne.s32.totalorder %s1688_s11, %s15778_s1  ;;  %p15785_p3 = scmp.lt.s32.totalorder %s1688_s11, %s1688_s11 }
 0x2cb   : > { %p15786_p4 = scmp.lt.s32.totalorder %s15784_s6, %s15778_s1 }
 0x2cc   : > { %p15780_p1 = pnand %p15779_p0, %p14941_p10 }
 0x2cd   : > { %p15787_p7 = por %p15786_p4, %p15785_p3 }
 0x2ce   : > { %p15781_p2 = pneg %p15780_p1 }
 0x2d0   : > { %p15788_p8 = pnand %p15787_p7, %p15781_p2 }
 0x2d2   : > { %15791 = shalt.err (!%p15788_p8)
}
 0x2d3   : > { %s18159_s26 = sld [smem:[#allocation98_spill]] }
 0x2d4   : > { %14840 = dma.hbm_to_vmem [thread:$0]  (%p14941_p10), %s18158_s2, 16, %s1688_s11, [#allocation27]  }
 0x2d9   : > { %s18160_s4 = smov %s18159_s26  ;;  %s15792_s23 = scalar_lea.hbm %s18159_s26, 16 }
 0x2da   : > { %p15793_p5 = scmp.ne.s32.totalorder %s18160_s4, %s15792_s23  ;;  %p15798_p12 = scmp.lt.u32.totalorder %s15792_s23, %s18160_s4 }
 0x2dc   : > { %p15794_p6 = pnand %p15793_p5, %p14941_p10 }
 0x2de   : > { %p15795_p11 = pneg %p15794_p6 }
 0x2e0   : > { %p15800_p13 = pnand %p15798_p12, %p15795_p11 }
 0x2e2   : > { %15803 = shalt.err (!%p15800_p13)
}
 0x2e3   : > { %s15804_s1 = scalar_lea.vmem %s1712_s10, 16  ;;  %s15810_s0 = scalar_lea.vmem %s1712_s10, 32 }
 0x2e4   : > { %p15805_p0 = scmp.ne.s32.totalorder %s1712_s10, %s15804_s1  ;;  %p15811_p3 = scmp.lt.s32.totalorder %s1712_s10, %s1712_s10 }
 0x2e5   : > { %p15812_p4 = scmp.lt.s32.totalorder %s15810_s0, %s15804_s1 }
 0x2e6   : > { %p15806_p1 = pnand %p15805_p0, %p14941_p10 }
 0x2e7   : > { %p15813_p7 = por %p15812_p4, %p15811_p3 }
 0x2e8   : > { %p15807_p2 = pneg %p15806_p1 }
 0x2ea   : > { %p15814_p8 = pnand %p15813_p7, %p15807_p2 }
 0x2ec   : > { %15817 = shalt.err (!%p15814_p8)
}
 0x2ed   : > { %s18161_s11 = sld [smem:[#allocation100_spill]]  ;;  %s16220_s6 = smov [#allocation34]  }
 0x2ee   : > { %14844 = dma.hbm_to_vmem [thread:$0]  (%p14941_p10), %s18160_s4, 16, %s1712_s10, [#allocation30]  }
 0x2ef   : > { %s1736_s26 = sshll.u32 %s16220_s6, 4  ;;  %s16221_s23 = smov [#allocation37]   ;;  %s1737_s26 = int_to_ptr.vmem [resolvable:$true] %s1736_s26 }
 0x2f0   : > { %s1761_s2 = sshll.u32 %s16221_s23, 4  ;;  %s1762_s2 = int_to_ptr.vmem [resolvable:$true] %s1761_s2 }
 0x2f3   : > { %s15818_s8 = scalar_lea.hbm %s18161_s11, 128 }
 0x2f4   : > { %p15819_p5 = scmp.ne.s32.totalorder %s18161_s11, %s15818_s8  ;;  %p15824_p12 = scmp.lt.u32.totalorder %s15818_s8, %s18161_s11 }
 0x2f6   : > { %p15820_p6 = pnand %p15819_p5, %p14941_p10 }
 0x2f8   : > { %p15821_p11 = pneg %p15820_p6 }
 0x2fa   : > { %p15826_p13 = pnand %p15824_p12, %p15821_p11 }
 0x2fc   : > { %15829 = shalt.err (!%p15826_p13)
}
 0x2fd   : > { %s15830_s1 = scalar_lea.vmem %s1737_s26, 128  ;;  %p15837_p3 = scmp.lt.s32.totalorder %s1737_s26, %s1737_s26 }
 0x2fe   : > { %p15831_p0 = scmp.ne.s32.totalorder %s1737_s26, %s15830_s1  ;;  %p15838_p4 = scmp.lt.s32.totalorder %s15830_s1, %s15830_s1 }
 0x300   : > { %p15832_p1 = pnand %p15831_p0, %p14941_p10  ;;  %p15839_p7 = por %p15838_p4, %p15837_p3 }
 0x302   : > { %p15833_p2 = pneg %p15832_p1 }
 0x304   : > { %p15840_p8 = pnand %p15839_p7, %p15833_p2 }
 0x306   : > { %15843 = shalt.err (!%p15840_p8)
}
 0x307   : > { %s18162_s10 = sld [smem:[#allocation102_spill]] }
 0x308   : > { %14848 = dma.hbm_to_vmem [thread:$0]  (%p14941_p10), %s18161_s11, 128, %s1737_s26, [#allocation33]  }
 0x30d   : > { %s15844_s8 = scalar_lea.hbm %s18162_s10, 16 }
 0x30e   : > { %p15845_p5 = scmp.ne.s32.totalorder %s18162_s10, %s15844_s8  ;;  %p15850_p12 = scmp.lt.u32.totalorder %s15844_s8, %s18162_s10 }
 0x310   : > { %p15846_p6 = pnand %p15845_p5, %p14941_p10 }
 0x312   : > { %p15847_p11 = pneg %p15846_p6 }
 0x314   : > { %p15852_p13 = pnand %p15850_p12, %p15847_p11 }
 0x316   : > { %15855 = shalt.err (!%p15852_p13)
}
 0x317   : > { %s15856_s0 = scalar_lea.vmem %s1762_s2, 16  ;;  %s15862_s6 = scalar_lea.vmem %s1762_s2, 32 }
 0x318   : > { %p15857_p0 = scmp.ne.s32.totalorder %s1762_s2, %s15856_s0  ;;  %p15863_p3 = scmp.lt.s32.totalorder %s1762_s2, %s1762_s2 }
 0x319   : > { %p15864_p4 = scmp.lt.s32.totalorder %s15862_s6, %s15856_s0 }
 0x31a   : > { %p15858_p1 = pnand %p15857_p0, %p14941_p10 }
 0x31b   : > { %p15865_p7 = por %p15864_p4, %p15863_p3 }
 0x31c   : > { %p15859_p2 = pneg %p15858_p1 }
 0x31e   : > { %p15866_p8 = pnand %p15865_p7, %p15859_p2 }
 0x320   : > { %15869 = shalt.err (!%p15866_p8)
}
 0x321   : > { %s18163_s26 = sld [smem:[#allocation105_spill]]  ;;  %s16222_s23 = smov [#allocation40]  }
 0x322   : > { %14852 = dma.hbm_to_vmem [thread:$0]  (%p14941_p10), %s18162_s10, 16, %s1762_s2, [#allocation36]  }
 0x323   : > { %s1790_s8 = sshll.u32 %s16222_s23, 4  ;;  %s16223_s4 = smov [#allocation43]   ;;  %s1791_s8 = int_to_ptr.vmem [resolvable:$true] %s1790_s8 }
 0x324   : > { %s1821_s9 = sshll.u32 %s16223_s4, 4  ;;  %s1822_s9 = int_to_ptr.vmem [resolvable:$true] %s1821_s9 }
 0x327   : > { %s18164_s1 = smov %s18163_s26  ;;  %s15870_s11 = scalar_lea.hbm %s18163_s26, 256 }
 0x328   : > { %p15871_p5 = scmp.ne.s32.totalorder %s18164_s1, %s15870_s11  ;;  %p15876_p12 = scmp.lt.u32.totalorder %s15870_s11, %s18164_s1 }
 0x32a   : > { %p15872_p6 = pnand %p15871_p5, %p14941_p10 }
 0x32c   : > { %p15873_p11 = pneg %p15872_p6 }
 0x32e   : > { %p15878_p13 = pnand %p15876_p12, %p15873_p11 }
 0x330   : > { %15881 = shalt.err (!%p15878_p13)
}
 0x331   : > { %s15882_s0 = scalar_lea.vmem %s1791_s8, 256  ;;  %p15889_p3 = scmp.lt.s32.totalorder %s1791_s8, %s1791_s8 }
 0x332   : > { %p15883_p0 = scmp.ne.s32.totalorder %s1791_s8, %s15882_s0  ;;  %p15890_p4 = scmp.lt.s32.totalorder %s15882_s0, %s15882_s0 }
 0x334   : > { %p15884_p1 = pnand %p15883_p0, %p14941_p10  ;;  %p15891_p7 = por %p15890_p4, %p15889_p3 }
 0x336   : > { %p15885_p2 = pneg %p15884_p1 }
 0x338   : > { %p15892_p8 = pnand %p15891_p7, %p15885_p2 }
 0x33a   : > { %15895 = shalt.err (!%p15892_p8)
}
 0x33b   : > { %s18165_s2 = sld [smem:[#allocation109_spill]] }
 0x33c   : > { %14856 = dma.hbm_to_vmem [thread:$0]  (%p14941_p10), %s18164_s1, 256, %s1791_s8, [#allocation39], %s18145_s16, %s18145_s16, %s18144_s7  }
 0x341   : > { %s15896_s4 = scalar_lea.hbm %s18165_s2, 16 }
 0x342   : > { %p15897_p5 = scmp.ne.s32.totalorder %s18165_s2, %s15896_s4  ;;  %p15902_p12 = scmp.lt.u32.totalorder %s15896_s4, %s18165_s2 }
 0x344   : > { %p15898_p6 = pnand %p15897_p5, %p14941_p10 }
 0x346   : > { %p15899_p11 = pneg %p15898_p6 }
 0x348   : > { %p15904_p13 = pnand %p15902_p12, %p15899_p11 }
 0x34a   : > { %15907 = shalt.err (!%p15904_p13)
}
 0x34b   : > { %s15908_s11 = scalar_lea.vmem %s1822_s9, 16  ;;  %s15914_s6 = scalar_lea.vmem %s1822_s9, 32 }
 0x34c   : > { %p15909_p0 = scmp.ne.s32.totalorder %s1822_s9, %s15908_s11  ;;  %p15915_p3 = scmp.lt.s32.totalorder %s1822_s9, %s1822_s9 }
 0x34d   : > { %p15916_p4 = scmp.lt.s32.totalorder %s15914_s6, %s15908_s11 }
 0x34e   : > { %p15910_p1 = pnand %p15909_p0, %p14941_p10 }
 0x34f   : > { %p15917_p7 = por %p15916_p4, %p15915_p3 }
 0x350   : > { %p15911_p2 = pneg %p15910_p1 }
 0x352   : > { %p15918_p8 = pnand %p15917_p7, %p15911_p2 }
 0x354   : > { %15921 = shalt.err (!%p15918_p8)
}
 0x355   : > { %s18166_s7 = sld [smem:[#allocation112_spill]]  ;;  %s16224_s16 = smov [#allocation46]  }
 0x356   : > { %14860 = dma.hbm_to_vmem [thread:$0]  (%p14941_p10), %s18165_s2, 16, %s1822_s9, [#allocation42]  }
 0x357   : > { %s1848_s26 = sshll.u32 %s16224_s16, 4  ;;  %s1849_s26 = int_to_ptr.vmem [resolvable:$true] %s1848_s26 }
 0x35b   : > { %s15922_s23 = scalar_lea.hbm %s18166_s7, 32 }
 0x35c   : > { %p15923_p5 = scmp.ne.s32.totalorder %s18166_s7, %s15922_s23  ;;  %p15928_p12 = scmp.lt.u32.totalorder %s15922_s23, %s18166_s7 }
 0x35e   : > { %p15924_p6 = pnand %p15923_p5, %p14941_p10 }
 0x360   : > { %p15925_p11 = pneg %p15924_p6 }
 0x362   : > { %p15930_p13 = pnand %p15928_p12, %p15925_p11 }
 0x364   : > { %15933 = shalt.err (!%p15930_p13)
}
 0x365   : > { %s15934_s8 = scalar_lea.vmem %s1849_s26, 32  ;;  %p15941_p3 = scmp.lt.s32.totalorder %s1849_s26, %s1849_s26 }
 0x366   : > { %p15935_p0 = scmp.ne.s32.totalorder %s1849_s26, %s15934_s8  ;;  %p15942_p4 = scmp.lt.s32.totalorder %s15934_s8, %s15934_s8 }
 0x368   : > { %p15936_p1 = pnand %p15935_p0, %p14941_p10  ;;  %p15943_p7 = por %p15942_p4, %p15941_p3 }
 0x36a   : > { %p15937_p2 = pneg %p15936_p1 }
 0x36c   : > { %p15944_p8 = pnand %p15943_p7, %p15937_p2 }
 0x36e   : > { %15947 = shalt.err (!%p15944_p8)
}
 0x36f   : > { %s16225_s9 = smov 16   ;;  %s18167_s0 = sld [smem:[#allocation114_spill]] }
 0x370   : > { %s16226_s11 = smov 1   ;;  %s16227_s6 = smov [#allocation49]  }
 0x371   : > { %14864 = dma.hbm_to_vmem [thread:$0]  (%p14941_p10), %s18166_s7, 32, %s1849_s26, [#allocation45], %s16225_s9, %s16225_s9, %s16226_s11  }
 0x372   : > { %s1873_s16 = sshll.u32 %s16227_s6, 4  ;;  %s16228_s23 = smov [#allocation50]   ;;  %s1874_s16 = int_to_ptr.vmem [resolvable:$true] %s1873_s16 }
 0x373   : > { %s1884_s1 = sshll.u32 %s16228_s23, 4  ;;  %s16982_s1 = int_to_ptr.vmem [resolvable:$true] %s1884_s1 }
 0x375   : > { %s18168_s4 = smov %s18167_s0  ;;  %s15948_s8 = scalar_lea.hbm %s18167_s0, 16 }
 0x376   : > { %p15949_p5 = scmp.ne.s32.totalorder %s18168_s4, %s15948_s8  ;;  %p15954_p12 = scmp.lt.u32.totalorder %s15948_s8, %s18168_s4 }
 0x378   : > { %p15950_p6 = pnand %p15949_p5, %p14941_p10 }
 0x37a   : > { %p15951_p11 = pneg %p15950_p6 }
 0x37c   : > { %p15956_p13 = pnand %p15954_p12, %p15951_p11 }
 0x37e   : > { %15959 = shalt.err (!%p15956_p13)
}
 0x37f   : > { %s15960_s2 = scalar_lea.vmem %s1874_s16, 16  ;;  %s15966_s26 = scalar_lea.vmem %s1874_s16, 32 }
 0x380   : > { %p15961_p0 = scmp.ne.s32.totalorder %s1874_s16, %s15960_s2  ;;  %p15967_p3 = scmp.lt.s32.totalorder %s1874_s16, %s1874_s16 }
 0x381   : > { %p15968_p4 = scmp.lt.s32.totalorder %s15966_s26, %s15960_s2 }
 0x382   : > { %p15962_p1 = pnand %p15961_p0, %p14941_p10 }
 0x383   : > { %p15969_p7 = por %p15968_p4, %p15967_p3 }
 0x384   : > { %p15963_p2 = pneg %p15962_p1 }
 0x386   : > { %p15970_p8 = pnand %p15969_p7, %p15963_p2 }
 0x388   : > { %15973 = shalt.err (!%p15970_p8)
}
 0x389   : > { %s18169_s9 = sld [smem:[#allocation115_spill]] }
 0x38a   : > { %14868 = dma.hbm_to_vmem [thread:$0]  (%p14941_p10), %s18168_s4, 16, %s1874_s16, [#allocation48]  }
 0x38f   : > { %s15974_s0 = scalar_lea.hbm %s18169_s9, 16 }
 0x390   : > { %p15975_p5 = scmp.ne.s32.totalorder %s18169_s9, %s15974_s0  ;;  %p15980_p12 = scmp.lt.u32.totalorder %s15974_s0, %s18169_s9 }
 0x392   : > { %p15976_p6 = pnand %p15975_p5, %p14941_p10 }
 0x394   : > { %p15977_p11 = pneg %p15976_p6 }
 0x396   : > { %p15982_p13 = pnand %p15980_p12, %p15977_p11 }
 0x398   : > { %15985 = shalt.err (!%p15982_p13)
}
 0x399   : > { %s15986_s2 = scalar_lea.vmem %s16982_s1, 16  ;;  %s15992_s11 = scalar_lea.vmem %s16982_s1, 32 }
 0x39a   : > { %p15987_p0 = scmp.ne.s32.totalorder %s16982_s1, %s15986_s2  ;;  %p15993_p3 = scmp.lt.s32.totalorder %s16982_s1, %s16982_s1 }
 0x39b   : > { %p15994_p4 = scmp.lt.s32.totalorder %s15992_s11, %s15986_s2 }
 0x39c   : > { %p15988_p1 = pnand %p15987_p0, %p14941_p10 }
 0x39d   : > { %p15995_p7 = por %p15994_p4, %p15993_p3 }
 0x39e   : > { %p15989_p2 = pneg %p15988_p1 }
 0x3a0   : > { %p15996_p8 = pnand %p15995_p7, %p15989_p2 }
 0x3a2   : > { %15999 = shalt.err (!%p15996_p8)
}
 0x3a3   : > { %14870 = dma.hbm_to_vmem [thread:$0]  (%p14941_p10), %s18169_s9, 16, %s16982_s1, [#allocation51]  }
 0x3a4 PF: > { %1908 = sbr.rel (%p16588_p9) target bundleno = 12541 (0x30fd), region = 244  ;;  %p14973_p5 = scmp.eq.s32.totalorder (!%p16588_p9), %s16561_s28, 0 }
 0x3ab   : > { %16045 = dma.done.wait (%p14973_p5), [#allocation3], 1024  }
 0x3ac   : > { %16047 = vsyncadd (%p14973_p5), [#allocation3], 4294966272 }
 0x3ad   : > { %16049 = dma.done.wait (%p14973_p5), [#allocation6], 1024  }
 0x3ae   : > { %16051 = vsyncadd (%p14973_p5), [#allocation6], 4294966272 }
 0x3af   : > { %16053 = dma.done.wait (%p14973_p5), [#allocation9], 768  }
 0x3b0   : > { %16055 = vsyncadd (%p14973_p5), [#allocation9], 4294966528 }
 0x3b1   : > { %16057 = dma.done.wait (%p14973_p5), [#allocation12], 208  }
 0x3b2   : > { %16059 = vsyncadd (%p14973_p5), [#allocation12], 4294967088 }
 0x3b3   : > { %16061 = dma.done.wait (%p14973_p5), [#allocation15], 32  }
 0x3b4   : > { %16063 = vsyncadd (%p14973_p5), [#allocation15], 4294967264 }
 0x3b5   : > { %16065 = dma.done.wait (%p14973_p5), [#allocation18], 32  }
 0x3b6   : > { %16067 = vsyncadd (%p14973_p5), [#allocation18], 4294967264 }
 0x3b7   : > { %16069 = dma.done.wait (%p14973_p5), [#allocation21], 3088  }
 0x3b8   : > { %16071 = vsyncadd (%p14973_p5), [#allocation21], 4294964208 }
 0x3b9   : > { %16073 = dma.done.wait (%p14973_p5), [#allocation24], 3088  }
 0x3ba   : > { %16075 = vsyncadd (%p14973_p5), [#allocation24], 4294964208 }
 0x3bb   : > { %16077 = dma.done.wait (%p14973_p5), [#allocation27], 32  }
 0x3bc   : > { %16079 = vsyncadd (%p14973_p5), [#allocation27], 4294967264 }
 0x3bd   : > { %16081 = dma.done.wait (%p14973_p5), [#allocation30], 2320  }
 0x3be   : > { %16083 = vsyncadd (%p14973_p5), [#allocation30], 4294964976 }
 0x3bf   : > { %16085 = dma.done.wait (%p14973_p5), [#allocation33], 144  }
 0x3c0   : > { %16087 = vsyncadd (%p14973_p5), [#allocation33], 4294967152 }
 0x3c1   : > { %16089 = dma.done.wait (%p14973_p5), [#allocation36], 32  }
 0x3c2   : > { %16091 = vsyncadd (%p14973_p5), [#allocation36], 4294967264 }
 0x3c3   : > { %16093 = dma.done.wait (%p14973_p5), [#allocation39], 512  }
 0x3c4   : > { %16095 = vsyncadd (%p14973_p5), [#allocation39], 4294966784 }
 0x3c5   : > { %16097 = dma.done.wait (%p14973_p5), [#allocation42], 32  }
 0x3c6   : > { %16099 = vsyncadd (%p14973_p5), [#allocation42], 4294967264 }
 0x3c7   : > { %16101 = dma.done.wait (%p14973_p5), [#allocation45], 48  }
 0x3c8   : > { %16103 = vsyncadd (%p14973_p5), [#allocation45], 4294967248 }
 0x3c9   : > { %16105 = dma.done.wait (%p14973_p5), [#allocation48], 32  }
 0x3ca   : > { %16107 = vsyncadd (%p14973_p5), [#allocation48], 4294967264 }
 0x3cb   : > { %16109 = dma.done.wait (%p14973_p5), [#allocation51], 16  }
 0x3cc   : > { %16111 = vsyncadd (%p14973_p5), [#allocation51], 4294967280  ;;  %s18170_s18 = sld [smem:[#allocation71_spill]]  ;;  %p2181_p9 = scmp.lt.s32.totalorder %s16561_s28, 1  ;;  %vm2203_vm0 = vcmask 130048   ;;  %v17090_v2 = vld [vmem:[#allocation7 + $0x10] sm:$0xff] }
 0x3cd   : > { %12895 = vmatprep.mubr.msk.f32.mxu1 %vm2203_vm0, %v17090_v2  ;;  %v2201_v4 = vld [vmem:[#allocation7] sm:$0xff]  ;;  %v2376_v5 = vld [vmem:[#allocation29 + $0x30] sm:$0xff]  ;;  %v2377_v6 = vld [vmem:[#allocation29 + $0x38] sm:$0xff]  ;;  %vm2382_vm1 = vcmask 392192   ;;  %s18171_s23 = sld [smem:[#allocation92_spill]]  ;;  %vm2897_vm2 = vcmask 523264  }
 0x3ce   : > { %s17083_s1 = scalar_select %p2181_p9, %s16561_s28, 1  ;;  %12888 = vmatprep.mubr.msk.f32.mxu0 %vm2203_vm0, %v2201_v4  ;;  %v2378_v7 = vld [vmem:[#allocation29 + $0x40] sm:$0xff]  ;;  %v2379_v8 = vld [vmem:[#allocation29 + $0x48] sm:$0xff]  ;;  %v14056_v11 = vpack.c.bf16 %v2377_v6, %v2376_v5  ;;  %v2380_v14 = vld [vmem:[#allocation29 + $0x50] sm:$0xff]  ;;  %vm16230_vm3 = vmmov 0   ;;  %vm3718_vm4 = vcmask 64512  }
 0x3cf   : > { %v17095_v9 = vld [vmem:[#allocation7 + $0x18] sm:$0xff]  ;;  %v17097_v10 = vld [vmem:[#allocation7 + $0x8] sm:$0xff]  ;;  %v2546_v12 = vld [vmem:[#allocation7 + $0x20] sm:$0xff]  ;;  %v14060_v13 = vpack.c.bf16 %v2379_v8, %v2378_v7  ;;  %s18173_s26 = sld [smem:[#allocation95_spill]]  ;;  %s18175_s0 = sld [smem:[#allocation74_spill]]  ;;  %vm4678_vm5 = vcmask 31744  }
 0x3d0   : > { %s17086_s6 = sshll.u32 %s17083_s1, 4  ;;  %v2381_v15 = vld [vmem:[#allocation29 + $0x58] sm:$0xff]  ;;  %v17104_v16 = vld [vmem:[#allocation7 + $0x28] sm:$0xff]  ;;  %v2285_v18 = vld [vmem:[#allocation29] sm:$0xff]  ;;  %vm4685_vm6 = vcmask 1043456   ;;  %s18185_s5 = sld [smem:[#allocation117_spill]] }
 0x3d1   : > { %v14064_v17 = vpack.c.bf16 %v2381_v15, %v2380_v14  ;;  %v2286_v19 = vld [vmem:[#allocation29 + $0x8] sm:$0xff]  ;;  %v2287_v21 = vld [vmem:[#allocation29 + $0x10] sm:$0xff]  ;;  %v2288_v22 = vld [vmem:[#allocation29 + $0x18] sm:$0xff]  ;;  %vm5731_vm12 = vcmask 7168   ;;  %vm5734_vm15 = vcmask 0   ;;  %p18215_p6 = scmp.ne.s32.totalorder %s18140_s15, 0 }
 0x3d2   : > { %s2185_s16 = scalar_lea.vmem %s18170_s18, %s17086_s6  ;;  %v14068_v20 = vpack.c.bf16 %v2286_v19, %v2285_v18  ;;  %v14072_v26 = vpack.c.bf16 %v2288_v22, %v2287_v21  ;;  %v2289_v28 = vld [vmem:[#allocation29 + $0x20] sm:$0xff]  ;;  %v2290_v29 = vld [vmem:[#allocation29 + $0x28] sm:$0xff]  ;;  %v2632_v36 = vld [vmem:[#allocation29 + $0x70] sm:$0xff]  ;;  %s18177_s18 = sld [smem:[#allocation72_spill]] }
 0x3d3   : > { %v2199_v0 = vld [vmem:[%s2185_s16] sm:$0xff]  ;;  %v2200_v1 = vld [vmem:[%s2185_s16 + $0x8] sm:$0xff]  ;;  %v14076_v31 = vpack.c.bf16 %v2290_v29, %v2289_v28  ;;  %v2631_v34 = vld [vmem:[#allocation29 + $0x68] sm:$0xff]  ;;  %s18172_s8 = smov %s18171_s23  ;;  %v16229_v28 = vmov 0.0|0.0   ;;  %v16231_v29 = vmov 0.0   ;;  %s18178_s16 = sld [smem:[#allocation101_spill]] }
 0x3d4   : > { %v14048_v3 = vpack.c.bf16 %v2200_v1, %v2199_v0  ;;  %v2630_v33 = vld [vmem:[#allocation29 + $0x60] sm:$0xff]  ;;  %v2633_v37 = vld [vmem:[#allocation29 + $0x78] sm:$0xff]  ;;  %v2635_v40 = vld [vmem:[#allocation29 + $0x88] sm:$0xff] }
 0x3d5   : > { %v14084_v35 = vpack.c.bf16 %v2631_v34, %v2630_v33  ;;  %v14088_v38 = vpack.c.bf16 %v2633_v37, %v2632_v36  ;;  %v2634_v39 = vld [vmem:[#allocation29 + $0x80] sm:$0xff]  ;;  %v11899_v42 = vld [vmem:[#allocation31] ss:$0 sm:$0xff]  ;;  %v11904_v50 = vld [vmem:[%s18171_s23 + $0x40] sm:$0xff]  ;;  %s18174_s2 = smov %s18173_s26  ;;  %s18176_s11 = smov %s18175_s0 }
 0x3d6   : > { %14053 = vmatprep.subr.bf16.mxu1 %v14048_v3  ;;  %14049 = vmatprep.subr.bf16.mxu0 %v14048_v3  ;;  %v14092_v41 = vpack.c.bf16 %v2635_v40, %v2634_v39  ;;  %v11905_v51 = vld [vmem:[%s18172_s8 + $0x48] sm:$0xff]  ;;  %v11906_v53 = vld [vmem:[%s18172_s8 + $0x50] sm:$0xff]  ;;  %v11907_v54 = vld [vmem:[%s18172_s8 + $0x58] sm:$0xff]  ;;  %s18179_s23 = sld [smem:[#allocation80_spill]] }
 0x3d7   : > { %14055 = vmatpush3.bf16.msra.mxu1 %v14048_v3  ;;  %14051 = vmatpush3.bf16.msra.mxu0 %v14048_v3  ;;  %v14104_v52 = vpack.c.bf16 %v11905_v51, %v11904_v50  ;;  %v14108_v55 = vpack.c.bf16 %v11907_v54, %v11906_v53  ;;  %v11908_v56 = vld [vmem:[%s18172_s8 + $0x60] sm:$0xff]  ;;  %v11909_v57 = vld [vmem:[%s18172_s8 + $0x68] sm:$0xff]  ;;  %v11910_v59 = vld [vmem:[%s18172_s8 + $0x70] sm:$0xff] }
 0x3d8   : > { %14081 = vmatprep.subr.bf16.mxu1 %v14048_v3  ;;  %14057 = vmatprep.subr.bf16.mxu0 %v14056_v11  ;;  %v14112_v58 = vpack.c.bf16 %v11909_v57, %v11908_v56  ;;  %v11911_v60 = vld [vmem:[%s18172_s8 + $0x78] sm:$0xff]  ;;  %v2805_v62 = vld [vmem:[%s18172_s8] sm:$0xff]  ;;  %v2806_v63 = vld [vmem:[%s18172_s8 + $0x8] sm:$0xff] }
 0x3d9   : > { %v14116_v61 = vpack.c.bf16 %v11911_v60, %v11910_v59  ;;  %v14120_v0 = vpack.c.bf16 %v2806_v63, %v2805_v62  ;;  %v2807_v5 = vld [vmem:[%s18172_s8 + $0x10] sm:$0xff]  ;;  %v2808_v6 = vld [vmem:[%s18172_s8 + $0x18] sm:$0xff]  ;;  %v11922_v22 = vld [vmem:[%s18172_s8 + $0xa0] sm:$0xff] }
 0x3da   : > { %12896 = vmatmul.mubr.msk.f32.vlgmr.msra.gmra.mrb[0].mxu1 %vm2203_vm0, %v17095_v9  ;;  %12889 = vmatmul.mubr.msk.f32.vlgmr.msra.gmra.mrb[0].mxu0 %vm2203_vm0, %v17097_v10  ;;  %v2812_v14 = vld [vmem:[%s18172_s8 + $0x38] sm:$0xff]  ;;  %v11920_v19 = vld [vmem:[%s18172_s8 + $0x90] sm:$0xff]  ;;  %v3315_v34 = vld [vmem:[#allocation25 + $0x18] sm:$0xff] }
 0x3db   : > { %14083 = vmatpush3.bf16.msra.mxu1 %v14048_v3  ;;  %12932 = vmatprep.mubr.msk.f32.mxu1 %vm2203_vm0, %v2546_v12  ;;  %v3314_v33 = vld [vmem:[#allocation25 + $0x10] sm:$0xff]  ;;  %v3316_v36 = vld [vmem:[#allocation25 + $0x20] sm:$0xff]  ;;  %v3317_v37 = vld [vmem:[#allocation25 + $0x28] sm:$0xff] }
 0x3dc   : > { %14059 = vmatpush3.bf16.msra.mxu0 %v14056_v11  ;;  %v2810_v11 = vld [vmem:[%s18172_s8 + $0x28] sm:$0xff]  ;;  %v3318_v39 = vld [vmem:[#allocation25 + $0x30] sm:$0xff]  ;;  %v3397_v53 = vld [vmem:[#allocation25 + $0x48] sm:$0xff] }
 0x3dd   : > { %14061 = vmatprep.subr.bf16.mxu0 %v14060_v13  ;;  %v3319_v40 = vld [vmem:[#allocation25 + $0x38] sm:$0xff]  ;;  %v3398_v56 = vld [vmem:[#allocation25 + $0x50] sm:$0xff]  ;;  %v3400_v59 = vld [vmem:[#allocation25 + $0x60] sm:$0xff] }
 0x3de   : > { %12933 = vmatmul.mubr.msk.f32.vlgmr.msra.gmra.mrb[2].mxu1 %vm2203_vm0, %v17104_v16  ;;  %v3238_v51 = vld [vmem:[#allocation8] sm:$0xff]  ;;  %v3321_v54 = vld [vmem:[#allocation8 + $0x8] sm:$0xff]  ;;  %v3401_v60 = vld [vmem:[#allocation25 + $0x68] sm:$0xff] }
 0x3df   : > { %12954 = vmatprep.mubr.msk.f32.mxu1 %vm2203_vm0, %v2201_v4  ;;  %v3399_v57 = vld [vmem:[#allocation25 + $0x58] sm:$0xff]  ;;  %v3402_v62 = vld [vmem:[#allocation25 + $0x70] sm:$0xff]  ;;  %vm17360_vm7 = vmpackc.low %vm3718_vm4, %vm3718_vm4 }
 0x3e0   : > { %14063 = vmatpush3.bf16.msra.mxu0 %v14060_v13  ;;  %v2811_v13 = vld [vmem:[%s18172_s8 + $0x30] sm:$0xff]  ;;  %v3403_v63 = vld [vmem:[#allocation25 + $0x78] sm:$0xff] }
 0x3e1   : > { %14065 = vmatprep.subr.bf16.mxu0 %v14064_v17  ;;  %v14132_v15 = vpack.c.bf16 %v2812_v14, %v2811_v13  ;;  %v3631_v13 = vld [vmem:[#allocation25 + $0xa8] sm:$0xff] }
 0x3e4   : > { %14067 = vmatpush3.bf16.msra.mxu0 %v14064_v17  ;;  %v11919_v17 = vld [vmem:[%s18172_s8 + $0x88] sm:$0xff] }
 0x3e5   : > { %14069 = vmatprep.subr.bf16.mxu0 %v14068_v20 }
 0x4ad   : > { %v12897_v23 = vpop.f32.mrb[0].mxu1  ;;  %v12890_v24 = vpop.f32.mrb[0].mxu0 }
 0x4ae   : > { %v2366_v25 = vpop.f32.mrb[1].mxu1  ;;  %v2276_v27 = vpop.f32.mrb[1].mxu0 }
 0x4af   : > { %12910 = vmatprep.mubr.msk.f32.mxu0 %vm2382_vm1, %v2366_v25  ;;  %v11924_v25 = vld [vmem:[%s18172_s8 + $0xb0] sm:$0xff] }
 0x4b0   : > { %12911 = vmatmul.mubr.msk.f32.vlgmr.msra.gmra.mrb[2].mxu0 %vm2382_vm1, %v12897_v23  ;;  %v11923_v23 = vld [vmem:[%s18172_s8 + $0xa8] sm:$0xff] }
 0x4b1   : > { %14071 = vmatpush3.bf16.msra.mxu0 %v14068_v20  ;;  %12925 = vmatprep.mubr.msk.f32.mxu0 %vm2382_vm1, %v2276_v27  ;;  %v12934_v30 = vpop.f32.mrb[2].mxu1  ;;  %v11921_v20 = vld [vmem:[%s18172_s8 + $0x98] sm:$0xff] }
 0x4b2   : > { %14073 = vmatprep.subr.bf16.mxu0 %v14072_v26  ;;  %v2620_v32 = vpop.f32.mrb[3].mxu1  ;;  %v14144_v21 = vpack.c.bf16 %v11921_v20, %v11920_v19 }
 0x4b5   : > { %14075 = vmatpush3.bf16.msra.mxu0 %v14072_v26  ;;  %v11925_v26 = vld [vmem:[%s18172_s8 + $0xb8] sm:$0xff] }
 0x4b6   : > { %14077 = vmatprep.subr.bf16.mxu0 %v14076_v31  ;;  %v14152_v27 = vpack.c.bf16 %v11925_v26, %v11924_v25  ;;  %v3876_v25 = vld [vmem:[#allocation22 + $0x40] sm:$0xff]  ;;  %v3877_v26 = vld [vmem:[#allocation22 + $0x48] sm:$0xff] }
 0x4b9   : > { %14079 = vmatpush3.bf16.msra.mxu0 %v14076_v31  ;;  %v3313_v31 = vld [vmem:[#allocation25 + $0x8] sm:$0xff] }
 0x4ba   : > { %14085 = vmatprep.subr.bf16.mxu0 %v14084_v35 }
 0x4bc   : > { %12926 = vmatmul.mubr.msk.f32.vlgmr.msra.gmra.mrb[2].mxu0 %vm2382_vm1, %v12890_v24  ;;  %v14148_v24 = vpack.c.bf16 %v11923_v23, %v11922_v22 }
 0x4bd   : > { %14087 = vmatpush3.bf16.msra.mxu0 %v14084_v35  ;;  %12947 = vmatprep.mubr.msk.f32.mxu0 %vm2382_vm1, %v2620_v32  ;;  %v14178_v35 = vpack.c.bf16 %v3315_v34, %v3314_v33  ;;  %v3880_v33 = vld [vmem:[#allocation22 + $0x60] sm:$0xff]  ;;  %v3881_v34 = vld [vmem:[#allocation22 + $0x68] sm:$0xff] }
 0x4be   : > { %14089 = vmatprep.subr.bf16.mxu0 %v14088_v38 }
 0x4c1   : > { %14091 = vmatpush3.bf16.msra.mxu0 %v14088_v38  ;;  %v14181_v38 = vpack.c.bf16 %v3317_v37, %v3316_v36  ;;  %v11935_v37 = vld [vmem:[#allocation26] ss:$0 sm:$0xff] }
 0x4c2   : > { %14093 = vmatprep.subr.bf16.mxu0 %v14092_v41 }
 0x4c5   : > { %14095 = vmatpush3.bf16.msra.mxu0 %v14092_v41  ;;  %v14184_v41 = vpack.c.bf16 %v3319_v40, %v3318_v39 }
 0x4c8   : > { %12948 = vmatmul.mubr.msk.f32.vlgmr.msra.gmra.mrb[2].mxu0 %vm2382_vm1, %v12934_v30  ;;  %v3312_v30 = vld [vmem:[#allocation25] sm:$0xff] }
 0x4c9   : > { %13006 = vmatprep.mubr.msk.f32.mxu0 %vm2203_vm0, %v2546_v12  ;;  %v14175_v32 = vpack.c.bf16 %v3313_v31, %v3312_v30  ;;  %v3878_v30 = vld [vmem:[#allocation22 + $0x50] sm:$0xff]  ;;  %v3879_v31 = vld [vmem:[#allocation22 + $0x58] sm:$0xff] }
 0x59b   : > { %v12949_v43 = vpop.f32.mrb[2].mxu0 }
 0x59c   : > { %v2727_v44 = vadd.f32 %v12949_v43, %v11899_v42  ;;  %v2708_v45 = vpop.f32.mrb[3].mxu0 }
 0x59d   : > { %v2726_v46 = vadd.f32 %v11899_v42, %v2708_v45  ;;  %v11928_v42 = vld [vmem:[#allocation20] ss:$0 sm:$0xff] }
 0x59e   : > { %v2729_v47 = vmax.f32 %v2727_v44, 0.0 }
 0x59f   : > { %v2728_v48 = vmax.f32 %v2726_v46, 0.0 }
 0x5a1   : > { %v17116_v49 = vpack.c.bf16 %v2729_v47, %v2728_v48 }
 0x5a3   : > { %14097 = vmatprep.subr.bf16.mxu1 %v17116_v49  ;;  %14137 = vmatprep.subr.bf16.mxu0 %v17116_v49 }
 0x5a4   : > { %14099 = vmatpush3.bf16.msra.mxu1 %v17116_v49  ;;  %14139 = vmatpush3.bf16.msra.mxu0 %v17116_v49 }
 0x5a5   : > { %14101 = vmatprep.subr.bf16.mxu1 %v17116_v49  ;;  %14156 = vmatprep.subr.bf16.mxu0 %v16229_v28 }
 0x5a7   : > { %12955 = vmatmul.mubr.msk.f32.vlgmr.msra.gmra.mrb[4].mxu1 %vm2203_vm0, %v17097_v10  ;;  %13007 = vmatmul.mubr.msk.f32.vlgmr.msra.gmra.mrb[4].mxu0 %vm2203_vm0, %v17104_v16  ;;  %v2809_v10 = vld [vmem:[%s18172_s8 + $0x20] sm:$0xff] }
 0x5a8   : > { %14103 = vmatpush3.bf16.msra.mxu1 %v17116_v49  ;;  %12961 = vmatprep.mubr.msk.f32.mxu1 %vm2203_vm0, %v17090_v2  ;;  %v14128_v12 = vpack.c.bf16 %v2810_v11, %v2809_v10  ;;  %v11918_v16 = vld [vmem:[%s18172_s8 + $0x80] sm:$0xff]  ;;  %s16232_s8 = smov [#allocation52]  }
 0x5a9   : > { %14105 = vmatprep.subr.bf16.mxu1 %v14104_v52  ;;  %v14140_v18 = vpack.c.bf16 %v11919_v17, %v11918_v16  ;;  %13032 = vmatprep.mubr.msk.f32.mxu0 %vm16230_vm3, %v16231_v29  ;;  %v3629_v10 = vld [vmem:[#allocation25 + $0x98] sm:$0xff]  ;;  %s16004_s9 = sshll.u32 %s16232_s8, 4  ;;  %s16005_s9 = int_to_ptr.vmem [resolvable:$false] %s16004_s9 }
 0x5aa   : > { %v3633_v16 = vld [vmem:[#allocation25 + $0xb8] sm:$0xff] }
 0x5ab   : > { %12962 = vmatmul.mubr.msk.f32.vlgmr.msra.gmra.mrb[6].mxu1 %vm2203_vm0, %v17095_v9  ;;  %v14124_v9 = vpack.c.bf16 %v2808_v6, %v2807_v5 }
 0x5ac   : > { %14107 = vmatpush3.bf16.msra.mxu1 %v14104_v52  ;;  %v3396_v52 = vld [vmem:[#allocation25 + $0x40] sm:$0xff] }
 0x5ad   : > { %14109 = vmatprep.subr.bf16.mxu1 %v14108_v55 }
 0x5b0   : > { %14111 = vmatpush3.bf16.msra.mxu1 %v14108_v55  ;;  %v14163_v55 = vpack.c.bf16 %v3397_v53, %v3396_v52  ;;  %v3797_v52 = vld [vmem:[#allocation22 + $0x28] sm:$0xff] }
 0x5b1   : > { %14113 = vmatprep.subr.bf16.mxu1 %v14112_v58 }
 0x5b4   : > { %14115 = vmatpush3.bf16.msra.mxu1 %v14112_v58  ;;  %v14166_v58 = vpack.c.bf16 %v3399_v57, %v3398_v56  ;;  %v3882_v57 = vld [vmem:[#allocation22 + $0x70] sm:$0xff] }
 0x5b5   : > { %14117 = vmatprep.subr.bf16.mxu1 %v14116_v61 }
 0x5b8   : > { %14119 = vmatpush3.bf16.msra.mxu1 %v14116_v61  ;;  %v14169_v61 = vpack.c.bf16 %v3401_v60, %v3400_v59  ;;  %v4106_v60 = vld [vmem:[#allocation22 + $0x80] sm:$0xff] }
 0x5b9   : > { %14121 = vmatprep.subr.bf16.mxu1 %v14120_v0 }
 0x67a   : > { %v12956_v1 = vpop.f32.mrb[4].mxu1  ;;  %v13008_v2 = vpop.f32.mrb[4].mxu0 }
 0x67b   : > { %v2796_v3 = vpop.f32.mrb[5].mxu1  ;;  %v3126_v4 = vpop.f32.mrb[5].mxu0 }
 0x67e   : > { %v12963_v7 = vpop.f32.mrb[6].mxu1 }
 0x67f   : > { %v2879_v8 = vpop.f32.mrb[7].mxu1 }
 0x680   : > { %12980 = vmatprep.mubr.msk.f32.mxu1 %vm2897_vm2, %v2879_v8 }
 0x681   : > { %12981 = vmatmul.mubr.msk.f32.vlgmr.msra.gmra.mrb[8].mxu1 %vm2897_vm2, %v12963_v7  ;;  %v3551_v7 = vld [vmem:[#allocation8 + $0x10] sm:$0xff] }
 0x682   : > { %14123 = vmatpush3.bf16.msra.mxu1 %v14120_v0  ;;  %12999 = vmatprep.mubr.msk.f32.mxu1 %vm2897_vm2, %v2796_v3  ;;  %v14172_v0 = vpack.c.bf16 %v3403_v63, %v3402_v62  ;;  %v3626_v3 = vld [vmem:[#allocation25 + $0x80] sm:$0xff] }
 0x683   : > { %14125 = vmatprep.subr.bf16.mxu1 %v14124_v9 }
 0x686   : > { %14127 = vmatpush3.bf16.msra.mxu1 %v14124_v9  ;;  %v3628_v9 = vld [vmem:[#allocation25 + $0x90] sm:$0xff] }
 0x687   : > { %14129 = vmatprep.subr.bf16.mxu1 %v14128_v12  ;;  %v14193_v11 = vpack.c.bf16 %v3629_v10, %v3628_v9  ;;  %v4112_v10 = vld [vmem:[#allocation22 + $0xb0] sm:$0xff] }
 0x68a   : > { %14131 = vmatpush3.bf16.msra.mxu1 %v14128_v12  ;;  %v3630_v12 = vld [vmem:[#allocation25 + $0xa0] sm:$0xff] }
 0x68b   : > { %14133 = vmatprep.subr.bf16.mxu1 %v14132_v15  ;;  %v14196_v14 = vpack.c.bf16 %v3631_v13, %v3630_v12 }
 0x68e   : > { %14135 = vmatpush3.bf16.msra.mxu1 %v14132_v15  ;;  %v3632_v15 = vld [vmem:[#allocation25 + $0xb0] sm:$0xff] }
 0x68f   : > { %14141 = vmatprep.subr.bf16.mxu1 %v14140_v18  ;;  %v14199_v17 = vpack.c.bf16 %v3633_v16, %v3632_v15 }
 0x691   : > { %13000 = vmatmul.mubr.msk.f32.vlgmr.msra.gmra.mrb[8].mxu1 %vm2897_vm2, %v12956_v1 }
 0x692   : > { %14143 = vmatpush3.bf16.msra.mxu1 %v14140_v18  ;;  %13025 = vmatprep.mubr.msk.f32.mxu1 %vm2897_vm2, %v3126_v4  ;;  %v3627_v4 = vld [vmem:[#allocation25 + $0x88] sm:$0xff] }
 0x693   : > { %14145 = vmatprep.subr.bf16.mxu1 %v14144_v21  ;;  %v14190_v8 = vpack.c.bf16 %v3627_v4, %v3626_v3 }
 0x696   : > { %14147 = vmatpush3.bf16.msra.mxu1 %v14144_v21 }
 0x697   : > { %14149 = vmatprep.subr.bf16.mxu1 %v14148_v24 }
 0x69a   : > { %14151 = vmatpush3.bf16.msra.mxu1 %v14148_v24 }
 0x69b   : > { %14153 = vmatprep.subr.bf16.mxu1 %v14152_v27 }
 0x69e   : > { %14155 = vmatpush3.bf16.msra.mxu1 %v14152_v27  ;;  %v14202_v27 = vpack.c.bf16 %v3877_v26, %v3876_v25  ;;  %v4275_v26 = vld [vmem:[%s18174_s2 + $0x20] sm:$0xff] }
 0x69f   : > { %14174 = vmatprep.subr.bf16.mxu1 %v16229_v28 }
 0x6a1   : > { %13026 = vmatmul.mubr.msk.f32.vlgmr.msra.gmra.mrb[8].mxu1 %vm2897_vm2, %v13008_v2 }
 0x6a2   : > { %13077 = vmatprep.mubr.msk.f32.mxu1 %vm16230_vm3, %v16231_v29  ;;  %14176 = vmatpush3.bf16.msra.mxu1 %v14175_v32  ;;  %v14205_v32 = vpack.c.bf16 %v3879_v31, %v3878_v30  ;;  %v4277_v31 = vld [vmem:[%s18174_s2 + $0x30] sm:$0xff] }
 0x6a3   : > { %14177 = vmatprep.subr.bf16.mxu1 %v16229_v28 }
 0x6a6   : > { %14179 = vmatpush3.bf16.msra.mxu1 %v14178_v35  ;;  %v14208_v35 = vpack.c.bf16 %v3881_v34, %v3880_v33 }
 0x6a7   : > { %14180 = vmatprep.subr.bf16.mxu1 %v16229_v28 }
 0x6aa   : > { %14182 = vmatpush3.bf16.msra.mxu1 %v14181_v38 }
 0x6ab   : > { %14183 = vmatprep.subr.bf16.mxu1 %v16229_v28 }
 0x6ae   : > { %14185 = vmatpush3.bf16.msra.mxu1 %v14184_v41 }
 0x6af   : > { %13106 = vmatprep.subr.mxu1 %v16231_v29 }
 0x774   : > { %v13027_v43 = vpop.f32.mrb[8].mxu1 }
 0x775   : > { %v3235_v44 = vadd.f32 %v13027_v43, %v11928_v42  ;;  %v3216_v45 = vpop.f32.mrb[9].mxu1  ;;  %v3792_v43 = vld [vmem:[#allocation22] sm:$0xff] }
 0x776   : > { %v3234_v46 = vadd.f32 %v11928_v42, %v3216_v45  ;;  %v3717_v42 = vld [vmem:[#allocation10] sm:$0xff]  ;;  %v3801_v45 = vld [vmem:[#allocation10 + $0x8] sm:$0xff] }
 0x777   : > { %v3237_v47 = vmax.f32 %v3235_v44, 0.0  ;;  %v3793_v44 = vld [vmem:[#allocation22 + $0x8] sm:$0xff] }
 0x778   : > { %v3236_v48 = vmax.f32 %v3234_v46, 0.0  ;;  %v14214_v46 = vpack.c.bf16 %v3793_v44, %v3792_v43  ;;  %v11946_v43 = vld [vmem:[%s18174_s2 + $0x48] sm:$0xff]  ;;  %v4280_v44 = vld [vmem:[#allocation11 + $0x4] sm:$0xf] }
 0x77a   : > { %v14157_v50 = vpack.c.bf16 %v3237_v47, %v3236_v48  ;;  %v3794_v47 = vld [vmem:[#allocation22 + $0x10] sm:$0xff]  ;;  %v3795_v48 = vld [vmem:[#allocation22 + $0x18] sm:$0xff] }
 0x77c   : > { %14158 = vmatpush3.bf16.msra.mxu0 %v14157_v50 }
 0x77d   : > { %14159 = vmatprep.subr.bf16.mxu0 %v16229_v28 }
 0x77f   : > { %13033 = vmatmul.mubr.msk.f32.vlgmr.msra.gmra.mrb[6].mxu0 %vm2203_vm0, %v3238_v51  ;;  %v3796_v51 = vld [vmem:[#allocation22 + $0x20] sm:$0xff] }
 0x780   : > { %14161 = vmatpush3.bf16.msra.mxu0 %v14157_v50  ;;  %13039 = vmatprep.mubr.msk.f32.mxu0 %vm16230_vm3, %v16231_v29  ;;  %v14220_v53 = vpack.c.bf16 %v3797_v52, %v3796_v51  ;;  %v11950_v51 = vld [vmem:[%s18174_s2 + $0x68] sm:$0xff] }
 0x781   : > { %14162 = vmatprep.subr.bf16.mxu0 %v16229_v28 }
 0x783   : > { %13040 = vmatmul.mubr.msk.f32.vlgmr.msra.gmra.mrb[8].mxu0 %vm2203_vm0, %v3321_v54  ;;  %v3798_v54 = vld [vmem:[#allocation22 + $0x30] sm:$0xff] }
 0x784   : > { %14164 = vmatpush3.bf16.msra.mxu0 %v14163_v55  ;;  %13058 = vmatprep.mubr.msk.f32.mxu0 %vm16230_vm3, %v16231_v29  ;;  %v3799_v55 = vld [vmem:[#allocation22 + $0x38] sm:$0xff] }
 0x785   : > { %14165 = vmatprep.subr.bf16.mxu0 %v16229_v28  ;;  %v14223_v56 = vpack.c.bf16 %v3799_v55, %v3798_v54  ;;  %v11952_v54 = vld [vmem:[%s18174_s2 + $0x78] sm:$0xff] }
 0x788   : > { %14167 = vmatpush3.bf16.msra.mxu0 %v14166_v58  ;;  %v3883_v58 = vld [vmem:[#allocation22 + $0x78] sm:$0xff] }
 0x789   : > { %14168 = vmatprep.subr.bf16.mxu0 %v16229_v28  ;;  %v14211_v59 = vpack.c.bf16 %v3883_v58, %v3882_v57  ;;  %v11956_v58 = vld [vmem:[%s18174_s2 + $0x80] sm:$0xff] }
 0x78c   : > { %14170 = vmatpush3.bf16.msra.mxu0 %v14169_v61  ;;  %v4107_v61 = vld [vmem:[#allocation22 + $0x88] sm:$0xff] }
 0x78d   : > { %14171 = vmatprep.subr.bf16.mxu0 %v16229_v28  ;;  %v14226_v62 = vpack.c.bf16 %v4107_v61, %v4106_v60 }
 0x790   : > { %14173 = vmatpush3.bf16.msra.mxu0 %v14172_v0  ;;  %v4108_v0 = vld [vmem:[#allocation22 + $0x90] sm:$0xff] }
 0x791   : > { %14186 = vmatprep.subr.bf16.mxu0 %v16229_v28 }
 0x852   : > { %v3308_v1 = vpop.f32.mrb[6].mxu0 }
 0x853   : > { %v13034_v2 = vpop.f32.mrb[7].mxu0  ;;  %13078 = vmatmul.mubr.msk.f32.vlgmr.msra.gmra.mrb[10].mxu1 %vm2897_vm2, %v3308_v1  ;;  %v4109_v1 = vld [vmem:[#allocation22 + $0x98] sm:$0xff] }
 0x854   : > { %13108 = vmatprep.mubr.msk.f32.mxu1 %vm16230_vm3, %v16231_v29  ;;  %v14229_v3 = vpack.c.bf16 %v4109_v1, %v4108_v0  ;;  %v11958_v0 = vld [vmem:[%s18174_s2 + $0x90] sm:$0xff]  ;;  %v11959_v1 = vld [vmem:[%s18174_s2 + $0x98] sm:$0xff] }
 0x856   : > { %v3391_v5 = vpop.f32.mrb[8].mxu0 }
 0x857   : > { %v13041_v6 = vpop.f32.mrb[9].mxu0  ;;  %13059 = vmatmul.mubr.msk.f32.vlgmr.msra.gmra.mrb[10].mxu0 %vm2897_vm2, %v3391_v5 }
 0x858   : > { %14188 = vmatpush3.bf16.msra.mxu0 %v14157_v50  ;;  %13084 = vmatprep.mubr.msk.f32.mxu0 %vm16230_vm3, %v16231_v29  ;;  %v14217_v50 = vpack.c.bf16 %v3795_v48, %v3794_v47  ;;  %v4031_v6 = vld [vmem:[#allocation10 + $0x10] sm:$0xff]  ;;  %v11948_v47 = vld [vmem:[%s18174_s2 + $0x58] sm:$0xff] }
 0x859   : > { %14189 = vmatprep.subr.bf16.mxu0 %v16229_v28 }
 0x85b   : > { %13085 = vmatmul.mubr.msk.f32.vlgmr.msra.gmra.mrb[12].mxu0 %vm2203_vm0, %v3551_v7  ;;  %v4110_v7 = vld [vmem:[#allocation22 + $0xa0] sm:$0xff] }
 0x85c   : > { %14191 = vmatpush3.bf16.msra.mxu0 %v14190_v8  ;;  %13103 = vmatprep.mubr.msk.f32.mxu0 %vm16230_vm3, %v16231_v29  ;;  %v4111_v8 = vld [vmem:[#allocation22 + $0xa8] sm:$0xff] }
 0x85d   : > { %14192 = vmatprep.subr.bf16.mxu0 %v16229_v28  ;;  %v14232_v9 = vpack.c.bf16 %v4111_v8, %v4110_v7  ;;  %v11963_v7 = vld [vmem:[%s18174_s2 + $0xb8] sm:$0xff] }
 0x860   : > { %14194 = vmatpush3.bf16.msra.mxu0 %v14193_v11  ;;  %v4113_v11 = vld [vmem:[#allocation22 + $0xb8] sm:$0xff] }
 0x861   : > { %14195 = vmatprep.subr.bf16.mxu0 %v16229_v28  ;;  %v14235_v12 = vpack.c.bf16 %v4113_v11, %v4112_v10 }
 0x864   : > { %14197 = vmatpush3.bf16.msra.mxu0 %v14196_v14 }
 0x865   : > { %14198 = vmatprep.subr.bf16.mxu0 %v16229_v28 }
 0x868   : > { %14200 = vmatpush3.bf16.msra.mxu0 %v14199_v17 }
 0x869   : > { %14201 = vmatprep.subr.bf16.mxu0 %v16229_v28 }
 0x926   : > { %v3546_v18 = vpop.f32.mrb[10].mxu1 }
 0x927   : > { %v13079_v19 = vpop.f32.mrb[11].mxu1 }
 0x92a   : > { %v3473_v20 = vpop.f32.mrb[10].mxu0 }
 0x92b   : > { %v3547_v21 = vadd.f32 %v3546_v18, %v3473_v20  ;;  %v13060_v22 = vpop.f32.mrb[11].mxu0  ;;  %v4271_v20 = vld [vmem:[%s18173_s26] sm:$0xff]  ;;  %s18181_s26 = sld [smem:[#allocation99_spill]] }
 0x92e   : > { %v3621_v23 = vpop.f32.mrb[12].mxu0 }
 0x92f   : > { %v13086_v24 = vpop.f32.mrb[13].mxu0  ;;  %13104 = vmatmul.mubr.msk.f32.vlgmr.msra.gmra.mrb[14].mxu0 %vm2897_vm2, %v3621_v23  ;;  %v4273_v23 = vld [vmem:[%s18174_s2 + $0x10] sm:$0xff] }
 0x930   : > { %13132 = vmatprep.mubr.msk.f32.mxu0 %vm16230_vm3, %v16231_v29  ;;  %14203 = vmatpush3.bf16.msra.mxu0 %v14202_v27  ;;  %v4274_v24 = vld [vmem:[%s18174_s2 + $0x18] sm:$0xff]  ;;  %v4276_v27 = vld [vmem:[%s18174_s2 + $0x28] sm:$0xff] }
 0x931   : > { %14204 = vmatprep.subr.bf16.mxu0 %v16229_v28  ;;  %v14253_v25 = vpack.c.bf16 %v4274_v24, %v4273_v23  ;;  %v14256_v30 = vpack.c.bf16 %v4276_v27, %v4275_v26  ;;  %v4677_v24 = vld [vmem:[%s18176_s11 + $0x8] sm:$0xff]  ;;  %s18182_s4 = smov %s18181_s26 }
 0x932   : > { %v11975_v26 = vld [vmem:[%s18177_s18 + $0x48] sm:$0xff] }
 0x933   : > { %v11987_v27 = vld [vmem:[%s18176_s11 + $0x28] sm:$0xff] }
 0x934   : > { %14206 = vmatpush3.bf16.msra.mxu0 %v14205_v32  ;;  %v4278_v32 = vld [vmem:[%s18174_s2 + $0x38] sm:$0xff] }
 0x935   : > { %14207 = vmatprep.subr.bf16.mxu0 %v16229_v28  ;;  %v14259_v33 = vpack.c.bf16 %v4278_v32, %v4277_v31  ;;  %v11976_v31 = vld [vmem:[%s18177_s18 + $0x50] sm:$0xff]  ;;  %v11977_v32 = vld [vmem:[%s18177_s18 + $0x58] sm:$0xff] }
 0x938   : > { %14209 = vmatpush3.bf16.msra.mxu0 %v14208_v35  ;;  %v11942_v35 = vld [vmem:[#allocation23] ss:$0 sm:$0xff] }
 0x939   : > { %14210 = vmatprep.subr.bf16.mxu0 %v16229_v28 }
 0x93c   : > { %14212 = vmatpush3.bf16.msra.mxu0 %v14211_v59  ;;  %v11957_v59 = vld [vmem:[%s18174_s2 + $0x88] sm:$0xff] }
 0x93d   : > { %13154 = vmatprep.subr.mxu0 %v16231_v29 }
 0xa02   : > { %v3703_v36 = vpop.f32.mrb[14].mxu0 }
 0xa03   : > { %v3707_v38 = vadd.f32 %v3703_v36, %v3547_v21  ;;  %v13105_v39 = vpop.f32.mrb[15].mxu0  ;;  %v4272_v21 = vld [vmem:[%s18174_s2 + $0x8] sm:$0xff] }
 0xa04   : > { %v14250_v22 = vpack.c.bf16 %v4272_v21, %v4271_v20 }
 0xa05   : > { %v3715_v40 = vadd.f32 %v11935_v37, %v3707_v38 }
 0xa07   : > { %v17204_v41 = vmax.f32 %v3715_v40, 0.0  ;;  %v4197_v40 = vld [vmem:[#allocation11] sm:$0xf] }
 0xa09   : > { %13107 = vmatpush3.msra.mxu1 %v17204_v41 }
 0xa0a   : > { %13109 = vmatmul.mubr.msk.f32.vlgmr.msra.gmra.mrb[12].mxu1 %vm3718_vm4, %v3717_v42  ;;  %13111 = vmatprep.subr.mxu1 %v16231_v29  ;;  %v11945_v42 = vld [vmem:[%s18174_s2 + $0x40] sm:$0xff] }
 0xa0b   : > { %13112 = vmatpush3.msra.mxu1 %v17204_v41  ;;  %13113 = vmatprep.mubr.msk.f32.mxu1 %vm16230_vm3, %v16231_v29 }
 0xa0c   : > { %14213 = vmatprep.subr.bf16.mxu1 %v16229_v28 }
 0xa0e   : > { %13114 = vmatmul.mubr.msk.f32.vlgmr.msra.gmra.mrb[14].mxu1 %vm3718_vm4, %v3801_v45  ;;  %v14238_v45 = vpack.c.bf16 %v11946_v43, %v11945_v42  ;;  %v11980_v42 = vld [vmem:[%s18177_s18 + $0x70] sm:$0xff]  ;;  %v11981_v43 = vld [vmem:[%s18177_s18 + $0x78] sm:$0xff] }
 0xa0f   : > { %14215 = vmatpush3.bf16.msra.mxu1 %v14214_v46  ;;  %13151 = vmatprep.mubr.msk.f32.mxu1 %vm16230_vm3, %v16231_v29  ;;  %v11947_v46 = vld [vmem:[%s18174_s2 + $0x50] sm:$0xff] }
 0xa10   : > { %14216 = vmatprep.subr.bf16.mxu1 %v16229_v28  ;;  %v14241_v48 = vpack.c.bf16 %v11948_v47, %v11947_v46  ;;  %v4765_v46 = vld [vmem:[%s18177_s18 + $0x8] sm:$0xff] }
 0xa13   : > { %14218 = vmatpush3.bf16.msra.mxu1 %v14217_v50  ;;  %v11949_v50 = vld [vmem:[%s18174_s2 + $0x60] sm:$0xff] }
 0xa14   : > { %14219 = vmatprep.subr.bf16.mxu1 %v16229_v28  ;;  %v14244_v52 = vpack.c.bf16 %v11950_v51, %v11949_v50  ;;  %v5380_v50 = vld [vmem:[%s18178_s16 + $0x8] sm:$0xff] }
 0xa17   : > { %14221 = vmatpush3.bf16.msra.mxu1 %v14220_v53  ;;  %v11951_v53 = vld [vmem:[%s18174_s2 + $0x70] sm:$0xff] }
 0xa18   : > { %14222 = vmatprep.subr.bf16.mxu1 %v16229_v28  ;;  %v14247_v55 = vpack.c.bf16 %v11952_v54, %v11951_v53  ;;  %v4766_v54 = vld [vmem:[%s18177_s18 + $0x10] sm:$0xff] }
 0xa1b   : > { %14224 = vmatpush3.bf16.msra.mxu1 %v14223_v56 }
 0xa1c   : > { %14225 = vmatprep.subr.bf16.mxu1 %v16229_v28 }
 0xadd   : > { %v3788_v63 = vpop.f32.mrb[12].mxu1 }
 0xade   : > { %v13110_v2 = vpop.f32.mrb[13].mxu1  ;;  %13152 = vmatmul.mubr.msk.f32.vlgmr.msra.gmra.mrb[16].mxu1 %vm2897_vm2, %v3788_v63  ;;  %v14262_v63 = vpack.c.bf16 %v11957_v59, %v11956_v58 }
 0xadf   : > { %14227 = vmatpush3.bf16.msra.mxu1 %v14226_v62  ;;  %13175 = vmatprep.mubr.msk.f32.mxu1 %vm16230_vm3, %v16231_v29  ;;  %v4510_v62 = vld [vmem:[#allocation11 + $0x8] sm:$0xf]  ;;  %v14265_v2 = vpack.c.bf16 %v11959_v1, %v11958_v0 }
 0xae0   : > { %14228 = vmatprep.subr.bf16.mxu1 %v16229_v28 }
 0xae1   : > { %v3871_v4 = vpop.f32.mrb[14].mxu1 }
 0xae2   : > { %v13115_v5 = vpop.f32.mrb[15].mxu1  ;;  %13133 = vmatmul.mubr.msk.f32.vlgmr.msra.gmra.mrb[16].mxu0 %vm2897_vm2, %v3871_v4  ;;  %v11961_v4 = vld [vmem:[%s18174_s2 + $0xa8] sm:$0xff] }
 0xae3   : > { %13155 = vmatpush3.msra.mxu0 %v17204_v41  ;;  %13156 = vmatprep.mubr.msk.f32.mxu0 %vm16230_vm3, %v16231_v29 }
 0xae4   : > { %14230 = vmatpush3.bf16.msra.mxu1 %v14229_v3  ;;  %13178 = vmatprep.subr.mxu0 %v16231_v29  ;;  %v11960_v3 = vld [vmem:[%s18174_s2 + $0xa0] sm:$0xff] }
 0xae5   : > { %14231 = vmatprep.subr.bf16.mxu1 %v16229_v28  ;;  %v14268_v5 = vpack.c.bf16 %v11961_v4, %v11960_v3  ;;  %v4771_v3 = vld [vmem:[%s18177_s18 + $0x38] sm:$0xff] }
 0xae6   : > { %13157 = vmatmul.mubr.msk.f32.vlgmr.msra.gmra.mrb[18].mxu0 %vm3718_vm4, %v4031_v6  ;;  %v11962_v6 = vld [vmem:[%s18174_s2 + $0xb0] sm:$0xff]  ;;  %s18180_s2 = smov %s18179_s23 }
 0xae7   : > { %13180 = vmatprep.mubr.msk.f32.mxu0 %vm16230_vm3, %v16231_v29  ;;  %v14271_v8 = vpack.c.bf16 %v11963_v7, %v11962_v6  ;;  %v11992_v6 = vld [vmem:[%s18177_s18 + $0x88] sm:$0xff] }
 0xae8   : > { %14233 = vmatpush3.bf16.msra.mxu1 %v14232_v9 }
 0xae9   : > { %14234 = vmatprep.subr.bf16.mxu1 %v16229_v28 }
 0xaec   : > { %14236 = vmatpush3.bf16.msra.mxu1 %v14235_v12 }
 0xaed   : > { %14249 = vmatprep.subr.bf16.mxu1 %v16229_v28 }
 0xbb1   : > { %v4026_v13 = vpop.f32.mrb[16].mxu1 }
 0xbb2   : > { %v13153_v14 = vpop.f32.mrb[17].mxu1 }
 0xbb5   : > { %v3953_v15 = vpop.f32.mrb[16].mxu0 }
 0xbb6   : > { %v4027_v16 = vadd.f32 %v4026_v13, %v3953_v15  ;;  %v13134_v17 = vpop.f32.mrb[17].mxu0 }
 0xbb7   : > { %v11986_v17 = vld [vmem:[%s18176_s11 + $0x20] sm:$0xff] }
 0xbb9   : > { %v4101_v18 = vpop.f32.mrb[18].mxu0 }
 0xbba   : > { %v13158_v19 = vpop.f32.mrb[19].mxu0  ;;  %13176 = vmatmul.mubr.msk.f32.vlgmr.msra.gmra.mrb[18].mxu1 %vm2897_vm2, %v4101_v18 }
 0xbbb   : > { %13223 = vmatprep.mubr.msk.f32.mxu1 %vm16230_vm3, %v16231_v29  ;;  %14251 = vmatpush3.bf16.msra.mxu1 %v14250_v22  ;;  %v11965_v19 = vld [vmem:[#allocation28] ss:$0 sm:$0xff] }
 0xbbc   : > { %14252 = vmatprep.subr.bf16.mxu1 %v16229_v28 }
 0xbbf   : > { %14254 = vmatpush3.bf16.msra.mxu1 %v14253_v25  ;;  %v11974_v25 = vld [vmem:[%s18177_s18 + $0x40] sm:$0xff] }
 0xbc0   : > { %14255 = vmatprep.subr.bf16.mxu1 %v16229_v28 }
 0xbc3   : > { %14257 = vmatpush3.bf16.msra.mxu1 %v14256_v30  ;;  %v11969_v30 = vld [vmem:[%s18176_s11 + $0x10] sm:$0xff] }
 0xbc4   : > { %14258 = vmatprep.subr.bf16.mxu1 %v16229_v28 }
 0xbc7   : > { %14260 = vmatpush3.bf16.msra.mxu1 %v14259_v33  ;;  %v12001_v33 = vld [vmem:[%s18176_s11 + $0x30] sm:$0xff] }
 0xc8d   : > { %v4183_v34 = vpop.f32.mrb[18].mxu1 }
 0xc8e   : > { %v4187_v36 = vadd.f32 %v4183_v34, %v4027_v16  ;;  %v13177_v37 = vpop.f32.mrb[19].mxu1  ;;  %v4676_v16 = vld [vmem:[%s18175_s0] sm:$0xff]  ;;  %v14273_v34 = vpack.c.bf16 %v11975_v26, %v11974_v25  ;;  %v12012_v26 = vld [vmem:[%s18177_s18 + $0xf0] sm:$0xff]  ;;  %s2198_s0 = scalar_lea.vmem %s18185_s5, %s17086_s6  ;;  %s18190_s5 = sld [smem:[#allocation104_spill]] }
 0xc8f   : > { %v12002_v37 = vld [vmem:[%s18176_s11 + $0x38] sm:$0xff] }
 0xc90   : > { %v4195_v38 = vadd.f32 %v11942_v35, %v4187_v36  ;;  %v11970_v35 = vld [vmem:[%s18176_s11 + $0x18] sm:$0xff]  ;;  %v14277_v36 = vpack.c.bf16 %v11977_v32, %v11976_v31  ;;  %v5473_v31 = vld [vmem:[%s18179_s23] sm:$0xff]  ;;  %v5474_v32 = vld [vmem:[%s18180_s2 + $0x8] sm:$0xff]  ;;  %s18062_s23 = sand.u32 1, %s16122_s22  }
 0xc92   : > { %v4196_v39 = vmax.f32 %v4195_v38, 0.0  ;;  %v11978_v38 = vld [vmem:[%s18177_s18 + $0x60] sm:$0xff] }
 0xc94   : > { %13179 = vmatpush3.msra.mxu0 %v4196_v39 }
 0xc95   : > { %13181 = vmatmul.mubr.msk.f32.vlgmr.msra.gmra.mrb[20].mxu0 %vm3718_vm4, %v4197_v40  ;;  %13183 = vmatprep.subr.mxu0 %v16231_v29 }
 0xc96   : > { %13184 = vmatpush3.msra.mxu0 %v4196_v39  ;;  %13185 = vmatprep.mubr.msk.f32.mxu0 %vm16230_vm3, %v16231_v29 }
 0xc97   : > { %14237 = vmatprep.subr.bf16.mxu0 %v16229_v28 }
 0xc99   : > { %13186 = vmatmul.mubr.msk.f32.vlgmr.msra.gmra.mrb[22].mxu0 %vm3718_vm4, %v4280_v44  ;;  %v14285_v44 = vpack.c.bf16 %v11981_v43, %v11980_v42  ;;  %v5469_v43 = vld [vmem:[%s18182_s4] sm:$0xff] }
 0xc9a   : > { %14239 = vmatpush3.bf16.msra.mxu0 %v14238_v45  ;;  %13204 = vmatprep.mubr.msk.f32.mxu0 %vm16230_vm3, %v16231_v29  ;;  %v4764_v45 = vld [vmem:[%s18177_s18] sm:$0xff] }
 0xc9b   : > { %14240 = vmatprep.subr.bf16.mxu0 %v16229_v28  ;;  %v14289_v47 = vpack.c.bf16 %v4765_v46, %v4764_v45 }
 0xc9e   : > { %14242 = vmatpush3.bf16.msra.mxu0 %v14241_v48  ;;  %v5379_v48 = vld [vmem:[%s18178_s16] sm:$0xff] }
 0xc9f   : > { %14243 = vmatprep.subr.bf16.mxu0 %v16229_v28  ;;  %v14337_v51 = vpack.c.bf16 %v5380_v50, %v5379_v48 }
 0xca2   : > { %14245 = vmatpush3.bf16.msra.mxu0 %v14244_v52 }
 0xca3   : > { %14246 = vmatprep.subr.bf16.mxu0 %v16229_v28 }
 0xca6   : > { %14248 = vmatpush3.bf16.msra.mxu0 %v14247_v55  ;;  %v4767_v55 = vld [vmem:[%s18177_s18 + $0x18] sm:$0xff] }
 0xca7   : > { %13226 = vmatprep.subr.mxu0 %v16231_v29 }
 0xd68   : > { %v4267_v56 = vpop.f32.mrb[20].mxu0 }
 0xd69   : > { %v13182_v57 = vpop.f32.mrb[21].mxu0  ;;  %13224 = vmatmul.mubr.msk.f32.vlgmr.msra.gmra.mrb[20].mxu1 %vm2897_vm2, %v4267_v56 }
 0xd6a   : > { %13252 = vmatprep.mubr.msk.f32.mxu1 %vm4678_vm5, %v4676_v16 }
 0xd6c   : > { %v4350_v60 = vpop.f32.mrb[22].mxu0 }
 0xd6d   : > { %v13187_v61 = vpop.f32.mrb[23].mxu0  ;;  %13205 = vmatmul.mubr.msk.f32.vlgmr.msra.gmra.mrb[24].mxu0 %vm2897_vm2, %v4350_v60  ;;  %v14293_v60 = vpack.c.bf16 %v4767_v55, %v4766_v54 }
 0xd6e   : > { %13227 = vmatpush3.msra.mxu0 %v4196_v39  ;;  %13228 = vmatprep.mubr.msk.f32.mxu0 %vm16230_vm3, %v16231_v29  ;;  %v11979_v39 = vld [vmem:[%s18177_s18 + $0x68] sm:$0xff]  ;;  %v4768_v61 = vld [vmem:[%s18177_s18 + $0x20] sm:$0xff] }
 0xd6f   : > { %14261 = vmatprep.subr.bf16.mxu0 %v16229_v28  ;;  %v14281_v40 = vpack.c.bf16 %v11979_v39, %v11978_v38 }
 0xd71   : > { %13229 = vmatmul.mubr.msk.f32.vlgmr.msra.gmra.mrb[26].mxu0 %vm3718_vm4, %v4510_v62  ;;  %v4769_v62 = vld [vmem:[%s18177_s18 + $0x28] sm:$0xff] }
 0xd72   : > { %14263 = vmatpush3.bf16.msra.mxu0 %v14262_v63  ;;  %13247 = vmatprep.mubr.msk.f32.mxu0 %vm16230_vm3, %v16231_v29  ;;  %v14297_v1 = vpack.c.bf16 %v4769_v62, %v4768_v61 }
 0xd73   : > { %14264 = vmatprep.subr.bf16.mxu0 %v16229_v28 }
 0xd76   : > { %14266 = vmatpush3.bf16.msra.mxu0 %v14265_v2  ;;  %v4770_v2 = vld [vmem:[%s18177_s18 + $0x30] sm:$0xff] }
 0xd77   : > { %14267 = vmatprep.subr.bf16.mxu0 %v16229_v28  ;;  %v14301_v4 = vpack.c.bf16 %v4771_v3, %v4770_v2 }
 0xd7a   : > { %14269 = vmatpush3.bf16.msra.mxu0 %v14268_v5  ;;  %v11991_v5 = vld [vmem:[%s18177_s18 + $0x80] sm:$0xff] }
 0xd7b   : > { %14270 = vmatprep.subr.bf16.mxu0 %v16229_v28  ;;  %v14305_v7 = vpack.c.bf16 %v11992_v6, %v11991_v5 }
 0xd7e   : > { %14272 = vmatpush3.bf16.msra.mxu0 %v14271_v8  ;;  %v11993_v8 = vld [vmem:[%s18177_s18 + $0x90] sm:$0xff] }
 0xe3c   : > { %v4505_v9 = vpop.f32.mrb[20].mxu1 }
 0xe3d   : > { %v13225_v10 = vpop.f32.mrb[21].mxu1 }
 0xe40   : > { %v4432_v11 = vpop.f32.mrb[24].mxu0 }
 0xe41   : > { %v4506_v12 = vadd.f32 %v4505_v9, %v4432_v11  ;;  %v13206_v13 = vpop.f32.mrb[25].mxu0  ;;  %v11994_v9 = vld [vmem:[%s18177_s18 + $0x98] sm:$0xff]  ;;  %v11995_v11 = vld [vmem:[%s18177_s18 + $0xa0] sm:$0xff] }
 0xe42   : > { %v14309_v10 = vpack.c.bf16 %v11994_v9, %v11993_v8 }
 0xe44   : > { %v4580_v14 = vpop.f32.mrb[26].mxu0 }
 0xe45   : > { %v13230_v15 = vpop.f32.mrb[27].mxu0  ;;  %13248 = vmatmul.mubr.msk.f32.vlgmr.msra.gmra.mrb[28].mxu0 %vm2897_vm2, %v4580_v14  ;;  %v11997_v14 = vld [vmem:[%s18177_s18 + $0xb0] sm:$0xff] }
 0xe46   : > { %13300 = vmatprep.mubr.msk.f32.mxu0 %vm4678_vm5, %v11986_v17  ;;  %v11998_v15 = vld [vmem:[%s18177_s18 + $0xb8] sm:$0xff]  ;;  %v12006_v17 = vld [vmem:[%s18177_s18 + $0xc0] sm:$0xff] }
 0xe47   : > { %v14317_v16 = vpack.c.bf16 %v11998_v15, %v11997_v14 }
 0xf18   : > { %v4662_v18 = vpop.f32.mrb[28].mxu0 }
 0xf19   : > { %v4666_v20 = vadd.f32 %v4662_v18, %v4506_v12  ;;  %v13249_v21 = vpop.f32.mrb[29].mxu0  ;;  %v11996_v12 = vld [vmem:[%s18177_s18 + $0xa8] sm:$0xff] }
 0xf1a   : > { %v14313_v13 = vpack.c.bf16 %v11996_v12, %v11995_v11  ;;  %v12007_v18 = vld [vmem:[%s18177_s18 + $0xc8] sm:$0xff]  ;;  %v12009_v21 = vld [vmem:[%s18177_s18 + $0xd8] sm:$0xff] }
 0xf1b   : > { %v4674_v22 = vadd.f32 %v11965_v19, %v4666_v20  ;;  %v14321_v19 = vpack.c.bf16 %v12007_v18, %v12006_v17  ;;  %v12008_v20 = vld [vmem:[%s18177_s18 + $0xd0] sm:$0xff] }
 0xf1d   : > { %v4675_v23 = vmax.f32 %v4674_v22, 0.0  ;;  %v14325_v22 = vpack.c.bf16 %v12009_v21, %v12008_v20 }
 0xf1f   : > { %13250 = vmatprep.subr.msk.mxu1 %vm4685_vm6, %v4675_v23  ;;  %13298 = vmatprep.subr.msk.mxu0 %vm4685_vm6, %v4675_v23 }
 0xf20   : > { %13251 = vmatpush3.msk.msra.mxu1 %vm4685_vm6, %v4675_v23  ;;  %13299 = vmatpush3.msk.msra.mxu0 %vm4685_vm6, %v4675_v23 }
 0xf21   : > { %13253 = vmatmul.mubr.msk.f32.vlgmr.msra.gmra.mrb[22].mxu1 %vm4678_vm5, %v4677_v24  ;;  %13255 = vmatprep.subr.msk.mxu1 %vm4685_vm6, %v4675_v23  ;;  %v12011_v24 = vld [vmem:[%s18177_s18 + $0xe8] sm:$0xff] }
 0xf22   : > { %13322 = vmatprep.subr.msk.mxu0 %vm4685_vm6, %v4675_v23  ;;  %13256 = vmatpush3.msk.msra.mxu1 %vm4685_vm6, %v4675_v23 }
 0xf23   : > { %13301 = vmatmul.mubr.msk.f32.vlgmr.msra.gmra.mrb[30].mxu0 %vm4678_vm5, %v11987_v27  ;;  %13257 = vmatprep.mubr.msk.f32.mxu1 %vm4678_vm5, %v11969_v30  ;;  %v12013_v27 = vld [vmem:[%s18177_s18 + $0xf8] sm:$0xff] }
 0xf24   : > { %13323 = vmatpush3.msk.msra.mxu0 %vm4685_vm6, %v4675_v23  ;;  %13324 = vmatprep.mubr.msk.f32.mxu0 %vm4678_vm5, %v12001_v33  ;;  %v12010_v23 = vld [vmem:[%s18177_s18 + $0xe0] sm:$0xff]  ;;  %v14333_v30 = vpack.c.bf16 %v12013_v27, %v12012_v26 }
 0xf25   : > { %13258 = vmatmul.mubr.msk.f32.vlgmr.msra.gmra.mrb[24].mxu1 %vm4678_vm5, %v11970_v35  ;;  %14274 = vmatprep.subr.bf16.mxu1 %v14273_v34  ;;  %v14329_v25 = vpack.c.bf16 %v12011_v24, %v12010_v23 }
 0xf26   : > { %14276 = vmatpush3.bf16.msra.mxu1 %v14273_v34  ;;  %14338 = vmatprep.subr.bf16.mxu0 %v14337_v51  ;;  %v14341_v34 = vpack.c.bf16 %v5474_v32, %v5473_v31 }
 0xf27   : > { %13325 = vmatmul.mubr.msk.f32.vlgmr.msra.gmra.mrb[32].mxu0 %vm4678_vm5, %v12002_v37  ;;  %14278 = vmatprep.subr.bf16.mxu1 %v14277_v36  ;;  %v12016_v37 = vld [vmem:[#allocation37] ss:$0 sm:$0xff] }
 0xf28   : > { %14340 = vmatpush3.bf16.msra.mxu0 %v14337_v51 }
 0xf29   : > { %14343 = vmatprep.subr.msk.bf16.mxu0 %vm17360_vm7, %v14341_v34 }
 0xf2a   : > { %14280 = vmatpush3.bf16.msra.mxu1 %v14277_v36 }
 0xf2b   : > { %14282 = vmatprep.subr.bf16.mxu1 %v14281_v40 }
 0xf2e   : > { %14284 = vmatpush3.bf16.msra.mxu1 %v14281_v40  ;;  %v5470_v40 = vld [vmem:[%s18181_s26 + $0x8] sm:$0xff]  ;;  %s11880_s26 = sshll.u32 %s18062_s23, 4 }
 0xf2f   : > { %14286 = vmatprep.subr.bf16.mxu1 %v14285_v44  ;;  %s17401_s2 = scalar_lea.vmem [#allocation52], %s11880_s26  ;;  %s18188_s26 = sld [smem:[#allocation107_spill]] }
 0xf32   : > { %14288 = vmatpush3.bf16.msra.mxu1 %v14285_v44 }
 0xf33   : > { %14290 = vmatprep.subr.bf16.mxu1 %v14289_v47 }
 0xf35   : > { %s18189_s4 = smov %s18188_s26 }
 0xff4   : > { %v13254_v52 = vpop.f32.mrb[22].mxu1 }
 0xff5   : > { %v4755_v53 = vpop.f32.mrb[23].mxu1 }
 0xff6   : > { %v13302_v56 = vpop.f32.mrb[30].mxu0 }
 0xff7   : > { %v5102_v57 = vpop.f32.mrb[31].mxu0 }
 0xff8   : > { %v13259_v58 = vpop.f32.mrb[24].mxu1 }
 0xff9   : > { %v4847_v59 = vpop.f32.mrb[25].mxu1 }
 0xffa   : > { %13276 = vmatprep.mubr.msk.f32.mxu1 %vm2897_vm2, %v4847_v59  ;;  %v13326_v63 = vpop.f32.mrb[32].mxu0 }
 0xffb   : > { %13277 = vmatmul.mubr.msk.f32.vlgmr.msra.gmra.mrb[26].mxu1 %vm2897_vm2, %v13259_v58  ;;  %v5278_v0 = vpop.f32.mrb[33].mxu0  ;;  %v12023_v58 = vld [vmem:[#allocation32] ss:$0 sm:$0xff] }
 0xffc   : > { %14292 = vmatpush3.bf16.msra.mxu1 %v14289_v47  ;;  %13295 = vmatprep.mubr.msk.f32.mxu1 %vm2897_vm2, %v4755_v53 }
 0xffd   : > { %14294 = vmatprep.subr.bf16.mxu1 %v14293_v60 }
0x1000   : > { %14296 = vmatpush3.bf16.msra.mxu1 %v14293_v60 }
0x1001   : > { %14298 = vmatprep.subr.bf16.mxu1 %v14297_v1 }
0x1004   : > { %14300 = vmatpush3.bf16.msra.mxu1 %v14297_v1  ;;  %v5583_v1 = vlaneseq }
0x1005   : > { %14302 = vmatprep.subr.bf16.mxu1 %v14301_v4 }
0x1006   : > { %v5584_v2 = vand.u32 127, %v5583_v1 }
0x1008   : > { %14304 = vmatpush3.bf16.msra.mxu1 %v14301_v4 }
0x1009   : > { %14306 = vmatprep.subr.bf16.mxu1 %v14305_v7 }
0x100b   : > { %13296 = vmatmul.mubr.msk.f32.vlgmr.msra.gmra.mrb[26].mxu1 %vm2897_vm2, %v13254_v52 }
0x100c   : > { %14308 = vmatpush3.bf16.msra.mxu1 %v14305_v7  ;;  %13319 = vmatprep.mubr.msk.f32.mxu1 %vm2897_vm2, %v5102_v57 }
0x100d   : > { %14310 = vmatprep.subr.bf16.mxu1 %v14309_v10 }
0x1010   : > { %14312 = vmatpush3.bf16.msra.mxu1 %v14309_v10 }
0x1011   : > { %14314 = vmatprep.subr.bf16.mxu1 %v14313_v13 }
0x1014   : > { %14316 = vmatpush3.bf16.msra.mxu1 %v14313_v13 }
0x1015   : > { %14318 = vmatprep.subr.bf16.mxu1 %v14317_v16 }
0x1018   : > { %14320 = vmatpush3.bf16.msra.mxu1 %v14317_v16 }
0x1019   : > { %14322 = vmatprep.subr.bf16.mxu1 %v14321_v19 }
0x101b   : > { %13320 = vmatmul.mubr.msk.f32.vlgmr.msra.gmra.mrb[26].mxu1 %vm2897_vm2, %v13302_v56 }
0x101c   : > { %14324 = vmatpush3.bf16.msra.mxu1 %v14321_v19  ;;  %13343 = vmatprep.mubr.msk.f32.mxu1 %vm2897_vm2, %v5278_v0 }
0x101d   : > { %14326 = vmatprep.subr.bf16.mxu1 %v14325_v22 }
0x1020   : > { %14328 = vmatpush3.bf16.msra.mxu1 %v14325_v22 }
0x1021   : > { %14330 = vmatprep.subr.bf16.mxu1 %v14329_v25 }
0x1024   : > { %14332 = vmatpush3.bf16.msra.mxu1 %v14329_v25 }
0x1025   : > { %14334 = vmatprep.subr.bf16.mxu1 %v14333_v30 }
0x1028   : > { %14336 = vmatpush3.bf16.msra.mxu1 %v14333_v30 }
0x102b   : > { %13344 = vmatmul.mubr.msk.f32.vlgmr.msra.gmra.mrb[26].mxu1 %vm2897_vm2, %v13326_v63 }
0x10fe   : > { %v13345_v35 = vpop.f32.mrb[26].mxu1 }
0x10ff   : > { %v5368_v36 = vpop.f32.mrb[27].mxu1 }
0x1100   : > { %13350 = vmatprep.mubr.msk.f32.mxu0 %vm2203_vm0, %v5368_v36  ;;  %v5736_v36 = vld [vmem:[#allocation34] sm:$0xff] }
0x1101   : > { %13351 = vmatmul.mubr.msk.f32.vlgmr.msra.gmra.mrb[34].mxu0 %vm2203_vm0, %v13345_v35 }
0x1102   : > { %14346 = vmatpush3.bf16.xpose.msk.msra.mxu0 %vm17360_vm7, %v14341_v34 }
0x1103   : > { %14348 = vmatprep.subr.bf16.mxu0 %v14341_v34 }
0x11d4   : > { %v13352_v38 = vpop.f32.mrb[34].mxu0 }
0x11d5   : > { %v5466_v39 = vadd.f32 %v13352_v38, %v12016_v37  ;;  %v5460_v42 = vpop.f32.mrb[35].mxu0 }
0x11d6   : > { %v5461_v44 = vadd.f32 %v12016_v37, %v5460_v42 }
0x11d7   : > { %v17372_v45 = vadd.f32 %v5470_v40, %v5466_v39  ;;  %v12028_v39 = vld [vmem:[#allocation35] ss:$0 sm:$0xff] }
0x11d8   : > { %v17374_v46 = vadd.f32 %v5469_v43, %v5461_v44 }
0x11d9   : > { %v5563_v50 = vmul.f32 %v17372_v45, %v17372_v45 }
0x11da   : > { %13357 = vmatprep.mubr.msk.f32.mxu0 %vm3718_vm4, %v17374_v46  ;;  %v5562_v47 = vmul.f32 %v17374_v46, %v17374_v46 }
0x11db   : > { %13358 = vmatmul.mubr.msk.f32.vlgmr.msra.gmra.mrb[36].mxu0 %vm3718_vm4, %v17372_v45  ;;  %v5567_v51 = vsel %vm3718_vm4, %v5563_v50, 0.0 }
0x11dc   : > { %v5564_v48 = vsel %vm3718_vm4, %v5562_v47, 0.0  ;;  %14350 = vmatpush3.bf16.msra.mxu0 %v14341_v34 }
0x11dd   : > { %5565 = vadd.xlane.f32.xlu0 %v5564_v48  ;;  %13367 = vmatprep.subr.mxu0 %v5736_v36 }
0x11e1   : > { %5568 = vadd.xlane.f32.xlu0 %v5567_v51 }
0x126a   : > { %v5566_v52 = vpop.xlane.xlu0 %5565 }
0x126e   : > { %v5569_v57 = vpop.xlane.xlu0 %5568 }
0x12ae   : > { %v13359_v53 = vpop.f32.mrb[36].mxu0 }
0x12af   : > { %v5571_v54 = vmul.f32 2.0, %v13359_v53  ;;  %v5553_v55 = vpop.f32.mrb[37].mxu0 }
0x12b0   : > { %v5570_v56 = vmul.f32 2.0, %v5553_v55 }
0x12b1   : > { %v5573_v59 = vsub.f32 %v5569_v57, %v5571_v54 }
0x12b2   : > { %v5572_v60 = vsub.f32 %v5566_v52, %v5570_v56 }
0x12b3   : > { %v5582_v63 = vadd.f32 %v12023_v58, %v5573_v59 }
0x12b4   : > { %v5581_v61 = vadd.f32 %v12023_v58, %v5572_v60 }
0x12b5   : > { %v5588_v0 = vsel %vm2203_vm0, %v5582_v63, inf }
0x12b6   : > { %v5585_v62 = vsel %vm2203_vm0, %v5581_v61, inf }
0x12b7   : > { %5586 = vmin.xlane.f32.xlu1 %v5585_v62  ;;  %v12060_v62 = vld [vmem:[%s18188_s26 + $0x10] sm:$0xff]  ;;  %s18193_s26 = sld [smem:[#allocation110_spill]] }
0x12bb   : > { %5589 = vmin.xlane.f32.xlu1 %v5588_v0  ;;  %v12061_v0 = vld [vmem:[%s18189_s4 + $0x18] sm:$0xff] }
0x12bc   : > { %v14381_v1 = vpack.c.bf16 %v12061_v0, %v12060_v62 }
0x12be   : > { %14382 = vmatprep.subr.bf16.mxu1 %v14381_v1 }
0x12bf   : > { %14384 = vmatpush3.bf16.msra.mxu1 %v14381_v1 }
0x1344   : > { %v5587_v3 = vpop.xlane.xlu1 %5586 }
0x1345   : > { %vm5591_vm8 = vcmp.eq.f32.partialorder %v5581_v61, %v5587_v3  ;;  %v5961_v3 = vld [vmem:[%s18190_s5 + $0x8] sm:$0xff] }
0x1346   : > { %v5593_v4 = vsel %vm5591_vm8, %v5584_v2, 16 }
0x1347   : > { %v5595_v5 = vsel %vm2203_vm0, %v5593_v4, 2147483647 }
0x1348   : > { %v5590_v6 = vpop.xlane.xlu1 %5589  ;;  %v5597_v7 = vshra.s32 %v5595_v5, 16  ;;  %v5596_v13 = vand.u32 65535, %v5595_v5 }
0x1349   : > { %vm5592_vm9 = vcmp.eq.f32.partialorder %v5582_v63, %v5590_v6 }
0x134a   : > { %v5594_v8 = vsel %vm5592_vm9, %v5584_v2, 16  ;;  %v5599_v9 = vcvt.s32.f32 %v5597_v7  ;;  %v5598_v15 = vcvt.s32.f32 %v5596_v13 }
0x134b   : > { %v5610_v10 = vsel %vm2203_vm0, %v5594_v8, 2147483647 }
0x134c   : > { %5600 = vmin.xlane.f32.xlu0 %v5599_v9  ;;  %v5612_v11 = vshra.s32 %v5610_v10, 16  ;;  %v5611_v16 = vand.u32 65535, %v5610_v10 }
0x134e   : > { %v5614_v12 = vcvt.s32.f32 %v5612_v11  ;;  %v5613_v19 = vcvt.s32.f32 %v5611_v16  ;;  %v12032_v16 = vld [vmem:[#allocation47] ss:$0 sm:$0xff] }
0x1350   : > { %5615 = vmin.xlane.f32.xlu1 %v5614_v12 }
0x13d9   : > { %v5601_v14 = vpop.xlane.xlu0 %5600 }
0x13da   : > { %vm5602_vm10 = vcmp.eq.f32.partialorder %v5599_v9, %v5601_v14  ;;  %v5607_v21 = vcvt.f32.s32 %v5601_v14 }
0x13db   : > { %v5603_v17 = vsel %vm5602_vm10, %v5598_v15, inf }
0x13dc   : > { %5604 = vmin.xlane.f32.xlu0 %v5603_v17  ;;  %v5608_v23 = vshll.u32 %v5607_v21, 16 }
0x13dd   : > { %v5616_v18 = vpop.xlane.xlu1 %5615 }
0x13de   : > { %vm5617_vm11 = vcmp.eq.f32.partialorder %v5614_v12, %v5616_v18  ;;  %v5622_v24 = vcvt.f32.s32 %v5616_v18  ;;  %v12031_v12 = vld [vmem:[#allocation49] ss:$0 sm:$0xff] }
0x13df   : > { %v5618_v20 = vsel %vm5617_vm11, %v5613_v19, inf  ;;  %v6044_v19 = vld [vmem:[%s18189_s4] sm:$0xff] }
0x13e0   : > { %5619 = vmin.xlane.f32.xlu1 %v5618_v20  ;;  %v5623_v30 = vshll.u32 %v5622_v24, 16  ;;  %v6045_v20 = vld [vmem:[%s18189_s4 + $0x8] sm:$0xff]  ;;  %s18194_s4 = smov %s18193_s26  ;;  %v12062_v24 = vld [vmem:[#allocation46 + $0x1] ss:$0 sm:$0xff] }
0x1469   : > { %v5605_v22 = vpop.xlane.xlu0 %5604 }
0x146a   : > { %v5606_v25 = vcvt.f32.s32 %v5605_v22 }
0x146c   : > { %v5609_v26 = vadd.s32 %v5608_v23, %v5606_v25  ;;  %v14359_v23 = vpack.c.bf16 %v6045_v20, %v6044_v19 }
0x146d   : > { %v5620_v27 = vpop.xlane.xlu1 %5619 }
0x146e   : > { %5732 = vst.msk [vmem:[%s2198_s0] sm:$0xff] %vm5731_vm12, %v5609_v26  ;;  %v5621_v31 = vcvt.f32.s32 %v5620_v27  ;;  %vm5625_vm13 = vcmp.eq.s32.totalorder %v5584_v2, %v5609_v26 }
0x146f   : > { %v12024_v32 = vsel %vm5625_vm13, 1.0, %v16231_v29 }
0x1470   : > { %v5624_v34 = vadd.s32 %v5623_v30, %v5621_v31  ;;  %13364 = vmatprep.mubr.msk.f32.mxu0 %vm2203_vm0, %v12024_v32 }
0x1472   : > { %vm5626_vm14 = vcmp.eq.s32.totalorder %v5584_v2, %v5624_v34  ;;  %5733 = vst.msk [vmem:[%s2198_s0 + $0x8] sm:$0xff] %vm5731_vm12, %v5624_v34  ;;  %s18186_s0 = sld [smem:[#allocation106_spill]]  ;;  %v5960_v2 = vld [vmem:[%s18190_s5] sm:$0xff] }
0x1473   : > { %v12025_v35 = vsel %vm5626_vm14, 1.0, %v16231_v29  ;;  %v14355_v4 = vpack.c.bf16 %v5961_v3, %v5960_v2 }
0x1474   : > { %13365 = vmatmul.mubr.msk.f32.vlgmr.msra.gmra.mrb[38].mxu0 %vm2203_vm0, %v12025_v35 }
0x1475   : > { %13368 = vmatpush3.msra.mxu0 %v5736_v36  ;;  %v12036_v36 = vld [vmem:[%s18193_s26] ss:$0 sm:$0xff]  ;;  %s18196_s26 = sld [smem:[#allocation103_spill]] }
0x1478   : > { %s18187_s23 = smov %s18186_s0  ;;  %v5870_v60 = vld [vmem:[%s18186_s0] sm:$0xff]  ;;  %s18191_s0 = sld [smem:[#allocation111_spill]] }
0x1479   : > { %v5871_v61 = vld [vmem:[%s18187_s23 + $0x8] sm:$0xff] }
0x147a   : > { %v14351_v63 = vpack.c.bf16 %v5871_v61, %v5870_v60 }
0x147c   : > { %14352 = vmatprep.subr.bf16.mxu0 %v14351_v63 }
0x147e   : > { %s18192_s7 = smov %s18191_s0  ;;  %v12033_v25 = vld [vmem:[%s18191_s0] ss:$0 sm:$0xff]  ;;  %s18195_s0 = sld [smem:[#allocation116_spill]] }
0x1547   : > { %v17399_v37 = vpop.f32.mrb[38].mxu0 }
0x1548   : > { %5730 = vst.msk [vmem:[%s17401_s2 + $0x8] sm:$0xff] %vm3718_vm4, %v17399_v37  ;;  %v17406_v38 = vpop.f32.mrb[39].mxu0 }
0x1549   : > { %5729 = vst.msk [vmem:[%s17401_s2] sm:$0xff] %vm3718_vm4, %v17406_v38  ;;  %13369 = vmatprep.mubr.msk.f32.mxu0 %vm3718_vm4, %v17406_v38 }
0x154a   : > { %13370 = vmatmul.mubr.msk.f32.vlgmr.msra.gmra.mrb[40].mxu0 %vm3718_vm4, %v17399_v37 }
0x154b   : > { %14354 = vmatpush3.bf16.msra.mxu0 %v14351_v63 }
0x154c   : > { %14356 = vmatprep.subr.bf16.mxu0 %v14355_v4 }
0x161d   : > { %v13371_v40 = vpop.f32.mrb[40].mxu0 }
0x161e   : > { %v17415_v42 = vadd.f32 %v13371_v40, %v12028_v39  ;;  %v5816_v43 = vpop.f32.mrb[41].mxu0 }
0x161f   : > { %v17417_v44 = vadd.f32 %v12028_v39, %v5816_v43 }
0x1620   : > { %v5828_v47 = vsel %vm2203_vm0, %v17415_v42, 0.0 }
0x1621   : > { %5829 = vadd.xlane.f32.xlu1 %v5828_v47  ;;  %v5825_v48 = vsel %vm2203_vm0, %v17417_v44, 0.0 }
0x1622   : > { %5826 = vadd.xlane.f32.xlu0 %v5825_v48 }
0x16ae   : > { %v5830_v50 = vpop.xlane.xlu1 %5829 }
0x16af   : > { %v5833_v51 = vmul.f32 0.0625, %v5830_v50  ;;  %v5827_v52 = vpop.xlane.xlu0 %5826  ;;  %v12039_v50 = vld [vmem:[#allocation46] ss:$0 sm:$0xff] }
0x16b0   : > { %v5832_v53 = vmul.f32 0.0625, %v5827_v52 }
0x16b1   : > { %v5835_v54 = vsub.f32 %v17415_v42, %v5833_v51 }
0x16b2   : > { %v5834_v55 = vsub.f32 %v17417_v44, %v5832_v53 }
0x16b3   : > { %v5837_v56 = vmul.f32 %v5835_v54, %v5835_v54 }
0x16b4   : > { %v5836_v57 = vmul.f32 %v5834_v55, %v5834_v55 }
0x16b5   : > { %v5841_v58 = vsel %vm2203_vm0, %v5837_v56, 0.0 }
0x16b6   : > { %5842 = vadd.xlane.f32.xlu1 %v5841_v58  ;;  %v5838_v59 = vsel %vm2203_vm0, %v5836_v57, 0.0 }
0x16b7   : > { %5839 = vadd.xlane.f32.xlu0 %v5838_v59 }
0x1743   : > { %v5843_v5 = vpop.xlane.xlu1 %5842 }
0x1744   : > { %v5845_v6 = vmul.f32 0.0625, %v5843_v5  ;;  %v5840_v7 = vpop.xlane.xlu0 %5839 }
0x1745   : > { %v5844_v8 = vmul.f32 0.0625, %v5840_v7 }
0x1746   : > { %v5847_v9 = vadd.f32 1e-05, %v5845_v6 }
0x1747   : > { %v5846_v10 = vadd.f32 1e-05, %v5844_v8 }
0x1748   : > { %15140 = vrsqrt.f32 %v5847_v9 }
0x1749   : > { %15142 = vrsqrt.f32 %v5846_v10  ;;  %v12048_v10 = vld [vmem:[%s18187_s23 + $0x10] sm:$0xff] }
0x1752   : > { %v15141_v11 = vpop.eup %15140 }
0x1753   : > { %v15143_v13 = vpop.eup %15142  ;;  %v5851_v14 = vmul.f32 %v15141_v11, %v5835_v54  ;;  %v12049_v11 = vld [vmem:[%s18187_s23 + $0x18] sm:$0xff] }
0x1754   : > { %v5850_v15 = vmul.f32 %v15143_v13, %v5834_v55 }
0x1755   : > { %v5860_v17 = vmul.f32 %v12031_v12, %v5851_v14 }
0x1756   : > { %v5859_v18 = vmul.f32 %v12031_v12, %v5850_v15  ;;  %v14373_v12 = vpack.c.bf16 %v12049_v11, %v12048_v10 }
0x1757   : > { %v17437_v22 = vadd.f32 %v12032_v16, %v5860_v17  ;;  %v12055_v17 = vld [vmem:[%s18190_s5 + $0x18] sm:$0xff] }
0x1758   : > { %v17435_v21 = vadd.f32 %v12032_v16, %v5859_v18  ;;  %v12054_v16 = vld [vmem:[%s18190_s5 + $0x10] sm:$0xff]  ;;  %s2193_s5 = scalar_lea.vmem %s16533_s25, %s17083_s1  ;;  %s18199_s1 = sld [smem:[#allocation79_spill]] }
0x175a   : > { %13376 = vmatprep.mubr.msk.f32.mxu0 %vm2203_vm0, %v17435_v21  ;;  %13425 = vmatprep.mubr.msk.f32.mxu1 %vm2203_vm0, %v17435_v21 }
0x175b   : > { %13377 = vmatmul.mubr.msk.f32.vlgmr.msra.gmra.mrb[42].mxu0 %vm2203_vm0, %v17437_v22  ;;  %13426 = vmatmul.mubr.msk.f32.vlgmr.msra.gmra.mrb[28].mxu1 %vm2203_vm0, %v17437_v22 }
0x175c   : > { %14358 = vmatpush3.bf16.msra.mxu0 %v14355_v4  ;;  %13383 = vmatprep.mubr.msk.f32.mxu0 %vm2203_vm0, %v17435_v21 }
0x175d   : > { %14360 = vmatprep.subr.bf16.mxu0 %v14359_v23 }
0x175f   : > { %13384 = vmatmul.mubr.msk.f32.vlgmr.msra.gmra.mrb[44].mxu0 %vm2203_vm0, %v17437_v22 }
0x1760   : > { %14362 = vmatpush3.bf16.msra.mxu0 %v14359_v23  ;;  %13390 = vmatprep.mubr.msk.f32.mxu0 %vm2203_vm0, %v17435_v21  ;;  %v14377_v23 = vpack.c.bf16 %v12055_v17, %v12054_v16 }
0x1763   : > { %13391 = vmatmul.mubr.msk.f32.vlgmr.msra.gmra.mrb[46].mxu0 %vm2203_vm0, %v17437_v22 }
0x182e   : > { %v13378_v26 = vpop.f32.mrb[42].mxu0  ;;  %v13427_v27 = vpop.f32.mrb[28].mxu1 }
0x182f   : > { %v6576_v30 = vadd.f32 %v13427_v27, %v12062_v24  ;;  %v5951_v31 = vpop.f32.mrb[43].mxu0  ;;  %v6570_v32 = vpop.f32.mrb[29].mxu1  ;;  %v5957_v57 = vadd.f32 %v13378_v26, %v12033_v25  ;;  %v12051_v26 = vld [vmem:[%s18192_s7 + $0x1] ss:$0 sm:$0xff] }
0x1830   : > { %v5952_v34 = vadd.f32 %v12033_v25, %v5951_v31  ;;  %v6571_v35 = vadd.f32 %v12062_v24, %v6570_v32  ;;  %v12057_v32 = vld [vmem:[%s18194_s4 + $0x1] ss:$0 sm:$0xff]  ;;  %s18197_s4 = smov %s18196_s26 }
0x1832   : > { %v14391_v39 = vpack.c.bf16 %v6576_v30, %v6571_v35  ;;  %v13385_v40 = vpop.f32.mrb[44].mxu0  ;;  %13397 = vmatprep.mubr.msk.f32.mxu0 %vm3718_vm4, %v5952_v34 }
0x1833   : > { %v6041_v43 = vadd.f32 %v13385_v40, %v12036_v36  ;;  %v6035_v47 = vpop.f32.mrb[45].mxu0 }
0x1834   : > { %v6036_v48 = vadd.f32 %v12036_v36, %v6035_v47  ;;  %14392 = vmatprep.subr.bf16.mxu1 %v14391_v39 }
0x1835   : > { %14394 = vmatpush3.bf16.msra.mxu1 %v14391_v39 }
0x1836   : > { %v14363_v51 = vpack.c.bf16 %v6041_v43, %v6036_v48  ;;  %v13392_v52 = vpop.f32.mrb[46].mxu0 }
0x1837   : > { %v6125_v53 = vadd.f32 %v13392_v52, %v12039_v50  ;;  %v6119_v54 = vpop.f32.mrb[47].mxu0 }
0x1838   : > { %v6120_v55 = vadd.f32 %v12039_v50, %v6119_v54  ;;  %14365 = vmatprep.subr.msk.bf16.mxu0 %vm17360_vm7, %v14363_v51 }
0x1839   : > { %14368 = vmatpush3.bf16.xpose.msk.msra.mxu0 %vm17360_vm7, %v14363_v51 }
0x183a   : > { %v14369_v56 = vpack.c.bf16 %v6125_v53, %v6120_v55 }
0x183c   : > { %14370 = vmatprep.subr.bf16.mxu0 %v14369_v56 }
0x1840   : > { %13398 = vmatmul.mubr.msk.f32.vlgmr.msra.gmra.mrb[48].mxu0 %vm3718_vm4, %v5957_v57 }
0x1841   : > { %14372 = vmatpush3.bf16.msra.mxu0 %v14369_v56 }
0x1842   : > { %14374 = vmatprep.subr.bf16.mxu0 %v14373_v12 }
0x1913   : > { %v13399_v58 = vpop.f32.mrb[48].mxu0 }
0x1914   : > { %v6216_v59 = vmul.f32 0.35355338, %v13399_v58  ;;  %v6206_v60 = vpop.f32.mrb[49].mxu0 }
0x1915   : > { %v6215_v61 = vmul.f32 0.35355338, %v6206_v60 }
0x1916   : > { %v6220_v62 = vsel %vm2203_vm0, %v6216_v59, -inf }
0x1917   : > { %6221 = vmax.xlane.f32.xlu1 %v6220_v62  ;;  %v6217_v63 = vsel %vm2203_vm0, %v6215_v61, -inf }
0x1918   : > { %6218 = vmax.xlane.f32.xlu0 %v6217_v63 }
0x19a4   : > { %v6222_v0 = vpop.xlane.xlu1 %6221 }
0x19a5   : > { %v6224_v1 = vsub.f32 %v6216_v59, %v6222_v0  ;;  %v6219_v2 = vpop.xlane.xlu0 %6218 }
0x19a6   : > { %v6223_v3 = vsub.f32 %v6215_v61, %v6219_v2 }
0x19a7   : > { %v6227_v4 = vmul.f32 1.442695, %v6224_v1 }
0x19a8   : > { %v6225_v5 = vmul.f32 1.442695, %v6223_v3  ;;  %v6772_v3 = vld [vmem:[#allocation40 + $0x8] sm:$0xff] }
0x19a9   : > { %15144 = vpow2.f32 %v6227_v4  ;;  %13442 = vmatprep.subr.mxu1 %v6772_v3  ;;  %v6320_v4 = vld [vmem:[#allocation40] sm:$0xff] }
0x19aa   : > { %15146 = vpow2.f32 %v6225_v5 }
0x19b3   : > { %v15145_v6 = vpop.eup %15144 }
0x19b4   : > { %v15147_v7 = vpop.eup %15146  ;;  %v6232_v8 = vsel %vm2203_vm0, %v15145_v6, 0.0 }
0x19b5   : > { %6233 = vadd.xlane.f32.xlu1 %v6232_v8  ;;  %v6229_v9 = vsel %vm2203_vm0, %v15147_v7, 0.0  ;;  %v12075_v8 = vld [vmem:[#allocation44] ss:$0 sm:$0xff] }
0x19b6   : > { %6230 = vadd.xlane.f32.xlu0 %v6229_v9 }
0x1a42   : > { %v6234_v13 = vpop.xlane.xlu1 %6233 }
0x1a43   : > { %15148 = vrcp.f32 %v6234_v13  ;;  %v6231_v14 = vpop.xlane.xlu0 %6230 }
0x1a44   : > { %15150 = vrcp.f32 %v6231_v14 }
0x1a4d   : > { %v15149_v15 = vpop.eup %15148 }
0x1a4e   : > { %v15151_v18 = vpop.eup %15150  ;;  %v6238_v20 = vmul.f32 %v15149_v15, %v15145_v6 }
0x1a4f   : > { %v6237_v19 = vmul.f32 %v15151_v18, %v15147_v7 }
0x1a51   : > { %13404 = vmatprep.mubr.msk.f32.mxu0 %vm2203_vm0, %v6237_v19 }
0x1a52   : > { %13405 = vmatmul.mubr.msk.f32.vlgmr.msra.gmra.mrb[50].mxu0 %vm2203_vm0, %v6238_v20 }
0x1a53   : > { %14376 = vmatpush3.bf16.msra.mxu0 %v14373_v12  ;;  %13411 = vmatprep.mubr.msk.f32.mxu0 %vm2203_vm0, %v17435_v21 }
0x1a54   : > { %14378 = vmatprep.subr.bf16.mxu0 %v14377_v23 }
0x1a56   : > { %13412 = vmatmul.mubr.msk.f32.vlgmr.msra.gmra.mrb[52].mxu0 %vm2203_vm0, %v17437_v22 }
0x1a57   : > { %14380 = vmatpush3.bf16.msra.mxu0 %v14377_v23  ;;  %13418 = vmatprep.mubr.msk.f32.mxu0 %vm2203_vm0, %v17435_v21  ;;  %v5712_v23 = vsub.f32 %v17406_v38, %v17374_v46 }
0x1a5a   : > { %13419 = vmatmul.mubr.msk.f32.vlgmr.msra.gmra.mrb[54].mxu0 %vm2203_vm0, %v17437_v22 }
0x1b25   : > { %v13406_v24 = vpop.f32.mrb[50].mxu0 }
0x1b26   : > { %v6311_v25 = vpop.f32.mrb[51].mxu0 }
0x1b29   : > { %v13413_v27 = vpop.f32.mrb[52].mxu0 }
0x1b2a   : > { %v6398_v30 = vpop.f32.mrb[53].mxu0  ;;  %v6404_v21 = vadd.f32 %v13413_v27, %v12051_v26 }
0x1b2b   : > { %v6399_v31 = vadd.f32 %v12051_v26, %v6398_v30 }
0x1b2d   : > { %v13420_v34 = vpop.f32.mrb[54].mxu0  ;;  %13432 = vmatprep.mubr.msk.f32.mxu0 %vm3718_vm4, %v6399_v31  ;;  %v5714_v31 = vmul.f32 %v5712_v23, %v5712_v23 }
0x1b2e   : > { %v6490_v35 = vadd.f32 %v13420_v34, %v12057_v32  ;;  %v6484_v36 = vpop.f32.mrb[55].mxu0  ;;  %v6991_v34 = vld [vmem:[#allocation38 + $0x8] sm:$0xff] }
0x1b2f   : > { %v6485_v39 = vadd.f32 %v12057_v32, %v6484_v36 }
0x1b31   : > { %v14385_v40 = vpack.c.bf16 %v6490_v35, %v6485_v39 }
0x1b33   : > { %14387 = vmatprep.subr.msk.bf16.mxu0 %vm17360_vm7, %v14385_v40 }
0x1b34   : > { %14390 = vmatpush3.bf16.xpose.msk.msra.mxu0 %vm17360_vm7, %v14385_v40  ;;  %vm7109_vm7 = vcmask 261120  }
0x1b3b   : > { %13433 = vmatmul.mubr.msk.f32.vlgmr.msra.gmra.mrb[56].mxu0 %vm3718_vm4, %v6404_v21 }
0x1c0e   : > { %v13434_v22 = vpop.f32.mrb[56].mxu0 }
0x1c0f   : > { %v6667_v43 = vmul.f32 0.35355338, %v13434_v22  ;;  %v6657_v47 = vpop.f32.mrb[57].mxu0 }
0x1c10   : > { %v6666_v48 = vmul.f32 0.35355338, %v6657_v47 }
0x1c11   : > { %v6671_v50 = vsel %vm2203_vm0, %v6667_v43, -inf }
0x1c12   : > { %6672 = vmax.xlane.f32.xlu1 %v6671_v50  ;;  %v6668_v51 = vsel %vm2203_vm0, %v6666_v48, -inf }
0x1c13   : > { %6669 = vmax.xlane.f32.xlu0 %v6668_v51 }
0x1c9f   : > { %v6673_v52 = vpop.xlane.xlu1 %6672 }
0x1ca0   : > { %v6675_v53 = vsub.f32 %v6667_v43, %v6673_v52  ;;  %v6670_v54 = vpop.xlane.xlu0 %6669 }
0x1ca1   : > { %v6674_v55 = vsub.f32 %v6666_v48, %v6670_v54  ;;  %v12076_v54 = vld [vmem:[%s18195_s0] ss:$0 sm:$0xff]  ;;  %s18200_s0 = sld [smem:[#allocation84_spill]] }
0x1ca2   : > { %v6678_v56 = vmul.f32 1.442695, %v6675_v53 }
0x1ca3   : > { %v6676_v33 = vmul.f32 1.442695, %v6674_v55 }
0x1ca4   : > { %15152 = vpow2.f32 %v6678_v56 }
0x1ca5   : > { %15154 = vpow2.f32 %v6676_v33 }
0x1cae   : > { %v15153_v57 = vpop.eup %15152 }
0x1caf   : > { %v15155_v58 = vpop.eup %15154  ;;  %v6683_v59 = vsel %vm2203_vm0, %v15153_v57, 0.0 }
0x1cb0   : > { %6684 = vadd.xlane.f32.xlu1 %v6683_v59  ;;  %v6680_v60 = vsel %vm2203_vm0, %v15155_v58, 0.0 }
0x1cb1   : > { %6681 = vadd.xlane.f32.xlu0 %v6680_v60  ;;  %v12077_v60 = vld [vmem:[#allocation50] ss:$0 sm:$0xff] }
0x1d3d   : > { %v6685_v61 = vpop.xlane.xlu1 %6684 }
0x1d3e   : > { %15156 = vrcp.f32 %v6685_v61  ;;  %v6682_v62 = vpop.xlane.xlu0 %6681 }
0x1d3f   : > { %15158 = vrcp.f32 %v6682_v62 }
0x1d48   : > { %v15157_v63 = vpop.eup %15156 }
0x1d49   : > { %v15159_v0 = vpop.eup %15158  ;;  %v6689_v2 = vmul.f32 %v15157_v63, %v15153_v57 }
0x1d4a   : > { %v6688_v1 = vmul.f32 %v15159_v0, %v15155_v58  ;;  %v7098_v0 = vld [vmem:[%s18196_s26] sm:$0xff]  ;;  %s18202_s26 = sld [smem:[#allocation85_spill]] }
0x1d4c   : > { %13439 = vmatprep.mubr.msk.f32.mxu1 %vm2203_vm0, %v6688_v1  ;;  %v7099_v1 = vld [vmem:[%s18197_s4 + $0x8] sm:$0xff] }
0x1d4d   : > { %13440 = vmatmul.mubr.msk.f32.vlgmr.msra.gmra.mrb[30].mxu1 %vm2203_vm0, %v6689_v2  ;;  %v14399_v2 = vpack.c.bf16 %v7099_v1, %v7098_v0 }
0x1d4e   : > { %13443 = vmatpush3.msra.mxu1 %v6772_v3  ;;  %v7100_v3 = vld [vmem:[%s18197_s4 + $0x10] sm:$0xff] }
0x1d4f   : > { %13447 = vmatprep.subr.mxu1 %v6320_v4 }
0x1e20   : > { %v13441_v5 = vpop.f32.mrb[30].mxu1 }
0x1e21   : > { %v6762_v6 = vpop.f32.mrb[31].mxu1 }
0x1e22   : > { %13444 = vmatprep.mubr.msk.f32.mxu1 %vm3718_vm4, %v6762_v6  ;;  %v12078_v6 = vld [vmem:[#allocation41] ss:$0 sm:$0xff] }
0x1e23   : > { %13445 = vmatmul.mubr.msk.f32.vlgmr.msra.gmra.mrb[32].mxu1 %vm3718_vm4, %v13441_v5 }
0x1e24   : > { %13449 = vmatprep.mubr.msk.f32.mxu1 %vm3718_vm4, %v6311_v25  ;;  %13448 = vmatpush3.msra.mxu1 %v6320_v4  ;;  %v7101_v4 = vld [vmem:[%s18197_s4 + $0x18] sm:$0xff]  ;;  %s18201_s4 = smov %s18200_s0 }
0x1e25   : > { %14407 = vmatprep.subr.bf16.mxu1 %v16229_v28  ;;  %v14403_v5 = vpack.c.bf16 %v7101_v4, %v7100_v3 }
0x1e2b   : > { %13450 = vmatmul.mubr.msk.f32.vlgmr.msra.gmra.mrb[32].mxu1 %vm3718_vm4, %v13406_v24 }
0x1e2c   : > { %13474 = vmatprep.mubr.msk.f32.mxu1 %vm16230_vm3, %v16231_v29 }
0x1efe   : > { %v13451_v7 = vpop.f32.mrb[32].mxu1 }
0x1eff   : > { %v6936_v9 = vadd.f32 %v13451_v7, %v17415_v42  ;;  %v6926_v10 = vpop.f32.mrb[33].mxu1 }
0x1f00   : > { %v6935_v11 = vadd.f32 %v6926_v10, %v17417_v44  ;;  %v5713_v44 = vsub.f32 %v17399_v37, %v17372_v45  ;;  %v5716_v45 = vsel %vm3718_vm4, %v5714_v31, 0.0  ;;  %v6990_v37 = vld [vmem:[#allocation38] sm:$0xff] }
0x1f01   : > { %v17504_v12 = vadd.f32 %v12075_v8, %v6936_v9  ;;  %v14395_v35 = vpack.c.bf16 %v6991_v34, %v6990_v37 }
0x1f02   : > { %v17506_v13 = vadd.f32 %v12075_v8, %v6935_v11  ;;  %v5715_v27 = vmul.f32 %v5713_v44, %v5713_v44 }
0x1f03   : > { %v6949_v14 = vsel %vm2203_vm0, %v17504_v12, 0.0  ;;  %14396 = vmatprep.subr.bf16.mxu0 %v14395_v35 }
0x1f04   : > { %6950 = vadd.xlane.f32.xlu1 %v6949_v14  ;;  %v6946_v15 = vsel %vm2203_vm0, %v17506_v13, 0.0  ;;  %v5719_v32 = vsel %vm3718_vm4, %v5715_v27, 0.0  ;;  %14398 = vmatpush3.bf16.msra.mxu0 %v14395_v35 }
0x1f05   : > { %6947 = vadd.xlane.f32.xlu0 %v6946_v15  ;;  %14400 = vmatprep.subr.bf16.mxu0 %v14399_v2 }
0x1f91   : > { %v6951_v16 = vpop.xlane.xlu1 %6950 }
0x1f92   : > { %v6953_v17 = vmul.f32 0.0625, %v6951_v16  ;;  %v6948_v18 = vpop.xlane.xlu0 %6947 }
0x1f93   : > { %v6952_v19 = vmul.f32 0.0625, %v6948_v18 }
0x1f94   : > { %v6955_v42 = vsub.f32 %v17504_v12, %v6953_v17 }
0x1f95   : > { %v6954_v20 = vsub.f32 %v17506_v13, %v6952_v19 }
0x1f96   : > { %v6957_v24 = vmul.f32 %v6955_v42, %v6955_v42 }
0x1f97   : > { %v6956_v25 = vmul.f32 %v6954_v20, %v6954_v20 }
0x1f98   : > { %v6961_v26 = vsel %vm2203_vm0, %v6957_v24, 0.0 }
0x1f99   : > { %6962 = vadd.xlane.f32.xlu1 %v6961_v26  ;;  %v6958_v30 = vsel %vm2203_vm0, %v6956_v25, 0.0 }
0x1f9a   : > { %6959 = vadd.xlane.f32.xlu0 %v6958_v30 }
0x1f9d   : > { %5720 = vadd.xlane.f32.xlu1 %v5719_v32 }
0x1f9e   : > { %5717 = vadd.xlane.f32.xlu0 %v5716_v45  ;;  %v12081_v45 = vld [vmem:[#allocation43] ss:$0 sm:$0xff] }
0x2026   : > { %v6963_v46 = vpop.xlane.xlu1 %6962 }
0x2027   : > { %v6965_v38 = vmul.f32 0.0625, %v6963_v46  ;;  %v6960_v36 = vpop.xlane.xlu0 %6959 }
0x2028   : > { %v6964_v39 = vmul.f32 0.0625, %v6960_v36 }
0x2029   : > { %v6967_v40 = vadd.f32 1e-05, %v6965_v38 }
0x202a   : > { %v6966_v21 = vadd.f32 1e-05, %v6964_v39  ;;  %v5721_v22 = vpop.xlane.xlu1 %5720 }
0x202b   : > { %15160 = vrsqrt.f32 %v6967_v40  ;;  %v5718_v43 = vpop.xlane.xlu0 %5717  ;;  %v7193_v40 = vld [vmem:[#allocation5] sm:$0xf] }
0x202c   : > { %15162 = vrsqrt.f32 %v6966_v21  ;;  %v5722_v47 = vadd.f32 %v5721_v22, %v5718_v43  ;;  %v7270_v21 = vld [vmem:[#allocation5 + $0x4] sm:$0xf]  ;;  %v7345_v22 = vld [vmem:[#allocation2 + $0x10] sm:$0xff]  ;;  %v7346_v43 = vld [vmem:[#allocation2 + $0x18] sm:$0xff] }
0x202e   : > { %v5723_v48 = vrot.slane %v5722_v47, 4 }
0x2030   : > { %v5724_v50 = vadd.f32 %v5723_v48, %v5722_v47  ;;  %v14414_v47 = vpack.c.bf16 %v7346_v43, %v7345_v22  ;;  %v7267_v48 = vld [vmem:[#allocation2] sm:$0xff] }
0x2032   : > { %v5725_v51 = vrot.slane %v5724_v50, 2 }
0x2034   : > { %v5726_v52 = vadd.f32 %v5725_v51, %v5724_v50  ;;  %v7268_v50 = vld [vmem:[#allocation2 + $0x8] sm:$0xff] }
0x2035   : > { %v15161_v53 = vpop.eup %15160 }
0x2036   : > { %v15163_v55 = vpop.eup %15162  ;;  %v6971_v56 = vmul.f32 %v15161_v53, %v6955_v42  ;;  %v5727_v33 = vrot.slane %v5726_v52, 1  ;;  %v14417_v53 = vpack.c.bf16 %v7268_v50, %v7267_v48 }
0x2037   : > { %v6970_v57 = vmul.f32 %v15163_v55, %v6954_v20 }
0x2038   : > { %v5728_v58 = vadd.f32 %v5727_v33, %v5726_v52  ;;  %v6980_v59 = vmul.f32 %v12076_v54, %v6971_v56  ;;  %v7569_v56 = vld [vmem:[#allocation2 + $0x20] sm:$0xff]  ;;  %v7570_v33 = vld [vmem:[#allocation2 + $0x28] sm:$0xff] }
0x2039   : > { %v6979_v61 = vmul.f32 %v12076_v54, %v6970_v57 }
0x203a   : > { %5735 = vst.msk [vmem:[%s2193_s5] sm:$0x1] %vm5734_vm15, %v5728_v58  ;;  %v6989_v63 = vadd.f32 %v12077_v60, %v6980_v59  ;;  %v14423_v59 = vpack.c.bf16 %v7570_v33, %v7569_v56  ;;  %s18198_s5 = sld [smem:[#allocation90_spill]] }
0x203b   : > { %v6988_v62 = vadd.f32 %v12077_v60, %v6979_v61 }
0x203d   : > { %13456 = vmatprep.mubr.msk.f32.mxu0 %vm2203_vm0, %v6988_v62  ;;  %v7721_v62 = vld [vmem:[#allocation2 + $0x30] sm:$0xff] }
0x203e   : > { %13457 = vmatmul.mubr.msk.f32.vlgmr.msra.gmra.mrb[58].mxu0 %vm2203_vm0, %v6989_v63  ;;  %v7722_v63 = vld [vmem:[#allocation2 + $0x38] sm:$0xff] }
0x203f   : > { %14402 = vmatpush3.bf16.msra.mxu0 %v14399_v2  ;;  %v14429_v0 = vpack.c.bf16 %v7722_v63, %v7721_v62  ;;  %v8357_v63 = vld [vmem:[%s18201_s4 + $0x20] sm:$0xff] }
0x2040   : > { %14404 = vmatprep.subr.bf16.mxu0 %v14403_v5  ;;  %v12097_v1 = vld [vmem:[%s18198_s5 + $0x40] sm:$0xff]  ;;  %v12098_v2 = vld [vmem:[%s18198_s5 + $0x48] sm:$0xff]  ;;  %v12099_v4 = vld [vmem:[%s18198_s5 + $0x50] sm:$0xff] }
0x2041   : > { %v14432_v3 = vpack.c.bf16 %v12098_v2, %v12097_v1  ;;  %v12115_v22 = vld [vmem:[%s18198_s5 + $0xa8] sm:$0xff]  ;;  %v12117_v48 = vld [vmem:[%s18198_s5 + $0xb8] sm:$0xff]  ;;  %v8359_v2 = vld [vmem:[%s18201_s4 + $0x30] sm:$0xff] }
0x2043   : > { %14406 = vmatpush3.bf16.msra.mxu0 %v14403_v5  ;;  %v12100_v5 = vld [vmem:[%s18198_s5 + $0x58] sm:$0xff] }
0x2044   : > { %14413 = vmatprep.subr.bf16.mxu0 %v16229_v28 }
0x2111   : > { %v13458_v7 = vpop.f32.mrb[58].mxu0 }
0x2112   : > { %v7077_v8 = vadd.f32 %v13458_v7, %v12078_v6  ;;  %v7071_v9 = vpop.f32.mrb[59].mxu0  ;;  %v12101_v7 = vld [vmem:[%s18198_s5 + $0x60] sm:$0xff] }
0x2113   : > { %v7072_v10 = vadd.f32 %v12078_v6, %v7071_v9  ;;  %v14435_v6 = vpack.c.bf16 %v12100_v5, %v12099_v4 }
0x2114   : > { %v7081_v11 = vmul.f32 %v7077_v8, %v7077_v8 }
0x2115   : > { %v7080_v14 = vmul.f32 %v7072_v10, %v7072_v10 }
0x2116   : > { %v7083_v15 = vmul.f32 %v7081_v11, %v7077_v8 }
0x2117   : > { %v7082_v16 = vmul.f32 %v7080_v14, %v7072_v10  ;;  %v7874_v14 = vld [vmem:[%s18198_s5] sm:$0xff] }
0x2118   : > { %v7085_v17 = vmul.f32 0.044715, %v7083_v15  ;;  %v7875_v15 = vld [vmem:[%s18198_s5 + $0x8] sm:$0xff] }
0x2119   : > { %v7084_v18 = vmul.f32 0.044715, %v7082_v16 }
0x211a   : > { %v7087_v19 = vadd.f32 %v7085_v17, %v7077_v8  ;;  %v12094_v17 = vld [vmem:[%s18199_s1 + $0x8] sm:$0xff] }
0x211b   : > { %v7086_v42 = vadd.f32 %v7084_v18, %v7072_v10  ;;  %v14444_v18 = vpack.c.bf16 %v7875_v15, %v7874_v14  ;;  %v8431_v14 = vld [vmem:[%s18202_s26] sm:$0xff] }
0x211c   : > { %v7089_v44 = vmul.f32 0.7978846, %v7087_v19  ;;  %v7876_v19 = vld [vmem:[%s18198_s5 + $0x10] sm:$0xff] }
0x211d   : > { %v7088_v20 = vmul.f32 0.7978846, %v7086_v42  ;;  %v7877_v42 = vld [vmem:[%s18198_s5 + $0x18] sm:$0xff] }
0x211e   : > { %15164 = vtanh.f32 %v7089_v44  ;;  %v14447_v44 = vpack.c.bf16 %v7877_v42, %v7876_v19 }
0x211f   : > { %15166 = vtanh.f32 %v7088_v20  ;;  %v7878_v20 = vld [vmem:[%s18198_s5 + $0x20] sm:$0xff] }
0x2128   : > { %v15165_v23 = vpop.eup %15164 }
0x2129   : > { %v15167_v24 = vpop.eup %15166  ;;  %v7093_v25 = vadd.f32 1.0, %v15165_v23  ;;  %v7879_v23 = vld [vmem:[%s18198_s5 + $0x28] sm:$0xff] }
0x212a   : > { %v7092_v26 = vadd.f32 1.0, %v15167_v24  ;;  %v14450_v24 = vpack.c.bf16 %v7879_v23, %v7878_v20 }
0x212b   : > { %v7095_v27 = vmul.f32 0.5, %v7093_v25  ;;  %v7880_v25 = vld [vmem:[%s18198_s5 + $0x30] sm:$0xff] }
0x212c   : > { %v7094_v30 = vmul.f32 0.5, %v7092_v26  ;;  %v7881_v26 = vld [vmem:[%s18198_s5 + $0x38] sm:$0xff] }
0x212d   : > { %v7097_v32 = vmul.f32 %v7095_v27, %v7077_v8  ;;  %v12102_v8 = vld [vmem:[%s18198_s5 + $0x68] sm:$0xff]  ;;  %v14453_v27 = vpack.c.bf16 %v7881_v26, %v7880_v25 }
0x212e   : > { %v7096_v31 = vmul.f32 %v7094_v30, %v7072_v10  ;;  %v14438_v9 = vpack.c.bf16 %v12102_v8, %v12101_v7  ;;  %v7797_v10 = vld [vmem:[%s18199_s1] sm:$0xff]  ;;  %v12103_v30 = vld [vmem:[%s18198_s5 + $0x70] sm:$0xff] }
0x2130   : > { %13467 = vmatprep.mubr.msk.f32.mxu0 %vm7109_vm7, %v7096_v31  ;;  %v12104_v31 = vld [vmem:[%s18198_s5 + $0x78] sm:$0xff] }
0x2131   : > { %13468 = vmatmul.mubr.msk.f32.vlgmr.msra.gmra.mrb[60].mxu0 %vm7109_vm7, %v7097_v32  ;;  %v14441_v32 = vpack.c.bf16 %v12104_v31, %v12103_v30 }
0x2132   : > { %13488 = vmatprep.mubr.msk.f32.mxu0 %vm16230_vm3, %v16231_v29  ;;  %14415 = vmatpush3.bf16.msra.mxu0 %v14414_v47  ;;  %v12116_v47 = vld [vmem:[%s18198_s5 + $0xb0] sm:$0xff] }
0x2133   : > { %14416 = vmatprep.subr.bf16.mxu0 %v16229_v28  ;;  %v14465_v50 = vpack.c.bf16 %v12117_v48, %v12116_v47 }
0x2204   : > { %v13469_v37 = vpop.f32.mrb[60].mxu0 }
0x2205   : > { %v7188_v34 = vadd.f32 %v13469_v37, %v12081_v45  ;;  %v7182_v35 = vpop.f32.mrb[61].mxu0  ;;  %v12111_v37 = vld [vmem:[%s18198_s5 + $0x88] sm:$0xff] }
0x2206   : > { %v7183_v46 = vadd.f32 %v12081_v45, %v7182_v35  ;;  %v12110_v45 = vld [vmem:[%s18198_s5 + $0x80] sm:$0xff] }
0x2207   : > { %v7192_v38 = vadd.f32 %v7188_v34, %v17504_v12  ;;  %v7494_v12 = vld [vmem:[#allocation5 + $0x8] sm:$0xf]  ;;  %v14456_v34 = vpack.c.bf16 %v12111_v37, %v12110_v45 }
0x2208   : > { %v7191_v36 = vadd.f32 %v7183_v46, %v17506_v13  ;;  %v7646_v13 = vld [vmem:[#allocation5 + $0xc] sm:$0xf]  ;;  %v12112_v46 = vld [vmem:[%s18198_s5 + $0x90] sm:$0xff] }
0x220a   : > { %v14408_v39 = vpack.c.bf16 %v7192_v38, %v7191_v36  ;;  %v12113_v38 = vld [vmem:[%s18198_s5 + $0x98] sm:$0xff] }
0x220c   : > { %14409 = vmatpush3.bf16.msra.mxu1 %v14408_v39 }
0x220d   : > { %14410 = vmatprep.subr.bf16.mxu1 %v16229_v28 }
0x220f   : > { %13475 = vmatmul.mubr.msk.f32.vlgmr.msra.gmra.mrb[34].mxu1 %vm2203_vm0, %v7193_v40 }
0x2210   : > { %14412 = vmatpush3.bf16.msra.mxu1 %v14408_v39  ;;  %13481 = vmatprep.mubr.msk.f32.mxu1 %vm16230_vm3, %v16231_v29 }
0x2211   : > { %14419 = vmatprep.subr.bf16.mxu1 %v16229_v28 }
0x2213   : > { %13482 = vmatmul.mubr.msk.f32.vlgmr.msra.gmra.mrb[36].mxu1 %vm2203_vm0, %v7270_v21 }
0x2214   : > { %14421 = vmatpush3.bf16.msra.mxu1 %v14408_v39  ;;  %13502 = vmatprep.mubr.msk.f32.mxu1 %vm16230_vm3, %v16231_v29 }
0x2215   : > { %14425 = vmatprep.subr.bf16.mxu1 %v16229_v28 }
0x2217   : > { %13503 = vmatmul.mubr.msk.f32.vlgmr.msra.gmra.mrb[38].mxu1 %vm2203_vm0, %v7494_v12  ;;  %v12107_v12 = vld [vmem:[%s18199_s1 + $0x10] sm:$0xff]  ;;  %s18203_s1 = smov %s18202_s26  ;;  %s18206_s26 = sld [smem:[#allocation89_spill]] }
0x2218   : > { %14427 = vmatpush3.bf16.msra.mxu1 %v14408_v39  ;;  %13516 = vmatprep.mubr.msk.f32.mxu1 %vm16230_vm3, %v16231_v29  ;;  %v14459_v39 = vpack.c.bf16 %v12113_v38, %v12112_v46  ;;  %v8432_v15 = vld [vmem:[%s18203_s1 + $0x8] sm:$0xff]  ;;  %v8435_v42 = vld [vmem:[%s18203_s1 + $0x20] sm:$0xff]  ;;  %v8437_v23 = vld [vmem:[%s18203_s1 + $0x30] sm:$0xff] }
0x2219   : > { %13526 = vmatprep.subr.mxu1 %v16231_v29  ;;  %v12134_v26 = vld [vmem:[%s18203_s1 + $0x40] sm:$0xff]  ;;  %v12126_v46 = vld [vmem:[%s18201_s4 + $0x48] sm:$0xff] }
0x221a   : > { %v12138_v48 = vld [vmem:[%s18203_s1 + $0x60] sm:$0xff] }
0x221b   : > { %13517 = vmatmul.mubr.msk.f32.vlgmr.msra.gmra.mrb[40].mxu1 %vm2203_vm0, %v7646_v13  ;;  %v12114_v13 = vld [vmem:[%s18198_s5 + $0xa0] sm:$0xff] }
0x221c   : > { %13528 = vmatprep.mubr.msk.f32.mxu1 %vm16230_vm3, %v16231_v29  ;;  %v14462_v43 = vpack.c.bf16 %v12115_v22, %v12114_v13  ;;  %v12129_v13 = vld [vmem:[%s18201_s4 + $0x60] sm:$0xff] }
0x22e2   : > { %v7263_v51 = vpop.f32.mrb[34].mxu1 }
0x22e3   : > { %v13476_v52 = vpop.f32.mrb[35].mxu1 }
0x22e6   : > { %v7340_v54 = vpop.f32.mrb[36].mxu1 }
0x22e7   : > { %v13483_v55 = vpop.f32.mrb[37].mxu1  ;;  %13489 = vmatmul.mubr.msk.f32.vlgmr.msra.gmra.mrb[62].mxu0 %vm2203_vm0, %v7340_v54 }
0x22e8   : > { %14418 = vmatpush3.bf16.msra.mxu0 %v14417_v53  ;;  %13495 = vmatprep.mubr.msk.f32.mxu0 %vm16230_vm3, %v16231_v29 }
0x22e9   : > { %14422 = vmatprep.subr.bf16.mxu0 %v16229_v28 }
0x22ea   : > { %v7564_v57 = vpop.f32.mrb[38].mxu1 }
0x22eb   : > { %v13504_v58 = vpop.f32.mrb[39].mxu1 }
0x22ec   : > { %v8354_v58 = vld [vmem:[%s18201_s4 + $0x8] sm:$0xff] }
0x22ee   : > { %v7716_v60 = vpop.f32.mrb[40].mxu1 }
0x22ef   : > { %13496 = vmatmul.mubr.msk.f32.vlgmr.msra.gmra.mrb[62].mxu0 %vm2203_vm0, %v7263_v51  ;;  %v13518_v61 = vpop.f32.mrb[41].mxu1 }
0x22f0   : > { %14424 = vmatpush3.bf16.msra.mxu0 %v14423_v59  ;;  %13509 = vmatprep.mubr.msk.f32.mxu0 %vm16230_vm3, %v16231_v29  ;;  %v8356_v61 = vld [vmem:[%s18201_s4 + $0x18] sm:$0xff] }
0x22f1   : > { %14428 = vmatprep.subr.bf16.mxu0 %v16229_v28 }
0x22f7   : > { %13510 = vmatmul.mubr.msk.f32.vlgmr.msra.gmra.mrb[62].mxu0 %vm2203_vm0, %v7564_v57  ;;  %v8353_v57 = vld [vmem:[%s18200_s0] sm:$0xff]  ;;  %s18204_s0 = sld [smem:[#allocation78_spill]] }
0x22f8   : > { %14430 = vmatpush3.bf16.msra.mxu0 %v14429_v0  ;;  %13523 = vmatprep.mubr.msk.f32.mxu0 %vm16230_vm3, %v16231_v29  ;;  %v14480_v59 = vpack.c.bf16 %v8354_v58, %v8353_v57  ;;  %v8358_v0 = vld [vmem:[%s18201_s4 + $0x28] sm:$0xff] }
0x22f9   : > { %14431 = vmatprep.subr.bf16.mxu0 %v16229_v28  ;;  %v14486_v1 = vpack.c.bf16 %v8358_v0, %v8357_v63  ;;  %v12145_v63 = vld [vmem:[%s18201_s4 + $0x80] sm:$0xff]  ;;  %v12146_v0 = vld [vmem:[%s18201_s4 + $0x88] sm:$0xff] }
0x22fd   : > { %s18205_s5 = smov %s18204_s0 }
0x22ff   : > { %13524 = vmatmul.mubr.msk.f32.vlgmr.msra.gmra.mrb[62].mxu0 %vm2203_vm0, %v7716_v60  ;;  %v8355_v60 = vld [vmem:[%s18201_s4 + $0x10] sm:$0xff] }
0x2300   : > { %13552 = vmatprep.mubr.msk.f32.mxu0 %vm16230_vm3, %v16231_v29  ;;  %14433 = vmatpush3.bf16.msra.mxu0 %v14432_v3  ;;  %v14483_v62 = vpack.c.bf16 %v8356_v61, %v8355_v60  ;;  %v8360_v3 = vld [vmem:[%s18201_s4 + $0x38] sm:$0xff] }
0x2301   : > { %14434 = vmatprep.subr.bf16.mxu0 %v16229_v28  ;;  %v14489_v4 = vpack.c.bf16 %v8360_v3, %v8359_v2  ;;  %v8894_v2 = vld [vmem:[#allocation10 + $0x10] sm:$0xff]  ;;  %v12154_v3 = vld [vmem:[%s18203_s1 + $0x80] sm:$0xff] }
0x2304   : > { %14436 = vmatpush3.bf16.msra.mxu0 %v14435_v6  ;;  %v12119_v6 = vld [vmem:[#allocation19] ss:$0 sm:$0xff] }
0x2305   : > { %14437 = vmatprep.subr.bf16.mxu0 %v16229_v28 }
0x2308   : > { %14439 = vmatpush3.bf16.msra.mxu0 %v14438_v9 }
0x2309   : > { %14440 = vmatprep.subr.bf16.mxu0 %v16229_v28 }
0x230c   : > { %14442 = vmatpush3.bf16.msra.mxu0 %v14441_v32 }
0x230d   : > { %13574 = vmatprep.subr.mxu0 %v16231_v29 }
0x23d2   : > { %v7792_v11 = vpop.f32.mrb[62].mxu0 }
0x23d3   : > { %v13525_v16 = vpop.f32.mrb[63].mxu0  ;;  %13527 = vmatpush3.msk.msra.mxu1 %vm4685_vm6, %v7792_v11 }
0x23d4   : > { %13529 = vmatmul.mubr.msk.f32.vlgmr.msra.gmra.mrb[42].mxu1 %vm4678_vm5, %v7797_v10  ;;  %13531 = vmatprep.subr.mxu1 %v16231_v29  ;;  %v14468_v16 = vpack.c.bf16 %v8432_v15, %v8431_v14  ;;  %v12157_v14 = vld [vmem:[%s18203_s1 + $0x98] sm:$0xff] }
0x23d5   : > { %13532 = vmatpush3.msk.msra.mxu1 %vm4685_vm6, %v7792_v11  ;;  %13533 = vmatprep.mubr.msk.f32.mxu1 %vm16230_vm3, %v16231_v29 }
0x23d6   : > { %14443 = vmatprep.subr.bf16.mxu1 %v16229_v28 }
0x23d8   : > { %13534 = vmatmul.mubr.msk.f32.vlgmr.msra.gmra.mrb[44].mxu1 %vm4678_vm5, %v12094_v17  ;;  %v8433_v17 = vld [vmem:[%s18203_s1 + $0x10] sm:$0xff] }
0x23d9   : > { %14445 = vmatpush3.bf16.msra.mxu1 %v14444_v18  ;;  %13571 = vmatprep.mubr.msk.f32.mxu1 %vm16230_vm3, %v16231_v29  ;;  %v8434_v18 = vld [vmem:[%s18203_s1 + $0x18] sm:$0xff] }
0x23da   : > { %14446 = vmatprep.subr.bf16.mxu1 %v16229_v28  ;;  %v14471_v19 = vpack.c.bf16 %v8434_v18, %v8433_v17  ;;  %v12159_v17 = vld [vmem:[%s18203_s1 + $0xa8] sm:$0xff] }
0x23dd   : > { %14448 = vmatpush3.bf16.msra.mxu1 %v14447_v44  ;;  %v8436_v44 = vld [vmem:[%s18203_s1 + $0x28] sm:$0xff] }
0x23de   : > { %14449 = vmatprep.subr.bf16.mxu1 %v16229_v28  ;;  %v14474_v20 = vpack.c.bf16 %v8436_v44, %v8435_v42  ;;  %v12150_v42 = vld [vmem:[%s18201_s4 + $0xa8] sm:$0xff] }
0x23e1   : > { %14451 = vmatpush3.bf16.msra.mxu1 %v14450_v24  ;;  %v8438_v24 = vld [vmem:[%s18203_s1 + $0x38] sm:$0xff] }
0x23e2   : > { %14452 = vmatprep.subr.bf16.mxu1 %v16229_v28  ;;  %v14477_v25 = vpack.c.bf16 %v8438_v24, %v8437_v23  ;;  %v12151_v24 = vld [vmem:[%s18201_s4 + $0xb0] sm:$0xff] }
0x23e5   : > { %14454 = vmatpush3.bf16.msra.mxu1 %v14453_v27  ;;  %v12135_v27 = vld [vmem:[%s18203_s1 + $0x48] sm:$0xff] }
0x23e6   : > { %14455 = vmatprep.subr.bf16.mxu1 %v16229_v28  ;;  %v14492_v30 = vpack.c.bf16 %v12135_v27, %v12134_v26 }
0x24a7   : > { %v7870_v35 = vpop.f32.mrb[42].mxu1 }
0x24a8   : > { %v13530_v36 = vpop.f32.mrb[43].mxu1  ;;  %13572 = vmatmul.mubr.msk.f32.vlgmr.msra.gmra.mrb[46].mxu1 %vm2897_vm2, %v7870_v35  ;;  %v12125_v35 = vld [vmem:[%s18201_s4 + $0x40] sm:$0xff] }
0x24a9   : > { %14457 = vmatpush3.bf16.msra.mxu1 %v14456_v34  ;;  %13595 = vmatprep.mubr.msk.f32.mxu1 %vm16230_vm3, %v16231_v29  ;;  %v8585_v34 = vld [vmem:[#allocation10 + $0x8] sm:$0xff]  ;;  %v14504_v38 = vpack.c.bf16 %v12126_v46, %v12125_v35  ;;  %v12127_v36 = vld [vmem:[%s18201_s4 + $0x50] sm:$0xff] }
0x24aa   : > { %14458 = vmatprep.subr.bf16.mxu1 %v16229_v28 }
0x24ab   : > { %v7953_v40 = vpop.f32.mrb[44].mxu1 }
0x24ac   : > { %v13535_v21 = vpop.f32.mrb[45].mxu1  ;;  %13553 = vmatmul.mubr.msk.f32.vlgmr.msra.gmra.mrb[64].mxu0 %vm2897_vm2, %v7953_v40 }
0x24ad   : > { %13575 = vmatpush3.msk.msra.mxu0 %vm4685_vm6, %v7792_v11  ;;  %13576 = vmatprep.mubr.msk.f32.mxu0 %vm16230_vm3, %v16231_v29  ;;  %v8279_v11 = vld [vmem:[#allocation10] sm:$0xff]  ;;  %v12136_v21 = vld [vmem:[%s18203_s1 + $0x50] sm:$0xff] }
0x24ae   : > { %14460 = vmatpush3.bf16.msra.mxu1 %v14459_v39  ;;  %13598 = vmatprep.subr.mxu0 %v16231_v29  ;;  %v12128_v39 = vld [vmem:[%s18201_s4 + $0x58] sm:$0xff] }
0x24af   : > { %14461 = vmatprep.subr.bf16.mxu1 %v16229_v28  ;;  %v14507_v40 = vpack.c.bf16 %v12128_v39, %v12127_v36  ;;  %v9212_v36 = vld [vmem:[%s18205_s5] sm:$0xff] }
0x24b0   : > { %13577 = vmatmul.mubr.msk.f32.vlgmr.msra.gmra.mrb[66].mxu0 %vm4678_vm5, %v12107_v12  ;;  %v12137_v12 = vld [vmem:[%s18203_s1 + $0x58] sm:$0xff] }
0x24b1   : > { %13600 = vmatprep.mubr.msk.f32.mxu0 %vm16230_vm3, %v16231_v29  ;;  %v14495_v22 = vpack.c.bf16 %v12137_v12, %v12136_v21 }
0x24b2   : > { %14463 = vmatpush3.bf16.msra.mxu1 %v14462_v43  ;;  %v12130_v43 = vld [vmem:[%s18201_s4 + $0x68] sm:$0xff] }
0x24b3   : > { %14464 = vmatprep.subr.bf16.mxu1 %v16229_v28  ;;  %v14510_v47 = vpack.c.bf16 %v12130_v43, %v12129_v13 }
0x24b6   : > { %14466 = vmatpush3.bf16.msra.mxu1 %v14465_v50  ;;  %v12139_v50 = vld [vmem:[%s18203_s1 + $0x68] sm:$0xff] }
0x24b7   : > { %14479 = vmatprep.subr.bf16.mxu1 %v16229_v28 }
0x257b   : > { %v8108_v51 = vpop.f32.mrb[46].mxu1 }
0x257c   : > { %v13573_v52 = vpop.f32.mrb[47].mxu1 }
0x257d   : > { %v14498_v52 = vpack.c.bf16 %v12139_v50, %v12138_v48  ;;  %v12171_v48 = vld [vmem:[%s18206_s26 + $0x40] sm:$0xff] }
0x257f   : > { %v8035_v53 = vpop.f32.mrb[64].mxu0 }
0x2580   : > { %v8109_v54 = vadd.f32 %v8108_v51, %v8035_v53  ;;  %v13554_v55 = vpop.f32.mrb[65].mxu0  ;;  %v12131_v51 = vld [vmem:[%s18201_s4 + $0x70] sm:$0xff]  ;;  %v12132_v53 = vld [vmem:[%s18201_s4 + $0x78] sm:$0xff] }
0x2581   : > { %v12140_v55 = vld [vmem:[%s18203_s1 + $0x70] sm:$0xff] }
0x2583   : > { %v8183_v56 = vpop.f32.mrb[66].mxu0 }
0x2584   : > { %v13578_v33 = vpop.f32.mrb[67].mxu0  ;;  %13596 = vmatmul.mubr.msk.f32.vlgmr.msra.gmra.mrb[48].mxu1 %vm2897_vm2, %v8183_v56  ;;  %v12141_v56 = vld [vmem:[%s18203_s1 + $0x78] sm:$0xff] }
0x2585   : > { %13643 = vmatprep.mubr.msk.f32.mxu1 %vm16230_vm3, %v16231_v29  ;;  %14481 = vmatpush3.bf16.msra.mxu1 %v14480_v59  ;;  %v14501_v33 = vpack.c.bf16 %v12141_v56, %v12140_v55  ;;  %v9213_v55 = vld [vmem:[%s18205_s5 + $0x8] sm:$0xff] }
0x2586   : > { %14482 = vmatprep.subr.bf16.mxu1 %v16229_v28 }
0x2589   : > { %14484 = vmatpush3.bf16.msra.mxu1 %v14483_v62 }
0x258a   : > { %14485 = vmatprep.subr.bf16.mxu1 %v16229_v28 }
0x258d   : > { %14487 = vmatpush3.bf16.msra.mxu1 %v14486_v1 }
0x258e   : > { %14488 = vmatprep.subr.bf16.mxu1 %v16229_v28 }
0x2591   : > { %14490 = vmatpush3.bf16.msra.mxu1 %v14489_v4  ;;  %v12155_v4 = vld [vmem:[%s18203_s1 + $0x88] sm:$0xff] }
0x2592   : > { %14491 = vmatprep.subr.bf16.mxu1 %v16229_v28 }
0x2657   : > { %v8265_v5 = vpop.f32.mrb[48].mxu1 }
0x2658   : > { %v8269_v7 = vadd.f32 %v8265_v5, %v8109_v54  ;;  %v13597_v8 = vpop.f32.mrb[49].mxu1  ;;  %v14513_v54 = vpack.c.bf16 %v12132_v53, %v12131_v51  ;;  %v14528_v5 = vpack.c.bf16 %v12146_v0, %v12145_v63 }
0x2659   : > { %v12148_v8 = vld [vmem:[%s18201_s4 + $0x98] sm:$0xff] }
0x265a   : > { %v8277_v9 = vadd.f32 %v12119_v6, %v8269_v7  ;;  %v12147_v7 = vld [vmem:[%s18201_s4 + $0x90] sm:$0xff] }
0x265b   : > { %v14531_v15 = vpack.c.bf16 %v12148_v8, %v12147_v7 }
0x265c   : > { %v17643_v10 = vmax.f32 %v8277_v9, 0.0 }
0x265e   : > { %13599 = vmatpush3.msra.mxu0 %v17643_v10 }
0x265f   : > { %13601 = vmatmul.mubr.msk.f32.vlgmr.msra.gmra.mrb[68].mxu0 %vm3718_vm4, %v8279_v11  ;;  %13603 = vmatprep.subr.mxu0 %v16231_v29 }
0x2660   : > { %13604 = vmatpush3.msra.mxu0 %v17204_v41  ;;  %13605 = vmatprep.mubr.msk.f32.mxu0 %vm16230_vm3, %v16231_v29 }
0x2661   : > { %14467 = vmatprep.subr.bf16.mxu0 %v16229_v28 }
0x2663   : > { %13606 = vmatmul.mubr.msk.f32.vlgmr.msra.gmra.mrb[70].mxu0 %vm3718_vm4, %v8279_v11  ;;  %v12156_v11 = vld [vmem:[%s18203_s1 + $0x90] sm:$0xff] }
0x2664   : > { %14469 = vmatpush3.bf16.msra.mxu0 %v14468_v16  ;;  %13624 = vmatprep.mubr.msk.f32.mxu0 %vm16230_vm3, %v16231_v29  ;;  %v12158_v16 = vld [vmem:[%s18203_s1 + $0xa0] sm:$0xff] }
0x2665   : > { %14470 = vmatprep.subr.bf16.mxu0 %v16229_v28  ;;  %v14522_v18 = vpack.c.bf16 %v12159_v17, %v12158_v16 }
0x2668   : > { %14472 = vmatpush3.bf16.msra.mxu0 %v14471_v19  ;;  %v12149_v19 = vld [vmem:[%s18201_s4 + $0xa0] sm:$0xff] }
0x2669   : > { %14473 = vmatprep.subr.bf16.mxu0 %v16229_v28  ;;  %v14534_v44 = vpack.c.bf16 %v12150_v42, %v12149_v19 }
0x266c   : > { %14475 = vmatpush3.bf16.msra.mxu0 %v14474_v20  ;;  %v12161_v20 = vld [vmem:[%s18203_s1 + $0xb8] sm:$0xff] }
0x266d   : > { %14476 = vmatprep.subr.bf16.mxu0 %v16229_v28 }
0x2670   : > { %14478 = vmatpush3.bf16.msra.mxu0 %v14477_v25  ;;  %v12152_v25 = vld [vmem:[%s18201_s4 + $0xb8] sm:$0xff] }
0x2671   : > { %13646 = vmatprep.subr.mxu0 %v16231_v29  ;;  %v14537_v26 = vpack.c.bf16 %v12152_v25, %v12151_v24 }
0x2732   : > { %v8349_v31 = vpop.f32.mrb[68].mxu0 }
0x2733   : > { %v13602_v32 = vpop.f32.mrb[69].mxu0  ;;  %13644 = vmatmul.mubr.msk.f32.vlgmr.msra.gmra.mrb[50].mxu1 %vm2897_vm2, %v8349_v31 }
0x2734   : > { %14493 = vmatpush3.bf16.msra.mxu1 %v14492_v30  ;;  %13672 = vmatprep.mubr.msk.f32.mxu1 %vm16230_vm3, %v16231_v29 }
0x2735   : > { %14494 = vmatprep.subr.bf16.mxu1 %v16229_v28 }
0x2736   : > { %v8427_v45 = vpop.f32.mrb[70].mxu0 }
0x2737   : > { %v13607_v37 = vpop.f32.mrb[71].mxu0  ;;  %13625 = vmatmul.mubr.msk.f32.vlgmr.msra.gmra.mrb[72].mxu0 %vm2897_vm2, %v8427_v45 }
0x2738   : > { %13647 = vmatpush3.msra.mxu0 %v17643_v10  ;;  %13648 = vmatprep.mubr.msk.f32.mxu0 %vm16230_vm3, %v16231_v29 }
0x2739   : > { %13651 = vmatprep.subr.mxu0 %v16231_v29  ;;  %14496 = vmatpush3.bf16.msra.mxu1 %v14495_v22  ;;  %v12164_v22 = vld [vmem:[#allocation14] ss:$0 sm:$0xff] }
0x273a   : > { %14497 = vmatprep.subr.bf16.mxu1 %v16229_v28 }
0x273b   : > { %13649 = vmatmul.mubr.msk.f32.vlgmr.msra.gmra.mrb[74].mxu0 %vm3718_vm4, %v8585_v34 }
0x273c   : > { %13652 = vmatpush3.msra.mxu0 %v17204_v41  ;;  %13653 = vmatprep.mubr.msk.f32.mxu0 %vm16230_vm3, %v16231_v29 }
0x273d   : > { %14503 = vmatprep.subr.bf16.mxu0 %v16229_v28  ;;  %14499 = vmatpush3.bf16.msra.mxu1 %v14498_v52  ;;  %v12168_v52 = vld [vmem:[%s18205_s5 + $0x18] sm:$0xff] }
0x273e   : > { %14500 = vmatprep.subr.bf16.mxu1 %v16229_v28 }
0x273f   : > { %13654 = vmatmul.mubr.msk.f32.vlgmr.msra.gmra.mrb[76].mxu0 %vm3718_vm4, %v8585_v34 }
0x2740   : > { %14505 = vmatpush3.bf16.msra.mxu0 %v14504_v38  ;;  %13691 = vmatprep.mubr.msk.f32.mxu0 %vm16230_vm3, %v16231_v29  ;;  %v12167_v38 = vld [vmem:[%s18204_s0 + $0x10] sm:$0xff]  ;;  %s18208_s0 = sld [smem:[#allocation82_spill]] }
0x2741   : > { %14506 = vmatprep.subr.bf16.mxu0 %v16229_v28  ;;  %14502 = vmatpush3.bf16.msra.mxu1 %v14501_v33  ;;  %v12183_v33 = vld [vmem:[%s18205_s5 + $0x20] sm:$0xff] }
0x2742   : > { %13694 = vmatprep.subr.mxu1 %v16231_v29 }
0x2744   : > { %14508 = vmatpush3.bf16.msra.mxu0 %v14507_v40 }
0x2745   : > { %14509 = vmatprep.subr.bf16.mxu0 %v16229_v28 }
0x2746   : > { %s18209_s4 = smov %s18208_s0 }
0x2748   : > { %14511 = vmatpush3.bf16.msra.mxu0 %v14510_v47 }
0x2749   : > { %14512 = vmatprep.subr.bf16.mxu0 %v16229_v28 }
0x274c   : > { %14514 = vmatpush3.bf16.msra.mxu0 %v14513_v54 }
0x274d   : > { %13699 = vmatprep.subr.mxu0 %v16231_v29 }
0x2806   : > { %v8581_v57 = vpop.f32.mrb[50].mxu1 }
0x2807   : > { %v13645_v58 = vpop.f32.mrb[51].mxu1 }
0x2808   : > { %v12184_v58 = vld [vmem:[%s18205_s5 + $0x28] sm:$0xff] }
0x280a   : > { %v8508_v59 = vpop.f32.mrb[72].mxu0 }
0x280b   : > { %v17707_v60 = vadd.f32 %v8581_v57, %v8508_v59  ;;  %v13626_v61 = vpop.f32.mrb[73].mxu0 }
0x280e   : > { %v8655_v62 = vpop.f32.mrb[74].mxu0 }
0x280f   : > { %v13650_v1 = vpop.f32.mrb[75].mxu0  ;;  %13692 = vmatmul.mubr.msk.f32.vlgmr.msra.gmra.mrb[78].mxu0 %vm2897_vm2, %v8655_v62 }
0x2810   : > { %13700 = vmatpush3.msra.mxu0 %v17204_v41  ;;  %13701 = vmatprep.mubr.msk.f32.mxu0 %vm16230_vm3, %v16231_v29  ;;  %v14516_v41 = vpack.c.bf16 %v12155_v4, %v12154_v3 }
0x2811   : > { %14527 = vmatprep.subr.bf16.mxu0 %v16229_v28 }
0x2812   : > { %v8734_v6 = vpop.f32.mrb[76].mxu0 }
0x2813   : > { %v13655_v9 = vpop.f32.mrb[77].mxu0  ;;  %13673 = vmatmul.mubr.msk.f32.vlgmr.msra.gmra.mrb[52].mxu1 %vm2897_vm2, %v8734_v6  ;;  %13702 = vmatmul.mubr.msk.f32.vlgmr.msra.gmra.mrb[80].mxu0 %vm3718_vm4, %v8894_v2 }
0x2814   : > { %13695 = vmatpush3.msra.mxu1 %v17643_v10  ;;  %13696 = vmatprep.mubr.msk.f32.mxu1 %vm16230_vm3, %v16231_v29  ;;  %v14519_v10 = vpack.c.bf16 %v12157_v14, %v12156_v11 }
0x2815   : > { %14515 = vmatprep.subr.bf16.mxu1 %v16229_v28  ;;  %14529 = vmatpush3.bf16.msra.mxu0 %v14528_v5 }
0x2816   : > { %14530 = vmatprep.subr.bf16.mxu0 %v16229_v28  ;;  %13739 = vmatprep.mubr.msk.f32.mxu0 %vm16230_vm3, %v16231_v29 }
0x2817   : > { %13697 = vmatmul.mubr.msk.f32.vlgmr.msra.gmra.mrb[54].mxu1 %vm3718_vm4, %v8894_v2 }
0x2818   : > { %14517 = vmatpush3.bf16.msra.mxu1 %v14516_v41  ;;  %13720 = vmatprep.mubr.msk.f32.mxu1 %vm16230_vm3, %v16231_v29  ;;  %v12160_v29 = vld [vmem:[%s18203_s1 + $0xb0] sm:$0xff]  ;;  %s18207_s1 = smov %s18206_s26  ;;  %s18210_s26 = sld [smem:[#allocation81_spill]] }
0x2819   : > { %14518 = vmatprep.subr.bf16.mxu1 %v16229_v28  ;;  %14532 = vmatpush3.bf16.msra.mxu0 %v14531_v15  ;;  %v14525_v23 = vpack.c.bf16 %v12161_v20, %v12160_v29  ;;  %v12172_v50 = vld [vmem:[%s18207_s1 + $0x48] sm:$0xff]  ;;  %v12173_v53 = vld [vmem:[%s18207_s1 + $0x50] sm:$0xff]  ;;  %v12174_v54 = vld [vmem:[%s18207_s1 + $0x58] sm:$0xff] }
0x281a   : > { %14533 = vmatprep.subr.bf16.mxu0 %v16229_v28  ;;  %v14539_v56 = vpack.c.bf16 %v12172_v50, %v12171_v48  ;;  %v14543_v57 = vpack.c.bf16 %v12174_v54, %v12173_v53  ;;  %v12175_v59 = vld [vmem:[%s18207_s1 + $0x60] sm:$0xff]  ;;  %v12177_v62 = vld [vmem:[%s18207_s1 + $0x70] sm:$0xff]  ;;  %v12178_v63 = vld [vmem:[%s18207_s1 + $0x78] sm:$0xff] }
0x281b   : > { %v14551_v0 = vpack.c.bf16 %v12178_v63, %v12177_v62  ;;  %v9295_v1 = vld [vmem:[%s18207_s1] sm:$0xff]  ;;  %v9296_v2 = vld [vmem:[%s18207_s1 + $0x8] sm:$0xff]  ;;  %v9297_v4 = vld [vmem:[%s18207_s1 + $0x10] sm:$0xff] }
0x281c   : > { %14520 = vmatpush3.bf16.msra.mxu1 %v14519_v10  ;;  %v14555_v3 = vpack.c.bf16 %v9296_v2, %v9295_v1  ;;  %v9298_v5 = vld [vmem:[%s18207_s1 + $0x18] sm:$0xff]  ;;  %v9299_v41 = vld [vmem:[%s18207_s1 + $0x20] sm:$0xff]  ;;  %v9300_v11 = vld [vmem:[%s18207_s1 + $0x28] sm:$0xff] }
0x281d   : > { %14521 = vmatprep.subr.bf16.mxu1 %v16229_v28  ;;  %14535 = vmatpush3.bf16.msra.mxu0 %v14534_v44  ;;  %v14559_v8 = vpack.c.bf16 %v9298_v5, %v9297_v4  ;;  %v14563_v10 = vpack.c.bf16 %v9300_v11, %v9299_v41  ;;  %v9301_v17 = vld [vmem:[%s18207_s1 + $0x30] sm:$0xff]  ;;  %v12187_v42 = vld [vmem:[%s18207_s1 + $0x80] sm:$0xff]  ;;  %v12188_v44 = vld [vmem:[%s18207_s1 + $0x88] sm:$0xff] }
0x281e   : > { %14536 = vmatprep.subr.bf16.mxu0 %v16229_v28  ;;  %v14571_v29 = vpack.c.bf16 %v12188_v44, %v12187_v42  ;;  %v12189_v20 = vld [vmem:[%s18207_s1 + $0x90] sm:$0xff]  ;;  %v12191_v25 = vld [vmem:[%s18207_s1 + $0xa0] sm:$0xff]  ;;  %v9916_v54 = vld [vmem:[%s18209_s4 + $0x28] sm:$0xff] }
0x281f   : > { %v9913_v50 = vld [vmem:[%s18209_s4 + $0x10] sm:$0xff]  ;;  %v9915_v53 = vld [vmem:[%s18209_s4 + $0x20] sm:$0xff] }
0x2820   : > { %14523 = vmatpush3.bf16.msra.mxu1 %v14522_v18  ;;  %v9302_v18 = vld [vmem:[%s18207_s1 + $0x38] sm:$0xff]  ;;  %v12218_v11 = vld [vmem:[%s18209_s4 + $0x40] sm:$0xff]  ;;  %v12224_v44 = vld [vmem:[%s18209_s4 + $0x70] sm:$0xff] }
0x2821   : > { %14524 = vmatprep.subr.bf16.mxu1 %v16229_v28  ;;  %14538 = vmatpush3.bf16.msra.mxu0 %v14537_v26  ;;  %v14567_v19 = vpack.c.bf16 %v9302_v18, %v9301_v17  ;;  %v12192_v26 = vld [vmem:[%s18207_s1 + $0xa8] sm:$0xff]  ;;  %v12222_v18 = vld [vmem:[%s18209_s4 + $0x60] sm:$0xff] }
0x2824   : > { %14526 = vmatpush3.bf16.msra.mxu1 %v14525_v23  ;;  %v12190_v23 = vld [vmem:[%s18207_s1 + $0x98] sm:$0xff] }
0x2825   : > { %v14575_v24 = vpack.c.bf16 %v12190_v23, %v12189_v20 }
0x28e2   : > { %v8889_v27 = vpop.f32.mrb[78].mxu0 }
0x28e3   : > { %v13693_v30 = vpop.f32.mrb[79].mxu0 }
0x28e4   : > { %v12193_v30 = vld [vmem:[%s18207_s1 + $0xb0] sm:$0xff] }
0x28e6   : > { %v8816_v31 = vpop.f32.mrb[52].mxu1  ;;  %v9043_v32 = vpop.f32.mrb[80].mxu0 }
0x28e7   : > { %v8890_v45 = vadd.f32 %v8889_v27, %v8816_v31  ;;  %v13674_v37 = vpop.f32.mrb[53].mxu1  ;;  %v13703_v34 = vpop.f32.mrb[81].mxu0  ;;  %13721 = vmatmul.mubr.msk.f32.vlgmr.msra.gmra.mrb[56].mxu1 %vm2897_vm2, %v9043_v32  ;;  %v14579_v27 = vpack.c.bf16 %v12192_v26, %v12191_v25  ;;  %v12194_v31 = vld [vmem:[%s18207_s1 + $0xb8] sm:$0xff] }
0x28e8   : > { %13744 = vmatprep.mubr.msk.f32.mxu1 %vm3718_vm4, %v9212_v36  ;;  %v14583_v32 = vpack.c.bf16 %v12194_v31, %v12193_v30  ;;  %v17798_v37 = vld [vmem:[#allocation7 + $0x18] sm:$0xff]  ;;  %v9745_v34 = vld [vmem:[#allocation7] sm:$0xff] }
0x28e9   : > { %v8893_v35 = vadd.f32 %v8890_v45, %v17707_v60  ;;  %v12176_v60 = vld [vmem:[%s18207_s1 + $0x68] sm:$0xff]  ;;  %v17794_v45 = vld [vmem:[#allocation7 + $0x10] sm:$0xff]  ;;  %s18211_s1 = smov %s18210_s26 }
0x28ea   : > { %v8964_v28 = vpop.f32.mrb[54].mxu1  ;;  %v14547_v61 = vpack.c.bf16 %v12176_v60, %v12175_v59  ;;  %v9831_v1 = vld [vmem:[%s18211_s1 + $0x18] sm:$0xff]  ;;  %v9832_v5 = vld [vmem:[%s18211_s1 + $0x20] sm:$0xff]  ;;  %v12210_v26 = vld [vmem:[%s18211_s1 + $0x50] sm:$0xff] }
0x28eb   : > { %v13698_v46 = vpop.f32.mrb[55].mxu1  ;;  %13740 = vmatmul.mubr.msk.f32.vlgmr.msra.gmra.mrb[82].mxu0 %vm2897_vm2, %v8964_v28  ;;  %v12197_v28 = vld [vmem:[#allocation17] ss:$0 sm:$0xff] }
0x28ec   : > { %13749 = vmatprep.mubr.msk.f32.mxu0 %vm3718_vm4, %v12167_v38  ;;  %v12208_v23 = vld [vmem:[%s18211_s1 + $0x40] sm:$0xff] }
0x28ed   : > { %v12212_v31 = vld [vmem:[%s18211_s1 + $0x60] sm:$0xff] }
0x29ba   : > { %v9125_v39 = vpop.f32.mrb[56].mxu1 }
0x29bb   : > { %v13722_v40 = vpop.f32.mrb[57].mxu1 }
0x29be   : > { %v9198_v21 = vpop.f32.mrb[82].mxu0 }
0x29bf   : > { %v9199_v12 = vadd.f32 %v9198_v21, %v9125_v39  ;;  %v13741_v13 = vpop.f32.mrb[83].mxu0 }
0x29c0   : > { %v9911_v13 = vld [vmem:[%s18208_s0] sm:$0xff]  ;;  %s18212_s0 = sld [smem:[#allocation87_spill]] }
0x29c1   : > { %v9202_v43 = vadd.f32 %v9199_v12, %v8893_v35  ;;  %v17803_v35 = vld [vmem:[#allocation7 + $0x20] sm:$0xff] }
0x29c3   : > { %v9210_v47 = vadd.f32 %v12164_v22, %v9202_v43  ;;  %v9912_v22 = vld [vmem:[%s18209_s4 + $0x8] sm:$0xff]  ;;  %v17815_v43 = vld [vmem:[#allocation7 + $0x8] sm:$0xff] }
0x29c4   : > { %v14595_v48 = vpack.c.bf16 %v9912_v22, %v9911_v13 }
0x29c5   : > { %v9211_v51 = vmax.f32 %v9210_v47, 0.0  ;;  %v17817_v47 = vld [vmem:[#allocation7 + $0x28] sm:$0xff] }
0x29c7   : > { %13742 = vmatprep.subr.mxu1 %v9211_v51  ;;  %13747 = vmatprep.subr.mxu0 %v9211_v51 }
0x29c8   : > { %13743 = vmatpush3.msra.mxu1 %v9211_v51  ;;  %13748 = vmatpush3.msra.mxu0 %v9211_v51 }
0x29c9   : > { %13750 = vmatmul.mubr.msk.f32.vlgmr.msra.gmra.mrb[84].mxu0 %vm3718_vm4, %v12168_v52  ;;  %13790 = vmatprep.subr.mxu0 %v9211_v51 }
0x29ca   : > { %13791 = vmatpush3.msra.mxu0 %v9211_v51  ;;  %13745 = vmatmul.mubr.msk.f32.vlgmr.msra.gmra.mrb[58].mxu1 %vm3718_vm4, %v9213_v55  ;;  %v9914_v51 = vld [vmem:[%s18209_s4 + $0x18] sm:$0xff]  ;;  %v9917_v55 = vld [vmem:[%s18209_s4 + $0x30] sm:$0xff] }
0x29cb   : > { %13792 = vmatprep.mubr.msk.f32.mxu0 %vm3718_vm4, %v12183_v33  ;;  %14540 = vmatprep.subr.bf16.mxu1 %v14539_v56  ;;  %v14599_v52 = vpack.c.bf16 %v9914_v51, %v9913_v50  ;;  %v12245_v50 = vld [vmem:[%s18209_s4 + $0x98] sm:$0xff] }
0x29cc   : > { %14542 = vmatpush3.bf16.msra.mxu1 %v14539_v56  ;;  %v9918_v56 = vld [vmem:[%s18209_s4 + $0x38] sm:$0xff] }
0x29cd   : > { %13793 = vmatmul.mubr.msk.f32.vlgmr.msra.gmra.mrb[86].mxu0 %vm3718_vm4, %v12184_v58  ;;  %14544 = vmatprep.subr.bf16.mxu1 %v14543_v57  ;;  %v14607_v33 = vpack.c.bf16 %v9918_v56, %v9917_v55  ;;  %v9829_v58 = vld [vmem:[%s18211_s1 + $0x8] sm:$0xff]  ;;  %v12248_v56 = vld [vmem:[%s18209_s4 + $0xb0] sm:$0xff] }
0x29ce   : > { %13818 = vmatprep.mubr.msk.f32.mxu0 %vm2203_vm0, %v9745_v34 }
0x29d0   : > { %14546 = vmatpush3.bf16.msra.mxu1 %v14543_v57  ;;  %v9828_v57 = vld [vmem:[%s18210_s26] sm:$0xff]  ;;  %s11309_s26 = sshll.u32 %s17401_s2, 4  ;;  %s16006_s2 = scalar_lea.vmem %s16005_s9, 512  ;;  %s17940_s26 = int_to_ptr.vmem [resolvable:$true] %s11309_s26 }
0x29d1   : > { %14548 = vmatprep.subr.bf16.mxu1 %v14547_v61  ;;  %v14611_v59 = vpack.c.bf16 %v9829_v58, %v9828_v57  ;;  %v12232_v58 = vld [vmem:[%s18211_s1 + $0x80] sm:$0xff]  ;;  %s16000_s7 = scalar_lea.vmem %s17940_s26, 256  ;;  %p16007_p13 = scmp.lt.s32.totalorder %s17940_s26, %s16005_s9 }
0x29d2   : > { %p16001_p10 = scmp.ne.s32.totalorder %s17940_s26, %s16000_s7  ;;  %p16008_p0 = scmp.lt.s32.totalorder %s16006_s2, %s16000_s7 }
0x29d4   : > { %14550 = vmatpush3.bf16.msra.mxu1 %v14547_v61  ;;  %p16002_p11 = pnand %p16001_p10, %p18215_p6  ;;  %p16009_p1 = por %p16008_p0, %p16007_p13 }
0x29d5   : > { %14552 = vmatprep.subr.bf16.mxu1 %v14551_v0 }
0x29d6   : > { %p16003_p12 = pneg %p16002_p11 }
0x29d8   : > { %14554 = vmatpush3.bf16.msra.mxu1 %v14551_v0  ;;  %v9830_v0 = vld [vmem:[%s18211_s1 + $0x10] sm:$0xff]  ;;  %p16010_p2 = pnand %p16009_p1, %p16003_p12 }
0x29d9   : > { %14556 = vmatprep.subr.bf16.mxu1 %v14555_v3  ;;  %v14615_v4 = vpack.c.bf16 %v9831_v1, %v9830_v0  ;;  %v12236_v0 = vld [vmem:[%s18211_s1 + $0xa0] sm:$0xff]  ;;  %v12237_v1 = vld [vmem:[%s18211_s1 + $0xa8] sm:$0xff] }
0x2a9c   : > { %v13751_v6 = vpop.f32.mrb[84].mxu0 }
0x2a9d   : > { %v9378_v7 = vpop.f32.mrb[85].mxu0  ;;  %v13746_v9 = vpop.f32.mrb[58].mxu1 }
0x2a9e   : > { %13768 = vmatprep.mubr.msk.f32.mxu1 %vm2897_vm2, %v9378_v7  ;;  %v9286_v14 = vpop.f32.mrb[59].mxu1 }
0x2a9f   : > { %13769 = vmatmul.mubr.msk.f32.vlgmr.msra.gmra.mrb[60].mxu1 %vm2897_vm2, %v13751_v6  ;;  %v9833_v6 = vld [vmem:[%s18211_s1 + $0x28] sm:$0xff] }
0x2aa0   : > { %14558 = vmatpush3.bf16.msra.mxu1 %v14555_v3  ;;  %13787 = vmatprep.mubr.msk.f32.mxu1 %vm2897_vm2, %v9286_v14  ;;  %v13794_v15 = vpop.f32.mrb[86].mxu0  ;;  %v14619_v7 = vpack.c.bf16 %v9833_v6, %v9832_v5  ;;  %v12219_v14 = vld [vmem:[%s18209_s4 + $0x48] sm:$0xff]  ;;  %v12254_v6 = vld [vmem:[#allocation13] ss:$0 sm:$0xff] }
0x2aa1   : > { %14560 = vmatprep.subr.bf16.mxu1 %v14559_v8  ;;  %v9633_v16 = vpop.f32.mrb[87].mxu0 }
0x2aa4   : > { %14562 = vmatpush3.bf16.msra.mxu1 %v14559_v8  ;;  %v9834_v8 = vld [vmem:[%s18211_s1 + $0x30] sm:$0xff] }
0x2aa5   : > { %14564 = vmatprep.subr.bf16.mxu1 %v14563_v10 }
0x2aa8   : > { %14566 = vmatpush3.bf16.msra.mxu1 %v14563_v10  ;;  %v12220_v10 = vld [vmem:[%s18209_s4 + $0x50] sm:$0xff] }
0x2aa9   : > { %14568 = vmatprep.subr.bf16.mxu1 %v14567_v19 }
0x2aac   : > { %14570 = vmatpush3.bf16.msra.mxu1 %v14567_v19  ;;  %v12223_v19 = vld [vmem:[%s18209_s4 + $0x68] sm:$0xff] }
0x2aad   : > { %14572 = vmatprep.subr.bf16.mxu1 %v14571_v29  ;;  %v14643_v42 = vpack.c.bf16 %v12223_v19, %v12222_v18 }
0x2aaf   : > { %13788 = vmatmul.mubr.msk.f32.vlgmr.msra.gmra.mrb[60].mxu1 %vm2897_vm2, %v13746_v9  ;;  %v9835_v9 = vld [vmem:[%s18211_s1 + $0x38] sm:$0xff] }
0x2ab0   : > { %14574 = vmatpush3.bf16.msra.mxu1 %v14571_v29  ;;  %13811 = vmatprep.mubr.msk.f32.mxu1 %vm2897_vm2, %v9633_v16  ;;  %v14623_v41 = vpack.c.bf16 %v9835_v9, %v9834_v8  ;;  %v12221_v16 = vld [vmem:[%s18209_s4 + $0x58] sm:$0xff] }
0x2ab1   : > { %14576 = vmatprep.subr.bf16.mxu1 %v14575_v24  ;;  %v14639_v17 = vpack.c.bf16 %v12221_v16, %v12220_v10  ;;  %v12225_v29 = vld [vmem:[%s18209_s4 + $0x78] sm:$0xff]  ;;  %v12259_v10 = vld [vmem:[%s18212_s0 + $0x40] sm:$0xff] }
0x2ab2   : > { %v14647_v20 = vpack.c.bf16 %v12225_v29, %v12224_v44 }
0x2ab4   : > { %14578 = vmatpush3.bf16.msra.mxu1 %v14575_v24  ;;  %v12209_v24 = vld [vmem:[%s18211_s1 + $0x48] sm:$0xff] }
0x2ab5   : > { %14580 = vmatprep.subr.bf16.mxu1 %v14579_v27  ;;  %v14651_v25 = vpack.c.bf16 %v12209_v24, %v12208_v23 }
0x2ab8   : > { %14582 = vmatpush3.bf16.msra.mxu1 %v14579_v27  ;;  %v12211_v27 = vld [vmem:[%s18211_s1 + $0x58] sm:$0xff] }
0x2ab9   : > { %14584 = vmatprep.subr.bf16.mxu1 %v14583_v32  ;;  %v14655_v30 = vpack.c.bf16 %v12211_v27, %v12210_v26 }
0x2abc   : > { %14586 = vmatpush3.bf16.msra.mxu1 %v14583_v32  ;;  %v12213_v32 = vld [vmem:[%s18211_s1 + $0x68] sm:$0xff] }
0x2abd   : > { %14632 = vmatprep.subr.bf16.mxu1 %v17116_v49 }
0x2abf   : > { %13812 = vmatmul.mubr.msk.f32.vlgmr.msra.gmra.mrb[60].mxu1 %vm2897_vm2, %v13794_v15  ;;  %v14635_v15 = vpack.c.bf16 %v12219_v14, %v12218_v11 }
0x2ac0   : > { %14634 = vmatpush3.bf16.msra.mxu1 %v17116_v49  ;;  %13877 = vmatprep.mubr.msk.f32.mxu1 %vm2203_vm0, %v17794_v45 }
0x2ac3   : > { %13878 = vmatmul.mubr.msk.f32.vlgmr.msra.gmra.mrb[62].mxu1 %vm2203_vm0, %v17798_v37 }
0x2ac4   : > { %13922 = vmatprep.mubr.msk.f32.mxu1 %vm2203_vm0, %v17803_v35 }
0x2b92   : > { %v13813_v46 = vpop.f32.mrb[60].mxu1 }
0x2b93   : > { %v9742_v38 = vadd.f32 %v13813_v46, %v12197_v28  ;;  %v9723_v36 = vpop.f32.mrb[61].mxu1  ;;  %v12215_v46 = vld [vmem:[%s18211_s1 + $0x78] sm:$0xff] }
0x2b94   : > { %v9741_v39 = vadd.f32 %v12197_v28, %v9723_v36  ;;  %v12214_v28 = vld [vmem:[%s18211_s1 + $0x70] sm:$0xff]  ;;  %v12242_v36 = vld [vmem:[%s18209_s4 + $0x80] sm:$0xff] }
0x2b95   : > { %v9744_v40 = vmax.f32 %v9742_v38, 0.0  ;;  %v14663_v38 = vpack.c.bf16 %v12215_v46, %v12214_v28 }
0x2b96   : > { %v9743_v21 = vmax.f32 %v9741_v39, 0.0  ;;  %v13879_v60 = vpop.f32.mrb[62].mxu1  ;;  %v12243_v39 = vld [vmem:[%s18209_s4 + $0x88] sm:$0xff] }
0x2b97   : > { %v10239_v61 = vpop.f32.mrb[63].mxu1 }
0x2b98   : > { %v17807_v12 = vpack.c.bf16 %v9744_v40, %v9743_v21  ;;  %v14675_v40 = vpack.c.bf16 %v12243_v39, %v12242_v36 }
0x2b9a   : > { %14588 = vmatprep.subr.bf16.mxu0 %v17807_v12  ;;  %14668 = vmatprep.subr.bf16.mxu1 %v17807_v12 }
0x2b9b   : > { %14590 = vmatpush3.bf16.msra.mxu0 %v17807_v12  ;;  %14670 = vmatpush3.bf16.msra.mxu1 %v17807_v12 }
0x2b9c   : > { %14592 = vmatprep.subr.bf16.mxu0 %v17116_v49  ;;  %14672 = vmatprep.subr.bf16.mxu1 %v17116_v49 }
0x2b9e   : > { %13819 = vmatmul.mubr.msk.f32.vlgmr.msra.gmra.mrb[88].mxu0 %vm2203_vm0, %v17815_v43  ;;  %13923 = vmatmul.mubr.msk.f32.vlgmr.msra.gmra.mrb[64].mxu1 %vm2203_vm0, %v17817_v47 }
0x2b9f   : > { %14594 = vmatpush3.bf16.msra.mxu0 %v17116_v49  ;;  %14674 = vmatpush3.bf16.msra.mxu1 %v17116_v49  ;;  %v14603_v49 = vpack.c.bf16 %v9916_v54, %v9915_v53  ;;  %v12246_v54 = vld [vmem:[%s18209_s4 + $0xa0] sm:$0xff] }
0x2ba0   : > { %13825 = vmatprep.mubr.msk.f32.mxu0 %vm2203_vm0, %v9745_v34  ;;  %14596 = vmatprep.subr.bf16.mxu0 %v14595_v48 }
0x2ba1   : > { %13929 = vmatprep.mubr.msk.f32.mxu1 %vm2203_vm0, %v17803_v35 }
0x2ba2   : > { %13826 = vmatmul.mubr.msk.f32.vlgmr.msra.gmra.mrb[90].mxu0 %vm2203_vm0, %v17815_v43  ;;  %13930 = vmatmul.mubr.msk.f32.vlgmr.msra.gmra.mrb[66].mxu1 %vm2203_vm0, %v17817_v47 }
0x2ba3   : > { %14598 = vmatpush3.bf16.msra.mxu0 %v14595_v48  ;;  %13974 = vmatprep.mubr.msk.f32.mxu1 %vm2203_vm0, %v9745_v34  ;;  %v14659_v34 = vpack.c.bf16 %v12213_v32, %v12212_v31  ;;  %v12244_v48 = vld [vmem:[%s18209_s4 + $0x90] sm:$0xff] }
0x2ba4   : > { %14600 = vmatprep.subr.bf16.mxu0 %v14599_v52  ;;  %v14679_v53 = vpack.c.bf16 %v12245_v50, %v12244_v48 }
0x2ba7   : > { %14602 = vmatpush3.bf16.msra.mxu0 %v14599_v52 }
0x2ba8   : > { %14604 = vmatprep.subr.bf16.mxu0 %v14603_v49 }
0x2bab   : > { %14606 = vmatpush3.bf16.msra.mxu0 %v14603_v49  ;;  %v12247_v49 = vld [vmem:[%s18209_s4 + $0xa8] sm:$0xff] }
0x2bac   : > { %14608 = vmatprep.subr.bf16.mxu0 %v14607_v33  ;;  %v14683_v55 = vpack.c.bf16 %v12247_v49, %v12246_v54 }
0x2baf   : > { %14610 = vmatpush3.bf16.msra.mxu0 %v14607_v33  ;;  %v12249_v33 = vld [vmem:[%s18209_s4 + $0xb8] sm:$0xff]  ;;  %s18213_s4 = smov %s18212_s0  ;;  %s12292_s0 = sshll.u32 %s16561_s28, 8 }
0x2bb0   : > { %14612 = vmatprep.subr.bf16.mxu0 %v14611_v59  ;;  %v14687_v57 = vpack.c.bf16 %v12249_v33, %v12248_v56  ;;  %v12260_v16 = vld [vmem:[%s18213_s4 + $0x48] sm:$0xff]  ;;  %v12261_v18 = vld [vmem:[%s18213_s4 + $0x50] sm:$0xff]  ;;  %v12262_v19 = vld [vmem:[%s18213_s4 + $0x58] sm:$0xff] }
0x2bb1   : > { %v12263_v44 = vld [vmem:[%s18213_s4 + $0x60] sm:$0xff]  ;;  %v12264_v29 = vld [vmem:[%s18213_s4 + $0x68] sm:$0xff]  ;;  %v12266_v23 = vld [vmem:[%s18213_s4 + $0x78] sm:$0xff] }
0x2bb2   : > { %v10847_v24 = vld [vmem:[%s18213_s4] sm:$0xff]  ;;  %v10850_v31 = vld [vmem:[%s18213_s4 + $0x18] sm:$0xff]  ;;  %v10853_v39 = vld [vmem:[%s18213_s4 + $0x30] sm:$0xff] }
0x2bb3   : > { %v10851_v46 = vld [vmem:[%s18213_s4 + $0x20] sm:$0xff]  ;;  %v12275_v48 = vld [vmem:[%s18213_s4 + $0x90] sm:$0xff]  ;;  %v12276_v50 = vld [vmem:[%s18213_s4 + $0x98] sm:$0xff] }
0x2bb4   : > { %v12279_v49 = vld [vmem:[%s18213_s4 + $0xb0] sm:$0xff] }
0x2c71   : > { %v13820_v62 = vpop.f32.mrb[88].mxu0  ;;  %v13924_v21 = vpop.f32.mrb[64].mxu1 }
0x2c72   : > { %v9819_v63 = vpop.f32.mrb[89].mxu0 }
0x2c75   : > { %v13827_v2 = vpop.f32.mrb[90].mxu0 }
0x2c76   : > { %v9902_v3 = vpop.f32.mrb[91].mxu0 }
0x2c77   : > { %13844 = vmatprep.mubr.msk.f32.mxu0 %vm2897_vm2, %v9902_v3  ;;  %v12238_v3 = vld [vmem:[%s18211_s1 + $0xb0] sm:$0xff] }
0x2c78   : > { %13845 = vmatmul.mubr.msk.f32.vlgmr.msra.gmra.mrb[92].mxu0 %vm2897_vm2, %v13827_v2  ;;  %v14699_v2 = vpack.c.bf16 %v12237_v1, %v12236_v0 }
0x2c79   : > { %14614 = vmatpush3.bf16.msra.mxu0 %v14611_v59  ;;  %13863 = vmatprep.mubr.msk.f32.mxu0 %vm2897_vm2, %v9819_v63  ;;  %v12233_v59 = vld [vmem:[%s18211_s1 + $0x88] sm:$0xff] }
0x2c7a   : > { %14616 = vmatprep.subr.bf16.mxu0 %v14615_v4 }
0x2c7d   : > { %14618 = vmatpush3.bf16.msra.mxu0 %v14615_v4  ;;  %v12239_v4 = vld [vmem:[%s18211_s1 + $0xb8] sm:$0xff] }
0x2c7e   : > { %14620 = vmatprep.subr.bf16.mxu0 %v14619_v7  ;;  %v14703_v5 = vpack.c.bf16 %v12239_v4, %v12238_v3 }
0x2c81   : > { %14622 = vmatpush3.bf16.msra.mxu0 %v14619_v7 }
0x2c82   : > { %14624 = vmatprep.subr.bf16.mxu0 %v14623_v41 }
0x2c85   : > { %14626 = vmatpush3.bf16.msra.mxu0 %v14623_v41 }
0x2c86   : > { %14628 = vmatprep.subr.bf16.mxu0 %v17807_v12 }
0x2c88   : > { %13864 = vmatmul.mubr.msk.f32.vlgmr.msra.gmra.mrb[92].mxu0 %vm2897_vm2, %v13820_v62  ;;  %v12235_v62 = vld [vmem:[%s18211_s1 + $0x98] sm:$0xff] }
0x2c89   : > { %14630 = vmatpush3.bf16.msra.mxu0 %v17807_v12  ;;  %13870 = vmatprep.mubr.msk.f32.mxu0 %vm2203_vm0, %v17794_v45  ;;  %v10495_v12 = vpop.f32.mrb[65].mxu1 }
0x2c8a   : > { %14636 = vmatprep.subr.bf16.mxu0 %v14635_v15  ;;  %v13931_v13 = vpop.f32.mrb[66].mxu1 }
0x2c8b   : > { %v10579_v22 = vpop.f32.mrb[67].mxu1 }
0x2c8c   : > { %13871 = vmatmul.mubr.msk.f32.vlgmr.msra.gmra.mrb[94].mxu0 %vm2203_vm0, %v17798_v37 }
0x2c8d   : > { %14638 = vmatpush3.bf16.msra.mxu0 %v14635_v15  ;;  %13896 = vmatprep.mubr.msk.f32.mxu0 %vm2897_vm2, %v10239_v61  ;;  %v12234_v61 = vld [vmem:[%s18211_s1 + $0x90] sm:$0xff]  ;;  %s17944_s1 = scalar_lea.hbm %s16528_s13, %s12292_s0 }
0x2c8e   : > { %14640 = vmatprep.subr.bf16.mxu0 %v14639_v17  ;;  %v14695_v63 = vpack.c.bf16 %v12235_v62, %v12234_v61 }
0x2c91   : > { %14642 = vmatpush3.bf16.msra.mxu0 %v14639_v17  ;;  %v14715_v17 = vpack.c.bf16 %v12260_v16, %v12259_v10 }
0x2c92   : > { %14644 = vmatprep.subr.bf16.mxu0 %v14643_v42 }
0x2c95   : > { %14646 = vmatpush3.bf16.msra.mxu0 %v14643_v42  ;;  %v14719_v42 = vpack.c.bf16 %v12262_v19, %v12261_v18 }
0x2c96   : > { %14648 = vmatprep.subr.bf16.mxu0 %v14647_v20 }
0x2c99   : > { %14650 = vmatpush3.bf16.msra.mxu0 %v14647_v20  ;;  %v14723_v20 = vpack.c.bf16 %v12264_v29, %v12263_v44 }
0x2c9a   : > { %14652 = vmatprep.subr.bf16.mxu0 %v14651_v25 }
0x2c9c   : > { %13897 = vmatmul.mubr.msk.f32.vlgmr.msra.gmra.mrb[92].mxu0 %vm2897_vm2, %v13879_v60  ;;  %v14691_v60 = vpack.c.bf16 %v12233_v59, %v12232_v58 }
0x2c9d   : > { %14654 = vmatpush3.bf16.msra.mxu0 %v14651_v25  ;;  %v10848_v25 = vld [vmem:[%s18213_s4 + $0x8] sm:$0xff] }
0x2c9e   : > { %14656 = vmatprep.subr.bf16.mxu0 %v14655_v30  ;;  %v14731_v26 = vpack.c.bf16 %v10848_v25, %v10847_v24 }
0x2ca1   : > { %14658 = vmatpush3.bf16.msra.mxu0 %v14655_v30  ;;  %v10849_v30 = vld [vmem:[%s18213_s4 + $0x10] sm:$0xff] }
0x2ca2   : > { %14660 = vmatprep.subr.bf16.mxu0 %v14659_v34  ;;  %v14735_v28 = vpack.c.bf16 %v10850_v31, %v10849_v30 }
0x2ca5   : > { %14662 = vmatpush3.bf16.msra.mxu0 %v14659_v34 }
0x2ca6   : > { %14664 = vmatprep.subr.bf16.mxu0 %v14663_v38 }
0x2ca9   : > { %14666 = vmatpush3.bf16.msra.mxu0 %v14663_v38  ;;  %v10852_v38 = vld [vmem:[%s18213_s4 + $0x28] sm:$0xff] }
0x2caa   : > { %14676 = vmatprep.subr.bf16.mxu0 %v14675_v40  ;;  %v14739_v36 = vpack.c.bf16 %v10852_v38, %v10851_v46 }
0x2d5f   : > { %v13872_v51 = vpop.f32.mrb[94].mxu0 }
0x2d60   : > { %v10155_v52 = vpop.f32.mrb[95].mxu0 }
0x2d61   : > { %13915 = vmatprep.mubr.msk.f32.mxu0 %vm2897_vm2, %v10155_v52  ;;  %v12277_v52 = vld [vmem:[%s18213_s4 + $0xa0] sm:$0xff] }
0x2d62   : > { %13916 = vmatmul.mubr.msk.f32.vlgmr.msra.gmra.mrb[92].mxu0 %vm2897_vm2, %v13872_v51  ;;  %v14755_v51 = vpack.c.bf16 %v12276_v50, %v12275_v48 }
0x2d63   : > { %14678 = vmatpush3.bf16.msra.mxu0 %v14675_v40  ;;  %13948 = vmatprep.mubr.msk.f32.mxu0 %vm2897_vm2, %v10579_v22  ;;  %v10854_v40 = vld [vmem:[%s18213_s4 + $0x38] sm:$0xff] }
0x2d64   : > { %14680 = vmatprep.subr.bf16.mxu0 %v14679_v53 }
0x2d67   : > { %14682 = vmatpush3.bf16.msra.mxu0 %v14679_v53  ;;  %v12278_v53 = vld [vmem:[%s18213_s4 + $0xa8] sm:$0xff] }
0x2d68   : > { %14684 = vmatprep.subr.bf16.mxu0 %v14683_v55  ;;  %v14759_v54 = vpack.c.bf16 %v12278_v53, %v12277_v52 }
0x2d6b   : > { %14686 = vmatpush3.bf16.msra.mxu0 %v14683_v55  ;;  %v12280_v55 = vld [vmem:[%s18213_s4 + $0xb8] sm:$0xff] }
0x2d6c   : > { %14688 = vmatprep.subr.bf16.mxu0 %v14687_v57 }
0x2d6f   : > { %14690 = vmatpush3.bf16.msra.mxu0 %v14687_v57 }
0x2d70   : > { %14692 = vmatprep.subr.bf16.mxu0 %v14691_v60 }
0x2d72   : > { %13949 = vmatmul.mubr.msk.f32.vlgmr.msra.gmra.mrb[92].mxu0 %vm2897_vm2, %v13931_v13  ;;  %v12274_v13 = vld [vmem:[%s18213_s4 + $0x88] sm:$0xff] }
0x2d73   : > { %14694 = vmatpush3.bf16.msra.mxu0 %v14691_v60  ;;  %13967 = vmatprep.mubr.msk.f32.mxu0 %vm2897_vm2, %v10495_v12  ;;  %v12273_v12 = vld [vmem:[%s18213_s4 + $0x80] sm:$0xff] }
0x2d74   : > { %14696 = vmatprep.subr.bf16.mxu0 %v14695_v63  ;;  %v14751_v22 = vpack.c.bf16 %v12274_v13, %v12273_v12 }
0x2d77   : > { %14698 = vmatpush3.bf16.msra.mxu0 %v14695_v63 }
0x2d78   : > { %14700 = vmatprep.subr.bf16.mxu0 %v14699_v2 }
0x2d7b   : > { %14702 = vmatpush3.bf16.msra.mxu0 %v14699_v2 }
0x2d7c   : > { %14704 = vmatprep.subr.bf16.mxu0 %v14703_v5 }
0x2d7f   : > { %14706 = vmatpush3.bf16.msra.mxu0 %v14703_v5 }
0x2d82   : > { %13968 = vmatmul.mubr.msk.f32.vlgmr.msra.gmra.mrb[92].mxu0 %vm2897_vm2, %v13924_v21  ;;  %v14743_v21 = vpack.c.bf16 %v10854_v40, %v10853_v39 }
0x2e55   : > { %v13969_v7 = vpop.f32.mrb[92].mxu0 }
0x2e56   : > { %v10769_v8 = vadd.f32 %v13969_v7, %v12254_v6  ;;  %v10750_v9 = vpop.f32.mrb[93].mxu0 }
0x2e57   : > { %v10768_v41 = vadd.f32 %v12254_v6, %v10750_v9 }
0x2e58   : > { %v10771_v11 = vmax.f32 %v10769_v8, 0.0 }
0x2e59   : > { %v10770_v14 = vmax.f32 %v10768_v41, 0.0 }
0x2e5b   : > { %v14707_v15 = vpack.c.bf16 %v10771_v11, %v10770_v14 }
0x2e5d   : > { %14708 = vmatprep.subr.bf16.mxu1 %v14707_v15 }
0x2e5e   : > { %14710 = vmatpush3.bf16.msra.mxu1 %v14707_v15 }
0x2e5f   : > { %14712 = vmatprep.subr.bf16.mxu1 %v14707_v15 }
0x2e61   : > { %13975 = vmatmul.mubr.msk.f32.vlgmr.msra.gmra.mrb[68].mxu1 %vm2203_vm0, %v17815_v43  ;;  %v12265_v43 = vld [vmem:[%s18213_s4 + $0x70] sm:$0xff]  ;;  %s18214_s4 = sand.u32 1, %s16122_s22  }
0x2e62   : > { %14714 = vmatpush3.bf16.msra.mxu1 %v14707_v15  ;;  %13981 = vmatprep.mubr.msk.f32.mxu1 %vm2203_vm0, %v17794_v45  ;;  %v14727_v45 = vpack.c.bf16 %v12266_v23, %v12265_v43  ;;  %s17948_s5 = scalar_lea.sflag [#allocation4], %s18214_s4 }
0x2e63   : > { %14716 = vmatprep.subr.bf16.mxu1 %v14715_v17 }
0x2e65   : > { %13982 = vmatmul.mubr.msk.f32.vlgmr.msra.gmra.mrb[70].mxu1 %vm2203_vm0, %v17798_v37 }
0x2e66   : > { %14718 = vmatpush3.bf16.msra.mxu1 %v14715_v17 }
0x2e67   : > { %14720 = vmatprep.subr.bf16.mxu1 %v14719_v42 }
0x2e6a   : > { %14722 = vmatpush3.bf16.msra.mxu1 %v14719_v42 }
0x2e6b   : > { %14724 = vmatprep.subr.bf16.mxu1 %v14723_v20 }
0x2e6e   : > { %14726 = vmatpush3.bf16.msra.mxu1 %v14723_v20 }
0x2e6f   : > { %14728 = vmatprep.subr.bf16.mxu1 %v14727_v45 }
0x2e72   : > { %14730 = vmatpush3.bf16.msra.mxu1 %v14727_v45 }
0x2e73   : > { %14732 = vmatprep.subr.bf16.mxu1 %v14731_v26 }
0x2f34   : > { %v13976_v37 = vpop.f32.mrb[68].mxu1 }
0x2f35   : > { %v10838_v27 = vpop.f32.mrb[69].mxu1 }
0x2f38   : > { %v13983_v32 = vpop.f32.mrb[70].mxu1 }
0x2f39   : > { %v10921_v34 = vpop.f32.mrb[71].mxu1 }
0x2f3a   : > { %14000 = vmatprep.mubr.msk.f32.mxu1 %vm2897_vm2, %v10921_v34 }
0x2f3b   : > { %14001 = vmatmul.mubr.msk.f32.vlgmr.msra.gmra.mrb[72].mxu1 %vm2897_vm2, %v13983_v32 }
0x2f3c   : > { %14734 = vmatpush3.bf16.msra.mxu1 %v14731_v26  ;;  %14019 = vmatprep.mubr.msk.f32.mxu1 %vm2897_vm2, %v10838_v27 }
0x2f3d   : > { %14736 = vmatprep.subr.bf16.mxu1 %v14735_v28 }
0x2f40   : > { %14738 = vmatpush3.bf16.msra.mxu1 %v14735_v28 }
0x2f41   : > { %14740 = vmatprep.subr.bf16.mxu1 %v14739_v36 }
0x2f44   : > { %14742 = vmatpush3.bf16.msra.mxu1 %v14739_v36 }
0x2f45   : > { %14744 = vmatprep.subr.bf16.mxu1 %v14743_v21 }
0x2f48   : > { %14746 = vmatpush3.bf16.msra.mxu1 %v14743_v21 }
0x2f49   : > { %14748 = vmatprep.subr.bf16.mxu1 %v14707_v15 }
0x2f4b   : > { %14020 = vmatmul.mubr.msk.f32.vlgmr.msra.gmra.mrb[72].mxu1 %vm2897_vm2, %v13976_v37 }
0x2f4c   : > { %14750 = vmatpush3.bf16.msra.mxu1 %v14707_v15  ;;  %14026 = vmatprep.mubr.msk.f32.mxu1 %vm2203_vm0, %v17803_v35  ;;  %v14763_v35 = vpack.c.bf16 %v12280_v55, %v12279_v49 }
0x2f4d   : > { %14752 = vmatprep.subr.bf16.mxu1 %v14751_v22 }
0x2f4f   : > { %14027 = vmatmul.mubr.msk.f32.vlgmr.msra.gmra.mrb[74].mxu1 %vm2203_vm0, %v17817_v47 }
0x2f50   : > { %14754 = vmatpush3.bf16.msra.mxu1 %v14751_v22 }
0x2f51   : > { %14756 = vmatprep.subr.bf16.mxu1 %v14755_v51 }
0x2f54   : > { %14758 = vmatpush3.bf16.msra.mxu1 %v14755_v51 }
0x2f55   : > { %14760 = vmatprep.subr.bf16.mxu1 %v14759_v54 }
0x2f58   : > { %14762 = vmatpush3.bf16.msra.mxu1 %v14759_v54 }
0x2f59   : > { %14764 = vmatprep.subr.bf16.mxu1 %v14763_v35 }
0x2f5c   : > { %14766 = vmatpush3.bf16.msra.mxu1 %v14763_v35 }
0x3022   : > { %v14028_v56 = vpop.f32.mrb[74].mxu1 }
0x3023   : > { %v11167_v33 = vpop.f32.mrb[75].mxu1 }
0x3024   : > { %14045 = vmatprep.mubr.msk.f32.mxu1 %vm2897_vm2, %v11167_v33 }
0x3025   : > { %14046 = vmatmul.mubr.msk.f32.vlgmr.msra.gmra.mrb[72].mxu1 %vm2897_vm2, %v14028_v56 }
0x3026   : > { %16013 = shalt.err (!%p16010_p2)
}
0x3027   : > { %s16014_s28 = scalar_lea.hbm %s17944_s1, 256  ;;  %s16018_s4 = scalar_lea.hbm %s16528_s13, 512 }
0x3028   : > { %p16015_p3 = scmp.ne.s32.totalorder %s17944_s1, %s16014_s28  ;;  %p16019_p8 = scmp.lt.u32.totalorder %s17944_s1, %s16528_s13 }
0x3029   : > { %p16020_p5 = scmp.lt.u32.totalorder %s16018_s4, %s16014_s28  ;;  %p16022_p10 = scmp.lt.u32.totalorder %s16014_s28, %s17944_s1 }
0x302a   : > { %p16016_p4 = pnand %p16015_p3, %p18215_p6 }
0x302b   : > { %p16021_p9 = por %p16020_p5, %p16019_p8 }
0x302c   : > { %p16017_p7 = pneg %p16016_p4 }
0x302d   : > { %p16023_p11 = por %p16022_p10, %p16021_p9 }
0x302f   : > { %p16024_p12 = pnand %p16023_p11, %p16017_p7 }
0x3031   : > { %16027 = shalt.err (!%p16024_p12)
}
0x3032   : > { %s16233_s7 = smov 128   ;;  %s16234_s9 = smov 8   ;;  %v12283_v47 = vld [vmem:[#allocation16] ss:$0 sm:$0xff] }
0x3033   : > { %14935 = dma.vmem_to_hbm [thread:$0]  (%p18215_p6), %s17940_s26, 256, %s17944_s1, %s17948_s5, %s16233_s7, %s16233_s7, %s16234_s9  }
0x3034   : > { %s2190_s8 = scalar_lea.vmem %s16523_s3, %s17086_s6 }
0x30f8   : > { %v14047_v57 = vpop.f32.mrb[72].mxu1 }
0x30f9   : > { %v11276_v58 = vadd.f32 %v14047_v57, %v12283_v47  ;;  %v11257_v59 = vpop.f32.mrb[73].mxu1 }
0x30fa   : > { %v11275_v60 = vadd.f32 %v12283_v47, %v11257_v59 }
0x30fb   : > { %11278 = vst.msk [vmem:[%s2190_s8 + $0x8] sm:$0xff] %vm2382_vm1, %v11276_v58 }
0x30fc   : > { %11277 = vst.msk [vmem:[%s2190_s8] sm:$0xff] %vm2382_vm1, %v11275_v60 }
0x30fd PF: > { %s18216_s0 = sld [smem:[#allocation120_spill]]  ;;  %s18217_s2 = sld [smem:[#allocation118_spill]] }
0x30fe   : > { %s18218_s28 = sld [smem:[#allocation123_spill]] }
0x3103   : > { %p15005_p13 = scmp.ge.s32.totalorder %s18216_s0, 2  ;;  %s11338_s4 = sand.u32 1, %s18217_s2  }
0x3104   : > { %p18219_p0 = scmp.ne.s32.totalorder %s18218_s28, 0  ;;  %s11339_s15 = scalar_lea.sflag [#allocation4], %s11338_s4 }
0x3106   : > { %p14938_p1 = pnand %p15005_p13, %p18219_p0 }
0x3108   : > { %16113 = dma.done.wait (!%p14938_p1), %s11339_s15, 256  }
0x3109   : > { %16115 = vsyncadd (!%p14938_p1), %s11339_s15, 4294967040  ;;  %s18220_s26 = sld [smem:[#allocation121_spill]]  ;;  %s18221_s6 = sld [smem:[#allocation119_spill]] }
0x310a   : > { %s18222_s5 = sld [smem:[#allocation122_spill]]  ;;  %s18223_s0 = smov %s16122_s22 }
0x310f   : > { %p147_p6 = scmp.ge.s32.totalorder %s18220_s26, 4   ;;  %s18224_s22 = smov %s18221_s6 }
0x3110   : > { %18225 = sst [smem:[#allocation118_spill]] %s18222_s5 }
0x3111   :  { %149 = sbr.rel (!%p147_p6) target bundleno = 135 (0x87), region = 558 }
0x3118   :  { %11358 = vsyncpa [#allocation3], 1 }
0x3119   :  { %11360 = vsyncpa [#allocation3 + $0x1], 1 }
0x311a   :  { %11361 = vsyncpa [#allocation6], 1 }
0x311b   :  { %11362 = vsyncpa [#allocation9], 1 }
0x311c   :  { %11363 = vsyncpa [#allocation12], 1 }
0x311d   :  { %11364 = vsyncpa [#allocation15], 1 }
0x311e   :  { %11365 = vsyncpa [#allocation18], 1 }
0x311f   :  { %11366 = vsyncpa [#allocation21], 1 }
0x3120   :  { %11367 = vsyncpa [#allocation24], 1 }
0x3121   :  { %11368 = vsyncpa [#allocation27], 1 }
0x3122   :  { %11369 = vsyncpa [#allocation30], 1 }
0x3123   :  { %11370 = vsyncpa [#allocation33], 1 }
0x3124   :  { %11371 = vsyncpa [#allocation36], 1 }
0x3125   :  { %11372 = vsyncpa [#allocation39], 1 }
0x3126   :  { %11373 = vsyncpa [#allocation42], 1 }
0x3127   :  { %11374 = vsyncpa [#allocation45], 1 }
0x3128   :  { %11375 = vsyncpa [#allocation48], 1 }
0x3129   :  { %11376 = vsyncpa [#allocation51], 1 }
0x312a   :  { %11377 = vsyncpa [#allocation4], 1 }
0x312b   :  { %11379 = vsyncpa [#allocation4 + $0x1], 1 }

</bundles_post_ra>
